<compile_context>
chip_gen: v7x
topology: tpu7x:2x2x1
jax: 0.10.0
libtpu: 0.0.40
codegen_flags: <defaults>
</compile_context>

<pallas_src>
import functools

import jax
import jax.numpy as jnp
from jax.experimental import pallas as pl
from jax.experimental.pallas import tpu as pltpu


def _semantic_attention_kernel(h_ref, w1_ref, w2_ref, e_ref, red_ref,
                               out_ref, attn_ref, *, R, D, A, O):
    # h_ref:    (tn, R*D)      packed node tile  h_packed[n, r*D+d] = h[r, n, d]
    # w1_ref:   (R*D, R*A)     block-diagonal W1
    # w2_ref:   (R*A, R*O)     block-diagonal W2
    # e_ref:    (R*O, R*O*D)   lane expansion: repeat each attention lane D times
    # red_ref:  (R*O*D, R*D)   sum-over-j reduction back to (R*D) lanes
    # out_ref:  (tn, R*D)
    # attn_ref: (tn, R*O)
    h = h_ref[...]                                                    # (tn, R*D)

    # ---- fused projection for all relations: one MXU stream --------------------
    t = jnp.tanh(jnp.dot(h, w1_ref[...],
                         preferred_element_type=jnp.float32))         # (tn, R*A) f32
    logits = jnp.dot(t, w2_ref[...].astype(jnp.float32),
                     preferred_element_type=jnp.float32)              # (tn, R*O) f32

    # ---- softmax over the relation axis (lane groups of width O) ---------------
    blocks = [logits[:, r * O:(r + 1) * O] for r in range(R)]          # R x (tn, O)
    m = blocks[0]
    for r in range(1, R):
        m = jnp.maximum(m, blocks[r])
    exps = [jnp.exp(b - m) for b in blocks]
    denom = exps[0]
    for r in range(1, R):
        denom = denom + exps[r]
    inv = pl.reciprocal(denom, approx=True)
    attn = jnp.concatenate([e * inv for e in exps], axis=-1)           # (tn, R*O) f32

    # single lane-dense store of the permuted attention (dropout p=0 -> identity)
    attn_ref[...] = attn.astype(attn_ref.dtype)

    # ---- mixing: out[n, i*D+d] = sum_j attn[n, i*O+j] * h[n, j*D+d] -------------
    # Broadcast each attention lane over D lanes via a constant 0/1 matmul (MXU),
    # multiply against R lane-tiled copies of h (VPU), reduce over j via Red (MXU).
    attn_rep = jnp.dot(attn, e_ref[...],
                       preferred_element_type=jnp.float32)             # (tn, R*O*D)
    h_tiled = jnp.concatenate([h.astype(jnp.float32)] * R, axis=-1)    # (tn, R*R*D)
    prod = attn_rep * h_tiled                                          # (tn, R*R*D)
    out = jnp.dot(prod, red_ref[...],
                  preferred_element_type=jnp.float32)                  # (tn, R*D)
    out_ref[...] = out.astype(out_ref.dtype)


def _block_diag(blocks):
    """blocks: (R, a, b) -> block-diagonal (R*a, R*b)."""
    R, a, b = blocks.shape
    eye = jnp.eye(R, dtype=blocks.dtype)
    return jnp.einsum("rs,rij->risj", eye, blocks).reshape(R * a, R * b)


def semantic_attention(h, w1, w2, *, tn=512):
    """h: (R, N, D_in); w1: (R, D_in, dim_a); w2: (R, dim_a, O). Returns (h_out, attention)."""
    R, N, D = h.shape
    A = w1.shape[2]
    O = w2.shape[2]
    assert O == R, "torch.matmul(attention, h.permute(1,0,2)) requires out_dim == num_relations"
    tn = min(tn, N)
    assert tn % 8 == 0 and N % tn == 0  # TODO(synk): no ragged-tail handling (pad N if needed)

    RD, RA, RO, RRD = R * D, R * A, R * O, R * O * D

    # ---- wrapper-side layout plumbing (lane-dense slabs + constant matrices) ----
    h_packed = jnp.transpose(h, (1, 0, 2)).reshape(N, RD)              # (N, R*D)
    w1_bd = _block_diag(w1)                                            # (R*D, R*A)
    w2_bd = _block_diag(w2)                                            # (R*A, R*O)
    expand = jnp.kron(jnp.eye(RO, dtype=jnp.float32),
                      jnp.ones((1, D), jnp.float32))                   # (R*O, R*O*D)
    reduce = jnp.kron(jnp.eye(R, dtype=jnp.float32),
                      jnp.kron(jnp.ones((R, 1), jnp.float32),
                               jnp.eye(D, dtype=jnp.float32)))         # (R*O*D, R*D)

    itemsize = jnp.dtype(h.dtype).itemsize
    mm = RD * RA + RA * RO + RO * RRD + RRD * RD
    cost = pl.CostEstimate(
        flops=int(2 * N * mm + N * RRD),
        transcendentals=int(N * (RA + RO)),
        bytes_accessed=int(itemsize * (2 * N * RD + N * RO) + 4 * mm),
    )

    kernel = functools.partial(_semantic_attention_kernel, R=R, D=D, A=A, O=O)
    out_packed, attn_packed = pl.pallas_call(
        kernel,
        out_shape=(
            jax.ShapeDtypeStruct((N, RD), h.dtype),   # new h (packed)
            jax.ShapeDtypeStruct((N, RO), h.dtype),   # attention (packed)
        ),
        grid_spec=pltpu.PrefetchScalarGridSpec(
            num_scalar_prefetch=0,
            grid=(N // tn,),
            in_specs=[
                pl.BlockSpec((tn, RD), lambda i: (i, 0)),
                pl.BlockSpec((RD, RA), lambda i: (0, 0)),
                pl.BlockSpec((RA, RO), lambda i: (0, 0)),
                pl.BlockSpec((RO, RRD), lambda i: (0, 0)),
                pl.BlockSpec((RRD, RD), lambda i: (0, 0)),
            ],
            out_specs=[
                pl.BlockSpec((tn, RD), lambda i: (i, 0)),
                pl.BlockSpec((tn, RO), lambda i: (i, 0)),
            ],
        ),
        compiler_params=pltpu.CompilerParams(dimension_semantics=("parallel",)),
        cost_estimate=cost,
    )(h_packed, w1_bd, w2_bd, expand, reduce)

    return out_packed.reshape(N, R, D), attn_packed.reshape(N, R, O)


def _xavier_uniform(key, shape, gain=1.0):
    # PyTorch fan convention for >2-D params.
    rfs = 1
    for s in shape[2:]:
        rfs *= s
    fan_in, fan_out = shape[1] * rfs, shape[0] * rfs
    bound = gain * (6.0 / (fan_in + fan_out)) ** 0.5
    return jax.random.uniform(key, shape, jnp.float32, minval=-bound, maxval=bound)


def _reference(h, w1, w2):
    logits = jnp.einsum("rna,rao->rno", jnp.tanh(jnp.einsum("rnd,rda->rna", h, w1)), w2)
    attn = jax.nn.softmax(logits, axis=0)            # (R, N, O), softmax over relations
    attn_p = jnp.transpose(attn, (1, 0, 2))          # (N, R, O)
    h_p = jnp.transpose(h, (1, 0, 2))                # (N, R, D)
    out = jnp.einsum("nij,njd->nid", attn_p, h_p)    # (N, R, D)
    return out, attn_p


if __name__ == "__main__":
    num_relations, N, in_dim, dim_a = 4, 1024, 32, 16
    out_dim = num_relations  # dim_attn_out=None; dropout=0.0 -> identity

    key = jax.random.PRNGKey(0)
    k_h, k_w1, k_w2 = jax.random.split(key, 3)

    h = jax.random.normal(k_h, (num_relations, N, in_dim), jnp.float32)
    gain_tanh = 5.0 / 3.0
    w1 = _xavier_uniform(k_w1, (num_relations, in_dim, dim_a), gain=gain_tanh)
    w2 = _xavier_uniform(k_w2, (num_relations, dim_a, out_dim), gain=1.0)

    h_out, attn_out = semantic_attention(h, w1, w2, tn=512)   # grid = (2,) -> both v7x TCs busy
    jax.block_until_ready((h_out, attn_out))

    h_ref, attn_ref = _reference(h, w1, w2)
    assert h_out.shape == (N, num_relations, in_dim)
    assert attn_out.shape == (N, num_relations, out_dim)
    assert jnp.allclose(h_out, h_ref, rtol=1e-2, atol=1e-2)
    assert jnp.allclose(attn_out, attn_ref, rtol=1e-2, atol=1e-2)

    print("KERNEL_OK")
</pallas_src>

<mosaic_0001>
module attributes {stable_mosaic.version = 11 : i64} {
  func.func @_semantic_attention_kernel(%arg0: i32, %arg1: memref<512x128xf32, #tpu.memory_space<vmem>>, %arg2: memref<128x64xf32, #tpu.memory_space<vmem>>, %arg3: memref<64x16xf32, #tpu.memory_space<vmem>>, %arg4: memref<16x512xf32, #tpu.memory_space<vmem>>, %arg5: memref<512x128xf32, #tpu.memory_space<vmem>>, %arg6: memref<512x128xf32, #tpu.memory_space<vmem>>, %arg7: memref<512x16xf32, #tpu.memory_space<vmem>>) attributes {dimension_semantics = [#tpu.dimension_semantics<parallel>], iteration_bounds = array<i64: 2>, scalar_prefetch = 0 : i64, scratch_operands = 0 : i64, tpu.core_type = #tpu.core_type<tc>, window_params = [{transform_indices = @transform_0, window_bounds = array<i64: 512, 128>}, {pipeline_mode = #tpu.pipeline_mode<synchronous>, transform_indices = @transform_1, window_bounds = array<i64: 128, 64>}, {pipeline_mode = #tpu.pipeline_mode<synchronous>, transform_indices = @transform_2, window_bounds = array<i64: 64, 16>}, {pipeline_mode = #tpu.pipeline_mode<synchronous>, transform_indices = @transform_3, window_bounds = array<i64: 16, 512>}, {pipeline_mode = #tpu.pipeline_mode<synchronous>, transform_indices = @transform_4, window_bounds = array<i64: 512, 128>}, {transform_indices = @transform_5, window_bounds = array<i64: 512, 128>}, {transform_indices = @transform_6, window_bounds = array<i64: 512, 16>}]} {
    %c0 = arith.constant 0 : index
    %c0_0 = arith.constant 0 : index
    %0 = vector.load %arg1[%c0, %c0_0] : memref<512x128xf32, #tpu.memory_space<vmem>>, vector<512x128xf32>
    %c0_1 = arith.constant 0 : index
    %c0_2 = arith.constant 0 : index
    %1 = vector.load %arg2[%c0_1, %c0_2] : memref<128x64xf32, #tpu.memory_space<vmem>>, vector<128x64xf32>
    %cst = arith.constant dense<0.000000e+00> : vector<512x64xf32>
    %2 = tpu.matmul %0, %1, %cst {dimension_numbers = #tpu.dot_dimension_numbers<[1], [0], [0], [1], [0, 0, 1, 1], [], []>} : vector<512x128xf32>, vector<128x64xf32>, vector<512x64xf32> -> vector<512x64xf32>
    %3 = math.tanh %2 : vector<512x64xf32>
    %c0_3 = arith.constant 0 : index
    %c0_4 = arith.constant 0 : index
    %4 = vector.load %arg3[%c0_3, %c0_4] : memref<64x16xf32, #tpu.memory_space<vmem>>, vector<64x16xf32>
    %cst_5 = arith.constant dense<0.000000e+00> : vector<512x16xf32>
    %5 = tpu.matmul %3, %4, %cst_5 {dimension_numbers = #tpu.dot_dimension_numbers<[1], [0], [0], [1], [0, 0, 1, 1], [], []>} : vector<512x64xf32>, vector<64x16xf32>, vector<512x16xf32> -> vector<512x16xf32>
    %6 = vector.extract_strided_slice %5 {offsets = [0, 0], sizes = [512, 4], strides = [1, 1]} : vector<512x16xf32> to vector<512x4xf32>
    %7 = vector.extract_strided_slice %5 {offsets = [0, 4], sizes = [512, 4], strides = [1, 1]} : vector<512x16xf32> to vector<512x4xf32>
    %8 = vector.extract_strided_slice %5 {offsets = [0, 8], sizes = [512, 4], strides = [1, 1]} : vector<512x16xf32> to vector<512x4xf32>
    %9 = vector.extract_strided_slice %5 {offsets = [0, 12], sizes = [512, 4], strides = [1, 1]} : vector<512x16xf32> to vector<512x4xf32>
    %10 = arith.maximumf %6, %7 : vector<512x4xf32>
    %11 = arith.maximumf %10, %8 : vector<512x4xf32>
    %12 = arith.maximumf %11, %9 : vector<512x4xf32>
    %13 = arith.subf %6, %12 : vector<512x4xf32>
    %14 = math.exp %13 : vector<512x4xf32>
    %15 = arith.subf %7, %12 : vector<512x4xf32>
    %16 = math.exp %15 : vector<512x4xf32>
    %17 = arith.subf %8, %12 : vector<512x4xf32>
    %18 = math.exp %17 : vector<512x4xf32>
    %19 = arith.subf %9, %12 : vector<512x4xf32>
    %20 = math.exp %19 : vector<512x4xf32>
    %21 = arith.addf %14, %16 : vector<512x4xf32>
    %22 = arith.addf %21, %18 : vector<512x4xf32>
    %23 = arith.addf %22, %20 : vector<512x4xf32>
    %24 = tpu.reciprocal %23 {approx = true} : vector<512x4xf32> -> vector<512x4xf32>
    %25 = arith.mulf %14, %24 : vector<512x4xf32>
    %26 = arith.mulf %16, %24 : vector<512x4xf32>
    %27 = arith.mulf %18, %24 : vector<512x4xf32>
    %28 = arith.mulf %20, %24 : vector<512x4xf32>
    %29 = tpu.concatenate %25, %26, %27, %28 in 1 : vector<512x4xf32>, vector<512x4xf32>, vector<512x4xf32>, vector<512x4xf32> -> vector<512x16xf32>
    %c0_6 = arith.constant 0 : index
    %c0_7 = arith.constant 0 : index
    %30 = vector.load %arg7[%c0_6, %c0_7] : memref<512x16xf32, #tpu.memory_space<vmem>>, vector<512x16xf32>
    tpu.vector_store %arg7[%c0_6, %c0_7], %29 {strides = array<i32>} : memref<512x16xf32, #tpu.memory_space<vmem>>, vector<512x16xf32>,
    %c0_8 = arith.constant 0 : index
    %c0_9 = arith.constant 0 : index
    %31 = vector.load %arg4[%c0_8, %c0_9] : memref<16x512xf32, #tpu.memory_space<vmem>>, vector<16x512xf32>
    %cst_10 = arith.constant dense<0.000000e+00> : vector<512x512xf32>
    %32 = tpu.matmul %29, %31, %cst_10 {dimension_numbers = #tpu.dot_dimension_numbers<[1], [0], [0], [1], [0, 0, 1, 1], [], []>} : vector<512x16xf32>, vector<16x512xf32>, vector<512x512xf32> -> vector<512x512xf32>
    %33 = tpu.concatenate %0, %0, %0, %0 in 1 : vector<512x128xf32>, vector<512x128xf32>, vector<512x128xf32>, vector<512x128xf32> -> vector<512x512xf32>
    %34 = arith.mulf %32, %33 : vector<512x512xf32>
    %c0_11 = arith.constant 0 : index
    %c0_12 = arith.constant 0 : index
    %35 = vector.load %arg5[%c0_11, %c0_12] : memref<512x128xf32, #tpu.memory_space<vmem>>, vector<512x128xf32>
    %cst_13 = arith.constant dense<0.000000e+00> : vector<512x128xf32>
    %36 = tpu.matmul %34, %35, %cst_13 {dimension_numbers = #tpu.dot_dimension_numbers<[1], [0], [0], [1], [0, 0, 1, 1], [], []>} : vector<512x512xf32>, vector<512x128xf32>, vector<512x128xf32> -> vector<512x128xf32>
    %c0_14 = arith.constant 0 : index
    %c0_15 = arith.constant 0 : index
    %37 = vector.load %arg6[%c0_14, %c0_15] : memref<512x128xf32, #tpu.memory_space<vmem>>, vector<512x128xf32>
    tpu.vector_store %arg6[%c0_14, %c0_15], %36 {strides = array<i32>} : memref<512x128xf32, #tpu.memory_space<vmem>>, vector<512x128xf32>,
    return
  }
  func.func @transform_0(%arg0: i32) -> (i32, i32) {
    %c0_i32 = arith.constant 0 : i32
    %c0_i32_0 = arith.constant 0 : i32
    return %arg0, %c0_i32 : i32, i32
  }
  func.func @transform_1(%arg0: i32) -> (i32, i32) {
    %c0_i32 = arith.constant 0 : i32
    %c0_i32_0 = arith.constant 0 : i32
    %c0_i32_1 = arith.constant 0 : i32
    return %c0_i32, %c0_i32_0 : i32, i32
  }
  func.func @transform_2(%arg0: i32) -> (i32, i32) {
    %c0_i32 = arith.constant 0 : i32
    %c0_i32_0 = arith.constant 0 : i32
    %c0_i32_1 = arith.constant 0 : i32
    return %c0_i32, %c0_i32_0 : i32, i32
  }
  func.func @transform_3(%arg0: i32) -> (i32, i32) {
    %c0_i32 = arith.constant 0 : i32
    %c0_i32_0 = arith.constant 0 : i32
    %c0_i32_1 = arith.constant 0 : i32
    return %c0_i32, %c0_i32_0 : i32, i32
  }
  func.func @transform_4(%arg0: i32) -> (i32, i32) {
    %c0_i32 = arith.constant 0 : i32
    %c0_i32_0 = arith.constant 0 : i32
    %c0_i32_1 = arith.constant 0 : i32
    return %c0_i32, %c0_i32_0 : i32, i32
  }
  func.func @transform_5(%arg0: i32) -> (i32, i32) {
    %c0_i32 = arith.constant 0 : i32
    %c0_i32_0 = arith.constant 0 : i32
    return %arg0, %c0_i32 : i32, i32
  }
  func.func @transform_6(%arg0: i32) -> (i32, i32) {
    %c0_i32 = arith.constant 0 : i32
    %c0_i32_0 = arith.constant 0 : i32
    return %arg0, %c0_i32 : i32, i32
  }
}

</mosaic_0001>

<bundles_post_ra>
// kernel: tpu_custom_call.1
= control target key start
LH: loop header
LB: loop body
LE: loop exit
PB: predicated region body
PF: predicated region fallthrough
CT: control target
= control target key end

     0   :  { %12 = vsyncpa [#allocation3], 0  ;;  %s16962_s0 = inlined_call_operand.hbm [shape: f32[1024,128], index: 0, kind: input, shape index: {}]   ;;  %s16963_s1 = inlined_call_operand.vmem [shape: f32[128,64], index: 1, kind: input, shape index: {}]   ;;  %s16964_s2 = inlined_call_operand.vmem [shape: f32[64,16], index: 2, kind: input, shape index: {}]   ;;  %s16965_s3 = inlined_call_operand.vmem [shape: f32[16,512], index: 3, kind: input, shape index: {}]   ;;  %s16966_s4 = inlined_call_operand.hbm [shape: f32[512,128], index: 4, kind: input, shape index: {}]   ;;  %s16967_s5 = inlined_call_operand.hbm [shape: f32[1024,128], index: 5, kind: output, shape index: {0}]   ;;  %s16968_s6 = inlined_call_operand.vmem [shape: f32[1024,16], index: 6, kind: output, shape index: {1}]  }
   0x1   :  { %14 = vsyncpa [#allocation3 + $0x1], 0 }
   0x2   :  { %15 = vsyncpa [#allocation6], 0 }
   0x3   :  { %16 = vsyncpa [#allocation4], 0 }
   0x4   :  { %18 = vsyncpa [#allocation4 + $0x1], 0  ;;  %s10152_s21 = smov 0   ;;  %s10154_s22 = smov 0  }
   0x5   :  { %s10156_s23 = smov 0   ;;  %s10158_s24 = smov 0  }
   0x6 LB: > { %s10173_s25 = sadd.s32 4294967295, %s10101_s24   ;;  %s8219_s26 = sadd.s32 4294967294, %s10101_s24   ;;  %s10101_s24 = sphi %s10158_s24, %s19114_s24   ;;  %s10097_s23 = sphi %s10156_s23, %s19113_s23   ;;  %s10093_s22 = sphi %s10154_s22, %s19112_s22   ;;  %s10089_s21 = sphi %s10152_s21, %s19111_s21  }
   0x7   : > { %p44_p0 = scmp.ne.s32.totalorder %s10093_s22, %s10089_s21  ;;  %p16969_p1 = scmp.eq.s32.totalorder %s10173_s25, 0 }
   0x8   : > { %p158_p3 = scmp.eq.s32.totalorder %s8219_s26, 1  ;;  %p8220_p5 = scmp.ge.s32.totalorder %s10101_s24, 1 }
   0x9   : > { %p10182_p4 = por %p16969_p1, %p44_p0  ;;  %p191_p7 = scmp.lt.s32.totalorder %s10101_s24, 3 }
   0xa   : > { %p10187_p6 = por %p158_p3, %p44_p0  ;;  %s10103_s30 = smov [#allocation5]  }
   0xb   : > { %s17463_s27 = scalar_select %p10182_p4, 1, 0 }
   0xc   : > { %s17464_s28 = scalar_select %p10187_p6, 1, 0 }
   0xd   : > { %p10192_p8 = pnand %p8220_p5, %p191_p7  ;;  %s212_s7 = sshll.u32 %s10103_s30, 4  ;;  %s10196_s7 = int_to_ptr.vmem [resolvable:$true] %s212_s7 }
   0xe   : > { %s10208_s9 = sadd.s32 1, %s10101_s24   ;;  %s31_s10 = sadd.s32 1, %s10097_s23 }
   0xf   : > { %s17465_s29 = scalar_select %p10192_p8, 1, 0 }
  0x10   : > { %p9081_p9 = pneg %p10192_p8  ;;  %s28_s11 = ssub.s32 %s10101_s24, %s10208_s9 }
  0x11   : > { %s9973_s14 = scalar_lea.hbm %s16966_s4, 8192 }
  0x12   : > { %p10203_p11 = pnand %p9081_p9, %p16969_p1  ;;  %p9974_p12 = scmp.ne.s32.totalorder %s16966_s4, %s9973_s14 }
  0x13   : > { %p9980_p5 = scmp.lt.u32.totalorder %s9973_s14, %s16966_s4 }
  0x14   : > { %p9975_p13 = pneg %p10203_p11 }
  0x16   : > { %p9976_p0 = pnand %p9975_p13, %p9974_p12 }
  0x18   : > { %p9977_p3 = pneg %p9976_p0 }
  0x1a   : > { %p9982_p7 = pnand %p9980_p5, %p9977_p3 }
  0x1c   : > { %9985 = shalt.err (!%p9982_p7)
}
  0x1d   : > { %s9986_s19 = scalar_lea.vmem %s10196_s7, 8192  ;;  %p9994_p2 = scmp.lt.s32.totalorder %s10196_s7, %s10196_s7 }
  0x1e   : > { %p9987_p9 = scmp.ne.s32.totalorder %s10196_s7, %s9986_s19  ;;  %p9995_p6 = scmp.lt.s32.totalorder %s9986_s19, %s9986_s19 }
  0x20   : > { %p9989_p10 = pnand %p9987_p9, %p9975_p13  ;;  %p9996_p4 = por %p9995_p6, %p9994_p2 }
  0x22   : > { %p9990_p1 = pneg %p9989_p10 }
  0x24   : > { %p9997_p8 = pnand %p9996_p4, %p9990_p1 }
  0x26   : > { %10000 = shalt.err (!%p9997_p8)
}
  0x27   : > { %s10104_s20 = smov 128   ;;  %s10105_s26 = smov 8  }
  0x28   : > { %9084 = dma.hbm_to_vmem [thread:$0]  (!%p10203_p11), %s16966_s4, 8192, %s10196_s7, [#allocation6], %s10104_s20, %s10104_s20, %s10105_s26  }
  0x29   : > { %p29_p1 = scmp.eq.s32.totalorder %s28_s11, 0  ;;  %p38_p2 = scmp.ne.s32.totalorder %s10097_s23, %s10093_s22 }
  0x2a   : > { %p39_p4 = scmp.eq.s32.totalorder %s10101_s24, 0  ;;  %p9094_p6 = scmp.lt.s32.totalorder %s10101_s24, 2 }
  0x2b   : > { %s10242_s13 = scalar_select %p29_p1, %s10097_s23, %s31_s10  }
  0x2c   : > { %p40_p8 = por %p39_p4, %p38_p2  ;;  %p17467_p10 = scmp.eq.s32.totalorder %s10173_s25, 1 }
  0x2d   : > { %s226_s8 = sand.u32 1, %s10097_s23   ;;  %s8429_s15 = sshll.u32 %s10101_s24, 13 }
  0x2e   : > { %p10246_p12 = por %p17467_p10, %p38_p2  ;;  %s8223_s16 = sshll.u32 %s226_s8, 9 }
  0x2f   : > { %s10255_s19 = scalar_lea.hbm %s16962_s0, %s8429_s15  ;;  %s230_s7 = scalar_lea.vmem [#allocation2], %s8223_s16 }
  0x30   : > { %s237_s10 = sshll.u32 %s230_s7, 4  ;;  %p10257_p11 = pnand %p9094_p6, %p40_p8  ;;  %s10261_s10 = int_to_ptr.vmem [resolvable:$true] %s237_s10 }
  0x31   : > { %s10263_s30 = scalar_lea.sflag [#allocation3], %s226_s8  ;;  %s10001_s12 = scalar_lea.hbm %s10255_s19, 8192 }
  0x32   : > { %p10002_p13 = scmp.ne.s32.totalorder %s10255_s19, %s10001_s12  ;;  %p10003_p0 = pneg %p10257_p11 }
  0x33   : > { %s10006_s17 = scalar_lea.hbm %s16962_s0, 16384  ;;  %p10007_p7 = scmp.lt.u32.totalorder %s10255_s19, %s16962_s0 }
  0x34   : > { %p10004_p3 = pnand %p10003_p0, %p10002_p13  ;;  %p10008_p9 = scmp.lt.u32.totalorder %s10006_s17, %s10001_s12 }
  0x35   : > { %p10010_p2 = scmp.lt.u32.totalorder %s10001_s12, %s10255_s19 }
  0x36   : > { %p10005_p5 = pneg %p10004_p3  ;;  %p10009_p1 = por %p10008_p9, %p10007_p7 }
  0x38   : > { %p10011_p4 = por %p10010_p2, %p10009_p1 }
  0x3a   : > { %p10012_p6 = pnand %p10011_p4, %p10005_p5 }
  0x3c   : > { %10015 = shalt.err (!%p10012_p6)
}
  0x3d   : > { %s10016_s8 = scalar_lea.vmem %s10261_s10, 8192  ;;  %s10106_s15 = smov [#allocation2]  }
  0x3e   : > { %p10017_p8 = scmp.ne.s32.totalorder %s10261_s10, %s10016_s8  ;;  %s10021_s16 = sshll.u32 %s10106_s15, 4  ;;  %s10022_s16 = int_to_ptr.vmem [resolvable:$false] %s10021_s16 }
  0x3f   : > { %s10023_s18 = scalar_lea.vmem %s10022_s16, 16384  ;;  %p10024_p3 = scmp.lt.s32.totalorder %s10261_s10, %s10022_s16 }
  0x40   : > { %p10019_p10 = pnand %p10017_p8, %p10003_p0  ;;  %p10025_p7 = scmp.lt.s32.totalorder %s10023_s18, %s10016_s8 }
  0x42   : > { %p10020_p13 = pneg %p10019_p10  ;;  %p10026_p9 = por %p10025_p7, %p10024_p3 }
  0x44   : > { %p10027_p1 = pnand %p10026_p9, %p10020_p13 }
  0x46   : > { %10030 = shalt.err (!%p10027_p1)
}
  0x47   : > { %9088 = dma.hbm_to_vmem [thread:$0]  (!%p10257_p11), %s10255_s19, 8192, %s10261_s10, %s10263_s30, %s10104_s20, %s10104_s20, %s10105_s26  }
  0x48   : > { %p17470_p0 = scmp.ne.s32.totalorder %s17465_s29, 0 }
  0x4a   : > { %249 = sbr.rel (%p17470_p0) target bundleno = 2725 (0xaa5), region = 40 }
  0x51   : > { %s10297_s12 = sand.u32 1, %s10093_s22   ;;  %p17471_p5 = scmp.ne.s32.totalorder %s17463_s27, 0 }
  0x52   : > { %s17242_s17 = sshll.u32 %s10297_s12, 9  ;;  %s252_s7 = scalar_lea.sflag [#allocation3], %s10297_s12 }
  0x53   : > { %s10303_s11 = scalar_lea.vmem [#allocation2], %s17242_s17 }
  0x54   : > { %10076 = dma.done.wait (%p17471_p5), %s252_s7, 8192  }
  0x55   : > { %10078 = vsyncadd (%p17471_p5), %s252_s7, 4294959104  ;;  %p17472_p11 = scmp.eq.s32.totalorder %s10173_s25, 0 }
  0x57   : > { %10080 = dma.done.wait (%p17472_p11), [#allocation6], 8192   ;;  %p17473_p2 = pmov %p17472_p11 }
  0x58   : > { %v365_v0 = vld [vmem:[%s16963_s1] sm:$0xff]  ;;  %v366_v1 = vld [vmem:[%s16963_s1 + $0x8] sm:$0xff]  ;;  %v367_v2 = vld [vmem:[%s16963_s1 + $0x10] sm:$0xff]  ;;  %vm838_vm0 = vcmask 523264   ;;  %s17243_s29 = smov 120   ;;  %s10108_s20 = smov 124  }
  0x59   : > { %10082 = vsyncadd (%p17473_p2), [#allocation6], 4294959104  ;;  %v8823_v3 = vpack.c.bf16 %v366_v1, %v365_v0  ;;  %v368_v4 = vld [vmem:[%s16963_s1 + $0x18] sm:$0xff]  ;;  %v369_v6 = vld [vmem:[%s16963_s1 + $0x20] sm:$0xff]  ;;  %s10109_s26 = smov 116   ;;  %s10110_s19 = smov 4  }
  0x5a   : > { %v8827_v5 = vpack.c.bf16 %v368_v4, %v367_v2  ;;  %v370_v7 = vld [vmem:[%s16963_s1 + $0x28] sm:$0xff]  ;;  %v301_v9 = vld [vmem:[%s10303_s11] sm:$0xff]  ;;  %v371_v10 = vld [vmem:[%s16963_s1 + $0x30] sm:$0xff]  ;;  %s17245_s10 = smov 12   ;;  %s10112_s30 = smov 8   ;;  %vm5576_vm1 = vcmask 31744  }
  0x5b   : > { %8824 = vmatprep.subr.bf16.mxu0 %v8823_v3  ;;  %v8831_v8 = vpack.c.bf16 %v370_v7, %v369_v6  ;;  %v372_v11 = vld [vmem:[%s16963_s1 + $0x38] sm:$0xff]  ;;  %8615 = vmatprep.mubr.f32.mxu0 %v301_v9  ;;  %v373_v13 = vld [vmem:[%s16963_s1 + $0x40] sm:$0xff]  ;;  %v374_v14 = vld [vmem:[%s16963_s1 + $0x48] sm:$0xff]  ;;  %s18141_s7 = smov 120   ;;  %s8230_s27 = sshll.u32 %s10173_s25, 6  ;;  %vm5641_vm2 = vcmask 64512  }
  0x5c   : > { %8826 = vmatpush3.bf16.msra.mxu0 %v8823_v3  ;;  %v8835_v12 = vpack.c.bf16 %v372_v11, %v371_v10  ;;  %v8839_v15 = vpack.c.bf16 %v374_v14, %v373_v13  ;;  %v375_v16 = vld [vmem:[%s16963_s1 + $0x50] sm:$0xff]  ;;  %v376_v17 = vld [vmem:[%s16963_s1 + $0x58] sm:$0xff]  ;;  %v830_v19 = vld [vmem:[%s16964_s2] sm:$0xff]  ;;  %p296_p4 = scmp.lt.s32.totalorder %s8230_s27, 127  ;;  %vm5706_vm3 = vcmask 97280   ;;  %vm5771_vm4 = vcmask 130048  }
  0x5d   : > { %8828 = vmatprep.subr.bf16.mxu0 %v8827_v5  ;;  %v8843_v18 = vpack.c.bf16 %v376_v17, %v375_v16  ;;  %v831_v20 = vld [vmem:[%s16964_s2 + $0x8] sm:$0xff]  ;;  %v377_v21 = vld [vmem:[%s16963_s1 + $0x60] sm:$0xff]  ;;  %v379_v25 = vld [vmem:[%s16963_s1 + $0x70] sm:$0xff] }
  0x5e   : > { %v378_v22 = vld [vmem:[%s16963_s1 + $0x68] sm:$0xff]  ;;  %v8855_v23 = vpack.c.bf16 %v831_v20, %v830_v19  ;;  %v380_v26 = vld [vmem:[%s16963_s1 + $0x78] sm:$0xff]  ;;  %v303_v29 = vld [vmem:[%s10303_s11 + $0x10] sm:$0xff]  ;;  %s19116_s27 = smov (!%p296_p4, %s8230_s27), 127 }
  0x5f   : > { %v8847_v24 = vpack.c.bf16 %v378_v22, %v377_v21  ;;  %v8851_v27 = vpack.c.bf16 %v380_v26, %v379_v25  ;;  %v302_v28 = vld [vmem:[%s10303_s11 + $0x8] sm:$0xff]  ;;  %v304_v30 = vld [vmem:[%s10303_s11 + $0x18] sm:$0xff]  ;;  %v305_v31 = vld [vmem:[%s10303_s11 + $0x20] sm:$0xff]  ;;  %s8231_s8 = sshll.u32 %s19116_s27, 3 }
  0x60   : > { %8830 = vmatpush3.bf16.msra.mxu0 %v8827_v5  ;;  %8856 = vmatprep.subr.bf16.mxu1 %v8855_v23  ;;  %v306_v32 = vld [vmem:[%s10303_s11 + $0x28] sm:$0xff]  ;;  %v307_v33 = vld [vmem:[%s10303_s11 + $0x30] sm:$0xff]  ;;  %v308_v34 = vld [vmem:[%s10303_s11 + $0x38] sm:$0xff]  ;;  %s13327_s18 = scalar_lea.vmem %s16968_s6, %s8231_s8 }
  0x61   : > { %8832 = vmatprep.subr.bf16.mxu0 %v8831_v8  ;;  %8858 = vmatpush3.bf16.msra.mxu1 %v8855_v23  ;;  %v309_v35 = vld [vmem:[%s10303_s11 + $0x40] sm:$0xff]  ;;  %v310_v36 = vld [vmem:[%s10303_s11 + $0x48] sm:$0xff]  ;;  %v311_v37 = vld [vmem:[%s10303_s11 + $0x50] sm:$0xff] }
  0x62   : > { %v312_v38 = vld [vmem:[%s10303_s11 + $0x58] sm:$0xff]  ;;  %v313_v39 = vld [vmem:[%s10303_s11 + $0x60] sm:$0xff]  ;;  %v314_v40 = vld [vmem:[%s10303_s11 + $0x68] sm:$0xff] }
  0x63   : > { %v315_v41 = vld [vmem:[%s10303_s11 + $0x70] sm:$0xff]  ;;  %v316_v42 = vld [vmem:[%s10303_s11 + $0x78] sm:$0xff]  ;;  %v317_v43 = vld [vmem:[%s10303_s11 + $0x80] sm:$0xff] }
  0x64   : > { %8834 = vmatpush3.bf16.msra.mxu0 %v8831_v8  ;;  %v318_v44 = vld [vmem:[%s10303_s11 + $0x88] sm:$0xff]  ;;  %v319_v45 = vld [vmem:[%s10303_s11 + $0x90] sm:$0xff]  ;;  %v320_v46 = vld [vmem:[%s10303_s11 + $0x98] sm:$0xff] }
  0x65   : > { %8836 = vmatprep.subr.bf16.mxu0 %v8835_v12  ;;  %v321_v47 = vld [vmem:[%s10303_s11 + $0xa0] sm:$0xff]  ;;  %v322_v48 = vld [vmem:[%s10303_s11 + $0xa8] sm:$0xff]  ;;  %v323_v49 = vld [vmem:[%s10303_s11 + $0xb0] sm:$0xff] }
  0x66   : > { %v324_v50 = vld [vmem:[%s10303_s11 + $0xb8] sm:$0xff]  ;;  %v325_v51 = vld [vmem:[%s10303_s11 + $0xc0] sm:$0xff]  ;;  %v326_v52 = vld [vmem:[%s10303_s11 + $0xc8] sm:$0xff] }
  0x67   : > { %v327_v53 = vld [vmem:[%s10303_s11 + $0xd0] sm:$0xff]  ;;  %v328_v54 = vld [vmem:[%s10303_s11 + $0xd8] sm:$0xff]  ;;  %v329_v55 = vld [vmem:[%s10303_s11 + $0xe0] sm:$0xff] }
  0x68   : > { %8838 = vmatpush3.bf16.msra.mxu0 %v8835_v12  ;;  %v330_v56 = vld [vmem:[%s10303_s11 + $0xe8] sm:$0xff]  ;;  %v331_v57 = vld [vmem:[%s10303_s11 + $0xf0] sm:$0xff]  ;;  %v332_v58 = vld [vmem:[%s10303_s11 + $0xf8] sm:$0xff] }
  0x69   : > { %8840 = vmatprep.subr.bf16.mxu0 %v8839_v15  ;;  %v333_v59 = vld [vmem:[%s10303_s11 + $0x100] sm:$0xff]  ;;  %v334_v60 = vld [vmem:[%s10303_s11 + $0x108] sm:$0xff]  ;;  %v335_v61 = vld [vmem:[%s10303_s11 + $0x110] sm:$0xff] }
  0x6a   : > { %v336_v62 = vld [vmem:[%s10303_s11 + $0x118] sm:$0xff]  ;;  %v832_v63 = vld [vmem:[%s16964_s2 + $0x10] sm:$0xff]  ;;  %v337_v1 = vld [vmem:[%s10303_s11 + $0x120] sm:$0xff] }
  0x6b   : > { %v833_v0 = vld [vmem:[%s16964_s2 + $0x18] sm:$0xff]  ;;  %v338_v3 = vld [vmem:[%s10303_s11 + $0x128] sm:$0xff]  ;;  %v834_v4 = vld [vmem:[%s16964_s2 + $0x20] sm:$0xff] }
  0x6c   : > { %8842 = vmatpush3.bf16.msra.mxu0 %v8839_v15  ;;  %v8859_v2 = vpack.c.bf16 %v833_v0, %v832_v63  ;;  %v835_v5 = vld [vmem:[%s16964_s2 + $0x28] sm:$0xff]  ;;  %v836_v7 = vld [vmem:[%s16964_s2 + $0x30] sm:$0xff]  ;;  %v837_v8 = vld [vmem:[%s16964_s2 + $0x38] sm:$0xff] }
  0x6d   : > { %8844 = vmatprep.subr.bf16.mxu0 %v8843_v18  ;;  %v8863_v6 = vpack.c.bf16 %v835_v5, %v834_v4  ;;  %v339_v9 = vld [vmem:[%s10303_s11 + $0x130] sm:$0xff]  ;;  %v8867_v10 = vpack.c.bf16 %v837_v8, %v836_v7  ;;  %v340_v11 = vld [vmem:[%s10303_s11 + $0x138] sm:$0xff]  ;;  %v341_v12 = vld [vmem:[%s10303_s11 + $0x140] sm:$0xff] }
  0x6e   : > { %8860 = vmatprep.subr.bf16.mxu1 %v8859_v2  ;;  %v342_v13 = vld [vmem:[%s10303_s11 + $0x148] sm:$0xff]  ;;  %v343_v14 = vld [vmem:[%s10303_s11 + $0x150] sm:$0xff]  ;;  %v344_v15 = vld [vmem:[%s10303_s11 + $0x158] sm:$0xff] }
  0x6f   : > { %8862 = vmatpush3.bf16.msra.mxu1 %v8859_v2  ;;  %v345_v16 = vld [vmem:[%s10303_s11 + $0x160] sm:$0xff]  ;;  %v346_v17 = vld [vmem:[%s10303_s11 + $0x168] sm:$0xff]  ;;  %v348_v19 = vld [vmem:[%s10303_s11 + $0x178] sm:$0xff] }
  0x70   : > { %8846 = vmatpush3.bf16.msra.mxu0 %v8843_v18  ;;  %8864 = vmatprep.subr.bf16.mxu1 %v8863_v6  ;;  %v347_v18 = vld [vmem:[%s10303_s11 + $0x170] sm:$0xff]  ;;  %v349_v20 = vld [vmem:[%s10303_s11 + $0x180] sm:$0xff]  ;;  %v350_v21 = vld [vmem:[%s10303_s11 + $0x188] sm:$0xff] }
  0x71   : > { %8848 = vmatprep.subr.bf16.mxu0 %v8847_v24  ;;  %v351_v22 = vld [vmem:[%s10303_s11 + $0x190] sm:$0xff]  ;;  %v352_v23 = vld [vmem:[%s10303_s11 + $0x198] sm:$0xff]  ;;  %v354_v25 = vld [vmem:[%s10303_s11 + $0x1a8] sm:$0xff] }
  0x72   : > { %v355_v26 = vld [vmem:[%s10303_s11 + $0x1b0] sm:$0xff] }
  0x73   : > { %8866 = vmatpush3.bf16.msra.mxu1 %v8863_v6 }
  0x74   : > { %8850 = vmatpush3.bf16.msra.mxu0 %v8847_v24  ;;  %8868 = vmatprep.subr.bf16.mxu1 %v8867_v10  ;;  %v353_v24 = vld [vmem:[%s10303_s11 + $0x1a0] sm:$0xff] }
  0x75   : > { %8852 = vmatprep.subr.bf16.mxu0 %v8851_v27 }
  0x77   : > { %8870 = vmatpush3.bf16.msra.mxu1 %v8867_v10 }
  0x78   : > { %8854 = vmatpush3.bf16.msra.mxu0 %v8851_v27  ;;  %v356_v27 = vld [vmem:[%s10303_s11 + $0x1b8] sm:$0xff] }
  0x7b   : > { %8616 = vmatmul.mubr.f32.vlgmr.msra.gmra.mrb[0].mxu0 %v302_v28  ;;  %v357_v28 = vld [vmem:[%s10303_s11 + $0x1c0] sm:$0xff] }
  0x7c   : > { %8618 = vmatprep.mubr.f32.mxu0 %v303_v29  ;;  %v358_v29 = vld [vmem:[%s10303_s11 + $0x1c8] sm:$0xff] }
  0x7f   : > { %8619 = vmatmul.mubr.f32.gmra.mrb[2].mxu0 %v304_v30  ;;  %v359_v30 = vld [vmem:[%s10303_s11 + $0x1d0] sm:$0xff] }
  0x80   : > { %8621 = vmatprep.mubr.f32.mxu0 %v305_v31  ;;  %v360_v31 = vld [vmem:[%s10303_s11 + $0x1d8] sm:$0xff] }
  0x83   : > { %8622 = vmatmul.mubr.f32.gmra.mrb[4].mxu0 %v306_v32  ;;  %v361_v32 = vld [vmem:[%s10303_s11 + $0x1e0] sm:$0xff] }
  0x84   : > { %8624 = vmatprep.mubr.f32.mxu0 %v307_v33  ;;  %v362_v33 = vld [vmem:[%s10303_s11 + $0x1e8] sm:$0xff] }
  0x87   : > { %8625 = vmatmul.mubr.f32.gmra.mrb[6].mxu0 %v308_v34  ;;  %v363_v34 = vld [vmem:[%s10303_s11 + $0x1f0] sm:$0xff] }
  0x88   : > { %8627 = vmatprep.mubr.f32.mxu0 %v309_v35  ;;  %v364_v35 = vld [vmem:[%s10303_s11 + $0x1f8] sm:$0xff] }
  0x8b   : > { %8628 = vmatmul.mubr.f32.gmra.mrb[8].mxu0 %v310_v36 }
  0x8c   : > { %8630 = vmatprep.mubr.f32.mxu0 %v311_v37 }
  0x8f   : > { %8631 = vmatmul.mubr.f32.gmra.mrb[10].mxu0 %v312_v38 }
  0x90   : > { %8633 = vmatprep.mubr.f32.mxu0 %v313_v39 }
  0x93   : > { %8634 = vmatmul.mubr.f32.gmra.mrb[12].mxu0 %v314_v40 }
  0x94   : > { %8636 = vmatprep.mubr.f32.mxu0 %v315_v41 }
  0x97   : > { %8637 = vmatmul.mubr.f32.gmra.mrb[14].mxu0 %v316_v42 }
  0x98   : > { %8639 = vmatprep.mubr.f32.mxu0 %v317_v43 }
  0x9b   : > { %8640 = vmatmul.mubr.f32.gmra.mrb[16].mxu0 %v318_v44 }
  0x9c   : > { %8642 = vmatprep.mubr.f32.mxu0 %v319_v45 }
  0x9f   : > { %8643 = vmatmul.mubr.f32.gmra.mrb[18].mxu0 %v320_v46 }
  0xa0   : > { %8645 = vmatprep.mubr.f32.mxu0 %v321_v47 }
  0xa3   : > { %8646 = vmatmul.mubr.f32.gmra.mrb[20].mxu0 %v322_v48 }
  0xa4   : > { %8648 = vmatprep.mubr.f32.mxu0 %v323_v49 }
  0xa7   : > { %8649 = vmatmul.mubr.f32.gmra.mrb[22].mxu0 %v324_v50 }
  0xa8   : > { %8651 = vmatprep.mubr.f32.mxu0 %v325_v51 }
  0xab   : > { %8652 = vmatmul.mubr.f32.gmra.mrb[24].mxu0 %v326_v52 }
  0xac   : > { %8654 = vmatprep.mubr.f32.mxu0 %v327_v53 }
  0xaf   : > { %8655 = vmatmul.mubr.f32.gmra.mrb[26].mxu0 %v328_v54 }
  0xb0   : > { %8657 = vmatprep.mubr.f32.mxu0 %v329_v55 }
  0xb3   : > { %8658 = vmatmul.mubr.f32.gmra.mrb[28].mxu0 %v330_v56 }
  0xb4   : > { %8660 = vmatprep.mubr.f32.mxu0 %v331_v57 }
  0xb7   : > { %8661 = vmatmul.mubr.f32.gmra.mrb[30].mxu0 %v332_v58 }
  0xb8   : > { %8663 = vmatprep.mubr.f32.mxu0 %v333_v59 }
  0xbb   : > { %8664 = vmatmul.mubr.f32.gmra.mrb[32].mxu0 %v334_v60 }
  0xbc   : > { %8666 = vmatprep.mubr.f32.mxu0 %v335_v61 }
  0xbf   : > { %8667 = vmatmul.mubr.f32.gmra.mrb[34].mxu0 %v336_v62 }
  0xc0   : > { %8669 = vmatprep.mubr.f32.mxu0 %v337_v1 }
  0xc3   : > { %8670 = vmatmul.mubr.f32.gmra.mrb[36].mxu0 %v338_v3 }
  0xc4   : > { %8672 = vmatprep.mubr.f32.mxu0 %v339_v9 }
  0xc7   : > { %8673 = vmatmul.mubr.f32.gmra.mrb[38].mxu0 %v340_v11 }
  0xc8   : > { %8675 = vmatprep.mubr.f32.mxu0 %v341_v12 }
  0xcb   : > { %8676 = vmatmul.mubr.f32.gmra.mrb[40].mxu0 %v342_v13 }
  0xcc   : > { %8678 = vmatprep.mubr.f32.mxu0 %v343_v14 }
  0xcf   : > { %8679 = vmatmul.mubr.f32.gmra.mrb[42].mxu0 %v344_v15 }
  0xd0   : > { %8681 = vmatprep.mubr.f32.mxu0 %v345_v16 }
  0xd3   : > { %8682 = vmatmul.mubr.f32.gmra.mrb[44].mxu0 %v346_v17 }
  0xd4   : > { %8684 = vmatprep.mubr.f32.mxu0 %v347_v18 }
  0xd7   : > { %8685 = vmatmul.mubr.f32.gmra.mrb[46].mxu0 %v348_v19 }
  0xd8   : > { %8687 = vmatprep.mubr.f32.mxu0 %v349_v20 }
  0xdb   : > { %8688 = vmatmul.mubr.f32.gmra.mrb[48].mxu0 %v350_v21 }
  0xdc   : > { %8690 = vmatprep.mubr.f32.mxu0 %v351_v22 }
  0xdf   : > { %8691 = vmatmul.mubr.f32.gmra.mrb[50].mxu0 %v352_v23 }
  0xe0   : > { %8693 = vmatprep.mubr.f32.mxu0 %v353_v24 }
  0xe3   : > { %8694 = vmatmul.mubr.f32.gmra.mrb[52].mxu0 %v354_v25 }
  0xe4   : > { %8696 = vmatprep.mubr.f32.mxu0 %v355_v26 }
  0xe7   : > { %8697 = vmatmul.mubr.f32.gmra.mrb[54].mxu0 %v356_v27 }
  0xe8   : > { %8699 = vmatprep.mubr.f32.mxu0 %v357_v28 }
  0xeb   : > { %8700 = vmatmul.mubr.f32.gmra.mrb[56].mxu0 %v358_v29 }
  0xec   : > { %8702 = vmatprep.mubr.f32.mxu0 %v359_v30 }
  0xef   : > { %8703 = vmatmul.mubr.f32.gmra.mrb[58].mxu0 %v360_v31 }
  0xf0   : > { %8705 = vmatprep.mubr.f32.mxu0 %v361_v32 }
  0xf3   : > { %8706 = vmatmul.mubr.f32.gmra.mrb[60].mxu0 %v362_v33 }
  0xf4   : > { %8708 = vmatprep.mubr.f32.mxu0 %v363_v34 }
  0xf7   : > { %8709 = vmatmul.mubr.f32.gmra.mrb[62].mxu0 %v364_v35 }
 0x14e   : > { %v8617_v36 = vpop.f32.mrb[0].mxu0 }
 0x14f   : > { %v447_v37 = vpop.f32.mrb[1].mxu0 }
 0x150   : > { %9141 = vtanh.f32 %v447_v37 }
 0x151   : > { %9143 = vtanh.f32 %v8617_v36 }
 0x152   : > { %v8620_v38 = vpop.f32.mrb[2].mxu0 }
 0x153   : > { %9145 = vtanh.f32 %v8620_v38  ;;  %v457_v39 = vpop.f32.mrb[3].mxu0 }
 0x154   : > { %9147 = vtanh.f32 %v457_v39 }
 0x156   : > { %v8623_v40 = vpop.f32.mrb[4].mxu0 }
 0x157   : > { %9149 = vtanh.f32 %v8623_v40  ;;  %v467_v41 = vpop.f32.mrb[5].mxu0 }
 0x158   : > { %9151 = vtanh.f32 %v467_v41 }
 0x15a   : > { %v9142_v42 = vpop.eup %9141  ;;  %v8626_v43 = vpop.f32.mrb[6].mxu0 }
 0x15b   : > { %v9144_v44 = vpop.eup %9143  ;;  %8727 = vmatprep.mubr.msk.f32.mxu1 %vm838_vm0, %v9142_v42  ;;  %9153 = vtanh.f32 %v8626_v43  ;;  %v477_v45 = vpop.f32.mrb[7].mxu0 }
 0x15c   : > { %8728 = vmatmul.mubr.msk.f32.vlgmr.msra.gmra.mrb[0].mxu1 %vm838_vm0, %v9144_v44  ;;  %9155 = vtanh.f32 %v477_v45 }
 0x15d   : > { %v9146_v46 = vpop.eup %9145 }
 0x15e   : > { %v9148_v47 = vpop.eup %9147  ;;  %v8629_v48 = vpop.f32.mrb[8].mxu0 }
 0x15f   : > { %8730 = vmatprep.mubr.msk.f32.mxu1 %vm838_vm0, %v9148_v47  ;;  %9157 = vtanh.f32 %v8629_v48  ;;  %v487_v49 = vpop.f32.mrb[9].mxu0 }
 0x160   : > { %8731 = vmatmul.mubr.msk.f32.gmra.mrb[2].mxu1 %vm838_vm0, %v9146_v46  ;;  %9159 = vtanh.f32 %v487_v49 }
 0x161   : > { %v9150_v50 = vpop.eup %9149 }
 0x162   : > { %v9152_v51 = vpop.eup %9151  ;;  %v8632_v52 = vpop.f32.mrb[10].mxu0 }
 0x163   : > { %8733 = vmatprep.mubr.msk.f32.mxu1 %vm838_vm0, %v9152_v51  ;;  %9161 = vtanh.f32 %v8632_v52  ;;  %v497_v53 = vpop.f32.mrb[11].mxu0 }
 0x164   : > { %8734 = vmatmul.mubr.msk.f32.gmra.mrb[4].mxu1 %vm838_vm0, %v9150_v50  ;;  %9163 = vtanh.f32 %v497_v53 }
 0x165   : > { %v9154_v54 = vpop.eup %9153 }
 0x166   : > { %v9156_v55 = vpop.eup %9155  ;;  %v8635_v56 = vpop.f32.mrb[12].mxu0 }
 0x167   : > { %8736 = vmatprep.mubr.msk.f32.mxu1 %vm838_vm0, %v9156_v55  ;;  %9165 = vtanh.f32 %v8635_v56  ;;  %v507_v57 = vpop.f32.mrb[13].mxu0 }
 0x168   : > { %8737 = vmatmul.mubr.msk.f32.gmra.mrb[6].mxu1 %vm838_vm0, %v9154_v54  ;;  %9167 = vtanh.f32 %v507_v57 }
 0x169   : > { %v9158_v58 = vpop.eup %9157 }
 0x16a   : > { %v9160_v59 = vpop.eup %9159  ;;  %v8638_v60 = vpop.f32.mrb[14].mxu0 }
 0x16b   : > { %8739 = vmatprep.mubr.msk.f32.mxu1 %vm838_vm0, %v9160_v59  ;;  %9169 = vtanh.f32 %v8638_v60  ;;  %v517_v61 = vpop.f32.mrb[15].mxu0 }
 0x16c   : > { %8740 = vmatmul.mubr.msk.f32.gmra.mrb[8].mxu1 %vm838_vm0, %v9158_v58  ;;  %9171 = vtanh.f32 %v517_v61 }
 0x16d   : > { %v9162_v62 = vpop.eup %9161 }
 0x16e   : > { %v9164_v63 = vpop.eup %9163  ;;  %v8641_v0 = vpop.f32.mrb[16].mxu0 }
 0x16f   : > { %8742 = vmatprep.mubr.msk.f32.mxu1 %vm838_vm0, %v9164_v63  ;;  %9173 = vtanh.f32 %v8641_v0  ;;  %v527_v1 = vpop.f32.mrb[17].mxu0 }
 0x170   : > { %8743 = vmatmul.mubr.msk.f32.gmra.mrb[10].mxu1 %vm838_vm0, %v9162_v62  ;;  %9175 = vtanh.f32 %v527_v1 }
 0x171   : > { %v9166_v2 = vpop.eup %9165 }
 0x172   : > { %v9168_v3 = vpop.eup %9167  ;;  %v8644_v4 = vpop.f32.mrb[18].mxu0 }
 0x173   : > { %8745 = vmatprep.mubr.msk.f32.mxu1 %vm838_vm0, %v9168_v3  ;;  %9177 = vtanh.f32 %v8644_v4  ;;  %v537_v5 = vpop.f32.mrb[19].mxu0 }
 0x174   : > { %8746 = vmatmul.mubr.msk.f32.gmra.mrb[12].mxu1 %vm838_vm0, %v9166_v2  ;;  %9179 = vtanh.f32 %v537_v5 }
 0x175   : > { %v9170_v6 = vpop.eup %9169 }
 0x176   : > { %v9172_v7 = vpop.eup %9171  ;;  %v8647_v8 = vpop.f32.mrb[20].mxu0 }
 0x177   : > { %8748 = vmatprep.mubr.msk.f32.mxu1 %vm838_vm0, %v9172_v7  ;;  %9181 = vtanh.f32 %v8647_v8  ;;  %v547_v9 = vpop.f32.mrb[21].mxu0 }
 0x178   : > { %8749 = vmatmul.mubr.msk.f32.gmra.mrb[14].mxu1 %vm838_vm0, %v9170_v6  ;;  %9183 = vtanh.f32 %v547_v9 }
 0x179   : > { %v9174_v10 = vpop.eup %9173 }
 0x17a   : > { %v9176_v11 = vpop.eup %9175  ;;  %v8650_v12 = vpop.f32.mrb[22].mxu0 }
 0x17b   : > { %8751 = vmatprep.mubr.msk.f32.mxu1 %vm838_vm0, %v9176_v11  ;;  %9185 = vtanh.f32 %v8650_v12  ;;  %v557_v13 = vpop.f32.mrb[23].mxu0 }
 0x17c   : > { %8752 = vmatmul.mubr.msk.f32.gmra.mrb[16].mxu1 %vm838_vm0, %v9174_v10  ;;  %9187 = vtanh.f32 %v557_v13 }
 0x17d   : > { %v9178_v14 = vpop.eup %9177 }
 0x17e   : > { %v9180_v15 = vpop.eup %9179  ;;  %v8653_v16 = vpop.f32.mrb[24].mxu0 }
 0x17f   : > { %8754 = vmatprep.mubr.msk.f32.mxu1 %vm838_vm0, %v9180_v15  ;;  %9189 = vtanh.f32 %v8653_v16  ;;  %v567_v17 = vpop.f32.mrb[25].mxu0 }
 0x180   : > { %8755 = vmatmul.mubr.msk.f32.gmra.mrb[18].mxu1 %vm838_vm0, %v9178_v14  ;;  %9191 = vtanh.f32 %v567_v17 }
 0x181   : > { %v9182_v18 = vpop.eup %9181 }
 0x182   : > { %v9184_v19 = vpop.eup %9183  ;;  %v8656_v20 = vpop.f32.mrb[26].mxu0 }
 0x183   : > { %8757 = vmatprep.mubr.msk.f32.mxu1 %vm838_vm0, %v9184_v19  ;;  %9193 = vtanh.f32 %v8656_v20  ;;  %v577_v21 = vpop.f32.mrb[27].mxu0 }
 0x184   : > { %8758 = vmatmul.mubr.msk.f32.gmra.mrb[20].mxu1 %vm838_vm0, %v9182_v18  ;;  %9195 = vtanh.f32 %v577_v21 }
 0x185   : > { %v9186_v22 = vpop.eup %9185 }
 0x186   : > { %v9188_v23 = vpop.eup %9187  ;;  %v8659_v24 = vpop.f32.mrb[28].mxu0 }
 0x187   : > { %8760 = vmatprep.mubr.msk.f32.mxu1 %vm838_vm0, %v9188_v23  ;;  %9197 = vtanh.f32 %v8659_v24  ;;  %v587_v25 = vpop.f32.mrb[29].mxu0 }
 0x188   : > { %8761 = vmatmul.mubr.msk.f32.gmra.mrb[22].mxu1 %vm838_vm0, %v9186_v22  ;;  %9199 = vtanh.f32 %v587_v25 }
 0x189   : > { %v9190_v26 = vpop.eup %9189 }
 0x18a   : > { %v9192_v27 = vpop.eup %9191  ;;  %v8662_v28 = vpop.f32.mrb[30].mxu0 }
 0x18b   : > { %8763 = vmatprep.mubr.msk.f32.mxu1 %vm838_vm0, %v9192_v27  ;;  %9201 = vtanh.f32 %v8662_v28  ;;  %v597_v29 = vpop.f32.mrb[31].mxu0 }
 0x18c   : > { %8764 = vmatmul.mubr.msk.f32.gmra.mrb[24].mxu1 %vm838_vm0, %v9190_v26  ;;  %9203 = vtanh.f32 %v597_v29 }
 0x18d   : > { %v9194_v30 = vpop.eup %9193 }
 0x18e   : > { %v9196_v31 = vpop.eup %9195  ;;  %v8665_v32 = vpop.f32.mrb[32].mxu0 }
 0x18f   : > { %8766 = vmatprep.mubr.msk.f32.mxu1 %vm838_vm0, %v9196_v31  ;;  %9205 = vtanh.f32 %v8665_v32  ;;  %v607_v33 = vpop.f32.mrb[33].mxu0 }
 0x190   : > { %8767 = vmatmul.mubr.msk.f32.gmra.mrb[26].mxu1 %vm838_vm0, %v9194_v30  ;;  %9207 = vtanh.f32 %v607_v33 }
 0x191   : > { %v9198_v34 = vpop.eup %9197 }
 0x192   : > { %v9200_v35 = vpop.eup %9199  ;;  %v8668_v36 = vpop.f32.mrb[34].mxu0 }
 0x193   : > { %8769 = vmatprep.mubr.msk.f32.mxu1 %vm838_vm0, %v9200_v35  ;;  %9209 = vtanh.f32 %v8668_v36  ;;  %v617_v37 = vpop.f32.mrb[35].mxu0 }
 0x194   : > { %8770 = vmatmul.mubr.msk.f32.gmra.mrb[28].mxu1 %vm838_vm0, %v9198_v34  ;;  %9211 = vtanh.f32 %v617_v37 }
 0x195   : > { %v9202_v38 = vpop.eup %9201 }
 0x196   : > { %v9204_v39 = vpop.eup %9203  ;;  %v8671_v44 = vpop.f32.mrb[36].mxu0 }
 0x197   : > { %8772 = vmatprep.mubr.msk.f32.mxu1 %vm838_vm0, %v9204_v39  ;;  %9213 = vtanh.f32 %v8671_v44  ;;  %v627_v45 = vpop.f32.mrb[37].mxu0 }
 0x198   : > { %8773 = vmatmul.mubr.msk.f32.gmra.mrb[30].mxu1 %vm838_vm0, %v9202_v38  ;;  %9215 = vtanh.f32 %v627_v45 }
 0x199   : > { %v9206_v40 = vpop.eup %9205 }
 0x19a   : > { %v9208_v41 = vpop.eup %9207  ;;  %v8674_v48 = vpop.f32.mrb[38].mxu0 }
 0x19b   : > { %8775 = vmatprep.mubr.msk.f32.mxu1 %vm838_vm0, %v9208_v41  ;;  %9217 = vtanh.f32 %v8674_v48  ;;  %v637_v49 = vpop.f32.mrb[39].mxu0 }
 0x19c   : > { %8776 = vmatmul.mubr.msk.f32.gmra.mrb[32].mxu1 %vm838_vm0, %v9206_v40  ;;  %9219 = vtanh.f32 %v637_v49 }
 0x19d   : > { %v9210_v42 = vpop.eup %9209 }
 0x19e   : > { %v9212_v43 = vpop.eup %9211  ;;  %v8677_v50 = vpop.f32.mrb[40].mxu0 }
 0x19f   : > { %8778 = vmatprep.mubr.msk.f32.mxu1 %vm838_vm0, %v9212_v43  ;;  %9221 = vtanh.f32 %v8677_v50  ;;  %v647_v53 = vpop.f32.mrb[41].mxu0 }
 0x1a0   : > { %8779 = vmatmul.mubr.msk.f32.gmra.mrb[34].mxu1 %vm838_vm0, %v9210_v42  ;;  %9223 = vtanh.f32 %v647_v53 }
 0x1a1   : > { %v9214_v46 = vpop.eup %9213 }
 0x1a2   : > { %v9216_v47 = vpop.eup %9215  ;;  %v8680_v54 = vpop.f32.mrb[42].mxu0 }
 0x1a3   : > { %8781 = vmatprep.mubr.msk.f32.mxu1 %vm838_vm0, %v9216_v47  ;;  %9225 = vtanh.f32 %v8680_v54  ;;  %v657_v57 = vpop.f32.mrb[43].mxu0 }
 0x1a4   : > { %8782 = vmatmul.mubr.msk.f32.gmra.mrb[36].mxu1 %vm838_vm0, %v9214_v46  ;;  %9227 = vtanh.f32 %v657_v57 }
 0x1a5   : > { %v9218_v51 = vpop.eup %9217 }
 0x1a6   : > { %v9220_v52 = vpop.eup %9219  ;;  %v8683_v58 = vpop.f32.mrb[44].mxu0 }
 0x1a7   : > { %8784 = vmatprep.mubr.msk.f32.mxu1 %vm838_vm0, %v9220_v52  ;;  %9229 = vtanh.f32 %v8683_v58  ;;  %v667_v61 = vpop.f32.mrb[45].mxu0 }
 0x1a8   : > { %8785 = vmatmul.mubr.msk.f32.gmra.mrb[38].mxu1 %vm838_vm0, %v9218_v51  ;;  %9231 = vtanh.f32 %v667_v61 }
 0x1a9   : > { %v9222_v55 = vpop.eup %9221 }
 0x1aa   : > { %v9224_v56 = vpop.eup %9223  ;;  %v8686_v62 = vpop.f32.mrb[46].mxu0 }
 0x1ab   : > { %8787 = vmatprep.mubr.msk.f32.mxu1 %vm838_vm0, %v9224_v56  ;;  %9233 = vtanh.f32 %v8686_v62  ;;  %v677_v1 = vpop.f32.mrb[47].mxu0 }
 0x1ac   : > { %8788 = vmatmul.mubr.msk.f32.gmra.mrb[40].mxu1 %vm838_vm0, %v9222_v55  ;;  %9235 = vtanh.f32 %v677_v1 }
 0x1ad   : > { %v9226_v59 = vpop.eup %9225 }
 0x1ae   : > { %v9228_v60 = vpop.eup %9227  ;;  %v8689_v2 = vpop.f32.mrb[48].mxu0 }
 0x1af   : > { %8790 = vmatprep.mubr.msk.f32.mxu1 %vm838_vm0, %v9228_v60  ;;  %9237 = vtanh.f32 %v8689_v2  ;;  %v687_v5 = vpop.f32.mrb[49].mxu0 }
 0x1b0   : > { %8791 = vmatmul.mubr.msk.f32.gmra.mrb[42].mxu1 %vm838_vm0, %v9226_v59  ;;  %9239 = vtanh.f32 %v687_v5 }
 0x1b1   : > { %v9230_v63 = vpop.eup %9229 }
 0x1b2   : > { %v9232_v0 = vpop.eup %9231  ;;  %v8692_v6 = vpop.f32.mrb[50].mxu0 }
 0x1b3   : > { %8793 = vmatprep.mubr.msk.f32.mxu1 %vm838_vm0, %v9232_v0  ;;  %9241 = vtanh.f32 %v8692_v6  ;;  %v697_v9 = vpop.f32.mrb[51].mxu0 }
 0x1b4   : > { %8794 = vmatmul.mubr.msk.f32.gmra.mrb[44].mxu1 %vm838_vm0, %v9230_v63  ;;  %9243 = vtanh.f32 %v697_v9 }
 0x1b5   : > { %v9234_v3 = vpop.eup %9233 }
 0x1b6   : > { %v9236_v4 = vpop.eup %9235  ;;  %v8695_v10 = vpop.f32.mrb[52].mxu0 }
 0x1b7   : > { %8796 = vmatprep.mubr.msk.f32.mxu1 %vm838_vm0, %v9236_v4  ;;  %9245 = vtanh.f32 %v8695_v10  ;;  %v707_v13 = vpop.f32.mrb[53].mxu0 }
 0x1b8   : > { %8797 = vmatmul.mubr.msk.f32.gmra.mrb[46].mxu1 %vm838_vm0, %v9234_v3  ;;  %9247 = vtanh.f32 %v707_v13 }
 0x1b9   : > { %v9238_v7 = vpop.eup %9237 }
 0x1ba   : > { %v9240_v8 = vpop.eup %9239  ;;  %v8698_v14 = vpop.f32.mrb[54].mxu0 }
 0x1bb   : > { %8799 = vmatprep.mubr.msk.f32.mxu1 %vm838_vm0, %v9240_v8  ;;  %9249 = vtanh.f32 %v8698_v14  ;;  %v717_v17 = vpop.f32.mrb[55].mxu0 }
 0x1bc   : > { %8800 = vmatmul.mubr.msk.f32.gmra.mrb[48].mxu1 %vm838_vm0, %v9238_v7  ;;  %9251 = vtanh.f32 %v717_v17 }
 0x1bd   : > { %v9242_v11 = vpop.eup %9241 }
 0x1be   : > { %v9244_v12 = vpop.eup %9243  ;;  %v8701_v18 = vpop.f32.mrb[56].mxu0 }
 0x1bf   : > { %8802 = vmatprep.mubr.msk.f32.mxu1 %vm838_vm0, %v9244_v12  ;;  %9253 = vtanh.f32 %v8701_v18  ;;  %v727_v21 = vpop.f32.mrb[57].mxu0 }
 0x1c0   : > { %8803 = vmatmul.mubr.msk.f32.gmra.mrb[50].mxu1 %vm838_vm0, %v9242_v11  ;;  %9255 = vtanh.f32 %v727_v21 }
 0x1c1   : > { %v9246_v15 = vpop.eup %9245 }
 0x1c2   : > { %v9248_v16 = vpop.eup %9247  ;;  %v8704_v24 = vpop.f32.mrb[58].mxu0 }
 0x1c3   : > { %8805 = vmatprep.mubr.msk.f32.mxu1 %vm838_vm0, %v9248_v16  ;;  %v737_v25 = vpop.f32.mrb[59].mxu0 }
 0x1c4   : > { %8806 = vmatmul.mubr.msk.f32.gmra.mrb[52].mxu1 %vm838_vm0, %v9246_v15  ;;  %9257 = vtanh.f32 %v737_v25 }
 0x1c5   : > { %v9250_v19 = vpop.eup %9249  ;;  %9259 = vtanh.f32 %v8704_v24 }
 0x1c6   : > { %v9252_v20 = vpop.eup %9251  ;;  %v8707_v30 = vpop.f32.mrb[60].mxu0 }
 0x1c7   : > { %8808 = vmatprep.mubr.msk.f32.mxu1 %vm838_vm0, %v9252_v20  ;;  %v747_v33 = vpop.f32.mrb[61].mxu0 }
 0x1c8   : > { %8809 = vmatmul.mubr.msk.f32.gmra.mrb[54].mxu1 %vm838_vm0, %v9250_v19  ;;  %9261 = vtanh.f32 %v747_v33 }
 0x1c9   : > { %v9254_v22 = vpop.eup %9253  ;;  %9263 = vtanh.f32 %v8707_v30 }
 0x1ca   : > { %v9256_v23 = vpop.eup %9255  ;;  %v8710_v46 = vpop.f32.mrb[62].mxu0 }
 0x1cb   : > { %8811 = vmatprep.mubr.msk.f32.mxu1 %vm838_vm0, %v9256_v23  ;;  %v757_v47 = vpop.f32.mrb[63].mxu0  ;;  %9265 = vtanh.f32 %v8710_v46 }
 0x1cc   : > { %8812 = vmatmul.mubr.msk.f32.gmra.mrb[56].mxu1 %vm838_vm0, %v9254_v22  ;;  %9267 = vtanh.f32 %v757_v47 }
 0x1ce   : > { %v9258_v28 = vpop.eup %9257 }
 0x1cf   : > { %v9260_v31 = vpop.eup %9259  ;;  %8814 = vmatprep.mubr.msk.f32.mxu1 %vm838_vm0, %v9258_v28 }
 0x1d0   : > { %8815 = vmatmul.mubr.msk.f32.gmra.mrb[58].mxu1 %vm838_vm0, %v9260_v31 }
 0x1d2   : > { %v9262_v38 = vpop.eup %9261 }
 0x1d3   : > { %v9264_v40 = vpop.eup %9263  ;;  %8817 = vmatprep.mubr.msk.f32.mxu1 %vm838_vm0, %v9262_v38 }
 0x1d4   : > { %8818 = vmatmul.mubr.msk.f32.gmra.mrb[60].mxu1 %vm838_vm0, %v9264_v40 }
 0x1d5   : > { %v9266_v53 = vpop.eup %9265 }
 0x1d6   : > { %v9268_v55 = vpop.eup %9267 }
 0x1d7   : > { %8820 = vmatprep.mubr.msk.f32.mxu1 %vm838_vm0, %v9268_v55 }
 0x1d8   : > { %8821 = vmatmul.mubr.msk.f32.gmra.mrb[62].mxu1 %vm838_vm0, %v9266_v53 }
 0x22f   : > { %v10507_v26 = vpop.f32.mrb[0].mxu1 }
 0x230   : > { %17474 = vst [vmem:[#allocation11_spill] sm:$0xff] %v10507_v26  ;;  %1738 = vrot.lane.b32.xlu1 %v10507_v26, %s17243_s29  ;;  %1482 = vrot.lane.b32.xlu0 %v10507_v26, %s10108_s20  ;;  %v10513_v27 = vpop.f32.mrb[1].mxu1 }
 0x231   : > { %17475 = vst [vmem:[#allocation12_spill] sm:$0xff] %v10513_v27 }
 0x233   : > { %v10515_v29 = vpop.f32.mrb[2].mxu1 }
 0x234   : > { %17476 = vst [vmem:[#allocation13_spill] sm:$0xff] %v10515_v29  ;;  %1994 = vrot.lane.b32.xlu1 %v10507_v26, %s10109_s26  ;;  %1480 = vrot.lane.b32.xlu0 %v10513_v27, %s10108_s20  ;;  %v10521_v32 = vpop.f32.mrb[3].mxu1 }
 0x235   : > { %17477 = vst [vmem:[#allocation14_spill] sm:$0xff] %v10521_v32 }
 0x237   : > { %v10525_v34 = vpop.f32.mrb[4].mxu1 }
 0x238   : > { %17478 = vst [vmem:[#allocation15_spill] sm:$0xff] %v10525_v34  ;;  %1736 = vrot.lane.b32.xlu0 %v10513_v27, %s17243_s29  ;;  %1486 = vrot.lane.b32.xlu1 %v10515_v29, %s10108_s20  ;;  %v10531_v35 = vpop.f32.mrb[5].mxu1 }
 0x239   : > { %17479 = vst [vmem:[#allocation16_spill] sm:$0xff] %v10531_v35 }
 0x23b   : > { %v10533_v36 = vpop.f32.mrb[6].mxu1 }
 0x23c   : > { %17480 = vst [vmem:[#allocation17_spill] sm:$0xff] %v10533_v36  ;;  %1992 = vrot.lane.b32.xlu0 %v10513_v27, %s10109_s26  ;;  %1742 = vrot.lane.b32.xlu1 %v10515_v29, %s17243_s29  ;;  %v10539_v37 = vpop.f32.mrb[7].mxu1 }
 0x23d   : > { %17481 = vst [vmem:[#allocation18_spill] sm:$0xff] %v10539_v37 }
 0x23f   : > { %v10541_v39 = vpop.f32.mrb[8].mxu1 }
 0x240   : > { %17482 = vst [vmem:[#allocation19_spill] sm:$0xff] %v10541_v39  ;;  %1998 = vrot.lane.b32.xlu1 %v10515_v29, %s10109_s26  ;;  %1740 = vrot.lane.b32.xlu0 %v10521_v32, %s17243_s29  ;;  %v10547_v41 = vpop.f32.mrb[9].mxu1 }
 0x241   : > { %17483 = vst [vmem:[#allocation20_spill] sm:$0xff] %v10547_v41 }
 0x243   : > { %v10551_v42 = vpop.f32.mrb[10].mxu1 }
 0x244   : > { %17484 = vst [vmem:[#allocation21_spill] sm:$0xff] %v10551_v42  ;;  %1996 = vrot.lane.b32.xlu0 %v10521_v32, %s10109_s26  ;;  %1484 = vrot.lane.b32.xlu1 %v10521_v32, %s10108_s20  ;;  %v10557_v43 = vpop.f32.mrb[11].mxu1 }
 0x245   : > { %17485 = vst [vmem:[#allocation22_spill] sm:$0xff] %v10557_v43 }
 0x247   : > { %v10559_v44 = vpop.f32.mrb[12].mxu1 }
 0x248   : > { %17486 = vst [vmem:[#allocation23_spill] sm:$0xff] %v10559_v44  ;;  %1490 = vrot.lane.b32.xlu1 %v10525_v34, %s10108_s20  ;;  %1488 = vrot.lane.b32.xlu0 %v10531_v35, %s10108_s20  ;;  %v10565_v45 = vpop.f32.mrb[13].mxu1 }
 0x249   : > { %17487 = vst [vmem:[#allocation24_spill] sm:$0xff] %v10565_v45 }
 0x24b   : > { %v10567_v48 = vpop.f32.mrb[14].mxu1 }
 0x24c   : > { %17488 = vst [vmem:[#allocation25_spill] sm:$0xff] %v10567_v48  ;;  %1746 = vrot.lane.b32.xlu1 %v10525_v34, %s17243_s29  ;;  %1744 = vrot.lane.b32.xlu0 %v10531_v35, %s17243_s29  ;;  %v10573_v49 = vpop.f32.mrb[15].mxu1 }
 0x24d   : > { %17489 = vst [vmem:[#allocation26_spill] sm:$0xff] %v10573_v49 }
 0x24f   : > { %v10575_v50 = vpop.f32.mrb[16].mxu1 }
 0x250   : > { %17490 = vst [vmem:[#allocation27_spill] sm:$0xff] %v10575_v50  ;;  %2002 = vrot.lane.b32.xlu1 %v10525_v34, %s10109_s26  ;;  %2000 = vrot.lane.b32.xlu0 %v10531_v35, %s10109_s26  ;;  %v10581_v51 = vpop.f32.mrb[17].mxu1 }
 0x251   : > { %17491 = vst [vmem:[#allocation28_spill] sm:$0xff] %v10581_v51 }
 0x253   : > { %v10583_v52 = vpop.f32.mrb[18].mxu1 }
 0x254   : > { %17492 = vst [vmem:[#allocation29_spill] sm:$0xff] %v10583_v52  ;;  %1494 = vrot.lane.b32.xlu1 %v10533_v36, %s10108_s20  ;;  %1492 = vrot.lane.b32.xlu0 %v10539_v37, %s10108_s20  ;;  %v10589_v54 = vpop.f32.mrb[19].mxu1 }
 0x255   : > { %17493 = vst [vmem:[#allocation30_spill] sm:$0xff] %v10589_v54 }
 0x257   : > { %v10592_v56 = vpop.f32.mrb[20].mxu1 }
 0x258   : > { %17494 = vst [vmem:[#allocation31_spill] sm:$0xff] %v10592_v56  ;;  %1750 = vrot.lane.b32.xlu1 %v10533_v36, %s17243_s29  ;;  %1748 = vrot.lane.b32.xlu0 %v10539_v37, %s17243_s29  ;;  %v10599_v57 = vpop.f32.mrb[21].mxu1 }
 0x259   : > { %17495 = vst [vmem:[#allocation32_spill] sm:$0xff] %v10599_v57 }
 0x25b   : > { %v10601_v58 = vpop.f32.mrb[22].mxu1 }
 0x25c   : > { %17496 = vst [vmem:[#allocation33_spill] sm:$0xff] %v10601_v58  ;;  %2006 = vrot.lane.b32.xlu1 %v10533_v36, %s10109_s26  ;;  %2004 = vrot.lane.b32.xlu0 %v10539_v37, %s10109_s26  ;;  %v10607_v59 = vpop.f32.mrb[23].mxu1 }
 0x25d   : > { %17497 = vst [vmem:[#allocation34_spill] sm:$0xff] %v10607_v59 }
 0x25f   : > { %v10609_v60 = vpop.f32.mrb[24].mxu1 }
 0x260   : > { %17498 = vst [vmem:[#allocation35_spill] sm:$0xff] %v10609_v60  ;;  %1498 = vrot.lane.b32.xlu1 %v10541_v39, %s10108_s20  ;;  %1496 = vrot.lane.b32.xlu0 %v10547_v41, %s10108_s20  ;;  %v10615_v61 = vpop.f32.mrb[25].mxu1 }
 0x261   : > { %17499 = vst [vmem:[#allocation36_spill] sm:$0xff] %v10615_v61 }
 0x263   : > { %v10617_v62 = vpop.f32.mrb[26].mxu1 }
 0x264   : > { %17500 = vst [vmem:[#allocation37_spill] sm:$0xff] %v10617_v62  ;;  %1754 = vrot.lane.b32.xlu1 %v10541_v39, %s17243_s29  ;;  %1752 = vrot.lane.b32.xlu0 %v10547_v41, %s17243_s29  ;;  %v10623_v63 = vpop.f32.mrb[27].mxu1 }
 0x265   : > { %17501 = vst [vmem:[#allocation38_spill] sm:$0xff] %v10623_v63 }
 0x267   : > { %v10625_v0 = vpop.f32.mrb[28].mxu1 }
 0x268   : > { %17502 = vst [vmem:[#allocation39_spill] sm:$0xff] %v10625_v0  ;;  %2010 = vrot.lane.b32.xlu1 %v10541_v39, %s10109_s26  ;;  %2008 = vrot.lane.b32.xlu0 %v10547_v41, %s10109_s26  ;;  %v10631_v1 = vpop.f32.mrb[29].mxu1 }
 0x269   : > { %17503 = vst [vmem:[#allocation40_spill] sm:$0xff] %v10631_v1 }
 0x26b   : > { %v10633_v2 = vpop.f32.mrb[30].mxu1 }
 0x26c   : > { %17504 = vst [vmem:[#allocation41_spill] sm:$0xff] %v10633_v2  ;;  %1502 = vrot.lane.b32.xlu1 %v10551_v42, %s10108_s20  ;;  %1500 = vrot.lane.b32.xlu0 %v10557_v43, %s10108_s20  ;;  %v10639_v3 = vpop.f32.mrb[31].mxu1 }
 0x26d   : > { %17505 = vst [vmem:[#allocation42_spill] sm:$0xff] %v10639_v3 }
 0x26f   : > { %v10641_v4 = vpop.f32.mrb[32].mxu1 }
 0x270   : > { %17506 = vst [vmem:[#allocation43_spill] sm:$0xff] %v10641_v4  ;;  %1758 = vrot.lane.b32.xlu1 %v10551_v42, %s17243_s29  ;;  %1756 = vrot.lane.b32.xlu0 %v10557_v43, %s17243_s29  ;;  %v10647_v5 = vpop.f32.mrb[33].mxu1 }
 0x271   : > { %17507 = vst [vmem:[#allocation44_spill] sm:$0xff] %v10647_v5 }
 0x273   : > { %v10657_v6 = vpop.f32.mrb[34].mxu1 }
 0x274   : > { %2014 = vrot.lane.b32.xlu1 %v10551_v42, %s10109_s26  ;;  %2012 = vrot.lane.b32.xlu0 %v10557_v43, %s10109_s26  ;;  %17508 = vst [vmem:[#allocation45_spill] sm:$0xff] %v10657_v6  ;;  %v10659_v7 = vpop.f32.mrb[35].mxu1 }
 0x275   : > { %17509 = vst [vmem:[#allocation46_spill] sm:$0xff] %v10659_v7 }
 0x277   : > { %v10673_v8 = vpop.f32.mrb[36].mxu1 }
 0x278   : > { %1506 = vrot.lane.b32.xlu1 %v10559_v44, %s10108_s20  ;;  %1504 = vrot.lane.b32.xlu0 %v10565_v45, %s10108_s20  ;;  %17510 = vst [vmem:[#allocation47_spill] sm:$0xff] %v10673_v8  ;;  %v10675_v9 = vpop.f32.mrb[37].mxu1 }
 0x279   : > { %17511 = vst [vmem:[#allocation48_spill] sm:$0xff] %v10675_v9 }
 0x27b   : > { %v10689_v10 = vpop.f32.mrb[38].mxu1 }
 0x27c   : > { %1762 = vrot.lane.b32.xlu1 %v10559_v44, %s17243_s29  ;;  %1760 = vrot.lane.b32.xlu0 %v10565_v45, %s17243_s29  ;;  %17512 = vst [vmem:[#allocation49_spill] sm:$0xff] %v10689_v10  ;;  %v10691_v11 = vpop.f32.mrb[39].mxu1 }
 0x27d   : > { %17513 = vst [vmem:[#allocation50_spill] sm:$0xff] %v10691_v11 }
 0x27f   : > { %v10705_v12 = vpop.f32.mrb[40].mxu1 }
 0x280   : > { %2018 = vrot.lane.b32.xlu1 %v10559_v44, %s10109_s26  ;;  %2016 = vrot.lane.b32.xlu0 %v10565_v45, %s10109_s26  ;;  %17514 = vst [vmem:[#allocation51_spill] sm:$0xff] %v10705_v12  ;;  %v10707_v13 = vpop.f32.mrb[41].mxu1 }
 0x281   : > { %17515 = vst [vmem:[#allocation52_spill] sm:$0xff] %v10707_v13 }
 0x283   : > { %v10729_v18 = vpop.f32.mrb[42].mxu1 }
 0x284   : > { %1510 = vrot.lane.b32.xlu1 %v10567_v48, %s10108_s20  ;;  %1508 = vrot.lane.b32.xlu0 %v10573_v49, %s10108_s20  ;;  %17516 = vst [vmem:[#allocation53_spill] sm:$0xff] %v10729_v18  ;;  %v10735_v21 = vpop.f32.mrb[43].mxu1 }
 0x285   : > { %17517 = vst [vmem:[#allocation54_spill] sm:$0xff] %v10735_v21 }
 0x287   : > { %v10757_v28 = vpop.f32.mrb[44].mxu1 }
 0x288   : > { %1766 = vrot.lane.b32.xlu1 %v10567_v48, %s17243_s29  ;;  %1764 = vrot.lane.b32.xlu0 %v10573_v49, %s17243_s29  ;;  %17518 = vst [vmem:[#allocation55_spill] sm:$0xff] %v10757_v28  ;;  %v10763_v33 = vpop.f32.mrb[45].mxu1 }
 0x289   : > { %17519 = vst [vmem:[#allocation56_spill] sm:$0xff] %v10763_v33 }
 0x28b   : > { %v10785_v53 = vpop.f32.mrb[46].mxu1 }
 0x28c   : > { %2022 = vrot.lane.b32.xlu1 %v10567_v48, %s10109_s26  ;;  %2020 = vrot.lane.b32.xlu0 %v10573_v49, %s10109_s26  ;;  %17520 = vst [vmem:[#allocation57_spill] sm:$0xff] %v10785_v53  ;;  %v10791_v49 = vpop.f32.mrb[47].mxu1 }
 0x28d   : > { %17521 = vst [vmem:[#allocation58_spill] sm:$0xff] %v10791_v49 }
 0x290   : > { %1514 = vrot.lane.b32.xlu1 %v10575_v50, %s10108_s20  ;;  %1512 = vrot.lane.b32.xlu0 %v10581_v51, %s10108_s20 }
 0x294   : > { %1770 = vrot.lane.b32.xlu1 %v10575_v50, %s17243_s29  ;;  %1768 = vrot.lane.b32.xlu0 %v10581_v51, %s17243_s29 }
 0x298   : > { %2026 = vrot.lane.b32.xlu1 %v10575_v50, %s10109_s26  ;;  %2024 = vrot.lane.b32.xlu0 %v10581_v51, %s10109_s26 }
 0x29c   : > { %1518 = vrot.lane.b32.xlu1 %v10583_v52, %s10108_s20  ;;  %1516 = vrot.lane.b32.xlu0 %v10589_v54, %s10108_s20 }
 0x2a0   : > { %1774 = vrot.lane.b32.xlu1 %v10583_v52, %s17243_s29  ;;  %1772 = vrot.lane.b32.xlu0 %v10589_v54, %s17243_s29 }
 0x2a2   : > { %v10713_v14 = vpop.permute.xlu1 %1738  ;;  %v10715_v15 = vpop.permute.xlu0 %1482 }
 0x2a4   : > { %2030 = vrot.lane.b32.xlu1 %v10583_v52, %s10109_s26  ;;  %2028 = vrot.lane.b32.xlu0 %v10589_v54, %s10109_s26 }
 0x2a6   : > { %v10721_v16 = vpop.permute.xlu1 %1994  ;;  %v10723_v17 = vpop.permute.xlu0 %1480 }
 0x2a8   : > { %1522 = vrot.lane.b32.xlu1 %v10592_v56, %s10108_s20  ;;  %1520 = vrot.lane.b32.xlu0 %v10599_v57, %s10108_s20 }
 0x2aa   : > { %v10731_v19 = vpop.permute.xlu0 %1736  ;;  %v10733_v20 = vpop.permute.xlu1 %1486 }
 0x2ac   : > { %1778 = vrot.lane.b32.xlu1 %v10592_v56, %s17243_s29  ;;  %1776 = vrot.lane.b32.xlu0 %v10599_v57, %s17243_s29 }
 0x2ae   : > { %v10741_v22 = vpop.permute.xlu0 %1992  ;;  %v10743_v23 = vpop.permute.xlu1 %1742 }
 0x2b0   : > { %2034 = vrot.lane.b32.xlu1 %v10592_v56, %s10109_s26  ;;  %2032 = vrot.lane.b32.xlu0 %v10599_v57, %s10109_s26  ;;  %v10813_v56 = vpop.f32.mrb[48].mxu1 }
 0x2b1   : > { %17524 = vst [vmem:[#allocation61_spill] sm:$0xff] %v10813_v56 }
 0x2b2   : > { %v10749_v24 = vpop.permute.xlu1 %1998  ;;  %v10751_v25 = vpop.permute.xlu0 %1740 }
 0x2b4   : > { %1526 = vrot.lane.b32.xlu1 %v10601_v58, %s10108_s20  ;;  %1524 = vrot.lane.b32.xlu0 %v10607_v59, %s10108_s20 }
 0x2b6   : > { %v10759_v30 = vpop.permute.xlu0 %1996  ;;  %v10761_v31 = vpop.permute.xlu1 %1484 }
 0x2b8   : > { %1782 = vrot.lane.b32.xlu1 %v10601_v58, %s17243_s29  ;;  %1780 = vrot.lane.b32.xlu0 %v10607_v59, %s17243_s29 }
 0x2ba   : > { %v10769_v38 = vpop.permute.xlu1 %1490  ;;  %v10771_v40 = vpop.permute.xlu0 %1488 }
 0x2bc   : > { %2038 = vrot.lane.b32.xlu1 %v10601_v58, %s10109_s26  ;;  %2036 = vrot.lane.b32.xlu0 %v10607_v59, %s10109_s26 }
 0x2be   : > { %v10777_v46 = vpop.permute.xlu1 %1746  ;;  %v10779_v47 = vpop.permute.xlu0 %1744 }
 0x2c0   : > { %1530 = vrot.lane.b32.xlu1 %v10609_v60, %s10108_s20  ;;  %1528 = vrot.lane.b32.xlu0 %v10615_v61, %s10108_s20 }
 0x2c2   : > { %v10787_v55 = vpop.permute.xlu1 %2002  ;;  %v10789_v51 = vpop.permute.xlu0 %2000 }
 0x2c4   : > { %1786 = vrot.lane.b32.xlu1 %v10609_v60, %s17243_s29  ;;  %1784 = vrot.lane.b32.xlu0 %v10615_v61, %s17243_s29 }
 0x2c6   : > { %v10797_v59 = vpop.permute.xlu1 %1494  ;;  %v10799_v58 = vpop.permute.xlu0 %1492 }
 0x2c7   : > { %17522 = vst [vmem:[#allocation59_spill] sm:$0xff] %v10799_v58 }
 0x2c8   : > { %2042 = vrot.lane.b32.xlu1 %v10609_v60, %s10109_s26  ;;  %2040 = vrot.lane.b32.xlu0 %v10615_v61, %s10109_s26  ;;  %v10819_v60 = vpop.f32.mrb[49].mxu1 }
 0x2c9   : > { %17526 = vst [vmem:[#allocation63_spill] sm:$0xff] %v10819_v60  ;;  %v10841_v48 = vpop.f32.mrb[50].mxu1 }
 0x2ca   : > { %v10805_v57 = vpop.permute.xlu1 %1750  ;;  %v10807_v45 = vpop.permute.xlu0 %1748  ;;  %17529 = vst [vmem:[#allocation66_spill] sm:$0xff] %v10841_v48 }
 0x2cb   : > { %17523 = vst [vmem:[#allocation60_spill] sm:$0xff] %v10807_v45 }
 0x2cc   : > { %1534 = vrot.lane.b32.xlu1 %v10617_v62, %s10108_s20  ;;  %1532 = vrot.lane.b32.xlu0 %v10623_v63, %s10108_s20 }
 0x2ce   : > { %v10815_v54 = vpop.permute.xlu1 %2006  ;;  %v10817_v43 = vpop.permute.xlu0 %2004 }
 0x2cf   : > { %17525 = vst [vmem:[#allocation62_spill] sm:$0xff] %v10817_v43 }
 0x2d0   : > { %1790 = vrot.lane.b32.xlu1 %v10617_v62, %s17243_s29  ;;  %1788 = vrot.lane.b32.xlu0 %v10623_v63, %s17243_s29 }
 0x2d2   : > { %v10825_v61 = vpop.permute.xlu1 %1498  ;;  %v10827_v52 = vpop.permute.xlu0 %1496 }
 0x2d3   : > { %17527 = vst [vmem:[#allocation64_spill] sm:$0xff] %v10827_v52 }
 0x2d4   : > { %2046 = vrot.lane.b32.xlu1 %v10617_v62, %s10109_s26  ;;  %2044 = vrot.lane.b32.xlu0 %v10623_v63, %s10109_s26  ;;  %v10847_v62 = vpop.f32.mrb[51].mxu1 }
 0x2d5   : > { %17531 = vst [vmem:[#allocation68_spill] sm:$0xff] %v10847_v62  ;;  %v10869_v37 = vpop.f32.mrb[52].mxu1 }
 0x2d6   : > { %v10833_v41 = vpop.permute.xlu1 %1754  ;;  %v10835_v50 = vpop.permute.xlu0 %1752  ;;  %17534 = vst [vmem:[#allocation71_spill] sm:$0xff] %v10869_v37 }
 0x2d7   : > { %17528 = vst [vmem:[#allocation65_spill] sm:$0xff] %v10835_v50 }
 0x2d8   : > { %1538 = vrot.lane.b32.xlu1 %v10625_v0, %s10108_s20  ;;  %1536 = vrot.lane.b32.xlu0 %v10631_v1, %s10108_s20 }
 0x2da   : > { %v10843_v43 = vpop.permute.xlu1 %2010  ;;  %v10845_v52 = vpop.permute.xlu0 %2008 }
 0x2db   : > { %17530 = vst [vmem:[#allocation67_spill] sm:$0xff] %v10845_v52 }
 0x2dc   : > { %1794 = vrot.lane.b32.xlu1 %v10625_v0, %s17243_s29  ;;  %1792 = vrot.lane.b32.xlu0 %v10631_v1, %s17243_s29 }
 0x2de   : > { %v10853_v63 = vpop.permute.xlu1 %1502  ;;  %v10855_v50 = vpop.permute.xlu0 %1500 }
 0x2df   : > { %17532 = vst [vmem:[#allocation69_spill] sm:$0xff] %v10855_v50 }
 0x2e0   : > { %2050 = vrot.lane.b32.xlu1 %v10625_v0, %s10109_s26  ;;  %2048 = vrot.lane.b32.xlu0 %v10631_v1, %s10109_s26  ;;  %v10875_v0 = vpop.f32.mrb[53].mxu1 }
 0x2e1   : > { %17537 = vst [vmem:[#allocation74_spill] sm:$0xff] %v10875_v0 }
 0x2e2   : > { %v10861_v45 = vpop.permute.xlu1 %1758  ;;  %v10863_v52 = vpop.permute.xlu0 %1756 }
 0x2e3   : > { %17533 = vst [vmem:[#allocation70_spill] sm:$0xff] %v10863_v52 }
 0x2e4   : > { %1542 = vrot.lane.b32.xlu1 %v10633_v2, %s10108_s20  ;;  %1540 = vrot.lane.b32.xlu0 %v10639_v3, %s10108_s20 }
 0x2e6   : > { %v10871_v58 = vpop.permute.xlu1 %2014  ;;  %v10873_v50 = vpop.permute.xlu0 %2012 }
 0x2e7   : > { %17535 = vst [vmem:[#allocation72_spill] sm:$0xff] %v10871_v58  ;;  %17536 = vst [vmem:[#allocation73_spill] sm:$0xff] %v10873_v50  ;;  %v10897_v58 = vpop.f32.mrb[54].mxu1 }
 0x2e8   : > { %1798 = vrot.lane.b32.xlu1 %v10633_v2, %s17243_s29  ;;  %1796 = vrot.lane.b32.xlu0 %v10639_v3, %s17243_s29  ;;  %17542 = vst [vmem:[#allocation79_spill] sm:$0xff] %v10897_v58 }
 0x2ea   : > { %v10881_v1 = vpop.permute.xlu1 %1506  ;;  %v10883_v52 = vpop.permute.xlu0 %1504 }
 0x2eb   : > { %17538 = vst [vmem:[#allocation75_spill] sm:$0xff] %v10881_v1  ;;  %17539 = vst [vmem:[#allocation76_spill] sm:$0xff] %v10883_v52 }
 0x2ec   : > { %2054 = vrot.lane.b32.xlu1 %v10633_v2, %s10109_s26  ;;  %2052 = vrot.lane.b32.xlu0 %v10639_v3, %s10109_s26  ;;  %v10903_v2 = vpop.f32.mrb[55].mxu1 }
 0x2ed   : > { %17545 = vst [vmem:[#allocation82_spill] sm:$0xff] %v10903_v2 }
 0x2ee   : > { %v10889_v44 = vpop.permute.xlu1 %1762  ;;  %v10891_v50 = vpop.permute.xlu0 %1760 }
 0x2ef   : > { %17540 = vst [vmem:[#allocation77_spill] sm:$0xff] %v10889_v44  ;;  %17541 = vst [vmem:[#allocation78_spill] sm:$0xff] %v10891_v50  ;;  %v10925_v44 = vpop.f32.mrb[56].mxu1 }
 0x2f0   : > { %1546 = vrot.lane.b32.xlu1 %v10641_v4, %s10108_s20  ;;  %1544 = vrot.lane.b32.xlu0 %v10647_v5, %s10108_s20  ;;  %17550 = vst [vmem:[#allocation87_spill] sm:$0xff] %v10925_v44 }
 0x2f2   : > { %v10899_v1 = vpop.permute.xlu1 %2018  ;;  %v10901_v52 = vpop.permute.xlu0 %2016 }
 0x2f3   : > { %17543 = vst [vmem:[#allocation80_spill] sm:$0xff] %v10899_v1  ;;  %17544 = vst [vmem:[#allocation81_spill] sm:$0xff] %v10901_v52 }
 0x2f4   : > { %1802 = vrot.lane.b32.xlu1 %v10641_v4, %s17243_s29  ;;  %1800 = vrot.lane.b32.xlu0 %v10647_v5, %s17243_s29 }
 0x2f6   : > { %v10909_v3 = vpop.permute.xlu1 %1510  ;;  %v10911_v50 = vpop.permute.xlu0 %1508 }
 0x2f7   : > { %17546 = vst [vmem:[#allocation83_spill] sm:$0xff] %v10909_v3  ;;  %17547 = vst [vmem:[#allocation84_spill] sm:$0xff] %v10911_v50 }
 0x2f8   : > { %2058 = vrot.lane.b32.xlu1 %v10641_v4, %s10109_s26  ;;  %2056 = vrot.lane.b32.xlu0 %v10647_v5, %s10109_s26  ;;  %v10931_v4 = vpop.f32.mrb[57].mxu1 }
 0x2f9   : > { %17553 = vst [vmem:[#allocation90_spill] sm:$0xff] %v10931_v4 }
 0x2fa   : > { %v10917_v1 = vpop.permute.xlu1 %1766  ;;  %v10919_v52 = vpop.permute.xlu0 %1764 }
 0x2fb   : > { %17548 = vst [vmem:[#allocation85_spill] sm:$0xff] %v10917_v1  ;;  %17549 = vst [vmem:[#allocation86_spill] sm:$0xff] %v10919_v52  ;;  %v10953_v1 = vpop.f32.mrb[58].mxu1 }
 0x2fc   : > { %1550 = vrot.lane.b32.xlu1 %v10657_v6, %s10108_s20  ;;  %1548 = vrot.lane.b32.xlu0 %v10659_v7, %s10108_s20  ;;  %17558 = vst [vmem:[#allocation95_spill] sm:$0xff] %v10953_v1 }
 0x2fe   : > { %v10927_v3 = vpop.permute.xlu1 %2022  ;;  %v10929_v50 = vpop.permute.xlu0 %2020 }
 0x2ff   : > { %17551 = vst [vmem:[#allocation88_spill] sm:$0xff] %v10927_v3  ;;  %17552 = vst [vmem:[#allocation89_spill] sm:$0xff] %v10929_v50 }
 0x300   : > { %1806 = vrot.lane.b32.xlu1 %v10657_v6, %s17243_s29  ;;  %1804 = vrot.lane.b32.xlu0 %v10659_v7, %s17243_s29 }
 0x302   : > { %v10937_v5 = vpop.permute.xlu1 %1514  ;;  %v10939_v52 = vpop.permute.xlu0 %1512 }
 0x303   : > { %17554 = vst [vmem:[#allocation91_spill] sm:$0xff] %v10937_v5  ;;  %17555 = vst [vmem:[#allocation92_spill] sm:$0xff] %v10939_v52 }
 0x304   : > { %2062 = vrot.lane.b32.xlu1 %v10657_v6, %s10109_s26  ;;  %2060 = vrot.lane.b32.xlu0 %v10659_v7, %s10109_s26  ;;  %v10959_v6 = vpop.f32.mrb[59].mxu1 }
 0x305   : > { %17561 = vst [vmem:[#allocation98_spill] sm:$0xff] %v10959_v6 }
 0x306   : > { %v10945_v3 = vpop.permute.xlu1 %1770  ;;  %v10947_v50 = vpop.permute.xlu0 %1768 }
 0x307   : > { %17556 = vst [vmem:[#allocation93_spill] sm:$0xff] %v10945_v3  ;;  %17557 = vst [vmem:[#allocation94_spill] sm:$0xff] %v10947_v50  ;;  %v10981_v3 = vpop.f32.mrb[60].mxu1 }
 0x308   : > { %1554 = vrot.lane.b32.xlu1 %v10673_v8, %s10108_s20  ;;  %1552 = vrot.lane.b32.xlu0 %v10675_v9, %s10108_s20  ;;  %17566 = vst [vmem:[#allocation103_spill] sm:$0xff] %v10981_v3 }
 0x30a   : > { %v10955_v5 = vpop.permute.xlu1 %2026  ;;  %v10957_v52 = vpop.permute.xlu0 %2024 }
 0x30b   : > { %17559 = vst [vmem:[#allocation96_spill] sm:$0xff] %v10955_v5  ;;  %17560 = vst [vmem:[#allocation97_spill] sm:$0xff] %v10957_v52 }
 0x30c   : > { %1810 = vrot.lane.b32.xlu1 %v10673_v8, %s17243_s29  ;;  %1808 = vrot.lane.b32.xlu0 %v10675_v9, %s17243_s29 }
 0x30e   : > { %v10965_v7 = vpop.permute.xlu1 %1518  ;;  %v10967_v50 = vpop.permute.xlu0 %1516 }
 0x30f   : > { %17562 = vst [vmem:[#allocation99_spill] sm:$0xff] %v10965_v7  ;;  %17563 = vst [vmem:[#allocation100_spill] sm:$0xff] %v10967_v50 }
 0x310   : > { %2066 = vrot.lane.b32.xlu1 %v10673_v8, %s10109_s26  ;;  %2064 = vrot.lane.b32.xlu0 %v10675_v9, %s10109_s26  ;;  %v10987_v8 = vpop.f32.mrb[61].mxu1 }
 0x311   : > { %17569 = vst [vmem:[#allocation106_spill] sm:$0xff] %v10987_v8 }
 0x312   : > { %v10973_v5 = vpop.permute.xlu1 %1774  ;;  %v10975_v52 = vpop.permute.xlu0 %1772 }
 0x313   : > { %17564 = vst [vmem:[#allocation101_spill] sm:$0xff] %v10973_v5  ;;  %17565 = vst [vmem:[#allocation102_spill] sm:$0xff] %v10975_v52 }
 0x314   : > { %1558 = vrot.lane.b32.xlu1 %v10689_v10, %s10108_s20  ;;  %1556 = vrot.lane.b32.xlu0 %v10691_v11, %s10108_s20 }
 0x316   : > { %v10983_v7 = vpop.permute.xlu1 %2030  ;;  %v10985_v50 = vpop.permute.xlu0 %2028 }
 0x317   : > { %17567 = vst [vmem:[#allocation104_spill] sm:$0xff] %v10983_v7  ;;  %17568 = vst [vmem:[#allocation105_spill] sm:$0xff] %v10985_v50 }
 0x318   : > { %1814 = vrot.lane.b32.xlu1 %v10689_v10, %s17243_s29  ;;  %1812 = vrot.lane.b32.xlu0 %v10691_v11, %s17243_s29 }
 0x31a   : > { %v10993_v9 = vpop.permute.xlu1 %1522  ;;  %v10995_v52 = vpop.permute.xlu0 %1520 }
 0x31b   : > { %17570 = vst [vmem:[#allocation107_spill] sm:$0xff] %v10993_v9  ;;  %17571 = vst [vmem:[#allocation108_spill] sm:$0xff] %v10995_v52 }
 0x31c   : > { %2070 = vrot.lane.b32.xlu1 %v10689_v10, %s10109_s26  ;;  %2068 = vrot.lane.b32.xlu0 %v10691_v11, %s10109_s26 }
 0x31e   : > { %v11001_v7 = vpop.permute.xlu1 %1778  ;;  %v11003_v50 = vpop.permute.xlu0 %1776 }
 0x31f   : > { %17572 = vst [vmem:[#allocation109_spill] sm:$0xff] %v11003_v50 }
 0x320   : > { %1562 = vrot.lane.b32.xlu1 %v10705_v12, %s10108_s20  ;;  %1560 = vrot.lane.b32.xlu0 %v10707_v13, %s10108_s20 }
 0x322   : > { %v11009_v5 = vpop.permute.xlu1 %2034  ;;  %v11011_v9 = vpop.permute.xlu0 %2032 }
 0x323   : > { %17573 = vst [vmem:[#allocation110_spill] sm:$0xff] %v11011_v9  ;;  %v11029_v9 = vpop.f32.mrb[62].mxu1 }
 0x324   : > { %1818 = vrot.lane.b32.xlu1 %v10705_v12, %s17243_s29  ;;  %1816 = vrot.lane.b32.xlu0 %v10707_v13, %s17243_s29  ;;  %17578 = vst [vmem:[#allocation115_spill] sm:$0xff] %v11029_v9 }
 0x326   : > { %v11017_v11 = vpop.permute.xlu1 %1526  ;;  %v11019_v10 = vpop.permute.xlu0 %1524 }
 0x327   : > { %17574 = vst [vmem:[#allocation111_spill] sm:$0xff] %v11017_v11  ;;  %17575 = vst [vmem:[#allocation112_spill] sm:$0xff] %v11019_v10  ;;  %v11035_v11 = vpop.f32.mrb[63].mxu1 }
 0x328   : > { %2074 = vrot.lane.b32.xlu1 %v10705_v12, %s10109_s26  ;;  %2072 = vrot.lane.b32.xlu0 %v10707_v13, %s10109_s26  ;;  %17579 = vst [vmem:[#allocation116_spill] sm:$0xff] %v11035_v11 }
 0x32a   : > { %v11025_v50 = vpop.permute.xlu1 %1782  ;;  %v11027_v52 = vpop.permute.xlu0 %1780 }
 0x32b   : > { %17576 = vst [vmem:[#allocation113_spill] sm:$0xff] %v11025_v50  ;;  %17577 = vst [vmem:[#allocation114_spill] sm:$0xff] %v11027_v52 }
 0x32c   : > { %1566 = vrot.lane.b32.xlu1 %v10729_v18, %s10108_s20  ;;  %1564 = vrot.lane.b32.xlu0 %v10735_v21, %s10108_s20 }
 0x32e   : > { %v11037_v10 = vpop.permute.xlu1 %2038  ;;  %v11039_v12 = vpop.permute.xlu0 %2036 }
 0x32f   : > { %17580 = vst [vmem:[#allocation117_spill] sm:$0xff] %v11037_v10  ;;  %17581 = vst [vmem:[#allocation118_spill] sm:$0xff] %v11039_v12 }
 0x330   : > { %1822 = vrot.lane.b32.xlu1 %v10729_v18, %s17243_s29  ;;  %1820 = vrot.lane.b32.xlu0 %v10735_v21, %s17243_s29 }
 0x332   : > { %v11045_v13 = vpop.permute.xlu1 %1530  ;;  %v11047_v52 = vpop.permute.xlu0 %1528 }
 0x333   : > { %17582 = vst [vmem:[#allocation119_spill] sm:$0xff] %v11045_v13  ;;  %17583 = vst [vmem:[#allocation120_spill] sm:$0xff] %v11047_v52 }
 0x334   : > { %2078 = vrot.lane.b32.xlu1 %v10729_v18, %s10109_s26  ;;  %2076 = vrot.lane.b32.xlu0 %v10735_v21, %s10109_s26 }
 0x336   : > { %v11053_v50 = vpop.permute.xlu1 %1786  ;;  %v11055_v10 = vpop.permute.xlu0 %1784 }
 0x337   : > { %17584 = vst [vmem:[#allocation121_spill] sm:$0xff] %v11055_v10 }
 0x338   : > { %1570 = vrot.lane.b32.xlu1 %v10757_v28, %s10108_s20  ;;  %1568 = vrot.lane.b32.xlu0 %v10763_v33, %s10108_s20 }
 0x33a   : > { %v11061_v12 = vpop.permute.xlu1 %2042  ;;  %v11063_v13 = vpop.permute.xlu0 %2040 }
 0x33b   : > { %17585 = vst [vmem:[#allocation122_spill] sm:$0xff] %v11063_v13 }
 0x33c   : > { %1826 = vrot.lane.b32.xlu1 %v10757_v28, %s17243_s29  ;;  %1824 = vrot.lane.b32.xlu0 %v10763_v33, %s17243_s29 }
 0x33e   : > { %v11069_v21 = vpop.permute.xlu1 %1534  ;;  %v11071_v18 = vpop.permute.xlu0 %1532 }
 0x33f   : > { %17586 = vst [vmem:[#allocation123_spill] sm:$0xff] %v11069_v21  ;;  %17587 = vst [vmem:[#allocation124_spill] sm:$0xff] %v11071_v18 }
 0x340   : > { %2082 = vrot.lane.b32.xlu1 %v10757_v28, %s10109_s26  ;;  %2080 = vrot.lane.b32.xlu0 %v10763_v33, %s10109_s26 }
 0x342   : > { %v11077_v10 = vpop.permute.xlu1 %1790  ;;  %v11079_v52 = vpop.permute.xlu0 %1788 }
 0x343   : > { %17588 = vst [vmem:[#allocation125_spill] sm:$0xff] %v11079_v52 }
 0x344   : > { %1574 = vrot.lane.b32.xlu1 %v10785_v53, %s10108_s20  ;;  %1572 = vrot.lane.b32.xlu0 %v10791_v49, %s10108_s20 }
 0x346   : > { %v11085_v13 = vpop.permute.xlu1 %2046  ;;  %v11087_v21 = vpop.permute.xlu0 %2044 }
 0x347   : > { %17589 = vst [vmem:[#allocation126_spill] sm:$0xff] %v11087_v21 }
 0x348   : > { %1830 = vrot.lane.b32.xlu1 %v10785_v53, %s17243_s29  ;;  %1828 = vrot.lane.b32.xlu0 %v10791_v49, %s17243_s29 }
 0x34a   : > { %v11093_v33 = vpop.permute.xlu1 %1538  ;;  %v11095_v28 = vpop.permute.xlu0 %1536 }
 0x34b   : > { %17590 = vst [vmem:[#allocation127_spill] sm:$0xff] %v11093_v33  ;;  %17591 = vst [vmem:[#allocation128_spill] sm:$0xff] %v11095_v28 }
 0x34c   : > { %2086 = vrot.lane.b32.xlu1 %v10785_v53, %s10109_s26  ;;  %2084 = vrot.lane.b32.xlu0 %v10791_v49, %s10109_s26 }
 0x34e   : > { %v11101_v52 = vpop.permute.xlu1 %1794  ;;  %v11103_v18 = vpop.permute.xlu0 %1792 }
 0x34f   : > { %17592 = vst [vmem:[#allocation129_spill] sm:$0xff] %v11103_v18 }
 0x350   : > { %1578 = vrot.lane.b32.xlu1 %v10813_v56, %s10108_s20  ;;  %1576 = vrot.lane.b32.xlu0 %v10819_v60, %s10108_s20 }
 0x352   : > { %v11109_v21 = vpop.permute.xlu1 %2050  ;;  %v11111_v33 = vpop.permute.xlu0 %2048 }
 0x353   : > { %17593 = vst [vmem:[#allocation130_spill] sm:$0xff] %v11111_v33 }
 0x354   : > { %1834 = vrot.lane.b32.xlu1 %v10813_v56, %s17243_s29  ;;  %1832 = vrot.lane.b32.xlu0 %v10819_v60, %s17243_s29 }
 0x356   : > { %v11117_v49 = vpop.permute.xlu1 %1542  ;;  %v11119_v53 = vpop.permute.xlu0 %1540 }
 0x357   : > { %17594 = vst [vmem:[#allocation131_spill] sm:$0xff] %v11117_v49  ;;  %17595 = vst [vmem:[#allocation132_spill] sm:$0xff] %v11119_v53 }
 0x358   : > { %2090 = vrot.lane.b32.xlu1 %v10813_v56, %s10109_s26  ;;  %2088 = vrot.lane.b32.xlu0 %v10819_v60, %s10109_s26 }
 0x35a   : > { %v11125_v18 = vpop.permute.xlu1 %1798  ;;  %v11127_v28 = vpop.permute.xlu0 %1796 }
 0x35b   : > { %17596 = vst [vmem:[#allocation133_spill] sm:$0xff] %v11127_v28 }
 0x35c   : > { %1582 = vrot.lane.b32.xlu1 %v10841_v48, %s10108_s20  ;;  %1580 = vrot.lane.b32.xlu0 %v10847_v62, %s10108_s20 }
 0x35e   : > { %v11133_v33 = vpop.permute.xlu1 %2054  ;;  %v11135_v49 = vpop.permute.xlu0 %2052 }
 0x35f   : > { %17597 = vst [vmem:[#allocation134_spill] sm:$0xff] %v11135_v49 }
 0x360   : > { %1838 = vrot.lane.b32.xlu1 %v10841_v48, %s17243_s29  ;;  %1836 = vrot.lane.b32.xlu0 %v10847_v62, %s17243_s29 }
 0x362   : > { %v11141_v60 = vpop.permute.xlu1 %1546  ;;  %v11143_v56 = vpop.permute.xlu0 %1544 }
 0x363   : > { %17598 = vst [vmem:[#allocation135_spill] sm:$0xff] %v11141_v60  ;;  %17599 = vst [vmem:[#allocation136_spill] sm:$0xff] %v11143_v56 }
 0x364   : > { %2094 = vrot.lane.b32.xlu1 %v10841_v48, %s10109_s26  ;;  %2092 = vrot.lane.b32.xlu0 %v10847_v62, %s10109_s26 }
 0x366   : > { %v11149_v28 = vpop.permute.xlu1 %1802  ;;  %v11151_v53 = vpop.permute.xlu0 %1800 }
 0x367   : > { %17600 = vst [vmem:[#allocation137_spill] sm:$0xff] %v11151_v53 }
 0x368   : > { %1586 = vrot.lane.b32.xlu1 %v10869_v37, %s10108_s20  ;;  %1584 = vrot.lane.b32.xlu0 %v10875_v0, %s10108_s20 }
 0x36a   : > { %v11157_v49 = vpop.permute.xlu1 %2058  ;;  %v11159_v60 = vpop.permute.xlu0 %2056 }
 0x36b   : > { %17601 = vst [vmem:[#allocation138_spill] sm:$0xff] %v11159_v60 }
 0x36c   : > { %1842 = vrot.lane.b32.xlu1 %v10869_v37, %s17243_s29  ;;  %1840 = vrot.lane.b32.xlu0 %v10875_v0, %s17243_s29 }
 0x36e   : > { %v11165_v62 = vpop.permute.xlu1 %1550  ;;  %v11167_v48 = vpop.permute.xlu0 %1548 }
 0x36f   : > { %17602 = vst [vmem:[#allocation139_spill] sm:$0xff] %v11165_v62  ;;  %17603 = vst [vmem:[#allocation140_spill] sm:$0xff] %v11167_v48 }
 0x370   : > { %2098 = vrot.lane.b32.xlu1 %v10869_v37, %s10109_s26  ;;  %2096 = vrot.lane.b32.xlu0 %v10875_v0, %s10109_s26 }
 0x372   : > { %v11173_v53 = vpop.permute.xlu1 %1806  ;;  %v11175_v56 = vpop.permute.xlu0 %1804 }
 0x373   : > { %17604 = vst [vmem:[#allocation141_spill] sm:$0xff] %v11175_v56 }
 0x374   : > { %1590 = vrot.lane.b32.xlu1 %v10897_v58, %s10108_s20  ;;  %1588 = vrot.lane.b32.xlu0 %v10903_v2, %s10108_s20 }
 0x376   : > { %v11181_v60 = vpop.permute.xlu1 %2062  ;;  %v11183_v62 = vpop.permute.xlu0 %2060 }
 0x377   : > { %17605 = vst [vmem:[#allocation142_spill] sm:$0xff] %v11183_v62 }
 0x378   : > { %1846 = vrot.lane.b32.xlu1 %v10897_v58, %s17243_s29  ;;  %1844 = vrot.lane.b32.xlu0 %v10903_v2, %s17243_s29 }
 0x37a   : > { %v11189_v0 = vpop.permute.xlu1 %1554  ;;  %v11191_v37 = vpop.permute.xlu0 %1552 }
 0x37b   : > { %17606 = vst [vmem:[#allocation143_spill] sm:$0xff] %v11189_v0  ;;  %17607 = vst [vmem:[#allocation144_spill] sm:$0xff] %v11191_v37 }
 0x37c   : > { %2102 = vrot.lane.b32.xlu1 %v10897_v58, %s10109_s26  ;;  %2100 = vrot.lane.b32.xlu0 %v10903_v2, %s10109_s26 }
 0x37e   : > { %v11197_v56 = vpop.permute.xlu1 %1810  ;;  %v11199_v48 = vpop.permute.xlu0 %1808 }
 0x37f   : > { %17608 = vst [vmem:[#allocation145_spill] sm:$0xff] %v11199_v48 }
 0x380   : > { %1594 = vrot.lane.b32.xlu1 %v10925_v44, %s10108_s20  ;;  %1592 = vrot.lane.b32.xlu0 %v10931_v4, %s10108_s20 }
 0x382   : > { %v11205_v62 = vpop.permute.xlu1 %2066  ;;  %v11207_v0 = vpop.permute.xlu0 %2064 }
 0x383   : > { %17609 = vst [vmem:[#allocation146_spill] sm:$0xff] %v11207_v0 }
 0x384   : > { %1850 = vrot.lane.b32.xlu1 %v10925_v44, %s17243_s29  ;;  %1848 = vrot.lane.b32.xlu0 %v10931_v4, %s17243_s29 }
 0x386   : > { %v11213_v58 = vpop.permute.xlu1 %1558  ;;  %v11215_v2 = vpop.permute.xlu0 %1556 }
 0x387   : > { %17610 = vst [vmem:[#allocation147_spill] sm:$0xff] %v11213_v58  ;;  %17611 = vst [vmem:[#allocation148_spill] sm:$0xff] %v11215_v2 }
 0x388   : > { %2106 = vrot.lane.b32.xlu1 %v10925_v44, %s10109_s26  ;;  %2104 = vrot.lane.b32.xlu0 %v10931_v4, %s10109_s26 }
 0x38a   : > { %v11221_v48 = vpop.permute.xlu1 %1814  ;;  %v11223_v37 = vpop.permute.xlu0 %1812 }
 0x38b   : > { %17612 = vst [vmem:[#allocation149_spill] sm:$0xff] %v11223_v37 }
 0x38c   : > { %1598 = vrot.lane.b32.xlu1 %v10953_v1, %s10108_s20  ;;  %1596 = vrot.lane.b32.xlu0 %v10959_v6, %s10108_s20 }
 0x38e   : > { %v11229_v0 = vpop.permute.xlu1 %2070  ;;  %v11231_v58 = vpop.permute.xlu0 %2068 }
 0x38f   : > { %17613 = vst [vmem:[#allocation150_spill] sm:$0xff] %v11231_v58  ;;  %v1673_v58 = vmax.f32 %v10507_v26, %v10715_v15  ;;  %v1672_v26 = vmax.f32 %v10513_v27, %v10723_v17 }
 0x390   : > { %1854 = vrot.lane.b32.xlu1 %v10953_v1, %s17243_s29  ;;  %1852 = vrot.lane.b32.xlu0 %v10959_v6, %s17243_s29 }
 0x392   : > { %v11237_v44 = vpop.permute.xlu1 %1562  ;;  %v11239_v4 = vpop.permute.xlu0 %1560 }
 0x393   : > { %17614 = vst [vmem:[#allocation151_spill] sm:$0xff] %v11237_v44  ;;  %17615 = vst [vmem:[#allocation152_spill] sm:$0xff] %v11239_v4 }
 0x394   : > { %2110 = vrot.lane.b32.xlu1 %v10953_v1, %s10109_s26  ;;  %2108 = vrot.lane.b32.xlu0 %v10959_v6, %s10109_s26  ;;  %v1929_v1 = vmax.f32 %v1673_v58, %v10713_v14  ;;  %v1928_v58 = vmax.f32 %v1672_v26, %v10731_v19 }
 0x396   : > { %v11245_v37 = vpop.permute.xlu1 %1818  ;;  %v11247_v2 = vpop.permute.xlu0 %1816  ;;  %v11273_v15 = vmax.f32 %v1929_v1, %v10721_v16  ;;  %v11287_v1 = vmax.f32 %v1928_v58, %v10741_v22  ;;  %v1675_v58 = vmax.f32 %v10515_v29, %v10733_v20  ;;  %v1674_v20 = vmax.f32 %v10521_v32, %v10761_v31  ;;  %v17640_v32 = vld [vmem:[#allocation80_spill] sm:$0xff] }
 0x397   : > { %17616 = vst [vmem:[#allocation153_spill] sm:$0xff] %v11247_v2 }
 0x398   : > { %1602 = vrot.lane.b32.xlu1 %v10981_v3, %s10108_s20  ;;  %1600 = vrot.lane.b32.xlu0 %v10987_v8, %s10108_s20  ;;  %17619 = vst [vmem:[#allocation156_spill] sm:$0xff] %v11273_v15  ;;  %17620 = vst [vmem:[#allocation157_spill] sm:$0xff] %v11287_v1  ;;  %v1931_v27 = vmax.f32 %v1675_v58, %v10743_v23  ;;  %v1677_v23 = vmax.f32 %v10525_v34, %v10769_v38 }
 0x39a   : > { %v11255_v4 = vpop.permute.xlu1 %2074  ;;  %v11257_v44 = vpop.permute.xlu0 %2072 }
 0x39b   : > { %17617 = vst [vmem:[#allocation154_spill] sm:$0xff] %v11255_v4  ;;  %17618 = vst [vmem:[#allocation155_spill] sm:$0xff] %v11257_v44 }
 0x39c   : > { %1858 = vrot.lane.b32.xlu1 %v10981_v3, %s17243_s29  ;;  %1856 = vrot.lane.b32.xlu0 %v10987_v8, %s17243_s29 }
 0x39e   : > { %v11264_v6 = vpop.permute.xlu1 %1566  ;;  %v11266_v2 = vpop.permute.xlu0 %1564 }
 0x3a0   : > { %2114 = vrot.lane.b32.xlu1 %v10981_v3, %s10109_s26  ;;  %2112 = vrot.lane.b32.xlu0 %v10987_v8, %s10109_s26 }
 0x3a2   : > { %v11277_v44 = vpop.permute.xlu1 %1822  ;;  %v11279_v4 = vpop.permute.xlu0 %1820 }
 0x3a4   : > { %2506 = vrot.lane.b32.xlu1 %v11273_v15, %s10110_s19  ;;  %3274 = vrot.lane.b32.xlu0 %v11273_v15, %s17245_s10 }
 0x3a6   : > { %v11289_v14 = vpop.permute.xlu1 %2078  ;;  %v11291_v16 = vpop.permute.xlu0 %2076 }
 0x3a7   : > { %17621 = vst [vmem:[#allocation158_spill] sm:$0xff] %v11291_v16 }
 0x3a8   : > { %2890 = vrot.lane.b32.xlu1 %v11273_v15, %s10112_s30  ;;  %2504 = vrot.lane.b32.xlu0 %v11287_v1, %s10110_s19 }
 0x3aa   : > { %v11297_v26 = vpop.permute.xlu1 %1570  ;;  %v11299_v17 = vpop.permute.xlu0 %1568 }
 0x3ac   : > { %2888 = vrot.lane.b32.xlu0 %v11287_v1, %s10112_s30  ;;  %1606 = vrot.lane.b32.xlu1 %v11029_v9, %s10108_s20 }
 0x3ae   : > { %v11305_v19 = vpop.permute.xlu1 %1826  ;;  %v11307_v22 = vpop.permute.xlu0 %1824 }
 0x3b0   : > { %3272 = vrot.lane.b32.xlu0 %v11287_v1, %s17245_s10  ;;  %1862 = vrot.lane.b32.xlu1 %v11029_v9, %s17243_s29  ;;  %v11325_v1 = vmax.f32 %v1931_v27, %v10749_v24  ;;  %v1933_v24 = vmax.f32 %v1677_v23, %v10777_v46  ;;  %v1679_v23 = vmax.f32 %v10533_v36, %v10797_v59 }
 0x3b2   : > { %v11315_v15 = vpop.permute.xlu1 %2082  ;;  %v11317_v3 = vpop.permute.xlu0 %2080  ;;  %17622 = vst [vmem:[#allocation159_spill] sm:$0xff] %v11325_v1  ;;  %v11350_v29 = vmax.f32 %v1933_v24, %v10787_v55 }
 0x3b4   : > { %2118 = vrot.lane.b32.xlu1 %v11029_v9, %s10109_s26  ;;  %1604 = vrot.lane.b32.xlu0 %v11035_v11, %s10108_s20  ;;  %v1930_v9 = vmax.f32 %v1674_v20, %v10751_v25  ;;  %17623 = vst [vmem:[#allocation160_spill] sm:$0xff] %v11350_v29  ;;  %v1935_v20 = vmax.f32 %v1679_v23, %v10805_v57 }
 0x3b5   : > { %v1681_v57 = vmax.f32 %v10541_v39, %v10825_v61 }
 0x3b6   : > { %v11327_v8 = vpop.permute.xlu1 %1574  ;;  %v11329_v16 = vpop.permute.xlu0 %1572  ;;  %v11361_v46 = vmax.f32 %v1930_v9, %v10759_v30  ;;  %v11375_v24 = vmax.f32 %v1935_v20, %v10815_v54  ;;  %v1676_v20 = vmax.f32 %v10531_v35, %v10771_v40  ;;  %v1683_v40 = vmax.f32 %v10551_v42, %v10853_v63  ;;  %v17634_v63 = vld [vmem:[#allocation23_spill] sm:$0xff]  ;;  %v17637_v42 = vld [vmem:[#allocation77_spill] sm:$0xff]  ;;  %v17639_v35 = vld [vmem:[#allocation18_spill] sm:$0xff] }
 0x3b7   : > { %v1937_v54 = vmax.f32 %v1681_v57, %v10833_v41 }
 0x3b8   : > { %2510 = vrot.lane.b32.xlu1 %v11325_v1, %s10110_s19  ;;  %1860 = vrot.lane.b32.xlu0 %v11035_v11, %s17243_s29  ;;  %17624 = vst [vmem:[#allocation161_spill] sm:$0xff] %v11361_v46  ;;  %17625 = vst [vmem:[#allocation162_spill] sm:$0xff] %v11375_v24  ;;  %v1932_v39 = vmax.f32 %v1676_v20, %v10779_v47  ;;  %v17630_v47 = vld [vmem:[#allocation72_spill] sm:$0xff] }
 0x3ba   : > { %v11339_v58 = vpop.permute.xlu1 %1830  ;;  %v11341_v27 = vpop.permute.xlu0 %1828  ;;  %v11411_v41 = vmax.f32 %v1932_v39, %v10789_v51 }
 0x3bc   : > { %2894 = vrot.lane.b32.xlu1 %v11325_v1, %s10112_s30  ;;  %2116 = vrot.lane.b32.xlu0 %v11035_v11, %s10109_s26  ;;  %17628 = vst [vmem:[#allocation165_spill] sm:$0xff] %v11411_v41 }
 0x3be   : > { %v11352_v31 = vpop.permute.xlu1 %2086  ;;  %v11354_v38 = vpop.permute.xlu0 %2084 }
 0x3c0   : > { %2514 = vrot.lane.b32.xlu1 %v11350_v29, %s10110_s19  ;;  %3278 = vrot.lane.b32.xlu0 %v11325_v1, %s17245_s10  ;;  %v11399_v1 = vmax.f32 %v1937_v54, %v10843_v43  ;;  %v1939_v54 = vmax.f32 %v1683_v40, %v10861_v45  ;;  %v17633_v45 = vld [vmem:[#allocation75_spill] sm:$0xff] }
 0x3c1   : > { %v1685_v40 = vmax.f32 %v17634_v63, %v17633_v45  ;;  %v17644_v63 = vld [vmem:[#allocation60_spill] sm:$0xff] }
 0x3c2   : > { %v11365_v25 = vpop.permute.xlu1 %1578  ;;  %v11367_v55 = vpop.permute.xlu0 %1576  ;;  %17626 = vst [vmem:[#allocation163_spill] sm:$0xff] %v11399_v1  ;;  %v11425_v20 = vmax.f32 %v1939_v54, %v17630_v47  ;;  %v17638_v47 = vld [vmem:[#allocation59_spill] sm:$0xff] }
 0x3c3   : > { %v1941_v54 = vmax.f32 %v1685_v40, %v17637_v42  ;;  %v1678_v34 = vmax.f32 %v17639_v35, %v17638_v47  ;;  %v17645_v42 = vld [vmem:[#allocation62_spill] sm:$0xff]  ;;  %v17648_v47 = vld [vmem:[#allocation25_spill] sm:$0xff] }
 0x3c4   : > { %2898 = vrot.lane.b32.xlu1 %v11350_v29, %s10112_s30  ;;  %2508 = vrot.lane.b32.xlu0 %v11361_v46, %s10110_s19  ;;  %17631 = vst [vmem:[#allocation72_spill] sm:$0xff] %v11425_v20 }
 0x3c5   : > { %v11449_v11 = vmax.f32 %v1941_v54, %v17640_v32 }
 0x3c6   : > { %v11377_v9 = vpop.permute.xlu1 %1834  ;;  %v11379_v30 = vpop.permute.xlu0 %1832 }
 0x3c7   : > { %17641 = vst [vmem:[#allocation77_spill] sm:$0xff] %v11449_v11 }
 0x3c8   : > { %2518 = vrot.lane.b32.xlu1 %v11375_v24, %s10110_s19  ;;  %2892 = vrot.lane.b32.xlu0 %v11361_v46, %s10112_s30 }
 0x3ca   : > { %v11387_v59 = vpop.permute.xlu1 %2090  ;;  %v11389_v23 = vpop.permute.xlu0 %2088 }
 0x3cc   : > { %2902 = vrot.lane.b32.xlu1 %v11375_v24, %s10112_s30  ;;  %3276 = vrot.lane.b32.xlu0 %v11361_v46, %s17245_s10 }
 0x3ce   : > { %v11401_v36 = vpop.permute.xlu1 %1582  ;;  %v11403_v61 = vpop.permute.xlu0 %1580 }
 0x3cf   : > { %17627 = vst [vmem:[#allocation164_spill] sm:$0xff] %v11403_v61 }
 0x3d0   : > { %2522 = vrot.lane.b32.xlu1 %v11399_v1, %s10110_s19  ;;  %3282 = vrot.lane.b32.xlu0 %v11350_v29, %s17245_s10 }
 0x3d2   : > { %v11415_v43 = vpop.permute.xlu1 %1838  ;;  %v11417_v57 = vpop.permute.xlu0 %1836 }
 0x3d3   : > { %17629 = vst [vmem:[#allocation166_spill] sm:$0xff] %v11417_v57 }
 0x3d4   : > { %2906 = vrot.lane.b32.xlu1 %v11399_v1, %s10112_s30  ;;  %2512 = vrot.lane.b32.xlu0 %v11411_v41, %s10110_s19 }
 0x3d6   : > { %v11427_v39 = vpop.permute.xlu1 %2094  ;;  %v11429_v51 = vpop.permute.xlu0 %2092 }
 0x3d7   : > { %17632 = vst [vmem:[#allocation167_spill] sm:$0xff] %v11429_v51 }
 0x3d8   : > { %2526 = vrot.lane.b32.xlu1 %v11425_v20, %s10110_s19  ;;  %2896 = vrot.lane.b32.xlu0 %v11411_v41, %s10112_s30 }
 0x3da   : > { %v11437_v29 = vpop.permute.xlu1 %1586  ;;  %v11439_v46 = vpop.permute.xlu0 %1584 }
 0x3db   : > { %17635 = vst [vmem:[#allocation75_spill] sm:$0xff] %v11437_v29  ;;  %17636 = vst [vmem:[#allocation168_spill] sm:$0xff] %v11439_v46  ;;  %v1934_v46 = vmax.f32 %v1678_v34, %v17644_v63  ;;  %v17652_v34 = vld [vmem:[#allocation88_spill] sm:$0xff] }
 0x3dc   : > { %2910 = vrot.lane.b32.xlu1 %v11425_v20, %s10112_s30  ;;  %3280 = vrot.lane.b32.xlu0 %v11411_v41, %s17245_s10  ;;  %v17647_v41 = vld [vmem:[#allocation83_spill] sm:$0xff] }
 0x3dd   : > { %v11461_v40 = vmax.f32 %v1934_v46, %v17645_v42  ;;  %v1687_v35 = vmax.f32 %v17648_v47, %v17647_v41  ;;  %v17657_v41 = vld [vmem:[#allocation27_spill] sm:$0xff] }
 0x3de   : > { %v11451_v51 = vpop.permute.xlu1 %1842  ;;  %v11453_v45 = vpop.permute.xlu0 %1840 }
 0x3df   : > { %17642 = vst [vmem:[#allocation59_spill] sm:$0xff] %v11451_v51  ;;  %17643 = vst [vmem:[#allocation80_spill] sm:$0xff] %v11453_v45  ;;  %v17651_v51 = vld [vmem:[#allocation85_spill] sm:$0xff] }
 0x3e0   : > { %2530 = vrot.lane.b32.xlu1 %v11449_v11, %s10110_s19  ;;  %3286 = vrot.lane.b32.xlu0 %v11375_v24, %s17245_s10  ;;  %17646 = vst [vmem:[#allocation60_spill] sm:$0xff] %v11461_v40  ;;  %v1943_v45 = vmax.f32 %v1687_v35, %v17651_v51  ;;  %v17656_v35 = vld [vmem:[#allocation91_spill] sm:$0xff] }
 0x3e1   : > { %v1689_v51 = vmax.f32 %v17657_v41, %v17656_v35  ;;  %v17667_v41 = vld [vmem:[#allocation65_spill] sm:$0xff] }
 0x3e2   : > { %v11465_v32 = vpop.permute.xlu1 %2098  ;;  %v11467_v54 = vpop.permute.xlu0 %2096  ;;  %v11475_v63 = vmax.f32 %v1943_v45, %v17652_v34  ;;  %v17661_v34 = vld [vmem:[#allocation64_spill] sm:$0xff] }
 0x3e3   : > { %17649 = vst [vmem:[#allocation62_spill] sm:$0xff] %v11465_v32  ;;  %17650 = vst [vmem:[#allocation83_spill] sm:$0xff] %v11467_v54  ;;  %v17660_v54 = vld [vmem:[#allocation93_spill] sm:$0xff]  ;;  %v17663_v32 = vld [vmem:[#allocation96_spill] sm:$0xff] }
 0x3e4   : > { %2914 = vrot.lane.b32.xlu1 %v11449_v11, %s10112_s30  ;;  %2516 = vrot.lane.b32.xlu0 %v11461_v40, %s10110_s19  ;;  %17653 = vst [vmem:[#allocation85_spill] sm:$0xff] %v11475_v63  ;;  %v1945_v45 = vmax.f32 %v1689_v51, %v17660_v54  ;;  %v17668_v54 = vld [vmem:[#allocation67_spill] sm:$0xff] }
 0x3e6   : > { %v11477_v46 = vpop.permute.xlu1 %1590  ;;  %v11479_v42 = vpop.permute.xlu0 %1588  ;;  %v11499_v29 = vmax.f32 %v1945_v45, %v17663_v32 }
 0x3e7   : > { %17654 = vst [vmem:[#allocation88_spill] sm:$0xff] %v11477_v46  ;;  %17655 = vst [vmem:[#allocation169_spill] sm:$0xff] %v11479_v42  ;;  %v17662_v46 = vld [vmem:[#allocation20_spill] sm:$0xff] }
 0x3e8   : > { %2534 = vrot.lane.b32.xlu1 %v11475_v63, %s10110_s19  ;;  %2900 = vrot.lane.b32.xlu0 %v11461_v40, %s10112_s30  ;;  %v1680_v42 = vmax.f32 %v17662_v46, %v17661_v34  ;;  %17664 = vst [vmem:[#allocation93_spill] sm:$0xff] %v11499_v29  ;;  %v17671_v34 = vld [vmem:[#allocation29_spill] sm:$0xff] }
 0x3ea   : > { %v11487_v24 = vpop.permute.xlu1 %1846  ;;  %v11489_v47 = vpop.permute.xlu0 %1844 }
 0x3eb   : > { %17658 = vst [vmem:[#allocation91_spill] sm:$0xff] %v11487_v24  ;;  %17659 = vst [vmem:[#allocation170_spill] sm:$0xff] %v11489_v47  ;;  %v1936_v24 = vmax.f32 %v1680_v42, %v17667_v41  ;;  %v17675_v42 = vld [vmem:[#allocation104_spill] sm:$0xff]  ;;  %v17688_v47 = vld [vmem:[#allocation102_spill] sm:$0xff] }
 0x3ec   : > { %2918 = vrot.lane.b32.xlu1 %v11475_v63, %s10112_s30  ;;  %3284 = vrot.lane.b32.xlu0 %v11461_v40, %s17245_s10  ;;  %v17670_v40 = vld [vmem:[#allocation99_spill] sm:$0xff] }
 0x3ed   : > { %v11511_v51 = vmax.f32 %v1936_v24, %v17668_v54  ;;  %v1691_v46 = vmax.f32 %v17671_v34, %v17670_v40  ;;  %v17684_v34 = vld [vmem:[#allocation30_spill] sm:$0xff] }
 0x3ee   : > { %v11501_v57 = vpop.permute.xlu1 %2102  ;;  %v11503_v35 = vpop.permute.xlu0 %2100 }
 0x3ef   : > { %17665 = vst [vmem:[#allocation64_spill] sm:$0xff] %v11501_v57  ;;  %17666 = vst [vmem:[#allocation96_spill] sm:$0xff] %v11503_v35  ;;  %v17674_v57 = vld [vmem:[#allocation101_spill] sm:$0xff] }
 0x3f0   : > { %2538 = vrot.lane.b32.xlu1 %v11499_v29, %s10110_s19  ;;  %3290 = vrot.lane.b32.xlu0 %v11399_v1, %s17245_s10  ;;  %17669 = vst [vmem:[#allocation65_spill] sm:$0xff] %v11511_v51  ;;  %v1947_v35 = vmax.f32 %v1691_v46, %v17674_v57  ;;  %v17681_v46 = vld [vmem:[#allocation69_spill] sm:$0xff]  ;;  %v17683_v1 = vld [vmem:[#allocation100_spill] sm:$0xff] }
 0x3f2   : > { %v11515_v32 = vpop.permute.xlu1 %1594  ;;  %v11517_v45 = vpop.permute.xlu0 %1592  ;;  %v11525_v41 = vmax.f32 %v1947_v35, %v17675_v42  ;;  %v17682_v35 = vld [vmem:[#allocation22_spill] sm:$0xff] }
 0x3f3   : > { %17672 = vst [vmem:[#allocation67_spill] sm:$0xff] %v11515_v32  ;;  %17673 = vst [vmem:[#allocation99_spill] sm:$0xff] %v11517_v45  ;;  %v1682_v42 = vmax.f32 %v17682_v35, %v17681_v46  ;;  %v17687_v45 = vld [vmem:[#allocation70_spill] sm:$0xff]  ;;  %v17691_v46 = vld [vmem:[#allocation105_spill] sm:$0xff] }
 0x3f4   : > { %2922 = vrot.lane.b32.xlu1 %v11499_v29, %s10112_s30  ;;  %2520 = vrot.lane.b32.xlu0 %v11511_v51, %s10110_s19  ;;  %17676 = vst [vmem:[#allocation101_spill] sm:$0xff] %v11525_v41 }
 0x3f6   : > { %v11527_v24 = vpop.permute.xlu1 %1850  ;;  %v11529_v54 = vpop.permute.xlu0 %1848 }
 0x3f7   : > { %17677 = vst [vmem:[#allocation104_spill] sm:$0xff] %v11527_v24  ;;  %17678 = vst [vmem:[#allocation171_spill] sm:$0xff] %v11529_v54  ;;  %v1690_v24 = vmax.f32 %v17684_v34, %v17683_v1  ;;  %v17693_v1 = vld [vmem:[#allocation107_spill] sm:$0xff] }
 0x3f8   : > { %2542 = vrot.lane.b32.xlu1 %v11525_v41, %s10110_s19  ;;  %2904 = vrot.lane.b32.xlu0 %v11511_v51, %s10112_s30  ;;  %v17694_v34 = vld [vmem:[#allocation31_spill] sm:$0xff] }
 0x3fa   : > { %v11535_v57 = vpop.permute.xlu1 %2106  ;;  %v11537_v40 = vpop.permute.xlu0 %2104 }
 0x3fb   : > { %17679 = vst [vmem:[#allocation172_spill] sm:$0xff] %v11535_v57  ;;  %17680 = vst [vmem:[#allocation173_spill] sm:$0xff] %v11537_v40  ;;  %v1938_v57 = vmax.f32 %v1682_v42, %v17687_v45  ;;  %v1946_v40 = vmax.f32 %v1690_v24, %v17688_v47 }
 0x3fc   : > { %2926 = vrot.lane.b32.xlu1 %v11525_v41, %s10112_s30  ;;  %3288 = vrot.lane.b32.xlu0 %v11511_v51, %s17245_s10  ;;  %v17689_v51 = vld [vmem:[#allocation73_spill] sm:$0xff] }
 0x3fd   : > { %v11558_v61 = vmax.f32 %v1938_v57, %v17689_v51  ;;  %v11561_v35 = vmax.f32 %v1946_v40, %v17691_v46  ;;  %v17702_v40 = vld [vmem:[#allocation24_spill] sm:$0xff] }
 0x3fe   : > { %v11547_v32 = vpop.permute.xlu1 %1598  ;;  %v11549_v54 = vpop.permute.xlu0 %1596  ;;  %v17703_v46 = vld [vmem:[#allocation108_spill] sm:$0xff] }
 0x3ff   : > { %17685 = vst [vmem:[#allocation69_spill] sm:$0xff] %v11547_v32  ;;  %17686 = vst [vmem:[#allocation100_spill] sm:$0xff] %v11549_v54  ;;  %v1693_v32 = vmax.f32 %v17694_v34, %v17693_v1  ;;  %v17704_v1 = vld [vmem:[#allocation32_spill] sm:$0xff]  ;;  %v17707_v34 = vld [vmem:[#allocation78_spill] sm:$0xff] }
 0x400   : > { %3310 = vrot.lane.b32.xlu1 %v11525_v41, %s17245_s10  ;;  %3294 = vrot.lane.b32.xlu0 %v11425_v20, %s17245_s10  ;;  %17690 = vst [vmem:[#allocation70_spill] sm:$0xff] %v11558_v61  ;;  %17692 = vst [vmem:[#allocation102_spill] sm:$0xff] %v11561_v35 }
 0x401   : > { %v1949_v47 = vmax.f32 %v1693_v32, %v11001_v7 }
 0x402   : > { %v11565_v54 = vpop.permute.xlu1 %1854  ;;  %v11567_v45 = vpop.permute.xlu0 %1852 }
 0x403   : > { %17695 = vst [vmem:[#allocation73_spill] sm:$0xff] %v11565_v54  ;;  %v11575_v51 = vmax.f32 %v1949_v47, %v11009_v5  ;;  %v17701_v5 = vld [vmem:[#allocation76_spill] sm:$0xff]  ;;  %v1692_v47 = vmax.f32 %v17704_v1, %v17703_v46  ;;  %v17713_v46 = vld [vmem:[#allocation111_spill] sm:$0xff]  ;;  %v17714_v1 = vld [vmem:[#allocation33_spill] sm:$0xff] }
 0x404   : > { %3308 = vrot.lane.b32.xlu1 %v11561_v35, %s17245_s10  ;;  %2524 = vrot.lane.b32.xlu0 %v11558_v61, %s10110_s19  ;;  %v1684_v42 = vmax.f32 %v17702_v40, %v17701_v5  ;;  %v17711_v5 = vld [vmem:[#allocation110_spill] sm:$0xff] }
 0x405   : > { %17696 = vst [vmem:[#allocation105_spill] sm:$0xff] %v11575_v51 }
 0x406   : > { %v11577_v24 = vpop.permute.xlu1 %2110  ;;  %v11579_v57 = vpop.permute.xlu0 %2108 }
 0x407   : > { %17697 = vst [vmem:[#allocation107_spill] sm:$0xff] %v11577_v24  ;;  %17698 = vst [vmem:[#allocation174_spill] sm:$0xff] %v11579_v57  ;;  %v17708_v24 = vld [vmem:[#allocation109_spill] sm:$0xff]  ;;  %v17730_v57 = vld [vmem:[#allocation114_spill] sm:$0xff] }
 0x408   : > { %2546 = vrot.lane.b32.xlu1 %v11575_v51, %s10110_s19  ;;  %2908 = vrot.lane.b32.xlu0 %v11558_v61, %s10112_s30  ;;  %v1948_v54 = vmax.f32 %v1692_v47, %v17708_v24  ;;  %v17717_v24 = vld [vmem:[#allocation113_spill] sm:$0xff] }
 0x40a   : > { %v11585_v7 = vpop.permute.xlu1 %1602  ;;  %v11587_v32 = vpop.permute.xlu0 %1600  ;;  %v11611_v40 = vmax.f32 %v1948_v54, %v17711_v5 }
 0x40b   : > { %17699 = vst [vmem:[#allocation175_spill] sm:$0xff] %v11585_v7  ;;  %17700 = vst [vmem:[#allocation176_spill] sm:$0xff] %v11587_v32  ;;  %v1940_v7 = vmax.f32 %v1684_v42, %v17707_v34 }
 0x40c   : > { %2930 = vrot.lane.b32.xlu1 %v11575_v51, %s10112_s30  ;;  %3292 = vrot.lane.b32.xlu0 %v11558_v61, %s17245_s10  ;;  %v17709_v61 = vld [vmem:[#allocation81_spill] sm:$0xff]  ;;  %17712 = vst [vmem:[#allocation109_spill] sm:$0xff] %v11611_v40 }
 0x40d   : > { %v11608_v32 = vmax.f32 %v1940_v7, %v17709_v61  ;;  %v17718_v61 = vld [vmem:[#allocation117_spill] sm:$0xff] }
 0x40e   : > { %v11597_v41 = vpop.permute.xlu1 %1858  ;;  %v11599_v20 = vpop.permute.xlu0 %1856 }
 0x40f   : > { %17705 = vst [vmem:[#allocation76_spill] sm:$0xff] %v11597_v41  ;;  %17706 = vst [vmem:[#allocation108_spill] sm:$0xff] %v11599_v20  ;;  %v1695_v41 = vmax.f32 %v17714_v1, %v17713_v46  ;;  %v17723_v46 = vld [vmem:[#allocation84_spill] sm:$0xff] }
 0x410   : > { %3314 = vrot.lane.b32.xlu1 %v11575_v51, %s17245_s10  ;;  %3298 = vrot.lane.b32.xlu0 %v11449_v11, %s17245_s10  ;;  %17710 = vst [vmem:[#allocation78_spill] sm:$0xff] %v11608_v32  ;;  %v17726_v51 = vld [vmem:[#allocation34_spill] sm:$0xff] }
 0x411   : > { %v1951_v42 = vmax.f32 %v1695_v41, %v17717_v24  ;;  %v17724_v24 = vld [vmem:[#allocation26_spill] sm:$0xff] }
 0x412   : > { %v11615_v20 = vpop.permute.xlu1 %2114  ;;  %v11617_v34 = vpop.permute.xlu0 %2112 }
 0x413   : > { %17715 = vst [vmem:[#allocation81_spill] sm:$0xff] %v11615_v20  ;;  %17716 = vst [vmem:[#allocation110_spill] sm:$0xff] %v11617_v34  ;;  %v11625_v7 = vmax.f32 %v1951_v42, %v17718_v61  ;;  %v1686_v42 = vmax.f32 %v17724_v24, %v17723_v46  ;;  %v17725_v61 = vld [vmem:[#allocation112_spill] sm:$0xff]  ;;  %v17733_v46 = vld [vmem:[#allocation118_spill] sm:$0xff] }
 0x414   : > { %3312 = vrot.lane.b32.xlu1 %v11611_v40, %s17245_s10  ;;  %2528 = vrot.lane.b32.xlu0 %v11608_v32, %s10110_s19  ;;  %v1694_v11 = vmax.f32 %v17726_v51, %v17725_v61  ;;  %v17735_v61 = vld [vmem:[#allocation119_spill] sm:$0xff] }
 0x415   : > { %17719 = vst [vmem:[#allocation111_spill] sm:$0xff] %v11625_v7  ;;  %v17736_v51 = vld [vmem:[#allocation35_spill] sm:$0xff] }
 0x416   : > { %v11627_v54 = vpop.permute.xlu1 %2506  ;;  %v11629_v47 = vpop.permute.xlu0 %3274 }
 0x417   : > { %17720 = vst [vmem:[#allocation113_spill] sm:$0xff] %v11629_v47  ;;  %v17729_v47 = vld [vmem:[#allocation86_spill] sm:$0xff] }
 0x418   : > { %2550 = vrot.lane.b32.xlu1 %v11625_v7, %s10110_s19  ;;  %2912 = vrot.lane.b32.xlu0 %v11608_v32, %s10112_s30  ;;  %v1942_v34 = vmax.f32 %v1686_v42, %v17729_v47 }
 0x41a   : > { %v11635_v41 = vpop.permute.xlu1 %2890  ;;  %v11637_v5 = vpop.permute.xlu0 %2504 }
 0x41b   : > { %17721 = vst [vmem:[#allocation117_spill] sm:$0xff] %v11635_v41  ;;  %17722 = vst [vmem:[#allocation177_spill] sm:$0xff] %v11637_v5  ;;  %v1950_v5 = vmax.f32 %v1694_v11, %v17730_v57 }
 0x41c   : > { %2934 = vrot.lane.b32.xlu1 %v11625_v7, %s10112_s30  ;;  %3296 = vrot.lane.b32.xlu0 %v11608_v32, %s17245_s10  ;;  %v17731_v32 = vld [vmem:[#allocation89_spill] sm:$0xff] }
 0x41d   : > { %v11658_v41 = vmax.f32 %v1942_v34, %v17731_v32  ;;  %v11661_v24 = vmax.f32 %v1950_v5, %v17733_v46  ;;  %v17743_v5 = vld [vmem:[#allocation28_spill] sm:$0xff] }
 0x41e   : > { %v11647_v1 = vpop.permute.xlu0 %2888  ;;  %v11649_v20 = vpop.permute.xlu1 %1606  ;;  %v17744_v46 = vld [vmem:[#allocation120_spill] sm:$0xff] }
 0x41f   : > { %17727 = vst [vmem:[#allocation84_spill] sm:$0xff] %v11647_v1  ;;  %17728 = vst [vmem:[#allocation112_spill] sm:$0xff] %v11649_v20  ;;  %v1697_v1 = vmax.f32 %v17736_v51, %v17735_v61  ;;  %v17745_v61 = vld [vmem:[#allocation36_spill] sm:$0xff]  ;;  %v17748_v51 = vld [vmem:[#allocation94_spill] sm:$0xff] }
 0x420   : > { %3318 = vrot.lane.b32.xlu1 %v11625_v7, %s17245_s10  ;;  %3302 = vrot.lane.b32.xlu0 %v11475_v63, %s17245_s10  ;;  %17732 = vst [vmem:[#allocation86_spill] sm:$0xff] %v11658_v41  ;;  %17734 = vst [vmem:[#allocation114_spill] sm:$0xff] %v11661_v24 }
 0x421   : > { %v1953_v11 = vmax.f32 %v1697_v1, %v11053_v50 }
 0x422   : > { %v11665_v20 = vpop.permute.xlu0 %3272  ;;  %v11667_v47 = vpop.permute.xlu1 %1862 }
 0x423   : > { %17737 = vst [vmem:[#allocation89_spill] sm:$0xff] %v11665_v20  ;;  %17738 = vst [vmem:[#allocation118_spill] sm:$0xff] %v11667_v47  ;;  %v11675_v57 = vmax.f32 %v1953_v11, %v11061_v12  ;;  %v17742_v12 = vld [vmem:[#allocation92_spill] sm:$0xff]  ;;  %v1696_v11 = vmax.f32 %v17745_v61, %v17744_v46  ;;  %v17749_v47 = vld [vmem:[#allocation121_spill] sm:$0xff] }
 0x424   : > { %3316 = vrot.lane.b32.xlu1 %v11661_v24, %s17245_s10  ;;  %2532 = vrot.lane.b32.xlu0 %v11658_v41, %s10110_s19  ;;  %v1688_v42 = vmax.f32 %v17743_v5, %v17742_v12  ;;  %v17752_v12 = vld [vmem:[#allocation122_spill] sm:$0xff]  ;;  %v17754_v46 = vld [vmem:[#allocation123_spill] sm:$0xff]  ;;  %v17755_v61 = vld [vmem:[#allocation37_spill] sm:$0xff] }
 0x425   : > { %17739 = vst [vmem:[#allocation119_spill] sm:$0xff] %v11675_v57  ;;  %v1952_v20 = vmax.f32 %v1696_v11, %v17749_v47 }
 0x426   : > { %v11677_v32 = vpop.permute.xlu1 %2118  ;;  %v11679_v34 = vpop.permute.xlu0 %1604 }
 0x427   : > { %17740 = vst [vmem:[#allocation178_spill] sm:$0xff] %v11677_v32  ;;  %v1944_v32 = vmax.f32 %v1688_v42, %v17748_v51  ;;  %v11711_v5 = vmax.f32 %v1952_v20, %v17752_v12  ;;  %v17761_v42 = vld [vmem:[#allocation38_spill] sm:$0xff] }
 0x428   : > { %2554 = vrot.lane.b32.xlu1 %v11675_v57, %s10110_s19  ;;  %2916 = vrot.lane.b32.xlu0 %v11658_v41, %s10112_s30 }
 0x429   : > { %17753 = vst [vmem:[#allocation121_spill] sm:$0xff] %v11711_v5 }
 0x42a   : > { %v11685_v50 = vpop.permute.xlu1 %2510  ;;  %v11687_v1 = vpop.permute.xlu0 %1860 }
 0x42b   : > { %17741 = vst [vmem:[#allocation179_spill] sm:$0xff] %v11685_v50 }
 0x42c   : > { %2938 = vrot.lane.b32.xlu1 %v11675_v57, %s10112_s30  ;;  %3300 = vrot.lane.b32.xlu0 %v11658_v41, %s17245_s10  ;;  %v17750_v41 = vld [vmem:[#allocation97_spill] sm:$0xff] }
 0x42d   : > { %v11708_v50 = vmax.f32 %v1944_v32, %v17750_v41 }
 0x42e   : > { %v11697_v7 = vpop.permute.xlu1 %2894  ;;  %v11699_v63 = vpop.permute.xlu0 %2116 }
 0x42f   : > { %17746 = vst [vmem:[#allocation92_spill] sm:$0xff] %v11697_v7  ;;  %17747 = vst [vmem:[#allocation120_spill] sm:$0xff] %v11699_v63  ;;  %v1699_v7 = vmax.f32 %v17755_v61, %v17754_v46 }
 0x430   : > { %3322 = vrot.lane.b32.xlu1 %v11675_v57, %s17245_s10  ;;  %3306 = vrot.lane.b32.xlu0 %v11499_v29, %s17245_s10  ;;  %17751 = vst [vmem:[#allocation94_spill] sm:$0xff] %v11708_v50  ;;  %v17763_v29 = vld [vmem:[#allocation126_spill] sm:$0xff] }
 0x431   : > { %v1955_v47 = vmax.f32 %v1699_v7, %v11077_v10 }
 0x432   : > { %v11715_v63 = vpop.permute.xlu1 %2514  ;;  %v11717_v51 = vpop.permute.xlu0 %3278 }
 0x433   : > { %17756 = vst [vmem:[#allocation97_spill] sm:$0xff] %v11717_v51  ;;  %v11725_v41 = vmax.f32 %v1955_v47, %v11085_v13  ;;  %v17760_v13 = vld [vmem:[#allocation124_spill] sm:$0xff]  ;;  %v17762_v47 = vld [vmem:[#allocation125_spill] sm:$0xff]  ;;  %v17765_v51 = vld [vmem:[#allocation127_spill] sm:$0xff] }
 0x434   : > { %3320 = vrot.lane.b32.xlu1 %v11711_v5, %s17245_s10  ;;  %2536 = vrot.lane.b32.xlu0 %v11708_v50, %s10110_s19  ;;  %v1698_v11 = vmax.f32 %v17761_v42, %v17760_v13 }
 0x435   : > { %17757 = vst [vmem:[#allocation122_spill] sm:$0xff] %v11725_v41 }
 0x436   : > { %v11727_v20 = vpop.permute.xlu1 %2898  ;;  %v11729_v32 = vpop.permute.xlu0 %2508  ;;  %v1954_v57 = vmax.f32 %v1698_v11, %v17762_v47 }
 0x437   : > { %17758 = vst [vmem:[#allocation123_spill] sm:$0xff] %v11727_v20 }
 0x438   : > { %2558 = vrot.lane.b32.xlu1 %v11725_v41, %s10110_s19  ;;  %2920 = vrot.lane.b32.xlu0 %v11708_v50, %s10112_s30  ;;  %v11755_v61 = vmax.f32 %v1954_v57, %v17763_v29 }
 0x43a   : > { %v11735_v10 = vpop.permute.xlu1 %2518  ;;  %v11737_v7 = vpop.permute.xlu0 %2892  ;;  %17764 = vst [vmem:[#allocation124_spill] sm:$0xff] %v11755_v61 }
 0x43b   : > { %17759 = vst [vmem:[#allocation180_spill] sm:$0xff] %v11735_v10 }
 0x43c   : > { %2942 = vrot.lane.b32.xlu1 %v11725_v41, %s10112_s30  ;;  %3304 = vrot.lane.b32.xlu0 %v11708_v50, %s17245_s10  ;;  %v17766_v50 = vld [vmem:[#allocation39_spill] sm:$0xff] }
 0x43d   : > { %v1701_v10 = vmax.f32 %v17766_v50, %v17765_v51  ;;  %v17769_v51 = vld [vmem:[#allocation41_spill] sm:$0xff] }
 0x43e   : > { %v11745_v12 = vpop.permute.xlu1 %2902  ;;  %v11747_v46 = vpop.permute.xlu0 %3276 }
 0x43f   : > { %v1957_v42 = vmax.f32 %v1701_v10, %v11101_v52  ;;  %v17768_v52 = vld [vmem:[#allocation131_spill] sm:$0xff] }
 0x440   : > { %3326 = vrot.lane.b32.xlu1 %v11725_v41, %s17245_s10  ;;  %2540 = vrot.lane.b32.xlu0 %v11561_v35, %s10110_s19  ;;  %v1703_v10 = vmax.f32 %v17769_v51, %v17768_v52  ;;  %v17774_v52 = vld [vmem:[#allocation43_spill] sm:$0xff] }
 0x441   : > { %v11769_v11 = vmax.f32 %v1957_v42, %v11109_v21 }
 0x442   : > { %v11759_v20 = vpop.permute.xlu1 %2522  ;;  %v11761_v13 = vpop.permute.xlu0 %3282  ;;  %v1959_v21 = vmax.f32 %v1703_v10, %v11125_v18  ;;  %v17773_v18 = vld [vmem:[#allocation135_spill] sm:$0xff] }
 0x443   : > { %17767 = vst [vmem:[#allocation125_spill] sm:$0xff] %v11769_v11  ;;  %v1705_v10 = vmax.f32 %v17774_v52, %v17773_v18  ;;  %v17779_v18 = vld [vmem:[#allocation45_spill] sm:$0xff] }
 0x444   : > { %3324 = vrot.lane.b32.xlu1 %v11755_v61, %s17245_s10  ;;  %2924 = vrot.lane.b32.xlu0 %v11561_v35, %s10112_s30  ;;  %v11791_v42 = vmax.f32 %v1959_v21, %v11133_v33 }
 0x445   : > { %v1961_v33 = vmax.f32 %v1705_v10, %v11149_v28  ;;  %v17778_v28 = vld [vmem:[#allocation139_spill] sm:$0xff] }
 0x446   : > { %v11771_v29 = vpop.permute.xlu1 %2906  ;;  %v11773_v57 = vpop.permute.xlu0 %2512  ;;  %17771 = vst [vmem:[#allocation127_spill] sm:$0xff] %v11791_v42  ;;  %v1707_v10 = vmax.f32 %v17779_v18, %v17778_v28  ;;  %v17785_v28 = vld [vmem:[#allocation40_spill] sm:$0xff]  ;;  %v17786_v18 = vld [vmem:[#allocation143_spill] sm:$0xff] }
 0x447   : > { %v11813_v21 = vmax.f32 %v1961_v33, %v11157_v49 }
 0x448   : > { %2562 = vrot.lane.b32.xlu1 %v11769_v11, %s10110_s19  ;;  %2544 = vrot.lane.b32.xlu0 %v11611_v40, %s10110_s19  ;;  %v1963_v49 = vmax.f32 %v1707_v10, %v11173_v53  ;;  %v17784_v53 = vld [vmem:[#allocation128_spill] sm:$0xff] }
 0x449   : > { %17776 = vst [vmem:[#allocation181_spill] sm:$0xff] %v11813_v21  ;;  %v1700_v10 = vmax.f32 %v17785_v28, %v17784_v53 }
 0x44a   : > { %v11781_v47 = vpop.permute.xlu1 %2526  ;;  %v11783_v41 = vpop.permute.xlu0 %2896  ;;  %v11835_v33 = vmax.f32 %v1963_v49, %v11181_v60  ;;  %v17789_v49 = vld [vmem:[#allocation129_spill] sm:$0xff] }
 0x44b   : > { %17770 = vst [vmem:[#allocation126_spill] sm:$0xff] %v11781_v47  ;;  %v17790_v47 = vld [vmem:[#allocation130_spill] sm:$0xff] }
 0x44c   : > { %2946 = vrot.lane.b32.xlu1 %v11769_v11, %s10112_s30  ;;  %2928 = vrot.lane.b32.xlu0 %v11611_v40, %s10112_s30  ;;  %17781 = vst [vmem:[#allocation183_spill] sm:$0xff] %v11835_v33 }
 0x44e   : > { %v11793_v35 = vpop.permute.xlu1 %2910  ;;  %v11795_v50 = vpop.permute.xlu0 %3280 }
 0x44f   : > { %17772 = vst [vmem:[#allocation131_spill] sm:$0xff] %v11793_v35 }
 0x450   : > { %2566 = vrot.lane.b32.xlu1 %v11791_v42, %s10110_s19  ;;  %2548 = vrot.lane.b32.xlu0 %v11661_v24, %s10110_s19 }
 0x452   : > { %v11803_v51 = vpop.permute.xlu1 %2530  ;;  %v11805_v11 = vpop.permute.xlu0 %3286 }
 0x453   : > { %17775 = vst [vmem:[#allocation135_spill] sm:$0xff] %v11803_v51 }
 0x454   : > { %2950 = vrot.lane.b32.xlu1 %v11791_v42, %s10112_s30  ;;  %2932 = vrot.lane.b32.xlu0 %v11661_v24, %s10112_s30 }
 0x456   : > { %v11815_v40 = vpop.permute.xlu1 %2914  ;;  %v11817_v35 = vpop.permute.xlu0 %2516 }
 0x457   : > { %17777 = vst [vmem:[#allocation182_spill] sm:$0xff] %v11815_v40 }
 0x458   : > { %2570 = vrot.lane.b32.xlu1 %v11813_v21, %s10110_s19  ;;  %2552 = vrot.lane.b32.xlu0 %v11711_v5, %s10110_s19 }
 0x45a   : > { %v11825_v52 = vpop.permute.xlu1 %2534  ;;  %v11827_v42 = vpop.permute.xlu0 %2900 }
 0x45b   : > { %17780 = vst [vmem:[#allocation139_spill] sm:$0xff] %v11825_v52 }
 0x45c   : > { %2954 = vrot.lane.b32.xlu1 %v11813_v21, %s10112_s30  ;;  %2936 = vrot.lane.b32.xlu0 %v11711_v5, %s10112_s30  ;;  %v17787_v21 = vld [vmem:[#allocation47_spill] sm:$0xff] }
 0x45d   : > { %v1709_v52 = vmax.f32 %v17787_v21, %v17786_v18 }
 0x45e   : > { %v11837_v24 = vpop.permute.xlu1 %2918  ;;  %v11839_v40 = vpop.permute.xlu0 %3284 }
 0x45f   : > { %17782 = vst [vmem:[#allocation184_spill] sm:$0xff] %v11837_v24  ;;  %17783 = vst [vmem:[#allocation185_spill] sm:$0xff] %v11839_v40  ;;  %v1956_v24 = vmax.f32 %v1700_v10, %v17789_v49  ;;  %v1965_v51 = vmax.f32 %v1709_v52, %v11197_v56  ;;  %v17794_v56 = vld [vmem:[#allocation132_spill] sm:$0xff]  ;;  %v17795_v52 = vld [vmem:[#allocation42_spill] sm:$0xff] }
 0x460   : > { %2574 = vrot.lane.b32.xlu1 %v11835_v33, %s10110_s19  ;;  %2556 = vrot.lane.b32.xlu0 %v11755_v61, %s10110_s19  ;;  %v1702_v10 = vmax.f32 %v17795_v52, %v17794_v56  ;;  %v17796_v49 = vld [vmem:[#allocation147_spill] sm:$0xff] }
 0x461   : > { %v11860_v40 = vmax.f32 %v1956_v24, %v17790_v47  ;;  %v11863_v53 = vmax.f32 %v1965_v51, %v11205_v62  ;;  %v17799_v51 = vld [vmem:[#allocation133_spill] sm:$0xff]  ;;  %v17807_v52 = vld [vmem:[#allocation51_spill] sm:$0xff] }
 0x462   : > { %v11849_v5 = vpop.permute.xlu1 %2538  ;;  %v11851_v60 = vpop.permute.xlu0 %3290  ;;  %v1958_v28 = vmax.f32 %v1702_v10, %v17799_v51  ;;  %v17805_v10 = vld [vmem:[#allocation44_spill] sm:$0xff]  ;;  %v17806_v51 = vld [vmem:[#allocation151_spill] sm:$0xff] }
 0x463   : > { %17788 = vst [vmem:[#allocation128_spill] sm:$0xff] %v11849_v5  ;;  %17791 = vst [vmem:[#allocation143_spill] sm:$0xff] %v11860_v40 }
 0x464   : > { %2958 = vrot.lane.b32.xlu1 %v11835_v33, %s10112_s30  ;;  %2940 = vrot.lane.b32.xlu0 %v11755_v61, %s10112_s30  ;;  %17792 = vst [vmem:[#allocation129_spill] sm:$0xff] %v11863_v53  ;;  %v17797_v61 = vld [vmem:[#allocation49_spill] sm:$0xff] }
 0x465   : > { %v1711_v24 = vmax.f32 %v17797_v61, %v17796_v49 }
 0x466   : > { %v11865_v18 = vpop.permute.xlu1 %2922  ;;  %v11867_v21 = vpop.permute.xlu0 %2520 }
 0x467   : > { %17793 = vst [vmem:[#allocation130_spill] sm:$0xff] %v11865_v18  ;;  %v1967_v33 = vmax.f32 %v1711_v24, %v11221_v48  ;;  %v17800_v18 = vld [vmem:[#allocation134_spill] sm:$0xff]  ;;  %v17804_v48 = vld [vmem:[#allocation136_spill] sm:$0xff] }
 0x468   : > { %2578 = vrot.lane.b32.xlu1 %v11863_v53, %s10110_s19  ;;  %2560 = vrot.lane.b32.xlu0 %v11860_v40, %s10110_s19  ;;  %v11888_v5 = vmax.f32 %v1958_v28, %v17800_v18  ;;  %v1704_v24 = vmax.f32 %v17805_v10, %v17804_v48  ;;  %v1713_v28 = vmax.f32 %v17807_v52, %v17806_v51  ;;  %v17812_v48 = vld [vmem:[#allocation154_spill] sm:$0xff] }
 0x469   : > { %v11891_v56 = vmax.f32 %v1967_v33, %v11229_v0  ;;  %v17809_v33 = vld [vmem:[#allocation137_spill] sm:$0xff] }
 0x46a   : > { %v11877_v47 = vpop.permute.xlu1 %2542  ;;  %v11879_v62 = vpop.permute.xlu0 %2904  ;;  %17801 = vst [vmem:[#allocation147_spill] sm:$0xff] %v11888_v5 }
 0x46b   : > { %17798 = vst [vmem:[#allocation132_spill] sm:$0xff] %v11877_v47  ;;  %17802 = vst [vmem:[#allocation133_spill] sm:$0xff] %v11891_v56  ;;  %v17810_v47 = vld [vmem:[#allocation138_spill] sm:$0xff] }
 0x46c   : > { %2962 = vrot.lane.b32.xlu1 %v11863_v53, %s10112_s30  ;;  %2944 = vrot.lane.b32.xlu0 %v11860_v40, %s10112_s30  ;;  %v1960_v53 = vmax.f32 %v1704_v24, %v17809_v33  ;;  %v17816_v24 = vld [vmem:[#allocation46_spill] sm:$0xff]  ;;  %v17817_v33 = vld [vmem:[#allocation53_spill] sm:$0xff] }
 0x46e   : > { %v11893_v49 = vpop.permute.xlu1 %2926  ;;  %v11895_v61 = vpop.permute.xlu0 %3288  ;;  %v11916_v40 = vmax.f32 %v1960_v53, %v17810_v47  ;;  %v1715_v53 = vmax.f32 %v17817_v33, %v11264_v6 }
 0x46f   : > { %17803 = vst [vmem:[#allocation134_spill] sm:$0xff] %v11893_v49  ;;  %v1969_v49 = vmax.f32 %v1713_v28, %v11245_v37  ;;  %v17815_v37 = vld [vmem:[#allocation140_spill] sm:$0xff] }
 0x470   : > { %2582 = vrot.lane.b32.xlu1 %v11891_v56, %s10110_s19  ;;  %2564 = vrot.lane.b32.xlu0 %v11888_v5, %s10110_s19  ;;  %17811 = vst [vmem:[#allocation151_spill] sm:$0xff] %v11916_v40  ;;  %v1706_v28 = vmax.f32 %v17816_v24, %v17815_v37 }
 0x471   : > { %v11919_v10 = vmax.f32 %v1969_v49, %v17812_v48  ;;  %v17819_v48 = vld [vmem:[#allocation141_spill] sm:$0xff] }
 0x472   : > { %v11905_v18 = vpop.permute.xlu1 %3310  ;;  %v11907_v0 = vpop.permute.xlu0 %3294 }
 0x473   : > { %17808 = vst [vmem:[#allocation136_spill] sm:$0xff] %v11905_v18  ;;  %17813 = vst [vmem:[#allocation137_spill] sm:$0xff] %v11919_v10  ;;  %v1971_v18 = vmax.f32 %v1715_v53, %v11277_v44  ;;  %v17824_v44 = vld [vmem:[#allocation144_spill] sm:$0xff] }
 0x474   : > { %2966 = vrot.lane.b32.xlu1 %v11891_v56, %s10112_s30  ;;  %2948 = vrot.lane.b32.xlu0 %v11888_v5, %s10112_s30  ;;  %v1962_v56 = vmax.f32 %v1706_v28, %v17819_v48  ;;  %v17825_v28 = vld [vmem:[#allocation48_spill] sm:$0xff]  ;;  %v17826_v48 = vld [vmem:[#allocation55_spill] sm:$0xff] }
 0x475   : > { %v11947_v37 = vmax.f32 %v1971_v18, %v11289_v14  ;;  %v1708_v53 = vmax.f32 %v17825_v28, %v17824_v44  ;;  %v17828_v18 = vld [vmem:[#allocation145_spill] sm:$0xff] }
 0x476   : > { %v11921_v51 = vpop.permute.xlu1 %3308  ;;  %v11923_v52 = vpop.permute.xlu0 %2524 }
 0x477   : > { %17814 = vst [vmem:[#allocation138_spill] sm:$0xff] %v11921_v51  ;;  %v17820_v51 = vld [vmem:[#allocation142_spill] sm:$0xff]  ;;  %17822 = vst [vmem:[#allocation141_spill] sm:$0xff] %v11947_v37  ;;  %v1964_v24 = vmax.f32 %v1708_v53, %v17828_v18  ;;  %v17835_v18 = vld [vmem:[#allocation56_spill] sm:$0xff] }
 0x478   : > { %2586 = vrot.lane.b32.xlu1 %v11919_v10, %s10110_s19  ;;  %2568 = vrot.lane.b32.xlu0 %v11916_v40, %s10110_s19  ;;  %v11944_v5 = vmax.f32 %v1962_v56, %v17820_v51  ;;  %v1717_v56 = vmax.f32 %v17826_v48, %v11297_v26  ;;  %v17834_v53 = vld [vmem:[#allocation50_spill] sm:$0xff] }
 0x47a   : > { %v11933_v47 = vpop.permute.xlu1 %2546  ;;  %v11935_v49 = vpop.permute.xlu0 %2908  ;;  %17821 = vst [vmem:[#allocation140_spill] sm:$0xff] %v11944_v5 }
 0x47b   : > { %17818 = vst [vmem:[#allocation154_spill] sm:$0xff] %v11933_v47 }
 0x47c   : > { %2970 = vrot.lane.b32.xlu1 %v11919_v10, %s10112_s30  ;;  %2952 = vrot.lane.b32.xlu0 %v11916_v40, %s10112_s30  ;;  %v1973_v10 = vmax.f32 %v1717_v56, %v11305_v19  ;;  %v17833_v19 = vld [vmem:[#allocation148_spill] sm:$0xff] }
 0x47d   : > { %v1710_v56 = vmax.f32 %v17834_v53, %v17833_v19 }
 0x47e   : > { %v11949_v6 = vpop.permute.xlu1 %2930  ;;  %v11951_v33 = vpop.permute.xlu0 %3292  ;;  %v11975_v44 = vmax.f32 %v1973_v10, %v11315_v15  ;;  %v17837_v10 = vld [vmem:[#allocation149_spill] sm:$0xff] }
 0x47f   : > { %17823 = vst [vmem:[#allocation142_spill] sm:$0xff] %v11949_v6  ;;  %v17829_v6 = vld [vmem:[#allocation146_spill] sm:$0xff]  ;;  %v1966_v28 = vmax.f32 %v1710_v56, %v17837_v10  ;;  %v17847_v10 = vld [vmem:[#allocation153_spill] sm:$0xff] }
 0x480   : > { %2590 = vrot.lane.b32.xlu1 %v11947_v37, %s10110_s19  ;;  %2572 = vrot.lane.b32.xlu0 %v11944_v5, %s10110_s19  ;;  %v11972_v47 = vmax.f32 %v1964_v24, %v17829_v6  ;;  %17831 = vst [vmem:[#allocation146_spill] sm:$0xff] %v11975_v44  ;;  %v1716_v24 = vmax.f32 %v17835_v18, %v11299_v17  ;;  %v17841_v17 = vld [vmem:[#allocation57_spill] sm:$0xff] }
 0x481   : > { %v1719_v18 = vmax.f32 %v17841_v17, %v11327_v8 }
 0x482   : > { %v11961_v51 = vpop.permute.xlu1 %3314  ;;  %v11963_v14 = vpop.permute.xlu0 %3298  ;;  %17830 = vst [vmem:[#allocation145_spill] sm:$0xff] %v11972_v47 }
 0x483   : > { %17827 = vst [vmem:[#allocation144_spill] sm:$0xff] %v11961_v51  ;;  %v17838_v51 = vld [vmem:[#allocation150_spill] sm:$0xff] }
 0x484   : > { %2974 = vrot.lane.b32.xlu1 %v11947_v37, %s10112_s30  ;;  %2956 = vrot.lane.b32.xlu0 %v11944_v5, %s10112_s30  ;;  %v1972_v37 = vmax.f32 %v1716_v24, %v11307_v22  ;;  %v1975_v22 = vmax.f32 %v1719_v18, %v11339_v58  ;;  %v17848_v58 = vld [vmem:[#allocation155_spill] sm:$0xff] }
 0x486   : > { %v11977_v26 = vpop.permute.xlu1 %3312  ;;  %v11979_v48 = vpop.permute.xlu0 %2528  ;;  %v12003_v19 = vmax.f32 %v1972_v37, %v11317_v3  ;;  %v12019_v3 = vmax.f32 %v1975_v22, %v11352_v31 }
 0x487   : > { %17832 = vst [vmem:[#allocation186_spill] sm:$0xff] %v11977_v26  ;;  %v12000_v26 = vmax.f32 %v1966_v28, %v17838_v51  ;;  %v17843_v28 = vld [vmem:[#allocation152_spill] sm:$0xff] }
 0x488   : > { %2594 = vrot.lane.b32.xlu1 %v11975_v44, %s10110_s19  ;;  %2576 = vrot.lane.b32.xlu0 %v11972_v47, %s10110_s19  ;;  %17840 = vst [vmem:[#allocation150_spill] sm:$0xff] %v12003_v19  ;;  %v17844_v51 = vld [vmem:[#allocation52_spill] sm:$0xff]  ;;  %17845 = vst [vmem:[#allocation152_spill] sm:$0xff] %v12019_v3 }
 0x489   : > { %17839 = vst [vmem:[#allocation149_spill] sm:$0xff] %v12000_v26  ;;  %v1712_v24 = vmax.f32 %v17844_v51, %v17843_v28  ;;  %v17850_v28 = vld [vmem:[#allocation58_spill] sm:$0xff] }
 0x48a   : > { %v11989_v6 = vpop.permute.xlu1 %2550  ;;  %v11991_v15 = vpop.permute.xlu0 %2912  ;;  %v1718_v51 = vmax.f32 %v17850_v28, %v11329_v16  ;;  %v17854_v16 = vld [vmem:[#allocation61_spill] sm:$0xff] }
 0x48b   : > { %17836 = vst [vmem:[#allocation148_spill] sm:$0xff] %v11989_v6  ;;  %v1968_v17 = vmax.f32 %v1712_v24, %v17847_v10  ;;  %v17852_v24 = vld [vmem:[#allocation54_spill] sm:$0xff] }
 0x48c   : > { %2978 = vrot.lane.b32.xlu1 %v11975_v44, %s10112_s30  ;;  %2960 = vrot.lane.b32.xlu0 %v11972_v47, %s10112_s30  ;;  %v1974_v44 = vmax.f32 %v1718_v51, %v11341_v27  ;;  %v1714_v10 = vmax.f32 %v17852_v24, %v11266_v2  ;;  %v17856_v2 = vld [vmem:[#allocation158_spill] sm:$0xff] }
 0x48d   : > { %v12031_v18 = vmax.f32 %v1968_v17, %v17848_v58  ;;  %v1721_v58 = vmax.f32 %v17854_v16, %v11365_v25 }
 0x48e   : > { %v12007_v53 = vpop.permute.xlu1 %2934  ;;  %v12009_v56 = vpop.permute.xlu0 %3296  ;;  %v12047_v17 = vmax.f32 %v1974_v44, %v11354_v38  ;;  %v1970_v27 = vmax.f32 %v1714_v10, %v11279_v4  ;;  %v17860_v4 = vld [vmem:[#allocation63_spill] sm:$0xff] }
 0x48f   : > { %17842 = vst [vmem:[#allocation187_spill] sm:$0xff] %v12007_v53  ;;  %17849 = vst [vmem:[#allocation153_spill] sm:$0xff] %v12031_v18  ;;  %v1977_v51 = vmax.f32 %v1721_v58, %v11377_v9  ;;  %v1720_v9 = vmax.f32 %v17860_v4, %v11367_v55 }
 0x490   : > { %2976 = vrot.lane.b32.xlu1 %v12003_v19, %s10112_s30  ;;  %2580 = vrot.lane.b32.xlu0 %v12000_v26, %s10110_s19  ;;  %17853 = vst [vmem:[#allocation189_spill] sm:$0xff] %v12047_v17  ;;  %v12062_v38 = vmax.f32 %v1970_v27, %v17856_v2 }
 0x491   : > { %v12065_v44 = vmax.f32 %v1977_v51, %v11387_v59  ;;  %v1976_v59 = vmax.f32 %v1720_v9, %v11379_v30  ;;  %v17863_v51 = vld [vmem:[#allocation66_spill] sm:$0xff] }
 0x492   : > { %v12021_v37 = vpop.permute.xlu1 %3318  ;;  %v12023_v8 = vpop.permute.xlu0 %3302  ;;  %17857 = vst [vmem:[#allocation158_spill] sm:$0xff] %v12062_v38  ;;  %v1723_v2 = vmax.f32 %v17863_v51, %v11401_v36  ;;  %v17867_v36 = vld [vmem:[#allocation164_spill] sm:$0xff] }
 0x493   : > { %17846 = vst [vmem:[#allocation188_spill] sm:$0xff] %v12021_v37  ;;  %17858 = vst [vmem:[#allocation191_spill] sm:$0xff] %v12065_v44  ;;  %v12087_v27 = vmax.f32 %v1976_v59, %v11389_v23 }
 0x494   : > { %2598 = vrot.lane.b32.xlu1 %v12019_v3, %s10110_s19  ;;  %2964 = vrot.lane.b32.xlu0 %v12000_v26, %s10112_s30  ;;  %v1979_v4 = vmax.f32 %v1723_v2, %v11415_v43  ;;  %v17868_v43 = vld [vmem:[#allocation68_spill] sm:$0xff]  ;;  %v17922_v26 = vld [vmem:[#allocation87_spill] sm:$0xff] }
 0x495   : > { %17862 = vst [vmem:[#allocation194_spill] sm:$0xff] %v12087_v27  ;;  %v1722_v59 = vmax.f32 %v17868_v43, %v17867_v36  ;;  %v17876_v36 = vld [vmem:[#allocation74_spill] sm:$0xff] }
 0x496   : > { %v12035_v31 = vpop.permute.xlu1 %3316  ;;  %v12037_v22 = vpop.permute.xlu0 %2532  ;;  %v12101_v30 = vmax.f32 %v1979_v4, %v11427_v39  ;;  %v17871_v4 = vld [vmem:[#allocation167_spill] sm:$0xff] }
 0x497   : > { %17851 = vst [vmem:[#allocation155_spill] sm:$0xff] %v12035_v31 }
 0x498   : > { %2982 = vrot.lane.b32.xlu1 %v12019_v3, %s10112_s30  ;;  %2584 = vrot.lane.b32.xlu0 %v12031_v18, %s10110_s19  ;;  %17865 = vst [vmem:[#allocation196_spill] sm:$0xff] %v12101_v30 }
 0x49a   : > { %v12051_v28 = vpop.permute.xlu1 %2554  ;;  %v12053_v37 = vpop.permute.xlu0 %2916 }
 0x49b   : > { %17855 = vst [vmem:[#allocation190_spill] sm:$0xff] %v12051_v28  ;;  %v17897_v28 = vld [vmem:[#allocation173_spill] sm:$0xff] }
 0x49c   : > { %2980 = vrot.lane.b32.xlu1 %v12047_v17, %s10112_s30  ;;  %2968 = vrot.lane.b32.xlu0 %v12031_v18, %s10112_s30 }
 0x49e   : > { %v12067_v25 = vpop.permute.xlu1 %2938  ;;  %v12069_v16 = vpop.permute.xlu0 %3300 }
 0x49f   : > { %17859 = vst [vmem:[#allocation192_spill] sm:$0xff] %v12067_v25  ;;  %v17879_v25 = vld [vmem:[#allocation80_spill] sm:$0xff] }
 0x4a0   : > { %2602 = vrot.lane.b32.xlu1 %v12065_v44, %s10110_s19  ;;  %2588 = vrot.lane.b32.xlu0 %v12062_v38, %s10110_s19 }
 0x4a2   : > { %v12077_v10 = vpop.permute.xlu1 %3322  ;;  %v12079_v58 = vpop.permute.xlu0 %3306 }
 0x4a3   : > { %17861 = vst [vmem:[#allocation193_spill] sm:$0xff] %v12077_v10 }
 0x4a4   : > { %2986 = vrot.lane.b32.xlu1 %v12065_v44, %s10112_s30  ;;  %2972 = vrot.lane.b32.xlu0 %v12062_v38, %s10112_s30  ;;  %v17870_v44 = vld [vmem:[#allocation166_spill] sm:$0xff]  ;;  %v17875_v38 = vld [vmem:[#allocation168_spill] sm:$0xff] }
 0x4a5   : > { %v1978_v39 = vmax.f32 %v1722_v59, %v17870_v44  ;;  %v1724_v43 = vmax.f32 %v17876_v36, %v17875_v38  ;;  %v17878_v44 = vld [vmem:[#allocation59_spill] sm:$0xff]  ;;  %v17884_v38 = vld [vmem:[#allocation169_spill] sm:$0xff]  ;;  %v17885_v36 = vld [vmem:[#allocation82_spill] sm:$0xff] }
 0x4a6   : > { %v12091_v24 = vpop.permute.xlu1 %3320  ;;  %v12093_v55 = vpop.permute.xlu0 %2536 }
 0x4a7   : > { %17864 = vst [vmem:[#allocation195_spill] sm:$0xff] %v12091_v24  ;;  %v12123_v3 = vmax.f32 %v1978_v39, %v17871_v4  ;;  %v17880_v39 = vld [vmem:[#allocation62_spill] sm:$0xff] }
 0x4a8   : > { %2984 = vrot.lane.b32.xlu1 %v12087_v27, %s10112_s30  ;;  %2592 = vrot.lane.b32.xlu0 %v12003_v19, %s10110_s19  ;;  %v17873_v19 = vld [vmem:[#allocation75_spill] sm:$0xff] }
 0x4a9   : > { %17872 = vst [vmem:[#allocation166_spill] sm:$0xff] %v12123_v3 }
 0x4aa   : > { %v12103_v23 = vpop.permute.xlu1 %2558  ;;  %v12105_v9 = vpop.permute.xlu0 %2920 }
 0x4ab   : > { %17866 = vst [vmem:[#allocation197_spill] sm:$0xff] %v12103_v23 }
 0x4ac   : > { %2606 = vrot.lane.b32.xlu1 %v12101_v30, %s10110_s19  ;;  %2596 = vrot.lane.b32.xlu0 %v12047_v17, %s10110_s19  ;;  %v17874_v17 = vld [vmem:[#allocation71_spill] sm:$0xff] }
 0x4ad   : > { %v1725_v23 = vmax.f32 %v17874_v17, %v17873_v19  ;;  %v17882_v19 = vld [vmem:[#allocation83_spill] sm:$0xff] }
 0x4ae   : > { %v12113_v2 = vpop.permute.xlu1 %2942  ;;  %v12115_v51 = vpop.permute.xlu0 %3304 }
 0x4af   : > { %17869 = vst [vmem:[#allocation164_spill] sm:$0xff] %v12113_v2  ;;  %v1981_v59 = vmax.f32 %v1725_v23, %v17878_v44  ;;  %v17888_v44 = vld [vmem:[#allocation96_spill] sm:$0xff] }
 0x4b0   : > { %2990 = vrot.lane.b32.xlu1 %v12101_v30, %s10112_s30  ;;  %2600 = vrot.lane.b32.xlu0 %v12087_v27, %s10110_s19  ;;  %v1980_v30 = vmax.f32 %v1724_v43, %v17879_v25  ;;  %v1726_v27 = vmax.f32 %v17885_v36, %v17884_v38  ;;  %v17887_v25 = vld [vmem:[#allocation170_spill] sm:$0xff]  ;;  %v17893_v36 = vld [vmem:[#allocation171_spill] sm:$0xff] }
 0x4b1   : > { %v12140_v4 = vmax.f32 %v1981_v59, %v17880_v39  ;;  %v17891_v39 = vld [vmem:[#allocation90_spill] sm:$0xff] }
 0x4b2   : > { %v12129_v2 = vpop.permute.xlu1 %3326  ;;  %v12131_v10 = vpop.permute.xlu0 %2540  ;;  %v12143_v17 = vmax.f32 %v1980_v30, %v17882_v19  ;;  %v1982_v43 = vmax.f32 %v1726_v27, %v17887_v25  ;;  %v17890_v30 = vld [vmem:[#allocation99_spill] sm:$0xff] }
 0x4b3   : > { %17877 = vst [vmem:[#allocation167_spill] sm:$0xff] %v12129_v2  ;;  %17881 = vst [vmem:[#allocation75_spill] sm:$0xff] %v12140_v4  ;;  %v1728_v19 = vmax.f32 %v17891_v39, %v17890_v30  ;;  %v17894_v27 = vld [vmem:[#allocation11_spill] sm:$0xff]  ;;  %v17899_v39 = vld [vmem:[#allocation100_spill] sm:$0xff] }
 0x4b4   : > { %2988 = vrot.lane.b32.xlu1 %v12123_v3, %s10112_s30  ;;  %2604 = vrot.lane.b32.xlu0 %v12123_v3, %s10110_s19  ;;  %17883 = vst [vmem:[#allocation168_spill] sm:$0xff] %v12143_v17  ;;  %v12157_v59 = vmax.f32 %v1982_v43, %v17888_v44  ;;  %v2697_v25 = vsub.f32 %v17894_v27, %v11627_v54  ;;  %v17895_v43 = vld [vmem:[#allocation88_spill] sm:$0xff]  ;;  %v17896_v44 = vld [vmem:[#allocation79_spill] sm:$0xff] }
 0x4b5   : > { %v1727_v24 = vmax.f32 %v17896_v44, %v17895_v43  ;;  %v17904_v43 = vld [vmem:[#allocation64_spill] sm:$0xff] }
 0x4b6   : > { %v12147_v2 = vpop.permute.xlu1 %3324  ;;  %v12149_v23 = vpop.permute.xlu0 %2924  ;;  %17889 = vst [vmem:[#allocation80_spill] sm:$0xff] %v12157_v59  ;;  %v2762_v54 = vmul.f32 1.442695, %v2697_v25  ;;  %v17912_v25 = vld [vmem:[#allocation84_spill] sm:$0xff] }
 0x4b7   : > { %17886 = vst [vmem:[#allocation59_spill] sm:$0xff] %v12147_v2  ;;  %v1984_v2 = vmax.f32 %v1728_v19, %v17893_v36  ;;  %v17902_v19 = vld [vmem:[#allocation91_spill] sm:$0xff] }
 0x4b8   : > { %2610 = vrot.lane.b32.xlu1 %v12140_v4, %s10110_s19  ;;  %2608 = vrot.lane.b32.xlu0 %v12143_v17, %s10110_s19  ;;  %9269 = vpow2.f32 %v2762_v54 }
 0x4b9   : > { %v12175_v30 = vmax.f32 %v1984_v2, %v17897_v28  ;;  %v17903_v28 = vld [vmem:[#allocation117_spill] sm:$0xff] }
 0x4ba   : > { %v12161_v3 = vpop.permute.xlu1 %2562  ;;  %v12163_v38 = vpop.permute.xlu0 %2544  ;;  %v3081_v2 = vsub.f32 %v17894_v27, %v17903_v28  ;;  %v17914_v28 = vld [vmem:[#allocation110_spill] sm:$0xff] }
 0x4bb   : > { %17892 = vst [vmem:[#allocation62_spill] sm:$0xff] %v12161_v3  ;;  %17898 = vst [vmem:[#allocation83_spill] sm:$0xff] %v12175_v30  ;;  %v17900_v3 = vld [vmem:[#allocation98_spill] sm:$0xff] }
 0x4bc   : > { %2994 = vrot.lane.b32.xlu1 %v12140_v4, %s10112_s30  ;;  %2612 = vrot.lane.b32.xlu0 %v12157_v59, %s10110_s19  ;;  %v1730_v18 = vmax.f32 %v17900_v3, %v17899_v39  ;;  %v1983_v4 = vmax.f32 %v1727_v24, %v17902_v19  ;;  %v17906_v3 = vld [vmem:[#allocation174_spill] sm:$0xff] }
 0x4bd   : > { %v17909_v24 = vld [vmem:[#allocation106_spill] sm:$0xff] }
 0x4be   : > { %v12179_v53 = vpop.permute.xlu1 %2946  ;;  %v12181_v36 = vpop.permute.xlu0 %2928  ;;  %v1986_v31 = vmax.f32 %v1730_v18, %v11567_v45  ;;  %v12192_v39 = vmax.f32 %v1983_v4, %v17904_v43  ;;  %v3146_v4 = vmul.f32 1.442695, %v3081_v2  ;;  %v17919_v2 = vld [vmem:[#allocation179_spill] sm:$0xff] }
 0x4bf   : > { %17901 = vst [vmem:[#allocation169_spill] sm:$0xff] %v12179_v53  ;;  %v17908_v53 = vld [vmem:[#allocation176_spill] sm:$0xff] }
 0x4c0   : > { %2992 = vrot.lane.b32.xlu1 %v12143_v17, %s10112_s30  ;;  %2616 = vrot.lane.b32.xlu0 %v12175_v30, %s10110_s19  ;;  %17905 = vst [vmem:[#allocation170_spill] sm:$0xff] %v12192_v39  ;;  %v12195_v44 = vmax.f32 %v1986_v31, %v17906_v3  ;;  %v1732_v19 = vmax.f32 %v17909_v24, %v17908_v53  ;;  %v17911_v17 = vld [vmem:[#allocation108_spill] sm:$0xff]  ;;  %9271 = vpow2.f32 %v3146_v4 }
 0x4c1   : > { %v17913_v3 = vld [vmem:[#allocation12_spill] sm:$0xff] }
 0x4c2   : > { %17907 = vst [vmem:[#allocation96_spill] sm:$0xff] %v12195_v44  ;;  %v12199_v45 = vpop.permute.xlu1 %2566  ;;  %v12201_v18 = vpop.permute.xlu0 %2548  ;;  %v1988_v6 = vmax.f32 %v1732_v19, %v17911_v17  ;;  %v3080_v31 = vsub.f32 %v17913_v3, %v17912_v25  ;;  %v17916_v53 = vld [vmem:[#allocation116_spill] sm:$0xff] }
 0x4c3   : > { %17910 = vst [vmem:[#allocation99_spill] sm:$0xff] %v12199_v45  ;;  %v1734_v24 = vmax.f32 %v17916_v53, %v11679_v34  ;;  %v17923_v53 = vld [vmem:[#allocation120_spill] sm:$0xff] }
 0x4c4   : > { %2614 = vrot.lane.b32.xlu1 %v12192_v39, %s10110_s19  ;;  %2620 = vrot.lane.b32.xlu0 %v12195_v44, %s10110_s19  ;;  %v12211_v43 = vmax.f32 %v1988_v6, %v17914_v28  ;;  %v3144_v54 = vmul.f32 1.442695, %v3080_v31  ;;  %v17920_v6 = vld [vmem:[#allocation13_spill] sm:$0xff]  ;;  %v17921_v28 = vld [vmem:[#allocation67_spill] sm:$0xff]  ;;  %v17927_v31 = vld [vmem:[#allocation92_spill] sm:$0xff] }
 0x4c5   : > { %v1990_v19 = vmax.f32 %v1734_v24, %v11687_v1  ;;  %v2699_v25 = vsub.f32 %v17920_v6, %v17919_v2  ;;  %v1729_v34 = vmax.f32 %v17922_v26, %v17921_v28  ;;  %v17926_v24 = vld [vmem:[#allocation104_spill] sm:$0xff]  ;;  %v3083_v2 = vsub.f32 %v17920_v6, %v17927_v31 }
 0x4c6   : > { %17915 = vst [vmem:[#allocation171_spill] sm:$0xff] %v12211_v43  ;;  %v12215_v45 = vpop.permute.xlu1 %2950  ;;  %v12217_v17 = vpop.permute.xlu0 %2932  ;;  %9273 = vpow2.f32 %v3144_v54  ;;  %v17928_v28 = vld [vmem:[#allocation172_spill] sm:$0xff] }
 0x4c7   : > { %17917 = vst [vmem:[#allocation11_spill] sm:$0xff] %v12215_v45  ;;  %17918 = vst [vmem:[#allocation88_spill] sm:$0xff] %v12217_v17  ;;  %v12229_v45 = vmax.f32 %v1990_v19, %v17923_v53  ;;  %v2766_v4 = vmul.f32 1.442695, %v2699_v25  ;;  %v3150_v54 = vmul.f32 1.442695, %v3083_v2 }
 0x4c8   : > { %2998 = vrot.lane.b32.xlu1 %v12192_v39, %s10112_s30  ;;  %2624 = vrot.lane.b32.xlu0 %v12211_v43, %s10110_s19  ;;  %v1985_v39 = vmax.f32 %v1729_v34, %v17926_v24  ;;  %v17933_v25 = vld [vmem:[#allocation14_spill] sm:$0xff]  ;;  %v17937_v2 = vld [vmem:[#allocation69_spill] sm:$0xff] }
 0x4c9   : > { %17924 = vst [vmem:[#allocation173_spill] sm:$0xff] %v12229_v45  ;;  %9275 = vpow2.f32 %v2766_v4  ;;  %v2698_v34 = vsub.f32 %v17933_v25, %v11729_v32  ;;  %v3082_v4 = vsub.f32 %v17933_v25, %v11737_v7 }
 0x4ca   : > { %v12231_v17 = vpop.permute.xlu1 %2570  ;;  %v12233_v1 = vpop.permute.xlu0 %2552  ;;  %v12243_v53 = vmax.f32 %v1985_v39, %v17928_v28  ;;  %9277 = vpow2.f32 %v3150_v54  ;;  %v17943_v54 = vld [vmem:[#allocation15_spill] sm:$0xff] }
 0x4cb   : > { %17925 = vst [vmem:[#allocation100_spill] sm:$0xff] %v12231_v17  ;;  %v12249_v17 = vpop.eup %9269  ;;  %v2764_v28 = vmul.f32 1.442695, %v2698_v34  ;;  %v2701_v7 = vsub.f32 %v17943_v54, %v11715_v63  ;;  %v3148_v34 = vmul.f32 1.442695, %v3082_v4 }
 0x4cc   : > { %2996 = vrot.lane.b32.xlu1 %v12157_v59, %s10112_s30  ;;  %2628 = vrot.lane.b32.xlu0 %v12229_v45, %s10110_s19  ;;  %17929 = vst [vmem:[#allocation91_spill] sm:$0xff] %v12243_v53  ;;  %17932 = vst [vmem:[#allocation174_spill] sm:$0xff] %v12249_v17  ;;  %v12261_v31 = vpop.eup %9271  ;;  %v17938_v45 = vld [vmem:[#allocation95_spill] sm:$0xff] }
 0x4cd   : > { %17936 = vst [vmem:[#allocation84_spill] sm:$0xff] %v12261_v31  ;;  %v1731_v32 = vmax.f32 %v17938_v45, %v17937_v2  ;;  %9279 = vpow2.f32 %v2764_v28  ;;  %v17944_v2 = vld [vmem:[#allocation107_spill] sm:$0xff] }
 0x4ce   : > { %v12245_v19 = vpop.permute.xlu1 %2954  ;;  %v12247_v26 = vpop.permute.xlu0 %2936  ;;  %9281 = vpow2.f32 %v3148_v34 }
 0x4cf   : > { %17930 = vst [vmem:[#allocation117_spill] sm:$0xff] %v12245_v19  ;;  %17931 = vst [vmem:[#allocation64_spill] sm:$0xff] %v12247_v26  ;;  %v17961_v26 = vld [vmem:[#allocation177_spill] sm:$0xff] }
 0x4d0   : > { %2618 = vrot.lane.b32.xlu1 %v12243_v53, %s10110_s19  ;;  %3722 = vrot.lane.b32.xlu0 %v12249_v17, %s10108_s20  ;;  %v12275_v19 = vpop.eup %9273  ;;  %v17942_v17 = vld [vmem:[#allocation73_spill] sm:$0xff] }
 0x4d1   : > { %17941 = vst [vmem:[#allocation179_spill] sm:$0xff] %v12275_v19 }
 0x4d2   : > { %v12257_v24 = vpop.permute.xlu1 %2574  ;;  %v12259_v39 = vpop.permute.xlu0 %2556 }
 0x4d3   : > { %17934 = vst [vmem:[#allocation176_spill] sm:$0xff] %v12257_v24  ;;  %17935 = vst [vmem:[#allocation108_spill] sm:$0xff] %v12259_v39  ;;  %v1987_v39 = vmax.f32 %v1731_v32, %v17942_v17  ;;  %v2770_v17 = vmul.f32 1.442695, %v2701_v7  ;;  %v17949_v32 = vld [vmem:[#allocation123_spill] sm:$0xff] }
 0x4d4   : > { %3002 = vrot.lane.b32.xlu1 %v12243_v53, %s10112_s30  ;;  %4042 = vrot.lane.b32.xlu0 %v12261_v31, %s17243_s29  ;;  %v12291_v31 = vpop.eup %9275  ;;  %v3085_v63 = vsub.f32 %v17943_v54, %v17949_v32  ;;  %v17954_v32 = vld [vmem:[#allocation16_spill] sm:$0xff] }
 0x4d5   : > { %v12285_v45 = vmax.f32 %v1987_v39, %v17944_v2  ;;  %17948 = vst [vmem:[#allocation104_spill] sm:$0xff] %v12291_v31  ;;  %v12303_v4 = vpop.eup %9277  ;;  %v17953_v2 = vld [vmem:[#allocation113_spill] sm:$0xff]  ;;  %9283 = vpow2.f32 %v2770_v17  ;;  %v2700_v34 = vsub.f32 %v17954_v32, %v11773_v57 }
 0x4d6   : > { %v12271_v59 = vpop.permute.xlu1 %2958  ;;  %v12273_v24 = vpop.permute.xlu0 %2940  ;;  %17952 = vst [vmem:[#allocation14_spill] sm:$0xff] %v12303_v4  ;;  %v3154_v7 = vmul.f32 1.442695, %v3085_v63  ;;  %v17962_v17 = vld [vmem:[#allocation81_spill] sm:$0xff] }
 0x4d7   : > { %17939 = vst [vmem:[#allocation12_spill] sm:$0xff] %v12271_v59  ;;  %17940 = vst [vmem:[#allocation110_spill] sm:$0xff] %v12273_v24  ;;  %v2768_v57 = vmul.f32 1.442695, %v2700_v34 }
 0x4d8   : > { %3000 = vrot.lane.b32.xlu1 %v12175_v30, %s10112_s30  ;;  %4040 = vrot.lane.b32.xlu0 %v12275_v19, %s17243_s29  ;;  %17945 = vst [vmem:[#allocation13_spill] sm:$0xff] %v12285_v45  ;;  %v3465_v30 = vsub.f32 %v17894_v27, %v17953_v2  ;;  %v17960_v2 = vld [vmem:[#allocation76_spill] sm:$0xff]  ;;  %9285 = vpow2.f32 %v3154_v7 }
 0x4da   : > { %v12287_v53 = vpop.permute.xlu1 %2578  ;;  %v12289_v59 = vpop.permute.xlu0 %2560 }
 0x4db   : > { %17946 = vst [vmem:[#allocation67_spill] sm:$0xff] %v12287_v53  ;;  %17947 = vst [vmem:[#allocation120_spill] sm:$0xff] %v12289_v59  ;;  %v17955_v53 = vld [vmem:[#allocation175_spill] sm:$0xff]  ;;  %v12319_v59 = vpop.eup %9279 }
 0x4dc   : > { %2622 = vrot.lane.b32.xlu1 %v12285_v45, %s10110_s19  ;;  %3726 = vrot.lane.b32.xlu0 %v12291_v31, %s10108_s20  ;;  %17959 = vst [vmem:[#allocation15_spill] sm:$0xff] %v12319_v59 }
 0x4de   : > { %v12299_v28 = vpop.permute.xlu1 %2962  ;;  %v12301_v39 = vpop.permute.xlu0 %2944 }
 0x4df   : > { %17950 = vst [vmem:[#allocation92_spill] sm:$0xff] %v12299_v28  ;;  %17951 = vst [vmem:[#allocation172_spill] sm:$0xff] %v12301_v39  ;;  %v17956_v28 = vld [vmem:[#allocation103_spill] sm:$0xff] }
 0x4e0   : > { %3006 = vrot.lane.b32.xlu1 %v12285_v45, %s10112_s30  ;;  %4046 = vrot.lane.b32.xlu0 %v12303_v4, %s17243_s29  ;;  %v1733_v31 = vmax.f32 %v17956_v28, %v17955_v53  ;;  %v3530_v45 = vmul.f32 1.442695, %v3465_v30  ;;  %v2696_v4 = vsub.f32 %v17913_v3, %v17961_v26  ;;  %v3084_v53 = vsub.f32 %v17954_v32, %v11783_v41  ;;  %v17968_v41 = vld [vmem:[#allocation180_spill] sm:$0xff] }
 0x4e2   : > { %v12315_v19 = vpop.permute.xlu1 %2582  ;;  %v12317_v39 = vpop.permute.xlu0 %2564  ;;  %v1989_v24 = vmax.f32 %v1733_v31, %v17960_v2  ;;  %9287 = vpow2.f32 %v3530_v45  ;;  %v2760_v26 = vmul.f32 1.442695, %v2696_v4  ;;  %v17967_v2 = vld [vmem:[#allocation89_spill] sm:$0xff]  ;;  %v3152_v34 = vmul.f32 1.442695, %v3084_v53 }
 0x4e3   : > { %17957 = vst [vmem:[#allocation69_spill] sm:$0xff] %v12315_v19  ;;  %17958 = vst [vmem:[#allocation73_spill] sm:$0xff] %v12317_v39  ;;  %v12337_v31 = vpop.eup %9281  ;;  %9289 = vpow2.f32 %v2768_v57  ;;  %v17975_v39 = vld [vmem:[#allocation97_spill] sm:$0xff] }
 0x4e4   : > { %3004 = vrot.lane.b32.xlu1 %v12195_v44, %s10112_s30  ;;  %3724 = vrot.lane.b32.xlu0 %v12319_v59, %s10108_s20  ;;  %v12331_v63 = vmax.f32 %v1989_v24, %v17962_v17  ;;  %17966 = vst [vmem:[#allocation16_spill] sm:$0xff] %v12337_v31  ;;  %v3464_v44 = vsub.f32 %v17913_v3, %v17967_v2  ;;  %v17969_v24 = vld [vmem:[#allocation17_spill] sm:$0xff]  ;;  %v17970_v17 = vld [vmem:[#allocation112_spill] sm:$0xff]  ;;  %v12353_v4 = vpop.eup %9283  ;;  %9291 = vpow2.f32 %v2760_v26 }
 0x4e5   : > { %v2703_v7 = vsub.f32 %v17969_v24, %v17968_v41  ;;  %17973 = vst [vmem:[#allocation76_spill] sm:$0xff] %v12353_v4  ;;  %v3087_v53 = vsub.f32 %v17969_v24, %v11745_v12  ;;  %9293 = vpow2.f32 %v3152_v34  ;;  %v17976_v41 = vld [vmem:[#allocation178_spill] sm:$0xff]  ;;  %v3466_v26 = vsub.f32 %v17933_v25, %v11747_v46 }
 0x4e6   : > { %17963 = vst [vmem:[#allocation107_spill] sm:$0xff] %v12331_v63  ;;  %v12333_v28 = vpop.permute.xlu1 %2966  ;;  %v12335_v30 = vpop.permute.xlu0 %2948  ;;  %v3528_v2 = vmul.f32 1.442695, %v3464_v44 }
 0x4e7   : > { %17964 = vst [vmem:[#allocation123_spill] sm:$0xff] %v12333_v28  ;;  %17965 = vst [vmem:[#allocation113_spill] sm:$0xff] %v12335_v30  ;;  %v17971_v28 = vld [vmem:[#allocation115_spill] sm:$0xff]  ;;  %v2774_v57 = vmul.f32 1.442695, %v2703_v7 }
 0x4e8   : > { %2626 = vrot.lane.b32.xlu1 %v12331_v63, %s10110_s19  ;;  %4044 = vrot.lane.b32.xlu0 %v12337_v31, %s17243_s29  ;;  %v1735_v19 = vmax.f32 %v17971_v28, %v17970_v17  ;;  %v17974_v63 = vld [vmem:[#allocation118_spill] sm:$0xff]  ;;  %v3467_v31 = vsub.f32 %v17920_v6, %v17975_v39  ;;  %9295 = vpow2.f32 %v3528_v2  ;;  %v3158_v12 = vmul.f32 1.442695, %v3087_v53 }
 0x4e9   : > { %9297 = vpow2.f32 %v2774_v57  ;;  %v3532_v46 = vmul.f32 1.442695, %v3466_v26  ;;  %v3469_v28 = vsub.f32 %v17943_v54, %v11761_v13  ;;  %v17985_v13 = vld [vmem:[#allocation19_spill] sm:$0xff] }
 0x4ea   : > { %v12349_v59 = vpop.permute.xlu1 %2586  ;;  %v12351_v45 = vpop.permute.xlu0 %2568  ;;  %v1991_v30 = vmax.f32 %v1735_v19, %v17974_v63  ;;  %v3534_v39 = vmul.f32 1.442695, %v3467_v31 }
 0x4eb   : > { %17972 = vst [vmem:[#allocation175_spill] sm:$0xff] %v12349_v59  ;;  %v12371_v63 = vpop.eup %9285  ;;  %v17992_v59 = vld [vmem:[#allocation185_spill] sm:$0xff] }
 0x4ec   : > { %3008 = vrot.lane.b32.xlu1 %v12211_v43, %s10112_s30  ;;  %3730 = vrot.lane.b32.xlu0 %v12353_v4, %s10108_s20  ;;  %v12365_v17 = vmax.f32 %v1991_v30, %v17976_v41  ;;  %17979 = vst [vmem:[#allocation89_spill] sm:$0xff] %v12371_v63  ;;  %v17980_v30 = vld [vmem:[#allocation18_spill] sm:$0xff]  ;;  %v12381_v34 = vpop.eup %9287  ;;  %9299 = vpow2.f32 %v3534_v39  ;;  %v2705_v43 = vsub.f32 %v17985_v13, %v11759_v20  ;;  %v18171_v4 = vld [vmem:[#allocation37_spill] sm:$0xff] }
 0x4ed   : > { %v2702_v7 = vsub.f32 %v17980_v30, %v11817_v35  ;;  %v12387_v31 = vpop.eup %9289  ;;  %9301 = vpow2.f32 %v3158_v12  ;;  %v3086_v57 = vsub.f32 %v17980_v30, %v11827_v42  ;;  %v3468_v42 = vsub.f32 %v17954_v32, %v11795_v50 }
 0x4ee   : > { %17977 = vst [vmem:[#allocation177_spill] sm:$0xff] %v12365_v17  ;;  %v12367_v44 = vpop.permute.xlu1 %2970  ;;  %v12369_v19 = vpop.permute.xlu0 %2952  ;;  %9303 = vpow2.f32 %v3532_v46  ;;  %v2778_v20 = vmul.f32 1.442695, %v2705_v43 }
 0x4ef   : > { %17978 = vst [vmem:[#allocation81_spill] sm:$0xff] %v12367_v44  ;;  %v2772_v35 = vmul.f32 1.442695, %v2702_v7  ;;  %v12397_v53 = vpop.eup %9291  ;;  %v3156_v12 = vmul.f32 1.442695, %v3086_v57 }
 0x4f0   : > { %2630 = vrot.lane.b32.xlu1 %v12365_v17, %s10110_s19  ;;  %4050 = vrot.lane.b32.xlu0 %v12371_v63, %s17243_s29  ;;  %v12403_v26 = vpop.eup %9293  ;;  %v3536_v50 = vmul.f32 1.442695, %v3468_v42  ;;  %v17993_v42 = vld [vmem:[#allocation20_spill] sm:$0xff] }
 0x4f1   : > { %9305 = vpow2.f32 %v2772_v35  ;;  %v3471_v35 = vsub.f32 %v17969_v24, %v11805_v11 }
 0x4f2   : > { %v12383_v41 = vpop.permute.xlu1 %2590  ;;  %v12385_v2 = vpop.permute.xlu0 %2572 }
 0x4f3   : > { %17981 = vst [vmem:[#allocation180_spill] sm:$0xff] %v12383_v41  ;;  %17982 = vst [vmem:[#allocation17_spill] sm:$0xff] %v12385_v2  ;;  %v3538_v41 = vmul.f32 1.442695, %v3469_v28  ;;  %v12413_v7 = vpop.eup %9295  ;;  %v3089_v28 = vsub.f32 %v17985_v13, %v11771_v29  ;;  %v3542_v11 = vmul.f32 1.442695, %v3471_v35 }
 0x4f4   : > { %4362 = vrot.lane.b32.xlu1 %v12381_v34, %s10109_s26  ;;  %3728 = vrot.lane.b32.xlu0 %v12387_v31, %s10108_s20  ;;  %v12419_v44 = vpop.eup %9297 }
 0x4f5   : > { %17988 = vst [vmem:[#allocation18_spill] sm:$0xff] %v12419_v44  ;;  %9307 = vpow2.f32 %v3538_v41  ;;  %v3162_v29 = vmul.f32 1.442695, %v3089_v28 }
 0x4f6   : > { %v12399_v17 = vpop.permute.xlu1 %2974  ;;  %v12401_v39 = vpop.permute.xlu0 %2956  ;;  %9309 = vpow2.f32 %v3156_v12  ;;  %v2704_v12 = vsub.f32 %v17993_v42, %v11867_v21 }
 0x4f7   : > { %17983 = vst [vmem:[#allocation112_spill] sm:$0xff] %v12399_v17  ;;  %17984 = vst [vmem:[#allocation118_spill] sm:$0xff] %v12401_v39  ;;  %v12429_v57 = vpop.eup %9299  ;;  %9311 = vpow2.f32 %v2778_v20 }
 0x4f8   : > { %3720 = vrot.lane.b32.xlu1 %v12397_v53, %s10108_s20  ;;  %4048 = vrot.lane.b32.xlu0 %v12403_v26, %s17243_s29  ;;  %v12435_v41 = vpop.eup %9301  ;;  %9313 = vpow2.f32 %v3536_v50  ;;  %v2776_v21 = vmul.f32 1.442695, %v2704_v12  ;;  %v3472_v50 = vsub.f32 %v17993_v42, %v11895_v61 }
 0x4f9   : > { %17991 = vst [vmem:[#allocation199_spill] sm:$0xff] %v12435_v41  ;;  %9315 = vpow2.f32 %v3162_v29 }
 0x4fa   : > { %v12415_v17 = vpop.permute.xlu1 %2594  ;;  %v12417_v46 = vpop.permute.xlu0 %2576  ;;  %9317 = vpow2.f32 %v3542_v11  ;;  %v3544_v61 = vmul.f32 1.442695, %v3472_v50  ;;  %v18001_v11 = vld [vmem:[#allocation22_spill] sm:$0xff] }
 0x4fb   : > { %17986 = vst [vmem:[#allocation97_spill] sm:$0xff] %v12415_v17  ;;  %17987 = vst [vmem:[#allocation178_spill] sm:$0xff] %v12417_v46  ;;  %v3470_v46 = vsub.f32 %v17980_v30, %v17992_v59  ;;  %v2706_v12 = vsub.f32 %v18001_v11, %v11923_v52  ;;  %v3090_v52 = vsub.f32 %v18001_v11, %v11935_v49 }
 0x4fc   : > { %4360 = vrot.lane.b32.xlu1 %v12413_v7, %s10109_s26  ;;  %3734 = vrot.lane.b32.xlu0 %v12419_v44, %s10108_s20  ;;  %v3088_v44 = vsub.f32 %v17993_v42, %v11879_v62  ;;  %v3473_v62 = vsub.f32 %v17985_v13, %v11851_v60 }
 0x4fd   : > { %v3540_v59 = vmul.f32 1.442695, %v3470_v46  ;;  %v3164_v49 = vmul.f32 1.442695, %v3090_v52 }
 0x4fe   : > { %v12431_v17 = vpop.permute.xlu1 %2978  ;;  %v12433_v43 = vpop.permute.xlu0 %2960  ;;  %v3546_v60 = vmul.f32 1.442695, %v3473_v62  ;;  %v18010_v62 = vld [vmem:[#allocation21_spill] sm:$0xff] }
 0x4ff   : > { %17989 = vst [vmem:[#allocation19_spill] sm:$0xff] %v12431_v17  ;;  %17990 = vst [vmem:[#allocation198_spill] sm:$0xff] %v12433_v43  ;;  %v12445_v17 = vpop.eup %9303  ;;  %9319 = vpow2.f32 %v3540_v59 }
 0x500   : > { %4366 = vrot.lane.b32.xlu1 %v12429_v57, %s10109_s26  ;;  %4054 = vrot.lane.b32.xlu0 %v12435_v41, %s17243_s29  ;;  %v12451_v28 = vpop.eup %9305  ;;  %9321 = vpow2.f32 %v2776_v21 }
 0x501   : > { %17996 = vst [vmem:[#allocation200_spill] sm:$0xff] %v12451_v28  ;;  %v12461_v35 = vpop.eup %9307 }
 0x502   : > { %v12447_v43 = vpop.permute.xlu1 %2976  ;;  %v12449_v20 = vpop.permute.xlu0 %2580  ;;  %17997 = vst [vmem:[#allocation201_spill] sm:$0xff] %v12461_v35 }
 0x503   : > { %17994 = vst [vmem:[#allocation185_spill] sm:$0xff] %v12447_v43  ;;  %17995 = vst [vmem:[#allocation20_spill] sm:$0xff] %v12449_v20  ;;  %v12467_v46 = vpop.eup %9309  ;;  %v3160_v20 = vmul.f32 1.442695, %v3088_v44  ;;  %v2780_v44 = vmul.f32 1.442695, %v2706_v12 }
 0x504   : > { %4364 = vrot.lane.b32.xlu1 %v12445_v17, %s10109_s26  ;;  %3732 = vrot.lane.b32.xlu0 %v12451_v28, %s10108_s20  ;;  %18000 = vst [vmem:[#allocation204_spill] sm:$0xff] %v12467_v46  ;;  %v18150_v28 = vld [vmem:[#allocation195_spill] sm:$0xff] }
 0x505   : > { %9323 = vpow2.f32 %v3160_v20  ;;  %v18009_v20 = vld [vmem:[#allocation126_spill] sm:$0xff] }
 0x506   : > { %v12463_v43 = vpop.permute.xlu1 %2598  ;;  %v12465_v29 = vpop.permute.xlu0 %2964  ;;  %9325 = vpow2.f32 %v3544_v61  ;;  %v3474_v61 = vsub.f32 %v18001_v11, %v11951_v33 }
 0x507   : > { %17998 = vst [vmem:[#allocation202_spill] sm:$0xff] %v12463_v43  ;;  %17999 = vst [vmem:[#allocation203_spill] sm:$0xff] %v12465_v29  ;;  %v12477_v43 = vpop.eup %9311  ;;  %9327 = vpow2.f32 %v3546_v60 }
 0x508   : > { %4370 = vrot.lane.b32.xlu1 %v12461_v35, %s10109_s26  ;;  %4052 = vrot.lane.b32.xlu0 %v12467_v46, %s17243_s29  ;;  %18002 = vst [vmem:[#allocation22_spill] sm:$0xff] %v12477_v43  ;;  %v12483_v41 = vpop.eup %9313  ;;  %v2707_v46 = vsub.f32 %v18010_v62, %v18009_v20  ;;  %9329 = vpow2.f32 %v2780_v44  ;;  %v18015_v44 = vld [vmem:[#allocation131_spill] sm:$0xff]  ;;  %v3548_v33 = vmul.f32 1.442695, %v3474_v61  ;;  %v18020_v61 = vld [vmem:[#allocation24_spill] sm:$0xff] }
 0x509   : > { %v12491_v21 = vpop.eup %9315  ;;  %v3091_v52 = vsub.f32 %v18010_v62, %v18015_v44  ;;  %9331 = vpow2.f32 %v3164_v49  ;;  %v2708_v44 = vsub.f32 %v18020_v61, %v11979_v48  ;;  %v3092_v48 = vsub.f32 %v18020_v61, %v11991_v15 }
 0x50a   : > { %v12479_v29 = vpop.permute.xlu1 %2982  ;;  %v12481_v59 = vpop.permute.xlu0 %2584  ;;  %18005 = vst [vmem:[#allocation207_spill] sm:$0xff] %v12491_v21  ;;  %v2782_v60 = vmul.f32 1.442695, %v2707_v46  ;;  %v3475_v46 = vsub.f32 %v18010_v62, %v11907_v0  ;;  %v3476_v15 = vsub.f32 %v18020_v61, %v12009_v56 }
 0x50b   : > { %18003 = vst [vmem:[#allocation205_spill] sm:$0xff] %v12479_v29  ;;  %18004 = vst [vmem:[#allocation206_spill] sm:$0xff] %v12481_v59  ;;  %v12497_v59 = vpop.eup %9317  ;;  %v3166_v49 = vmul.f32 1.442695, %v3091_v52  ;;  %v2784_v52 = vmul.f32 1.442695, %v2708_v44 }
 0x50c   : > { %4368 = vrot.lane.b32.xlu1 %v12483_v41, %s10109_s26  ;;  %3738 = vrot.lane.b32.xlu0 %v12477_v43, %s10108_s20  ;;  %18008 = vst [vmem:[#allocation210_spill] sm:$0xff] %v12497_v59  ;;  %v12507_v12 = vpop.eup %9319  ;;  %9333 = vpow2.f32 %v2782_v60  ;;  %v3550_v0 = vmul.f32 1.442695, %v3475_v46  ;;  %v3552_v56 = vmul.f32 1.442695, %v3476_v15 }
 0x50d   : > { %18011 = vst [vmem:[#allocation126_spill] sm:$0xff] %v12507_v12  ;;  %v12513_v43 = vpop.eup %9321  ;;  %9335 = vpow2.f32 %v3548_v33 }
 0x50e   : > { %v12493_v50 = vpop.permute.xlu1 %2980  ;;  %v12495_v29 = vpop.permute.xlu0 %2968  ;;  %18014 = vst [vmem:[#allocation212_spill] sm:$0xff] %v12513_v43  ;;  %9337 = vpow2.f32 %v3166_v49  ;;  %v3168_v49 = vmul.f32 1.442695, %v3092_v48 }
 0x50f   : > { %18006 = vst [vmem:[#allocation208_spill] sm:$0xff] %v12493_v50  ;;  %18007 = vst [vmem:[#allocation209_spill] sm:$0xff] %v12495_v29  ;;  %v12521_v20 = vpop.eup %9323  ;;  %9339 = vpow2.f32 %v3550_v0  ;;  %v18035_v0 = vld [vmem:[#allocation182_spill] sm:$0xff] }
 0x510   : > { %4374 = vrot.lane.b32.xlu1 %v12497_v59, %s10109_s26  ;;  %4058 = vrot.lane.b32.xlu0 %v12491_v21, %s17243_s29  ;;  %18016 = vst [vmem:[#allocation131_spill] sm:$0xff] %v12521_v20  ;;  %9341 = vpow2.f32 %v2784_v52  ;;  %v18148_v59 = vld [vmem:[#allocation35_spill] sm:$0xff] }
 0x511   : > { %9343 = vpow2.f32 %v3168_v49  ;;  %v18040_v49 = vld [vmem:[#allocation26_spill] sm:$0xff] }
 0x512   : > { %v12509_v50 = vpop.permute.xlu1 %2602  ;;  %v12511_v29 = vpop.permute.xlu0 %2588  ;;  %v2710_v15 = vsub.f32 %v18040_v49, %v12037_v22  ;;  %v3094_v22 = vsub.f32 %v18040_v49, %v12053_v37  ;;  %v3478_v37 = vsub.f32 %v18040_v49, %v12069_v16 }
 0x513   : > { %18012 = vst [vmem:[#allocation21_spill] sm:$0xff] %v12509_v50  ;;  %18013 = vst [vmem:[#allocation211_spill] sm:$0xff] %v12511_v29  ;;  %v12527_v29 = vpop.eup %9325 }
 0x514   : > { %4372 = vrot.lane.b32.xlu1 %v12507_v12, %s10109_s26  ;;  %3736 = vrot.lane.b32.xlu0 %v12513_v43, %s10108_s20  ;;  %18019 = vst [vmem:[#allocation215_spill] sm:$0xff] %v12527_v29  ;;  %v3556_v16 = vmul.f32 1.442695, %v3478_v37 }
 0x516   : > { %v12523_v21 = vpop.permute.xlu1 %2986  ;;  %v12525_v50 = vpop.permute.xlu0 %2972 }
 0x517   : > { %18017 = vst [vmem:[#allocation213_spill] sm:$0xff] %v12523_v21  ;;  %18018 = vst [vmem:[#allocation214_spill] sm:$0xff] %v12525_v50  ;;  %v12537_v21 = vpop.eup %9327 }
 0x518   : > { %4376 = vrot.lane.b32.xlu1 %v12527_v29, %s10109_s26  ;;  %4056 = vrot.lane.b32.xlu0 %v12521_v20, %s17243_s29  ;;  %18021 = vst [vmem:[#allocation24_spill] sm:$0xff] %v12537_v21  ;;  %v12543_v60 = vpop.eup %9329  ;;  %v18029_v20 = vld [vmem:[#allocation23_spill] sm:$0xff] }
 0x519   : > { %18024 = vst [vmem:[#allocation218_spill] sm:$0xff] %v12543_v60  ;;  %v3093_v52 = vsub.f32 %v18029_v20, %v18035_v0 }
 0x51a   : > { %v12539_v50 = vpop.permute.xlu1 %2984  ;;  %v12541_v43 = vpop.permute.xlu0 %2592 }
 0x51b   : > { %18022 = vst [vmem:[#allocation216_spill] sm:$0xff] %v12539_v50  ;;  %18023 = vst [vmem:[#allocation217_spill] sm:$0xff] %v12541_v43  ;;  %v12555_v50 = vpop.eup %9331  ;;  %v18028_v43 = vld [vmem:[#allocation135_spill] sm:$0xff] }
 0x51c   : > { %4378 = vrot.lane.b32.xlu1 %v12537_v21, %s10109_s26  ;;  %3740 = vrot.lane.b32.xlu0 %v12543_v60, %s10108_s20  ;;  %18027 = vst [vmem:[#allocation221_spill] sm:$0xff] %v12555_v50  ;;  %v2709_v46 = vsub.f32 %v18029_v20, %v18028_v43  ;;  %v18030_v21 = vld [vmem:[#allocation143_spill] sm:$0xff]  ;;  %v12565_v44 = vpop.eup %9333 }
 0x51d   : > { %18031 = vst [vmem:[#allocation135_spill] sm:$0xff] %v12565_v44  ;;  %v12571_v60 = vpop.eup %9335 }
 0x51e   : > { %v12551_v33 = vpop.permute.xlu1 %2606  ;;  %v12553_v29 = vpop.permute.xlu0 %2596  ;;  %18034 = vst [vmem:[#allocation223_spill] sm:$0xff] %v12571_v60  ;;  %v2786_v43 = vmul.f32 1.442695, %v2709_v46  ;;  %v3477_v46 = vsub.f32 %v18029_v20, %v11963_v14 }
 0x51f   : > { %18025 = vst [vmem:[#allocation219_spill] sm:$0xff] %v12551_v33  ;;  %18026 = vst [vmem:[#allocation220_spill] sm:$0xff] %v12553_v29 }
 0x520   : > { %3328 = vrot.lane.b32.xlu1 %v18030_v21, %s17245_s10  ;;  %4060 = vrot.lane.b32.xlu0 %v12555_v50, %s17243_s29  ;;  %9345 = vpow2.f32 %v2786_v43  ;;  %v3554_v14 = vmul.f32 1.442695, %v3477_v46 }
 0x521   : > { %9347 = vpow2.f32 %v3552_v56 }
 0x522   : > { %v12567_v33 = vpop.permute.xlu1 %2990  ;;  %v12569_v29 = vpop.permute.xlu0 %2600 }
 0x523   : > { %18032 = vst [vmem:[#allocation23_spill] sm:$0xff] %v12567_v33  ;;  %18033 = vst [vmem:[#allocation222_spill] sm:$0xff] %v12569_v29  ;;  %v12583_v33 = vpop.eup %9337  ;;  %v18039_v29 = vld [vmem:[#allocation125_spill] sm:$0xff] }
 0x524   : > { %4380 = vrot.lane.b32.xlu1 %v12571_v60, %s10109_s26  ;;  %3742 = vrot.lane.b32.xlu0 %v12565_v44, %s10108_s20  ;;  %18038 = vst [vmem:[#allocation225_spill] sm:$0xff] %v12583_v33  ;;  %v3170_v44 = vmul.f32 1.442695, %v3093_v52  ;;  %v12593_v0 = vpop.eup %9339  ;;  %v2788_v52 = vmul.f32 1.442695, %v2710_v15 }
 0x525   : > { %18041 = vst [vmem:[#allocation26_spill] sm:$0xff] %v12593_v0  ;;  %v12599_v43 = vpop.eup %9341 }
 0x526   : > { %v12579_v48 = vpop.permute.xlu1 %2988  ;;  %v12581_v21 = vpop.permute.xlu0 %2604  ;;  %18044 = vst [vmem:[#allocation228_spill] sm:$0xff] %v12599_v43  ;;  %9349 = vpow2.f32 %v3170_v44  ;;  %v3172_v44 = vmul.f32 1.442695, %v3094_v22 }
 0x527   : > { %18036 = vst [vmem:[#allocation182_spill] sm:$0xff] %v12579_v48  ;;  %18037 = vst [vmem:[#allocation224_spill] sm:$0xff] %v12581_v21  ;;  %9351 = vpow2.f32 %v3554_v14  ;;  %v18055_v14 = vld [vmem:[#allocation184_spill] sm:$0xff] }
 0x528   : > { %3330 = vrot.lane.b32.xlu1 %v18039_v29, %s17245_s10  ;;  %4062 = vrot.lane.b32.xlu0 %v12583_v33, %s17243_s29  ;;  %v18049_v33 = vld [vmem:[#allocation25_spill] sm:$0xff]  ;;  %9353 = vpow2.f32 %v2788_v52 }
 0x529   : > { %v3095_v52 = vsub.f32 %v18049_v33, %v18055_v14  ;;  %9355 = vpow2.f32 %v3172_v44  ;;  %v18060_v44 = vld [vmem:[#allocation28_spill] sm:$0xff] }
 0x52a   : > { %v12595_v48 = vpop.permute.xlu1 %2610  ;;  %v12597_v21 = vpop.permute.xlu0 %2608  ;;  %v2712_v37 = vsub.f32 %v18060_v44, %v12093_v55  ;;  %v3096_v55 = vsub.f32 %v18060_v44, %v12105_v9  ;;  %v3480_v9 = vsub.f32 %v18060_v44, %v12115_v51 }
 0x52b   : > { %18042 = vst [vmem:[#allocation226_spill] sm:$0xff] %v12595_v48  ;;  %18043 = vst [vmem:[#allocation227_spill] sm:$0xff] %v12597_v21  ;;  %v12611_v48 = vpop.eup %9343  ;;  %v18048_v21 = vld [vmem:[#allocation139_spill] sm:$0xff] }
 0x52c   : > { %4382 = vrot.lane.b32.xlu1 %v12593_v0, %s10109_s26  ;;  %3744 = vrot.lane.b32.xlu0 %v12599_v43, %s10108_s20  ;;  %18047 = vst [vmem:[#allocation231_spill] sm:$0xff] %v12611_v48  ;;  %v2711_v46 = vsub.f32 %v18049_v33, %v18048_v21  ;;  %v18050_v0 = vld [vmem:[#allocation147_spill] sm:$0xff]  ;;  %v12621_v15 = vpop.eup %9345  ;;  %v3560_v51 = vmul.f32 1.442695, %v3480_v9 }
 0x52d   : > { %18051 = vst [vmem:[#allocation139_spill] sm:$0xff] %v12621_v15  ;;  %v12627_v43 = vpop.eup %9347 }
 0x52e   : > { %v12607_v56 = vpop.permute.xlu1 %2994  ;;  %v12609_v29 = vpop.permute.xlu0 %2612  ;;  %18054 = vst [vmem:[#allocation233_spill] sm:$0xff] %v12627_v43  ;;  %v2790_v21 = vmul.f32 1.442695, %v2711_v46  ;;  %v3479_v46 = vsub.f32 %v18049_v33, %v12023_v8 }
 0x52f   : > { %18045 = vst [vmem:[#allocation229_spill] sm:$0xff] %v12607_v56  ;;  %18046 = vst [vmem:[#allocation230_spill] sm:$0xff] %v12609_v29 }
 0x530   : > { %3332 = vrot.lane.b32.xlu1 %v18050_v0, %s17245_s10  ;;  %4064 = vrot.lane.b32.xlu0 %v12611_v48, %s17243_s29  ;;  %9357 = vpow2.f32 %v2790_v21  ;;  %v3558_v8 = vmul.f32 1.442695, %v3479_v46 }
 0x531   : > { %9359 = vpow2.f32 %v3556_v16 }
 0x532   : > { %v12623_v29 = vpop.permute.xlu1 %2992  ;;  %v12625_v56 = vpop.permute.xlu0 %2616 }
 0x533   : > { %18052 = vst [vmem:[#allocation25_spill] sm:$0xff] %v12623_v29  ;;  %18053 = vst [vmem:[#allocation232_spill] sm:$0xff] %v12625_v56  ;;  %v12639_v29 = vpop.eup %9349  ;;  %v18059_v56 = vld [vmem:[#allocation127_spill] sm:$0xff] }
 0x534   : > { %4384 = vrot.lane.b32.xlu1 %v12627_v43, %s10109_s26  ;;  %3746 = vrot.lane.b32.xlu0 %v12621_v15, %s10108_s20  ;;  %18058 = vst [vmem:[#allocation235_spill] sm:$0xff] %v12639_v29  ;;  %v3174_v15 = vmul.f32 1.442695, %v3095_v52  ;;  %v12649_v14 = vpop.eup %9351  ;;  %v2792_v52 = vmul.f32 1.442695, %v2712_v37  ;;  %v18085_v43 = vld [vmem:[#allocation29_spill] sm:$0xff] }
 0x535   : > { %18061 = vst [vmem:[#allocation236_spill] sm:$0xff] %v12649_v14  ;;  %v12655_v21 = vpop.eup %9353 }
 0x536   : > { %v12635_v22 = vpop.permute.xlu1 %2614  ;;  %v12637_v0 = vpop.permute.xlu0 %2620  ;;  %18064 = vst [vmem:[#allocation239_spill] sm:$0xff] %v12655_v21  ;;  %9361 = vpow2.f32 %v3174_v15  ;;  %v3176_v15 = vmul.f32 1.442695, %v3096_v55 }
 0x537   : > { %18056 = vst [vmem:[#allocation184_spill] sm:$0xff] %v12635_v22  ;;  %18057 = vst [vmem:[#allocation234_spill] sm:$0xff] %v12637_v0  ;;  %9363 = vpow2.f32 %v3558_v8  ;;  %v18073_v8 = vld [vmem:[#allocation130_spill] sm:$0xff] }
 0x538   : > { %3334 = vrot.lane.b32.xlu1 %v18059_v56, %s17245_s10  ;;  %4066 = vrot.lane.b32.xlu0 %v12639_v29, %s17243_s29  ;;  %v18069_v29 = vld [vmem:[#allocation27_spill] sm:$0xff]  ;;  %9365 = vpow2.f32 %v2792_v52 }
 0x539   : > { %v3097_v52 = vsub.f32 %v18069_v29, %v18073_v8  ;;  %9367 = vpow2.f32 %v3176_v15  ;;  %v18077_v15 = vld [vmem:[#allocation30_spill] sm:$0xff] }
 0x53a   : > { %v12651_v0 = vpop.permute.xlu1 %2998  ;;  %v12653_v22 = vpop.permute.xlu0 %2624  ;;  %v2714_v9 = vsub.f32 %v18077_v15, %v12131_v10  ;;  %v3098_v10 = vsub.f32 %v18077_v15, %v12149_v23  ;;  %v18086_v23 = vld [vmem:[#allocation138_spill] sm:$0xff] }
 0x53b   : > { %18062 = vst [vmem:[#allocation237_spill] sm:$0xff] %v12651_v0  ;;  %18063 = vst [vmem:[#allocation238_spill] sm:$0xff] %v12653_v22  ;;  %v12667_v0 = vpop.eup %9355  ;;  %v18068_v22 = vld [vmem:[#allocation128_spill] sm:$0xff] }
 0x53c   : > { %4386 = vrot.lane.b32.xlu1 %v12649_v14, %s10109_s26  ;;  %3748 = vrot.lane.b32.xlu0 %v12655_v21, %s10108_s20  ;;  %18067 = vst [vmem:[#allocation242_spill] sm:$0xff] %v12667_v0  ;;  %v2713_v46 = vsub.f32 %v18069_v29, %v18068_v22  ;;  %v12677_v37 = vpop.eup %9357  ;;  %v18084_v14 = vld [vmem:[#allocation132_spill] sm:$0xff] }
 0x53d   : > { %18070 = vst [vmem:[#allocation128_spill] sm:$0xff] %v12677_v37  ;;  %v12683_v21 = vpop.eup %9359 }
 0x53e   : > { %v12663_v16 = vpop.permute.xlu1 %2996  ;;  %v12665_v56 = vpop.permute.xlu0 %2628  ;;  %18072 = vst [vmem:[#allocation244_spill] sm:$0xff] %v12683_v21  ;;  %v2794_v22 = vmul.f32 1.442695, %v2713_v46  ;;  %v3481_v46 = vsub.f32 %v18069_v29, %v12079_v58  ;;  %v18153_v29 = vld [vmem:[#allocation65_spill] sm:$0xff] }
 0x53f   : > { %18065 = vst [vmem:[#allocation240_spill] sm:$0xff] %v12663_v16  ;;  %18066 = vst [vmem:[#allocation241_spill] sm:$0xff] %v12665_v56 }
 0x540   : > { %3336 = vrot.lane.b32.xlu1 %v11916_v40, %s17245_s10  ;;  %4068 = vrot.lane.b32.xlu0 %v12667_v0, %s17243_s29  ;;  %9369 = vpow2.f32 %v2794_v22  ;;  %v3562_v58 = vmul.f32 1.442695, %v3481_v46 }
 0x541   : > { %9371 = vpow2.f32 %v3560_v51 }
 0x542   : > { %v12679_v56 = vpop.permute.xlu1 %2618  ;;  %v12681_v16 = vpop.permute.xlu0 %3722 }
 0x543   : > { %18071 = vst [vmem:[#allocation243_spill] sm:$0xff] %v12679_v56  ;;  %v12695_v56 = vpop.eup %9361 }
 0x544   : > { %4388 = vrot.lane.b32.xlu1 %v12683_v21, %s10109_s26  ;;  %3750 = vrot.lane.b32.xlu0 %v12677_v37, %s10108_s20  ;;  %18075 = vst [vmem:[#allocation245_spill] sm:$0xff] %v12695_v56  ;;  %v18076_v21 = vld [vmem:[#allocation181_spill] sm:$0xff]  ;;  %v3178_v37 = vmul.f32 1.442695, %v3097_v52  ;;  %v12705_v8 = vpop.eup %9363  ;;  %v2796_v52 = vmul.f32 1.442695, %v2714_v9 }
 0x545   : > { %18078 = vst [vmem:[#allocation246_spill] sm:$0xff] %v12705_v8  ;;  %v12711_v22 = vpop.eup %9365  ;;  %v3180_v9 = vmul.f32 1.442695, %v3098_v10 }
 0x546   : > { %v12691_v55 = vpop.permute.xlu1 %3002  ;;  %v12693_v40 = vpop.permute.xlu0 %4042  ;;  %18080 = vst [vmem:[#allocation248_spill] sm:$0xff] %v12711_v22  ;;  %9373 = vpow2.f32 %v3178_v37  ;;  %v3482_v37 = vsub.f32 %v18077_v15, %v18086_v23 }
 0x547   : > { %18074 = vst [vmem:[#allocation130_spill] sm:$0xff] %v12691_v55  ;;  %9375 = vpow2.f32 %v3562_v58 }
 0x548   : > { %3338 = vrot.lane.b32.xlu1 %v18076_v21, %s17245_s10  ;;  %4070 = vrot.lane.b32.xlu0 %v12695_v56, %s17243_s29  ;;  %v18083_v56 = vld [vmem:[#allocation156_spill] sm:$0xff]  ;;  %9377 = vpow2.f32 %v2796_v52  ;;  %v3564_v10 = vmul.f32 1.442695, %v3482_v37 }
 0x549   : > { %v2249_v46 = vsub.f32 %v17894_v27, %v18083_v56  ;;  %9379 = vpow2.f32 %v3180_v9  ;;  %v18096_v37 = vld [vmem:[#allocation32_spill] sm:$0xff] }
 0x54a   : > { %v12707_v55 = vpop.permute.xlu1 %3000  ;;  %v12709_v0 = vpop.permute.xlu0 %4040  ;;  %v2716_v9 = vsub.f32 %v18096_v37, %v12163_v38 }
 0x54b   : > { %18079 = vst [vmem:[#allocation247_spill] sm:$0xff] %v12707_v55  ;;  %v12723_v55 = vpop.eup %9367 }
 0x54c   : > { %4390 = vrot.lane.b32.xlu1 %v12705_v8, %s10109_s26  ;;  %3752 = vrot.lane.b32.xlu0 %v12711_v22, %s10108_s20  ;;  %18082 = vst [vmem:[#allocation250_spill] sm:$0xff] %v12723_v55  ;;  %v2715_v8 = vsub.f32 %v18085_v43, %v18084_v14  ;;  %v2314_v14 = vmul.f32 1.442695, %v2249_v46  ;;  %v18093_v46 = vld [vmem:[#allocation157_spill] sm:$0xff]  ;;  %v2800_v38 = vmul.f32 1.442695, %v2716_v9 }
 0x54e   : > { %v12719_v51 = vpop.permute.xlu1 %2622  ;;  %v12721_v21 = vpop.permute.xlu0 %3726  ;;  %v2798_v58 = vmul.f32 1.442695, %v2715_v8  ;;  %9381 = vpow2.f32 %v2314_v14  ;;  %v2248_v8 = vsub.f32 %v17913_v3, %v18093_v46  ;;  %v18100_v46 = vld [vmem:[#allocation159_spill] sm:$0xff] }
 0x54f   : > { %18081 = vst [vmem:[#allocation249_spill] sm:$0xff] %v12719_v51  ;;  %v12735_v51 = vpop.eup %9369 }
 0x550   : > { %3340 = vrot.lane.b32.xlu1 %v11944_v5, %s17245_s10  ;;  %4072 = vrot.lane.b32.xlu0 %v12723_v55, %s17243_s29  ;;  %18087 = vst [vmem:[#allocation156_spill] sm:$0xff] %v12735_v51  ;;  %v12741_v56 = vpop.eup %9371  ;;  %v18090_v5 = vld [vmem:[#allocation134_spill] sm:$0xff]  ;;  %9383 = vpow2.f32 %v2798_v58 }
 0x551   : > { %18089 = vst [vmem:[#allocation138_spill] sm:$0xff] %v12741_v56  ;;  %v3099_v52 = vsub.f32 %v18085_v43, %v18090_v5  ;;  %v12753_v55 = vpop.eup %9373  ;;  %9385 = vpow2.f32 %v3564_v10  ;;  %v18101_v10 = vld [vmem:[#allocation161_spill] sm:$0xff] }
 0x552   : > { %v12737_v22 = vpop.permute.xlu1 %3006  ;;  %v12739_v27 = vpop.permute.xlu0 %4046  ;;  %18092 = vst [vmem:[#allocation251_spill] sm:$0xff] %v12753_v55 }
 0x553   : > { %18088 = vst [vmem:[#allocation132_spill] sm:$0xff] %v12737_v22  ;;  %v3182_v5 = vmul.f32 1.442695, %v3099_v52  ;;  %v3100_v52 = vsub.f32 %v18096_v37, %v12181_v36 }
 0x554   : > { %4392 = vrot.lane.b32.xlu1 %v12741_v56, %s10109_s26  ;;  %3754 = vrot.lane.b32.xlu0 %v12735_v51, %s10108_s20  ;;  %v18094_v56 = vld [vmem:[#allocation136_spill] sm:$0xff]  ;;  %v18095_v51 = vld [vmem:[#allocation183_spill] sm:$0xff] }
 0x555   : > { %v3483_v48 = vsub.f32 %v18085_v43, %v18094_v56  ;;  %v2312_v56 = vmul.f32 1.442695, %v2248_v8  ;;  %9387 = vpow2.f32 %v3182_v5  ;;  %v18106_v5 = vld [vmem:[#allocation186_spill] sm:$0xff] }
 0x556   : > { %v12749_v23 = vpop.permute.xlu1 %3004  ;;  %v12751_v22 = vpop.permute.xlu0 %3724  ;;  %v3484_v9 = vsub.f32 %v18096_v37, %v18106_v5  ;;  %v18140_v37 = vld [vmem:[#allocation153_spill] sm:$0xff] }
 0x557   : > { %18091 = vst [vmem:[#allocation134_spill] sm:$0xff] %v12749_v23  ;;  %v12765_v23 = vpop.eup %9375  ;;  %v3566_v60 = vmul.f32 1.442695, %v3483_v48  ;;  %9389 = vpow2.f32 %v2312_v56  ;;  %v18104_v48 = vld [vmem:[#allocation154_spill] sm:$0xff] }
 0x558   : > { %3342 = vrot.lane.b32.xlu1 %v18095_v51, %s17245_s10  ;;  %4074 = vrot.lane.b32.xlu0 %v12753_v55, %s17243_s29  ;;  %18097 = vst [vmem:[#allocation157_spill] sm:$0xff] %v12765_v23  ;;  %v12771_v58 = vpop.eup %9377  ;;  %v2251_v51 = vsub.f32 %v17920_v6, %v18100_v46  ;;  %v18105_v46 = vld [vmem:[#allocation31_spill] sm:$0xff] }
 0x559   : > { %18099 = vst [vmem:[#allocation252_spill] sm:$0xff] %v12771_v58  ;;  %v12787_v6 = vpop.eup %9379  ;;  %9391 = vpow2.f32 %v3566_v60 }
 0x55a   : > { %v12767_v14 = vpop.permute.xlu1 %2626  ;;  %v12769_v3 = vpop.permute.xlu0 %4044  ;;  %18103 = vst [vmem:[#allocation161_spill] sm:$0xff] %v12787_v6  ;;  %v2318_v50 = vmul.f32 1.442695, %v2251_v51  ;;  %9393 = vpow2.f32 %v2800_v38 }
 0x55b   : > { %18098 = vst [vmem:[#allocation136_spill] sm:$0xff] %v12767_v14  ;;  %v2250_v14 = vsub.f32 %v17933_v25, %v18101_v10  ;;  %v12797_v36 = vpop.eup %9381  ;;  %v3184_v25 = vmul.f32 1.442695, %v3100_v52  ;;  %v18112_v52 = vld [vmem:[#allocation165_spill] sm:$0xff] }
 0x55c   : > { %4394 = vrot.lane.b32.xlu1 %v12765_v23, %s10109_s26  ;;  %3756 = vrot.lane.b32.xlu0 %v12771_v58, %s10108_s20  ;;  %v2717_v23 = vsub.f32 %v18105_v46, %v18104_v48  ;;  %v12799_v10 = vpop.eup %9383  ;;  %v3913_v5 = vadd.f32 %v12797_v36, %v12681_v16  ;;  %9395 = vpow2.f32 %v2318_v50  ;;  %v3568_v58 = vmul.f32 1.442695, %v3484_v9 }
 0x55d   : > { %18107 = vst [vmem:[#allocation154_spill] sm:$0xff] %v12799_v10  ;;  %v2316_v56 = vmul.f32 1.442695, %v2250_v14  ;;  %v12805_v60 = vpop.eup %9385  ;;  %v18111_v14 = vld [vmem:[#allocation142_spill] sm:$0xff]  ;;  %9397 = vpow2.f32 %v3184_v25  ;;  %v2252_v16 = vsub.f32 %v17954_v32, %v18112_v52 }
 0x55e   : > { %v12783_v55 = vpop.permute.xlu1 %3008  ;;  %v12785_v8 = vpop.permute.xlu0 %3730  ;;  %18109 = vst [vmem:[#allocation253_spill] sm:$0xff] %v12805_v60  ;;  %v2802_v48 = vmul.f32 1.442695, %v2717_v23  ;;  %v3101_v38 = vsub.f32 %v18105_v46, %v18111_v14  ;;  %v4233_v23 = vadd.f32 %v12693_v40, %v3913_v5  ;;  %v18115_v25 = vld [vmem:[#allocation34_spill] sm:$0xff]  ;;  %v18116_v40 = vld [vmem:[#allocation129_spill] sm:$0xff] }
 0x55f   : > { %18102 = vst [vmem:[#allocation159_spill] sm:$0xff] %v12783_v55  ;;  %9399 = vpow2.f32 %v2316_v56  ;;  %v2718_v14 = vsub.f32 %v18115_v25, %v12201_v18  ;;  %v2320_v5 = vmul.f32 1.442695, %v2252_v16 }
 0x560   : > { %3344 = vrot.lane.b32.xlu1 %v11972_v47, %s17245_s10  ;;  %4076 = vrot.lane.b32.xlu0 %v12787_v6, %s17243_s29  ;;  %v18110_v47 = vld [vmem:[#allocation160_spill] sm:$0xff]  ;;  %9401 = vpow2.f32 %v2802_v48  ;;  %v3186_v56 = vmul.f32 1.442695, %v3101_v38 }
 0x561   : > { %v2253_v6 = vsub.f32 %v17943_v54, %v18110_v47  ;;  %v12822_v47 = vpop.eup %9387  ;;  %v18114_v54 = vld [vmem:[#allocation144_spill] sm:$0xff]  ;;  %9403 = vpow2.f32 %v3568_v58 }
 0x562   : > { %v12801_v55 = vpop.permute.xlu1 %2630  ;;  %v12803_v51 = vpop.permute.xlu0 %4050  ;;  %18113 = vst [vmem:[#allocation160_spill] sm:$0xff] %v12822_v47  ;;  %v3485_v9 = vsub.f32 %v18105_v46, %v18114_v54 }
 0x563   : > { %18108 = vst [vmem:[#allocation186_spill] sm:$0xff] %v12801_v55  ;;  %v12832_v32 = vpop.eup %9389 }
 0x564   : > { %3758 = vrot.lane.b32.xlu1 %v12799_v10, %s10108_s20  ;;  %4396 = vrot.lane.b32.xlu0 %v12805_v60, %s10109_s26  ;;  %v2322_v60 = vmul.f32 1.442695, %v2253_v6  ;;  %v12834_v48 = vpop.eup %9391  ;;  %v3570_v6 = vmul.f32 1.442695, %v3485_v9 }
 0x565   : > { %18117 = vst [vmem:[#allocation142_spill] sm:$0xff] %v12834_v48  ;;  %v12838_v58 = vpop.eup %9393 }
 0x566   : > { %v4363_v50 = vpop.permute.xlu1 %4362  ;;  %v12820_v55 = vpop.permute.xlu0 %3728  ;;  %18118 = vst [vmem:[#allocation165_spill] sm:$0xff] %v12838_v58 }
 0x567   : > { %v4553_v10 = vadd.f32 %v4363_v50, %v4233_v23  ;;  %v18119_v50 = vld [vmem:[#allocation162_spill] sm:$0xff]  ;;  %v12848_v38 = vpop.eup %9395 }
 0x568   : > { %4078 = vrot.lane.b32.xlu1 %v12822_v47, %s17243_s29  ;;  %3346 = vrot.lane.b32.xlu0 %v18116_v40, %s17245_s10  ;;  %v2255_v54 = vsub.f32 %v17969_v24, %v18119_v50  ;;  %v2804_v40 = vmul.f32 1.442695, %v2718_v14  ;;  %v3915_v24 = vadd.f32 %v12848_v38, %v12721_v21 }
 0x569   : > { %9405 = vrcp.f32 %v4553_v10 }
 0x56a   : > { %v3721_v52 = vpop.permute.xlu1 %3720  ;;  %v12836_v23 = vpop.permute.xlu0 %4048  ;;  %9407 = vpow2.f32 %v2322_v60  ;;  %v2326_v50 = vmul.f32 1.442695, %v2255_v54 }
 0x56b   : > { %v3912_v18 = vadd.f32 %v12832_v32, %v3721_v52  ;;  %9409 = vpow2.f32 %v3186_v56  ;;  %v12852_v60 = vpop.eup %9397 }
 0x56c   : > { %4398 = vrot.lane.b32.xlu1 %v12834_v48, %s10109_s26  ;;  %3760 = vrot.lane.b32.xlu0 %v12838_v58, %s10108_s20  ;;  %9411 = vpow2.f32 %v2320_v5  ;;  %18120 = vst [vmem:[#allocation144_spill] sm:$0xff] %v12852_v60  ;;  %v12856_v52 = vpop.eup %9399  ;;  %v18121_v58 = vld [vmem:[#allocation60_spill] sm:$0xff] }
 0x56d   : > { %v4232_v10 = vadd.f32 %v12709_v0, %v3912_v18  ;;  %9413 = vpow2.f32 %v3570_v6  ;;  %v2254_v56 = vsub.f32 %v17980_v30, %v18121_v58  ;;  %v18122_v0 = vld [vmem:[#allocation149_spill] sm:$0xff]  ;;  %v12864_v5 = vpop.eup %9401  ;;  %v4235_v6 = vadd.f32 %v12739_v27, %v3915_v24 }
 0x56e   : > { %v4361_v16 = vpop.permute.xlu1 %4360  ;;  %v12850_v9 = vpop.permute.xlu0 %3734  ;;  %9415 = vpow2.f32 %v2804_v40  ;;  %18123 = vst [vmem:[#allocation162_spill] sm:$0xff] %v12864_v5  ;;  %v3914_v30 = vadd.f32 %v12856_v52, %v12751_v22 }
 0x56f   : > { %v4552_v14 = vadd.f32 %v4361_v16, %v4232_v10  ;;  %v12867_v21 = vpop.eup %9403  ;;  %v2324_v58 = vmul.f32 1.442695, %v2254_v56 }
 0x570   : > { %3348 = vrot.lane.b32.xlu1 %v18122_v0, %s17245_s10  ;;  %4080 = vrot.lane.b32.xlu0 %v12852_v60, %s17243_s29  ;;  %18124 = vst [vmem:[#allocation60_spill] sm:$0xff] %v12867_v21  ;;  %v4234_v16 = vadd.f32 %v12769_v3, %v3914_v30 }
 0x571   : > { %9417 = vrcp.f32 %v4552_v14 }
 0x572   : > { %v4367_v18 = vpop.permute.xlu1 %4366  ;;  %v12869_v10 = vpop.permute.xlu0 %4054  ;;  %9419 = vpow2.f32 %v2326_v50 }
 0x573   : > { %v12871_v54 = vpop.eup %9405  ;;  %v4555_v40 = vadd.f32 %v4367_v18, %v4235_v6 }
 0x574   : > { %3762 = vrot.lane.b32.xlu1 %v12864_v5, %s10108_s20  ;;  %4400 = vrot.lane.b32.xlu0 %v12867_v21, %s10109_s26  ;;  %v12881_v27 = vmul.f32 %v12871_v54, %v12797_v36  ;;  %v12884_v24 = vpop.eup %9407  ;;  %v18126_v36 = vld [vmem:[#allocation133_spill] sm:$0xff] }
 0x575   : > { %9421 = vrcp.f32 %v4555_v40  ;;  %v12886_v6 = vpop.eup %9409  ;;  %v3917_v50 = vadd.f32 %v12884_v24, %v12785_v8  ;;  %v5837_v40 = vld [vmem:[%s16965_s3 + $0x8] sm:$0xff] }
 0x576   : > { %v4365_v14 = vpop.permute.xlu1 %4364  ;;  %v3733_v22 = vpop.permute.xlu0 %3732  ;;  %18125 = vst [vmem:[#allocation254_spill] sm:$0xff] %v12886_v6  ;;  %9423 = vpow2.f32 %v2324_v58  ;;  %v5841_v8 = vld [vmem:[%s16965_s3 + $0x28] sm:$0xff]  ;;  %v5839_v58 = vld [vmem:[%s16965_s3 + $0x18] sm:$0xff] }
 0x577   : > { %v4554_v56 = vadd.f32 %v4365_v14, %v4234_v16  ;;  %v12890_v18 = vpop.eup %9411  ;;  %v4237_v30 = vadd.f32 %v12803_v51, %v3917_v50  ;;  %v8871_v0 = vpack.c.bf16 %v5841_v8, %v5837_v40  ;;  %v5843_v51 = vld [vmem:[%s16965_s3 + $0x38] sm:$0xff]  ;;  %v5836_v50 = vld [vmem:[%s16965_s3] sm:$0xff]  ;;  %v5838_v40 = vld [vmem:[%s16965_s3 + $0x10] sm:$0xff] }
 0x578   : > { %4082 = vrot.lane.b32.xlu1 %v12886_v6, %s17243_s29  ;;  %3350 = vrot.lane.b32.xlu0 %v18126_v36, %s17245_s10  ;;  %v12896_v3 = vpop.eup %9413  ;;  %v3916_v5 = vadd.f32 %v12890_v18, %v12820_v55  ;;  %v8875_v60 = vpack.c.bf16 %v5843_v51, %v5839_v58  ;;  %v5842_v8 = vld [vmem:[%s16965_s3 + $0x30] sm:$0xff]  ;;  %s18129_s10 = smov 12  }
 0x579   : > { %18127 = vst [vmem:[#allocation255_spill] sm:$0xff] %v12896_v3  ;;  %9425 = vrcp.f32 %v4554_v56  ;;  %v12908_v16 = vpop.eup %9415  ;;  %v5840_v56 = vld [vmem:[%s16965_s3 + $0x20] sm:$0xff]  ;;  %v8877_v55 = vpack.c.bf16 %v5842_v8, %v5838_v40  ;;  %8872 = vmatprep.subr.bf16.mxu1 %v8871_v0 }
 0x57a   : > { %18128 = vst [vmem:[#allocation256_spill] sm:$0xff] %v12908_v16  ;;  %v4371_v14 = vpop.permute.xlu1 %4370  ;;  %v4053_v36 = vpop.permute.xlu0 %4052  ;;  %v8873_v47 = vpack.c.bf16 %v5840_v56, %v5836_v50  ;;  %8876 = vmatprep.subr.bf16.mxu0 %v8875_v60 }
 0x57b   : > { %v9418_v6 = vpop.eup %9417  ;;  %v4557_v21 = vadd.f32 %v4371_v14, %v4237_v30  ;;  %v4236_v30 = vadd.f32 %v12836_v23, %v3916_v5  ;;  %8878 = vmatpush1.bf16.msra.mxu0 %v8877_v55 }
 0x57c   : > { %4402 = vrot.lane.b32.xlu1 %v12896_v3, %s10109_s26  ;;  %3764 = vrot.lane.b32.xlu0 %v12908_v16, %s10108_s20  ;;  %v12932_v48 = vmul.f32 %v9418_v6, %v12832_v32  ;;  %v9420_v58 = vpop.eup %9419  ;;  %v17255_v16 = vmov 0.0  }
 0x57d   : > { %9427 = vrcp.f32 %v4557_v21  ;;  %8874 = vmatpush1.bf16.msra.mxu1 %v8873_v47  ;;  %v3919_v56 = vadd.f32 %v9420_v58, %v12850_v9  ;;  %6100 = vmatprep.mubr.f32.mxu1 %v17255_v16 }
 0x57e   : > { %v4369_v14 = vpop.permute.xlu1 %4368  ;;  %v12935_v51 = vpop.permute.xlu0 %3738  ;;  %6549 = vmatprep.mubr.f32.mxu0 %v17255_v16 }
 0x57f   : > { %v9422_v50 = vpop.eup %9421  ;;  %v4556_v3 = vadd.f32 %v4369_v14, %v4236_v30  ;;  %v4239_v47 = vadd.f32 %v12869_v10, %v3919_v56  ;;  %v18133_v14 = vld [vmem:[#allocation33_spill] sm:$0xff] }
 0x580   : > { %5066 = vrot.lane.b32.xlu0 %v12871_v54, %s10112_s30  ;;  %4810 = vrot.lane.b32.xlu1 %v12871_v54, %s10110_s19  ;;  %v12945_v32 = vmul.f32 %v9422_v50, %v12848_v38  ;;  %v9424_v23 = vpop.eup %9423  ;;  %v18130_v38 = vld [vmem:[#allocation88_spill] sm:$0xff] }
 0x581   : > { %9429 = vrcp.f32 %v4556_v3  ;;  %v3918_v5 = vadd.f32 %v9424_v23, %v3733_v22  ;;  %v3102_v8 = vsub.f32 %v18115_v25, %v18130_v38 }
 0x582   : > { %v4375_v9 = vpop.permute.xlu1 %4374  ;;  %v12948_v60 = vpop.permute.xlu0 %4058 }
 0x583   : > { %v9426_v0 = vpop.eup %9425  ;;  %v4559_v21 = vadd.f32 %v4375_v9, %v4239_v47  ;;  %v4238_v10 = vadd.f32 %v4053_v36, %v3918_v5  ;;  %v3188_v47 = vmul.f32 1.442695, %v3102_v8 }
 0x584   : > { %5322 = vrot.lane.b32.xlu1 %v12871_v54, %s18129_s10  ;;  %4808 = vrot.lane.b32.xlu0 %v9418_v6, %s10110_s19  ;;  %v12954_v40 = vmul.f32 %v9426_v0, %v12856_v52  ;;  %v18132_v52 = vld [vmem:[#allocation148_spill] sm:$0xff] }
 0x585   : > { %9431 = vrcp.f32 %v4559_v21  ;;  %v2719_v56 = vsub.f32 %v18133_v14, %v18132_v52 }
 0x586   : > { %v4373_v3 = vpop.permute.xlu1 %4372  ;;  %v12958_v55 = vpop.permute.xlu0 %3736 }
 0x587   : > { %v12960_v30 = vpop.eup %9427  ;;  %v4558_v22 = vadd.f32 %v4373_v3, %v4238_v10  ;;  %v2806_v21 = vmul.f32 1.442695, %v2719_v56 }
 0x588   : > { %5064 = vrot.lane.b32.xlu1 %v9418_v6, %s10112_s30  ;;  %5320 = vrot.lane.b32.xlu0 %v9418_v6, %s18129_s10  ;;  %v12966_v54 = vmul.f32 %v12960_v30, %v12884_v24  ;;  %v18134_v24 = vld [vmem:[#allocation155_spill] sm:$0xff] }
 0x589   : > { %9433 = vrcp.f32 %v4558_v22  ;;  %v3486_v38 = vsub.f32 %v18115_v25, %v18134_v24 }
 0x58a   : > { %18131 = vst [vmem:[#allocation88_spill] sm:$0xff] %v12966_v54  ;;  %v12970_v36 = vpop.permute.xlu1 %4376  ;;  %v12972_v9 = vpop.permute.xlu0 %4056  ;;  %9435 = vpow2.f32 %v3188_v47  ;;  %v2256_v54 = vsub.f32 %v17993_v42, %v18153_v29 }
 0x58b   : > { %v9430_v5 = vpop.eup %9429  ;;  %9437 = vpow2.f32 %v2806_v21  ;;  %v3572_v56 = vmul.f32 1.442695, %v3486_v38 }
 0x58c   : > { %4814 = vrot.lane.b32.xlu1 %v9422_v50, %s10110_s19  ;;  %4812 = vrot.lane.b32.xlu0 %v9426_v0, %s10110_s19  ;;  %v12977_v6 = vmul.f32 %v9430_v5, %v12890_v18  ;;  %v18136_v18 = vld [vmem:[#allocation187_spill] sm:$0xff]  ;;  %v2328_v2 = vmul.f32 1.442695, %v2256_v54  ;;  %v18157_v54 = vld [vmem:[#allocation158_spill] sm:$0xff] }
 0x58d   : > { %v3103_v52 = vsub.f32 %v18133_v14, %v18136_v18  ;;  %9439 = vpow2.f32 %v3572_v56  ;;  %v18139_v18 = vld [vmem:[#allocation188_spill] sm:$0xff] }
 0x58e   : > { %v12981_v10 = vpop.permute.xlu1 %4378  ;;  %v12983_v8 = vpop.permute.xlu0 %3740  ;;  %v3487_v46 = vsub.f32 %v18133_v14, %v18139_v18 }
 0x58f   : > { %v12985_v3 = vpop.eup %9431 }
 0x590   : > { %5068 = vrot.lane.b32.xlu1 %v9426_v0, %s10112_s30  ;;  %5324 = vrot.lane.b32.xlu0 %v9426_v0, %s18129_s10  ;;  %v12990_v22 = vmul.f32 %v12985_v3, %v9420_v58  ;;  %v3190_v58 = vmul.f32 1.442695, %v3103_v52 }
 0x592   : > { %18135 = vst [vmem:[#allocation148_spill] sm:$0xff] %v12990_v22  ;;  %v12994_v24 = vpop.permute.xlu1 %3328  ;;  %v12996_v47 = vpop.permute.xlu0 %4060  ;;  %9441 = vpow2.f32 %v3190_v58  ;;  %v3574_v22 = vmul.f32 1.442695, %v3487_v46 }
 0x593   : > { %v12998_v16 = vpop.eup %9433 }
 0x594   : > { %5326 = vrot.lane.b32.xlu1 %v9422_v50, %s18129_s10  ;;  %5070 = vrot.lane.b32.xlu0 %v9422_v50, %s10112_s30  ;;  %v13003_v0 = vmul.f32 %v12998_v16, %v9424_v23  ;;  %v13009_v38 = vpop.eup %9435  ;;  %v18142_v50 = vld [vmem:[#allocation36_spill] sm:$0xff]  ;;  %9443 = vpow2.f32 %v3574_v22  ;;  %v18147_v22 = vld [vmem:[#allocation190_spill] sm:$0xff] }
 0x595   : > { %18138 = vst [vmem:[#allocation187_spill] sm:$0xff] %v13009_v38  ;;  %v2720_v23 = vsub.f32 %v18142_v50, %v12233_v1  ;;  %v13023_v43 = vpop.eup %9437  ;;  %v18145_v1 = vld [vmem:[#allocation64_spill] sm:$0xff]  ;;  %v2721_v15 = vsub.f32 %v18148_v59, %v18147_v22 }
 0x596   : > { %18137 = vst [vmem:[#allocation155_spill] sm:$0xff] %v13003_v0  ;;  %v13005_v21 = vpop.permute.xlu1 %4380  ;;  %v13007_v25 = vpop.permute.xlu0 %3742  ;;  %18143 = vst [vmem:[#allocation188_spill] sm:$0xff] %v13023_v43  ;;  %v3104_v46 = vsub.f32 %v18142_v50, %v18145_v1  ;;  %v18149_v1 = vld [vmem:[#allocation137_spill] sm:$0xff] }
 0x597   : > { %v2808_v18 = vmul.f32 1.442695, %v2720_v23  ;;  %v13032_v58 = vpop.eup %9439  ;;  %v2810_v0 = vmul.f32 1.442695, %v2721_v15 }
 0x598   : > { %3352 = vrot.lane.b32.xlu1 %v18140_v37, %s18129_s10  ;;  %4084 = vrot.lane.b32.xlu0 %v13009_v38, %s18141_s7  ;;  %18144 = vst [vmem:[#allocation257_spill] sm:$0xff] %v13032_v58  ;;  %v3192_v12 = vmul.f32 1.442695, %v3104_v46 }
 0x599   : > { %9445 = vpow2.f32 %v2808_v18 }
 0x59a   : > { %v13019_v52 = vpop.permute.xlu1 %3330  ;;  %v13021_v56 = vpop.permute.xlu0 %4062  ;;  %9447 = vpow2.f32 %v3192_v12 }
 0x59b   : > { %9449 = vpow2.f32 %v2810_v0 }
 0x59c   : > { %3766 = vrot.lane.b32.xlu1 %v13023_v43, %s10108_s20  ;;  %4816 = vrot.lane.b32.xlu0 %v9430_v5, %s10110_s19  ;;  %v13043_v23 = vpop.eup %9441 }
 0x59d   : > { %18146 = vst [vmem:[#allocation64_spill] sm:$0xff] %v13043_v23 }
 0x59e   : > { %v13028_v37 = vpop.permute.xlu1 %4382  ;;  %v13030_v38 = vpop.permute.xlu0 %3744 }
 0x5a0   : > { %5072 = vrot.lane.b32.xlu1 %v9430_v5, %s10112_s30  ;;  %4404 = vrot.lane.b32.xlu0 %v13032_v58, %s10109_s26 }
 0x5a2   : > { %v13039_v43 = vpop.permute.xlu1 %3332  ;;  %v13041_v14 = vpop.permute.xlu0 %4064 }
 0x5a4   : > { %4086 = vrot.lane.b32.xlu1 %v13043_v23, %s18141_s7  ;;  %5328 = vrot.lane.b32.xlu0 %v9430_v5, %s18129_s10  ;;  %v3488_v23 = vsub.f32 %v18142_v50, %v18150_v28  ;;  %v13060_v5 = vpop.eup %9443  ;;  %v18154_v28 = vld [vmem:[#allocation192_spill] sm:$0xff] }
 0x5a5   : > { %18151 = vst [vmem:[#allocation190_spill] sm:$0xff] %v13060_v5  ;;  %v13066_v22 = vpop.eup %9445  ;;  %v3105_v12 = vsub.f32 %v18148_v59, %v18154_v28 }
 0x5a6   : > { %v13050_v58 = vpop.permute.xlu1 %4384  ;;  %v13052_v18 = vpop.permute.xlu0 %3746  ;;  %18152 = vst [vmem:[#allocation195_spill] sm:$0xff] %v13066_v22  ;;  %v3576_v15 = vmul.f32 1.442695, %v3488_v23  ;;  %v18156_v23 = vld [vmem:[#allocation193_spill] sm:$0xff] }
 0x5a7   : > { %v3194_v42 = vmul.f32 1.442695, %v3105_v12  ;;  %v3489_v28 = vsub.f32 %v18148_v59, %v18156_v23  ;;  %v18159_v12 = vld [vmem:[#allocation38_spill] sm:$0xff] }
 0x5a8   : > { %4818 = vrot.lane.b32.xlu1 %v12960_v30, %s10110_s19  ;;  %3354 = vrot.lane.b32.xlu0 %v18149_v1, %s18129_s10  ;;  %9451 = vpow2.f32 %v3576_v15 }
 0x5a9   : > { %9453 = vpow2.f32 %v2328_v2  ;;  %v3578_v2 = vmul.f32 1.442695, %v3489_v28  ;;  %v18166_v28 = vld [vmem:[#allocation110_spill] sm:$0xff] }
 0x5aa   : > { %v13062_v39 = vpop.permute.xlu1 %3334  ;;  %v13064_v46 = vpop.permute.xlu0 %4066  ;;  %9455 = vpow2.f32 %v3194_v42 }
 0x5ab   : > { %9457 = vpow2.f32 %v3578_v2 }
 0x5ac   : > { %4406 = vrot.lane.b32.xlu1 %v13060_v5, %s10109_s26  ;;  %3768 = vrot.lane.b32.xlu0 %v13066_v22, %s10108_s20  ;;  %v13088_v22 = vpop.eup %9447 }
 0x5ad   : > { %18155 = vst [vmem:[#allocation65_spill] sm:$0xff] %v13088_v22  ;;  %v13102_v35 = vpop.eup %9449 }
 0x5ae   : > { %v13076_v1 = vpop.permute.xlu1 %4386  ;;  %v13078_v50 = vpop.permute.xlu0 %3748  ;;  %18161 = vst [vmem:[#allocation193_spill] sm:$0xff] %v13102_v35 }
 0x5b0   : > { %5330 = vrot.lane.b32.xlu1 %v12960_v30, %s18129_s10  ;;  %5074 = vrot.lane.b32.xlu0 %v12960_v30, %s10112_s30  ;;  %v18158_v30 = vld [vmem:[#allocation108_spill] sm:$0xff] }
 0x5b1   : > { %v2722_v15 = vsub.f32 %v18159_v12, %v18158_v30 }
 0x5b2   : > { %v13084_v29 = vpop.permute.xlu1 %3336  ;;  %v13086_v0 = vpop.permute.xlu0 %4068 }
 0x5b3   : > { %v2812_v23 = vmul.f32 1.442695, %v2722_v15  ;;  %v13114_v59 = vpop.eup %9451  ;;  %v3106_v15 = vsub.f32 %v18159_v12, %v18166_v28 }
 0x5b4   : > { %3356 = vrot.lane.b32.xlu1 %v18157_v54, %s18129_s10  ;;  %4088 = vrot.lane.b32.xlu0 %v13088_v22, %s18141_s7  ;;  %v18162_v54 = vld [vmem:[#allocation163_spill] sm:$0xff]  ;;  %18165 = vst [vmem:[#allocation258_spill] sm:$0xff] %v13114_v59 }
 0x5b5   : > { %v2257_v42 = vsub.f32 %v17985_v13, %v18162_v54  ;;  %9459 = vpow2.f32 %v2812_v23  ;;  %v3196_v23 = vmul.f32 1.442695, %v3106_v15 }
 0x5b6   : > { %v13098_v5 = vpop.permute.xlu1 %4388  ;;  %v13100_v63 = vpop.permute.xlu0 %3750 }
 0x5b7   : > { %18160 = vst [vmem:[#allocation192_spill] sm:$0xff] %v13100_v63  ;;  %v2330_v13 = vmul.f32 1.442695, %v2257_v42  ;;  %v18170_v63 = vld [vmem:[#allocation197_spill] sm:$0xff] }
 0x5b8   : > { %3770 = vrot.lane.b32.xlu1 %v13102_v35, %s10108_s20  ;;  %4820 = vrot.lane.b32.xlu0 %v12998_v16, %s10110_s19  ;;  %v13122_v35 = vpop.eup %9453  ;;  %v2723_v44 = vsub.f32 %v18171_v4, %v18170_v63  ;;  %v18172_v63 = vld [vmem:[#allocation141_spill] sm:$0xff] }
 0x5b9   : > { %18167 = vst [vmem:[#allocation110_spill] sm:$0xff] %v13122_v35  ;;  %v3920_v2 = vadd.f32 %v13122_v35, %v12958_v55  ;;  %9461 = vpow2.f32 %v2330_v13  ;;  %v18173_v55 = vld [vmem:[#allocation59_spill] sm:$0xff] }
 0x5ba   : > { %v13110_v22 = vpop.permute.xlu1 %3338  ;;  %v13112_v30 = vpop.permute.xlu0 %4070  ;;  %9463 = vpow2.f32 %v3196_v23 }
 0x5bb   : > { %18163 = vst [vmem:[#allocation108_spill] sm:$0xff] %v13110_v22  ;;  %18164 = vst [vmem:[#allocation163_spill] sm:$0xff] %v13112_v30  ;;  %v13128_v30 = vpop.eup %9455  ;;  %v4240_v42 = vadd.f32 %v12972_v9, %v3920_v2 }
 0x5bc   : > { %5076 = vrot.lane.b32.xlu1 %v12998_v16, %s10112_s30  ;;  %4408 = vrot.lane.b32.xlu0 %v13114_v59, %s10109_s26  ;;  %18169 = vst [vmem:[#allocation260_spill] sm:$0xff] %v13128_v30  ;;  %v13150_v15 = vpop.eup %9457 }
 0x5bd   : > { %18174 = vst [vmem:[#allocation197_spill] sm:$0xff] %v13150_v15 }
 0x5be   : > { %v13124_v54 = vpop.permute.xlu1 %4390  ;;  %v13126_v22 = vpop.permute.xlu0 %3752 }
 0x5bf   : > { %18168 = vst [vmem:[#allocation259_spill] sm:$0xff] %v13126_v22  ;;  %v2814_v22 = vmul.f32 1.442695, %v2723_v44  ;;  %v13156_v2 = vpop.eup %9459  ;;  %v18176_v44 = vld [vmem:[#allocation164_spill] sm:$0xff] }
 0x5c0   : > { %4090 = vrot.lane.b32.xlu1 %v13128_v30, %s18141_s7  ;;  %5332 = vrot.lane.b32.xlu0 %v12998_v16, %s18129_s10  ;;  %v3490_v30 = vsub.f32 %v18159_v12, %v18173_v55  ;;  %v4560_v16 = vadd.f32 %v12970_v36, %v4240_v42  ;;  %18175 = vst [vmem:[#allocation59_spill] sm:$0xff] %v13156_v2  ;;  %v18177_v36 = vld [vmem:[#allocation70_spill] sm:$0xff] }
 0x5c1   : > { %9465 = vpow2.f32 %v2814_v22  ;;  %v3107_v23 = vsub.f32 %v18171_v4, %v18176_v44  ;;  %v2258_v42 = vsub.f32 %v18001_v11, %v18177_v36 }
 0x5c2   : > { %v13139_v28 = vpop.permute.xlu1 %3340  ;;  %v13141_v59 = vpop.permute.xlu0 %4072  ;;  %v3580_v55 = vmul.f32 1.442695, %v3490_v30  ;;  %9467 = vrcp.f32 %v4560_v16 }
 0x5c3   : > { %v13170_v35 = vpop.eup %9461  ;;  %v3198_v22 = vmul.f32 1.442695, %v3107_v23  ;;  %v2332_v16 = vmul.f32 1.442695, %v2258_v42 }
 0x5c4   : > { %4822 = vrot.lane.b32.xlu1 %v12985_v3, %s10110_s19  ;;  %3358 = vrot.lane.b32.xlu0 %v18172_v63, %s18129_s10  ;;  %18180 = vst [vmem:[#allocation261_spill] sm:$0xff] %v13170_v35  ;;  %9469 = vpow2.f32 %v3580_v55  ;;  %v3921_v30 = vadd.f32 %v13170_v35, %v12935_v51  ;;  %v13182_v36 = vpop.eup %9463  ;;  %v18184_v51 = vld [vmem:[#allocation120_spill] sm:$0xff] }
 0x5c5   : > { %18181 = vst [vmem:[#allocation262_spill] sm:$0xff] %v13182_v36  ;;  %9471 = vpow2.f32 %v3198_v22 }
 0x5c6   : > { %v13152_v9 = vpop.permute.xlu1 %4392  ;;  %v13154_v13 = vpop.permute.xlu0 %3754  ;;  %9473 = vpow2.f32 %v2332_v16 }
 0x5c8   : > { %4410 = vrot.lane.b32.xlu1 %v13150_v15, %s10109_s26  ;;  %3772 = vrot.lane.b32.xlu0 %v13156_v2, %s10108_s20  ;;  %v4241_v2 = vadd.f32 %v12948_v60, %v3921_v30  ;;  %v18182_v15 = vld [vmem:[#allocation167_spill] sm:$0xff] }
 0x5ca   : > { %v13166_v63 = vpop.permute.xlu1 %3342  ;;  %v13168_v12 = vpop.permute.xlu0 %4074  ;;  %v4561_v55 = vadd.f32 %v12981_v10, %v4241_v2 }
 0x5cb   : > { %18178 = vst [vmem:[#allocation164_spill] sm:$0xff] %v13166_v63  ;;  %18179 = vst [vmem:[#allocation70_spill] sm:$0xff] %v13168_v12  ;;  %v3491_v63 = vsub.f32 %v18171_v4, %v18182_v15  ;;  %v18183_v12 = vld [vmem:[#allocation150_spill] sm:$0xff]  ;;  %v13194_v42 = vpop.eup %9465  ;;  %v18196_v4 = vld [vmem:[#allocation39_spill] sm:$0xff] }
 0x5cc   : > { %5334 = vrot.lane.b32.xlu1 %v12985_v3, %s18129_s10  ;;  %5078 = vrot.lane.b32.xlu0 %v12985_v3, %s10112_s30  ;;  %v18185_v3 = vld [vmem:[#allocation40_spill] sm:$0xff]  ;;  %18186 = vst [vmem:[#allocation167_spill] sm:$0xff] %v13194_v42  ;;  %v13200_v15 = vpop.eup %9467  ;;  %9475 = vrcp.f32 %v4561_v55 }
 0x5cd   : > { %v2724_v23 = vsub.f32 %v18185_v3, %v18184_v51  ;;  %v3582_v30 = vmul.f32 1.442695, %v3491_v63  ;;  %v18187_v51 = vld [vmem:[#allocation72_spill] sm:$0xff] }
 0x5ce   : > { %v13178_v44 = vpop.permute.xlu1 %4394  ;;  %v13180_v11 = vpop.permute.xlu0 %3756  ;;  %v2259_v10 = vsub.f32 %v18010_v62, %v18187_v51  ;;  %v18190_v63 = vld [vmem:[#allocation172_spill] sm:$0xff] }
 0x5cf   : > { %v2816_v22 = vmul.f32 1.442695, %v2724_v23  ;;  %9477 = vpow2.f32 %v3582_v30  ;;  %v3108_v23 = vsub.f32 %v18185_v3, %v18190_v63  ;;  %v18195_v30 = vld [vmem:[#allocation62_spill] sm:$0xff] }
 0x5d0   : > { %3360 = vrot.lane.b32.xlu1 %v18183_v12, %s18129_s10  ;;  %4092 = vrot.lane.b32.xlu0 %v13182_v36, %s18141_s7  ;;  %v13212_v12 = vpop.eup %9469  ;;  %v2334_v55 = vmul.f32 1.442695, %v2259_v10 }
 0x5d1   : > { %18189 = vst [vmem:[#allocation72_spill] sm:$0xff] %v13212_v12  ;;  %9479 = vpow2.f32 %v2816_v22  ;;  %v13224_v51 = vpop.eup %9471  ;;  %v3200_v22 = vmul.f32 1.442695, %v3108_v23 }
 0x5d2   : > { %v13196_v35 = vpop.permute.xlu1 %3344  ;;  %v13198_v60 = vpop.permute.xlu0 %4076  ;;  %18193 = vst [vmem:[#allocation264_spill] sm:$0xff] %v13224_v51  ;;  %9481 = vpow2.f32 %v2334_v55 }
 0x5d3   : > { %v13226_v36 = vpop.eup %9473  ;;  %9483 = vpow2.f32 %v3200_v22 }
 0x5d4   : > { %3774 = vrot.lane.b32.xlu1 %v13194_v42, %s10108_s20  ;;  %4824 = vrot.lane.b32.xlu0 %v13200_v15, %s10110_s19  ;;  %18194 = vst [vmem:[#allocation265_spill] sm:$0xff] %v13226_v36  ;;  %v3922_v10 = vadd.f32 %v13226_v36, %v12983_v8  ;;  %v3492_v8 = vsub.f32 %v18185_v3, %v12994_v24 }
 0x5d6   : > { %v13208_v2 = vpop.permute.xlu1 %3758  ;;  %v13210_v16 = vpop.permute.xlu0 %4396 }
 0x5d7   : > { %18188 = vst [vmem:[#allocation120_spill] sm:$0xff] %v13208_v2  ;;  %v2725_v2 = vsub.f32 %v18196_v4, %v18195_v30 }
 0x5d8   : > { %5080 = vrot.lane.b32.xlu1 %v13200_v15, %s10112_s30  ;;  %4412 = vrot.lane.b32.xlu0 %v13212_v12, %s10109_s26 }
 0x5d9   : > { %v2818_v30 = vmul.f32 1.442695, %v2725_v2  ;;  %v18202_v2 = vld [vmem:[#allocation169_spill] sm:$0xff] }
 0x5da   : > { %v13220_v42 = vpop.permute.xlu1 %4078  ;;  %v13222_v62 = vpop.permute.xlu0 %3346  ;;  %v3109_v24 = vsub.f32 %v18196_v4, %v18202_v2 }
 0x5db   : > { %18191 = vst [vmem:[#allocation172_spill] sm:$0xff] %v13220_v42  ;;  %18192 = vst [vmem:[#allocation263_spill] sm:$0xff] %v13222_v62  ;;  %v13240_v62 = vpop.eup %9475  ;;  %v4242_v42 = vadd.f32 %v12996_v47, %v3922_v10  ;;  %9485 = vpow2.f32 %v2818_v30 }
 0x5dc   : > { %4094 = vrot.lane.b32.xlu1 %v13224_v51, %s18141_s7  ;;  %5336 = vrot.lane.b32.xlu0 %v13200_v15, %s18129_s10  ;;  %v18198_v51 = vld [vmem:[#allocation146_spill] sm:$0xff]  ;;  %v13250_v55 = vpop.eup %9477  ;;  %v3202_v30 = vmul.f32 1.442695, %v3109_v24 }
 0x5dd   : > { %v4562_v23 = vadd.f32 %v13005_v21, %v4242_v42  ;;  %18199 = vst [vmem:[#allocation266_spill] sm:$0xff] %v13250_v55  ;;  %v13256_v47 = vpop.eup %9479  ;;  %v3584_v21 = vmul.f32 1.442695, %v3492_v8  ;;  %v18203_v42 = vld [vmem:[#allocation78_spill] sm:$0xff] }
 0x5de   : > { %v13236_v63 = vpop.permute.xlu1 %4398  ;;  %v13238_v12 = vpop.permute.xlu0 %3760  ;;  %18201 = vst [vmem:[#allocation268_spill] sm:$0xff] %v13256_v47  ;;  %v2260_v22 = vsub.f32 %v18020_v61, %v18203_v42 }
 0x5df   : > { %18197 = vst [vmem:[#allocation62_spill] sm:$0xff] %v13238_v12  ;;  %9487 = vrcp.f32 %v4562_v23  ;;  %v13270_v3 = vpop.eup %9481 }
 0x5e0   : > { %4826 = vrot.lane.b32.xlu1 %v13240_v62, %s10110_s19  ;;  %3362 = vrot.lane.b32.xlu0 %v18198_v51, %s18129_s10  ;;  %9489 = vpow2.f32 %v3584_v21  ;;  %v3923_v8 = vadd.f32 %v13270_v3, %v13007_v25  ;;  %v2336_v23 = vmul.f32 1.442695, %v2260_v22  ;;  %v13283_v42 = vpop.eup %9483  ;;  %v3493_v25 = vsub.f32 %v18196_v4, %v13019_v52 }
 0x5e1   : > { %18206 = vst [vmem:[#allocation269_spill] sm:$0xff] %v13283_v42  ;;  %9491 = vpow2.f32 %v3202_v30 }
 0x5e2   : > { %v13252_v36 = vpop.permute.xlu1 %3348  ;;  %v13254_v12 = vpop.permute.xlu0 %4080  ;;  %9493 = vpow2.f32 %v2336_v23  ;;  %v3586_v52 = vmul.f32 1.442695, %v3493_v25  ;;  %v18217_v25 = vld [vmem:[#allocation113_spill] sm:$0xff] }
 0x5e3   : > { %18200 = vst [vmem:[#allocation267_spill] sm:$0xff] %v13252_v36  ;;  %v18209_v36 = vld [vmem:[#allocation189_spill] sm:$0xff] }
 0x5e4   : > { %4414 = vrot.lane.b32.xlu1 %v13250_v55, %s10109_s26  ;;  %3776 = vrot.lane.b32.xlu0 %v13256_v47, %s10108_s20  ;;  %v4243_v47 = vadd.f32 %v13021_v56, %v3923_v8  ;;  %v18207_v55 = vld [vmem:[#allocation73_spill] sm:$0xff] }
 0x5e5   : > { %v13295_v21 = vpop.eup %9485 }
 0x5e6   : > { %v13266_v10 = vpop.permute.xlu1 %3762  ;;  %v13268_v51 = vpop.permute.xlu0 %4400  ;;  %v4563_v24 = vadd.f32 %v13028_v37, %v4243_v47  ;;  %18210 = vst [vmem:[#allocation73_spill] sm:$0xff] %v13295_v21  ;;  %v18213_v37 = vld [vmem:[#allocation77_spill] sm:$0xff] }
 0x5e7   : > { %18204 = vst [vmem:[#allocation169_spill] sm:$0xff] %v13266_v10  ;;  %18205 = vst [vmem:[#allocation78_spill] sm:$0xff] %v13268_v51  ;;  %v18208_v10 = vld [vmem:[#allocation42_spill] sm:$0xff]  ;;  %v2261_v47 = vsub.f32 %v18029_v20, %v18213_v37 }
 0x5e8   : > { %5338 = vrot.lane.b32.xlu1 %v13240_v62, %s18129_s10  ;;  %5082 = vrot.lane.b32.xlu0 %v13240_v62, %s10112_s30  ;;  %v2726_v51 = vsub.f32 %v18208_v10, %v18207_v55  ;;  %9495 = vrcp.f32 %v4563_v24  ;;  %v3110_v20 = vsub.f32 %v18208_v10, %v18217_v25 }
 0x5e9   : > { %v13301_v55 = vpop.eup %9487  ;;  %v2338_v37 = vmul.f32 1.442695, %v2261_v47 }
 0x5ea   : > { %v13279_v61 = vpop.permute.xlu1 %4082  ;;  %v13281_v2 = vpop.permute.xlu0 %3350  ;;  %v2820_v8 = vmul.f32 1.442695, %v2726_v51  ;;  %v18216_v51 = vld [vmem:[#allocation84_spill] sm:$0xff]  ;;  %v3204_v25 = vmul.f32 1.442695, %v3110_v20 }
 0x5ec   : > { %3364 = vrot.lane.b32.xlu1 %v18209_v36, %s18129_s10  ;;  %4096 = vrot.lane.b32.xlu0 %v13283_v42, %s18141_s7  ;;  %v13309_v36 = vpop.eup %9489  ;;  %v18215_v42 = vld [vmem:[#allocation174_spill] sm:$0xff]  ;;  %9497 = vpow2.f32 %v2820_v8 }
 0x5ed   : > { %18214 = vst [vmem:[#allocation77_spill] sm:$0xff] %v13309_v36  ;;  %9499 = vpow2.f32 %v3586_v52 }
 0x5ee   : > { %v13297_v56 = vpop.permute.xlu1 %4402  ;;  %v13299_v22 = vpop.permute.xlu0 %3764  ;;  %9501 = vpow2.f32 %v2338_v37  ;;  %v3494_v37 = vsub.f32 %v18208_v10, %v13039_v43  ;;  %v18225_v43 = vld [vmem:[#allocation15_spill] sm:$0xff] }
 0x5ef   : > { %18211 = vst [vmem:[#allocation270_spill] sm:$0xff] %v13297_v56  ;;  %18212 = vst [vmem:[#allocation271_spill] sm:$0xff] %v13299_v22  ;;  %9503 = vpow2.f32 %v3204_v25  ;;  %v18227_v25 = vmov 0.0  }
 0x5f0   : > { %3778 = vrot.lane.b32.xlu1 %v13295_v21, %s10108_s20  ;;  %4828 = vrot.lane.b32.xlu0 %v13301_v55, %s10110_s19 }
 0x5f2   : > { %v4811_v30 = vpop.permute.xlu1 %4810  ;;  %v5067_v23 = vpop.permute.xlu0 %5066 }
 0x5f3   : > { %v5001_v4 = vmul.f32 %v18215_v42, %v4811_v30  ;;  %v5257_v22 = vmul.f32 %v18216_v51, %v5067_v23  ;;  %v13321_v30 = vpop.eup %9491  ;;  %v18219_v51 = vld [vmem:[#allocation99_spill] sm:$0xff] }
 0x5f4   : > { %5084 = vrot.lane.b32.xlu1 %v13301_v55, %s10112_s30  ;;  %4416 = vrot.lane.b32.xlu0 %v13309_v36, %s10109_s26  ;;  %18218 = vst [vmem:[#allocation174_spill] sm:$0xff] %v13321_v30  ;;  %v13329_v52 = vpop.eup %9493 }
 0x5f5   : > { %v5578_v24 = vsel %vm5576_vm1, %v12881_v27, %v5001_v4  ;;  %v18220_v4 = vld [vmem:[#allocation41_spill] sm:$0xff] }
 0x5f6   : > { %v5323_v42 = vpop.permute.xlu1 %5322  ;;  %v4809_v8 = vpop.permute.xlu0 %4808  ;;  %v2727_v27 = vsub.f32 %v18220_v4, %v18219_v51  ;;  %v18221_v51 = vld [vmem:[#allocation179_spill] sm:$0xff] }
 0x5f7   : > { %v5513_v23 = vmul.f32 %v12381_v34, %v5323_v42  ;;  %v5000_v47 = vmul.f32 %v12397_v53, %v4809_v8  ;;  %v5643_v34 = vsel %vm5641_vm2, %v5578_v24, %v5257_v22  ;;  %v3924_v42 = vadd.f32 %v13329_v52, %v13030_v38  ;;  %v13344_v53 = vpop.eup %9495  ;;  %v18222_v24 = vld [vmem:[#allocation152_spill] sm:$0xff] }
 0x5f8   : > { %4098 = vrot.lane.b32.xlu1 %v13321_v30, %s18141_s7  ;;  %5340 = vrot.lane.b32.xlu0 %v13301_v55, %s18129_s10  ;;  %v2822_v20 = vmul.f32 1.442695, %v2727_v27 }
 0x5f9   : > { %v5708_v21 = vsel %vm5706_vm3, %v5643_v34, %v5513_v23  ;;  %v4244_v8 = vadd.f32 %v13041_v14, %v3924_v42  ;;  %v5577_v38 = vsel %vm5576_vm1, %v12932_v48, %v5000_v47  ;;  %v13359_v23 = vpop.eup %9497  ;;  %v3588_v34 = vmul.f32 1.442695, %v3494_v37  ;;  %v18228_v42 = vld [vmem:[#allocation86_spill] sm:$0xff]  ;;  %v18230_v37 = vld [vmem:[#allocation104_spill] sm:$0xff] }
 0x5fa   : > { %v5065_v36 = vpop.permute.xlu1 %5064  ;;  %v5321_v56 = vpop.permute.xlu0 %5320  ;;  %5773 = vst.msk [vmem:[%s13327_s18 + $0x8] sm:$0xff] %vm5771_vm4, %v5708_v21  ;;  %18223 = vst [vmem:[#allocation84_spill] sm:$0xff] %v13359_v23  ;;  %9505 = vpow2.f32 %v2822_v20  ;;  %v18229_v20 = vld [vmem:[#allocation16_spill] sm:$0xff] }
 0x5fb   : > { %v5256_v30 = vmul.f32 %v18221_v51, %v5065_v36  ;;  %v5512_v22 = vmul.f32 %v12413_v7, %v5321_v56  ;;  %v4564_v14 = vadd.f32 %v13050_v58, %v4244_v8  ;;  %v13362_v27 = vpop.eup %9499  ;;  %v18226_v58 = vld [vmem:[#allocation11_spill] sm:$0xff]  ;;  %v2262_v8 = vsub.f32 %v18040_v49, %v18228_v42 }
 0x5fc   : > { %4830 = vrot.lane.b32.xlu1 %v13344_v53, %s10110_s19  ;;  %3366 = vrot.lane.b32.xlu0 %v18222_v24, %s18129_s10  ;;  %18224 = vst [vmem:[#allocation113_spill] sm:$0xff] %v13362_v27 }
 0x5fd   : > { %v5642_v36 = vsel %vm5641_vm2, %v5577_v38, %v5256_v30  ;;  %v3111_v30 = vsub.f32 %v18220_v4, %v18226_v58  ;;  %9507 = vrcp.f32 %v4564_v14 }
 0x5fe   : > { %v5707_v7 = vsel %vm5706_vm3, %v5642_v36, %v5512_v22  ;;  %v4815_v56 = vpop.permute.xlu1 %4814  ;;  %v4813_v48 = vpop.permute.xlu0 %4812  ;;  %9509 = vpow2.f32 %v3588_v34  ;;  %v18232_v34 = vld [vmem:[#allocation14_spill] sm:$0xff] }
 0x5ff   : > { %5772 = vst.msk [vmem:[%s13327_s18] sm:$0xff] %vm5771_vm4, %v5707_v7  ;;  %8296 = vmatmul.mubr.msk.f32.vlgmr.msra.gmra.mrb[64].mxu1 %vm5771_vm4, %v5707_v7  ;;  %8360 = vmatmul.mubr.msk.f32.vlgmr.msra.gmra.mrb[64].mxu0 %vm5771_vm4, %v5707_v7  ;;  %v5002_v47 = vmul.f32 %v18225_v43, %v4813_v48  ;;  %v13383_v7 = vpop.eup %9501  ;;  %v5003_v14 = vmul.f32 %v18230_v37, %v4815_v56  ;;  %v3206_v49 = vmul.f32 1.442695, %v3111_v30  ;;  %v2340_v56 = vmul.f32 1.442695, %v2262_v8 }
 0x600   : > { %4418 = vrot.lane.b32.xlu1 %v13362_v27, %s10109_s26  ;;  %3780 = vrot.lane.b32.xlu0 %v13359_v23, %s10108_s20  ;;  %v13398_v58 = vpop.eup %9503  ;;  %v18280_v27 = vld [vmem:[#allocation210_spill] sm:$0xff] }
 0x601   : > { %6106 = vmatprep.mubr.f32.mxu1 %v18227_v25  ;;  %6555 = vmatprep.mubr.f32.mxu0 %v18227_v25  ;;  %v5579_v48 = vsel %vm5576_vm1, %v12954_v40, %v5002_v47  ;;  %18231 = vst [vmem:[#allocation99_spill] sm:$0xff] %v13398_v58  ;;  %9511 = vpow2.f32 %v3206_v49 }
 0x602   : > { %v5069_v51 = vpop.permute.xlu1 %5068  ;;  %v5325_v22 = vpop.permute.xlu0 %5324  ;;  %9513 = vpow2.f32 %v2340_v56 }
 0x603   : > { %v5258_v38 = vmul.f32 %v18229_v20, %v5069_v51  ;;  %v5514_v36 = vmul.f32 %v12445_v17, %v5325_v22  ;;  %8297 = vmatmul.mubr.msk.f32.gmra.mrb[66].mxu1 %vm5771_vm4, %v5708_v21  ;;  %8361 = vmatmul.mubr.msk.f32.gmra.mrb[66].mxu0 %vm5771_vm4, %v5708_v21  ;;  %v3925_v17 = vadd.f32 %v13383_v7, %v13052_v18  ;;  %v18233_v18 = vld [vmem:[#allocation44_spill] sm:$0xff]  ;;  %v18234_v20 = vld [vmem:[#allocation194_spill] sm:$0xff] }
 0x604   : > { %5342 = vrot.lane.b32.xlu1 %v13344_v53, %s18129_s10  ;;  %5086 = vrot.lane.b32.xlu0 %v13344_v53, %s10112_s30  ;;  %v2728_v8 = vsub.f32 %v18233_v18, %v12351_v45  ;;  %v5580_v22 = vsel %vm5576_vm1, %v12945_v32, %v5003_v14 }
 0x605   : > { %6112 = vmatprep.mubr.f32.mxu1 %v18227_v25  ;;  %6561 = vmatprep.mubr.f32.mxu0 %v18227_v25  ;;  %v5644_v21 = vsel %vm5641_vm2, %v5579_v48, %v5258_v38  ;;  %v4245_v42 = vadd.f32 %v13064_v46, %v3925_v17  ;;  %v13421_v38 = vpop.eup %9505  ;;  %v18236_v48 = vld [vmem:[#allocation85_spill] sm:$0xff] }
 0x606   : > { %v5327_v40 = vpop.permute.xlu1 %5326  ;;  %v5071_v43 = vpop.permute.xlu0 %5070  ;;  %v5709_v47 = vsel %vm5706_vm3, %v5644_v21, %v5514_v36  ;;  %18235 = vst [vmem:[#allocation179_spill] sm:$0xff] %v13421_v38  ;;  %v2263_v49 = vsub.f32 %v18049_v33, %v18236_v48 }
 0x607   : > { %v5515_v30 = vmul.f32 %v12429_v57, %v5327_v40  ;;  %v5259_v51 = vmul.f32 %v18232_v34, %v5071_v43  ;;  %5774 = vst.msk [vmem:[%s13327_s18 + $0x10] sm:$0xff] %vm5771_vm4, %v5709_v47  ;;  %8298 = vmatmul.mubr.msk.f32.gmra.mrb[68].mxu1 %vm5771_vm4, %v5709_v47  ;;  %8362 = vmatmul.mubr.msk.f32.gmra.mrb[68].mxu0 %vm5771_vm4, %v5709_v47  ;;  %v13428_v14 = vpop.eup %9507 }
 0x608   : > { %3368 = vrot.lane.b32.xlu1 %v18234_v20, %s18129_s10  ;;  %4100 = vrot.lane.b32.xlu0 %v13398_v58, %s18141_s7  ;;  %v3495_v57 = vsub.f32 %v18220_v4, %v13062_v39  ;;  %v4565_v46 = vadd.f32 %v13076_v1, %v4245_v42  ;;  %v2824_v39 = vmul.f32 1.442695, %v2728_v8  ;;  %v13444_v56 = vpop.eup %9509  ;;  %v3112_v40 = vsub.f32 %v18233_v18, %v12369_v19  ;;  %v18240_v8 = vld [vmem:[#allocation43_spill] sm:$0xff]  ;;  %v18251_v20 = vld [vmem:[#allocation201_spill] sm:$0xff] }
 0x609   : > { %6118 = vmatprep.mubr.f32.mxu1 %v18227_v25  ;;  %6567 = vmatprep.mubr.f32.mxu0 %v18227_v25  ;;  %v5645_v45 = vsel %vm5641_vm2, %v5580_v22, %v5259_v51  ;;  %18237 = vst [vmem:[#allocation15_spill] sm:$0xff] %v13444_v56  ;;  %v2342_v43 = vmul.f32 1.442695, %v2263_v49  ;;  %v18239_v51 = vld [vmem:[#allocation100_spill] sm:$0xff] }
 0x60a   : > { %v13423_v32 = vpop.permute.xlu1 %3352  ;;  %v13425_v36 = vpop.permute.xlu0 %4084  ;;  %v5710_v37 = vsel %vm5706_vm3, %v5645_v45, %v5515_v30  ;;  %v3590_v1 = vmul.f32 1.442695, %v3495_v57  ;;  %9515 = vrcp.f32 %v4565_v46  ;;  %v2729_v22 = vsub.f32 %v18240_v8, %v18239_v51  ;;  %v18245_v51 = vld [vmem:[#allocation94_spill] sm:$0xff] }
 0x60b   : > { %5775 = vst.msk [vmem:[%s13327_s18 + $0x18] sm:$0xff] %vm5771_vm4, %v5710_v37  ;;  %8299 = vmatmul.mubr.msk.f32.gmra.mrb[70].mxu1 %vm5771_vm4, %v5710_v37  ;;  %8363 = vmatmul.mubr.msk.f32.gmra.mrb[70].mxu0 %vm5771_vm4, %v5710_v37  ;;  %9517 = vpow2.f32 %v2824_v39  ;;  %v13454_v33 = vpop.eup %9511  ;;  %v3208_v19 = vmul.f32 1.442695, %v3112_v40 }
 0x60c   : > { %3782 = vrot.lane.b32.xlu1 %v13421_v38, %s10108_s20  ;;  %4832 = vrot.lane.b32.xlu0 %v13428_v14, %s10110_s19  ;;  %9519 = vpow2.f32 %v3590_v1  ;;  %18238 = vst [vmem:[#allocation11_spill] sm:$0xff] %v13454_v33  ;;  %v13457_v34 = vpop.eup %9513  ;;  %v2826_v48 = vmul.f32 1.442695, %v2729_v22  ;;  %v18246_v22 = vld [vmem:[#allocation28_spill] sm:$0xff] }
 0x60d   : > { %6124 = vmatprep.mubr.f32.mxu1 %v18227_v25  ;;  %6573 = vmatprep.mubr.f32.mxu0 %v18227_v25  ;;  %v3926_v46 = vadd.f32 %v13457_v34, %v13078_v50  ;;  %9521 = vpow2.f32 %v2342_v43  ;;  %v18241_v50 = vld [vmem:[#allocation191_spill] sm:$0xff] }
 0x60e   : > { %v13442_v17 = vpop.permute.xlu1 %3766  ;;  %v4817_v21 = vpop.permute.xlu0 %4816  ;;  %9523 = vpow2.f32 %v3208_v19 }
 0x60f   : > { %v5004_v30 = vmul.f32 %v12387_v31, %v4817_v21  ;;  %v4246_v39 = vadd.f32 %v13086_v0, %v3926_v46  ;;  %v3496_v21 = vsub.f32 %v18233_v18, %v13084_v29  ;;  %9525 = vpow2.f32 %v2826_v48  ;;  %v18248_v48 = vld [vmem:[#allocation192_spill] sm:$0xff] }
 0x610   : > { %5088 = vrot.lane.b32.xlu1 %v13428_v14, %s10112_s30  ;;  %4420 = vrot.lane.b32.xlu0 %v13444_v56, %s10109_s26  ;;  %v18267_v56 = vld [vmem:[#allocation204_spill] sm:$0xff] }
 0x611   : > { %v4566_v0 = vadd.f32 %v13098_v5, %v4246_v39  ;;  %v18244_v5 = vld [vmem:[#allocation117_spill] sm:$0xff]  ;;  %v18247_v39 = vld [vmem:[#allocation76_spill] sm:$0xff] }
 0x612   : > { %v5073_v47 = vpop.permute.xlu1 %5072  ;;  %v13452_v42 = vpop.permute.xlu0 %4404  ;;  %v3113_v29 = vsub.f32 %v18240_v8, %v18244_v5 }
 0x613   : > { %v5260_v57 = vmul.f32 %v12403_v26, %v5073_v47  ;;  %v5581_v26 = vsel %vm5576_vm1, %v12977_v6, %v5004_v30  ;;  %v3592_v30 = vmul.f32 1.442695, %v3496_v21  ;;  %9527 = vrcp.f32 %v4566_v0 }
 0x614   : > { %4102 = vrot.lane.b32.xlu1 %v13454_v33, %s18141_s7  ;;  %5344 = vrot.lane.b32.xlu0 %v13428_v14, %s18129_s10  ;;  %v13470_v37 = vpop.eup %9515 }
 0x615   : > { %v5646_v49 = vsel %vm5641_vm2, %v5581_v26, %v5260_v57  ;;  %v13485_v6 = vpop.eup %9517  ;;  %v2264_v57 = vsub.f32 %v18246_v22, %v18245_v51  ;;  %9529 = vpow2.f32 %v3592_v30  ;;  %v18250_v51 = vld [vmem:[#allocation163_spill] sm:$0xff] }
 0x616   : > { %v13468_v45 = vpop.permute.xlu1 %4086  ;;  %v5329_v31 = vpop.permute.xlu0 %5328  ;;  %18242 = vst [vmem:[#allocation86_spill] sm:$0xff] %v13485_v6 }
 0x617   : > { %v5516_v1 = vmul.f32 %v12483_v41, %v5329_v31  ;;  %v13493_v47 = vpop.eup %9519  ;;  %v2344_v21 = vmul.f32 1.442695, %v2264_v57  ;;  %v18257_v57 = vld [vmem:[#allocation108_spill] sm:$0xff] }
 0x618   : > { %4834 = vrot.lane.b32.xlu1 %v13470_v37, %s10110_s19  ;;  %3370 = vrot.lane.b32.xlu0 %v18241_v50, %s18129_s10  ;;  %18243 = vst [vmem:[#allocation16_spill] sm:$0xff] %v13493_v47  ;;  %v13509_v31 = vpop.eup %9521 }
 0x619   : > { %v5711_v40 = vsel %vm5706_vm3, %v5646_v49, %v5516_v1  ;;  %v3210_v1 = vmul.f32 1.442695, %v3113_v29  ;;  %v3927_v49 = vadd.f32 %v13509_v31, %v18248_v48  ;;  %v13518_v5 = vpop.eup %9523  ;;  %v18255_v29 = vld [vmem:[#allocation88_spill] sm:$0xff]  ;;  %v18256_v48 = vld [vmem:[#allocation166_spill] sm:$0xff] }
 0x61a   : > { %v4819_v41 = vpop.permute.xlu1 %4818  ;;  %5776 = vst.msk [vmem:[%s13327_s18 + $0x20] sm:$0xff] %vm5771_vm4, %v5711_v40  ;;  %8300 = vmatmul.mubr.msk.f32.gmra.mrb[72].mxu1 %vm5771_vm4, %v5711_v40  ;;  %8364 = vmatmul.mubr.msk.f32.gmra.mrb[72].mxu0 %vm5771_vm4, %v5711_v40  ;;  %v13491_v43 = vpop.permute.xlu0 %3354  ;;  %18249 = vst [vmem:[#allocation104_spill] sm:$0xff] %v13518_v5 }
 0x61b   : > { %6130 = vmatprep.mubr.f32.mxu1 %v18227_v25  ;;  %6579 = vmatprep.mubr.f32.mxu0 %v18227_v25  ;;  %v5005_v26 = vmul.f32 %v18247_v39, %v4819_v41  ;;  %v4247_v22 = vadd.f32 %v18250_v51, %v3927_v49  ;;  %v18252_v39 = vld [vmem:[#allocation89_spill] sm:$0xff]  ;;  %9531 = vpow2.f32 %v3210_v1  ;;  %v3497_v49 = vsub.f32 %v18240_v8, %v18257_v57  ;;  %v18283_v8 = vld [vmem:[#allocation48_spill] sm:$0xff] }
 0x61c   : > { %4422 = vrot.lane.b32.xlu1 %v13493_v47, %s10109_s26  ;;  %3784 = vrot.lane.b32.xlu0 %v13485_v6, %s10108_s20  ;;  %v18253_v6 = vld [vmem:[#allocation17_spill] sm:$0xff]  ;;  %v18254_v47 = vld [vmem:[#allocation46_spill] sm:$0xff]  ;;  %9533 = vpow2.f32 %v2344_v21  ;;  %v18260_v21 = vld [vmem:[#allocation27_spill] sm:$0xff] }
 0x61d   : > { %v2730_v33 = vsub.f32 %v18254_v47, %v18253_v6  ;;  %v5582_v30 = vsel %vm5576_vm1, %v18255_v29, %v5005_v26  ;;  %v18259_v1 = vld [vmem:[#allocation93_spill] sm:$0xff] }
 0x61e   : > { %v13505_v19 = vpop.permute.xlu1 %4406  ;;  %v13507_v46 = vpop.permute.xlu0 %3768 }
 0x620   : > { %5346 = vrot.lane.b32.xlu1 %v13470_v37, %s18129_s10  ;;  %5090 = vrot.lane.b32.xlu0 %v13470_v37, %s10112_s30 }
 0x622   : > { %v5331_v0 = vpop.permute.xlu1 %5330  ;;  %v5075_v40 = vpop.permute.xlu0 %5074 }
 0x623   : > { %v5517_v41 = vmul.f32 %v18251_v20, %v5331_v0  ;;  %v5261_v24 = vmul.f32 %v18252_v39, %v5075_v40  ;;  %v4567_v20 = vadd.f32 %v13124_v54, %v4247_v22  ;;  %v13535_v40 = vpop.eup %9525  ;;  %v2828_v54 = vmul.f32 1.442695, %v2730_v33  ;;  %v18262_v33 = vld [vmem:[#allocation118_spill] sm:$0xff] }
 0x624   : > { %3372 = vrot.lane.b32.xlu1 %v18256_v48, %s18129_s10  ;;  %4104 = vrot.lane.b32.xlu0 %v13518_v5, %s18141_s7  ;;  %18258 = vst [vmem:[#allocation14_spill] sm:$0xff] %v13535_v40  ;;  %v13542_v39 = vpop.eup %9527  ;;  %v2265_v22 = vsub.f32 %v18260_v21, %v18259_v1  ;;  %v3114_v57 = vsub.f32 %v18254_v47, %v18262_v33  ;;  %v18264_v1 = vld [vmem:[#allocation200_spill] sm:$0xff]  ;;  %v18266_v5 = vld [vmem:[#allocation45_spill] sm:$0xff] }
 0x625   : > { %v5647_v0 = vsel %vm5641_vm2, %v5582_v30, %v5261_v24  ;;  %v3594_v24 = vmul.f32 1.442695, %v3497_v49  ;;  %9535 = vrcp.f32 %v4567_v20  ;;  %v13558_v30 = vpop.eup %9529 }
 0x626   : > { %v13537_v6 = vpop.permute.xlu1 %3356  ;;  %v13539_v26 = vpop.permute.xlu0 %4088  ;;  %v5712_v51 = vsel %vm5706_vm3, %v5647_v0, %v5517_v41  ;;  %18261 = vst [vmem:[#allocation85_spill] sm:$0xff] %v13558_v30  ;;  %9537 = vpow2.f32 %v2828_v54  ;;  %v2346_v49 = vmul.f32 1.442695, %v2265_v22  ;;  %v18265_v54 = vld [vmem:[#allocation176_spill] sm:$0xff]  ;;  %v18268_v22 = vld [vmem:[#allocation259_spill] sm:$0xff] }
 0x627   : > { %5777 = vst.msk [vmem:[%s13327_s18 + $0x28] sm:$0xff] %vm5771_vm4, %v5712_v51  ;;  %8301 = vmatmul.mubr.msk.f32.gmra.mrb[74].mxu1 %vm5771_vm4, %v5712_v51  ;;  %8365 = vmatmul.mubr.msk.f32.gmra.mrb[74].mxu0 %vm5771_vm4, %v5712_v51  ;;  %9539 = vpow2.f32 %v3594_v24  ;;  %v13568_v51 = vpop.eup %9531  ;;  %v2731_v38 = vsub.f32 %v18266_v5, %v18265_v54  ;;  %v3212_v24 = vmul.f32 1.442695, %v3114_v57  ;;  %v18271_v57 = vld [vmem:[#allocation196_spill] sm:$0xff] }
 0x628   : > { %3786 = vrot.lane.b32.xlu1 %v13535_v40, %s10108_s20  ;;  %4836 = vrot.lane.b32.xlu0 %v13542_v39, %s10110_s19  ;;  %18263 = vst [vmem:[#allocation100_spill] sm:$0xff] %v13568_v51  ;;  %v13571_v40 = vpop.eup %9533  ;;  %9541 = vpow2.f32 %v2346_v49 }
 0x629   : > { %6136 = vmatprep.mubr.f32.mxu1 %v18227_v25  ;;  %6585 = vmatprep.mubr.f32.mxu0 %v18227_v25  ;;  %v3928_v33 = vadd.f32 %v13571_v40, %v18268_v22  ;;  %v2830_v23 = vmul.f32 1.442695, %v2731_v38  ;;  %9543 = vpow2.f32 %v3212_v24  ;;  %v3498_v22 = vsub.f32 %v18254_v47, %v13139_v28  ;;  %v18274_v28 = vld [vmem:[#allocation12_spill] sm:$0xff]  ;;  %v18275_v24 = vld [vmem:[#allocation102_spill] sm:$0xff] }
 0x62a   : > { %v13556_v41 = vpop.permute.xlu1 %3770  ;;  %v4821_v29 = vpop.permute.xlu0 %4820  ;;  %v18282_v47 = vld [vmem:[#allocation178_spill] sm:$0xff] }
 0x62b   : > { %v5006_v21 = vmul.f32 %v18264_v1, %v4821_v29  ;;  %v4248_v54 = vadd.f32 %v13141_v59, %v3928_v33  ;;  %9545 = vpow2.f32 %v2830_v23  ;;  %v18277_v23 = vld [vmem:[#allocation18_spill] sm:$0xff]  ;;  %v2732_v18 = vsub.f32 %v18283_v8, %v18282_v47 }
 0x62c   : > { %5092 = vrot.lane.b32.xlu1 %v13542_v39, %s10112_s30  ;;  %4424 = vrot.lane.b32.xlu0 %v13558_v30, %s10109_s26 }
 0x62d   : > { %v4568_v59 = vadd.f32 %v13152_v9, %v4248_v54  ;;  %v3115_v9 = vsub.f32 %v18266_v5, %v18274_v28 }
 0x62e   : > { %v5077_v20 = vpop.permute.xlu1 %5076  ;;  %v13566_v0 = vpop.permute.xlu0 %4408 }
 0x62f   : > { %v5262_v58 = vmul.f32 %v18267_v56, %v5077_v20  ;;  %v13584_v1 = vpop.eup %9535  ;;  %v18269_v56 = vld [vmem:[#allocation155_spill] sm:$0xff]  ;;  %9547 = vrcp.f32 %v4568_v59  ;;  %v3214_v28 = vmul.f32 1.442695, %v3115_v9  ;;  %v18284_v9 = vld [vmem:[#allocation148_spill] sm:$0xff] }
 0x630   : > { %4106 = vrot.lane.b32.xlu1 %v13568_v51, %s18141_s7  ;;  %5348 = vrot.lane.b32.xlu0 %v13542_v39, %s18129_s10  ;;  %v5583_v20 = vsel %vm5576_vm1, %v18269_v56, %v5006_v21  ;;  %v18270_v51 = vld [vmem:[#allocation126_spill] sm:$0xff]  ;;  %v13599_v21 = vpop.eup %9537 }
 0x631   : > { %v5648_v49 = vsel %vm5641_vm2, %v5583_v20, %v5262_v58  ;;  %18272 = vst [vmem:[#allocation117_spill] sm:$0xff] %v13599_v21  ;;  %v13607_v58 = vpop.eup %9539 }
 0x632   : > { %v13582_v30 = vpop.permute.xlu1 %4090  ;;  %v5333_v29 = vpop.permute.xlu0 %5332  ;;  %18273 = vst [vmem:[#allocation94_spill] sm:$0xff] %v13607_v58 }
 0x633   : > { %v5518_v48 = vmul.f32 %v18270_v51, %v5333_v29  ;;  %v18276_v29 = vld [vmem:[#allocation30_spill] sm:$0xff] }
 0x634   : > { %4838 = vrot.lane.b32.xlu1 %v13584_v1, %s10110_s19  ;;  %3374 = vrot.lane.b32.xlu0 %v18271_v57, %s18129_s10  ;;  %v2266_v54 = vsub.f32 %v18276_v29, %v18275_v24 }
 0x635   : > { %v5713_v33 = vsel %vm5706_vm3, %v5648_v49, %v5518_v48  ;;  %v3596_v48 = vmul.f32 1.442695, %v3498_v22  ;;  %v13623_v49 = vpop.eup %9541 }
 0x636   : > { %v4823_v51 = vpop.permute.xlu1 %4822  ;;  %5778 = vst.msk [vmem:[%s13327_s18 + $0x30] sm:$0xff] %vm5771_vm4, %v5713_v33  ;;  %8302 = vmatmul.mubr.msk.f32.gmra.mrb[76].mxu1 %vm5771_vm4, %v5713_v33  ;;  %8366 = vmatmul.mubr.msk.f32.gmra.mrb[76].mxu0 %vm5771_vm4, %v5713_v33  ;;  %v13605_v38 = vpop.permute.xlu0 %3358  ;;  %v3929_v22 = vadd.f32 %v13623_v49, %v13154_v13  ;;  %v2348_v59 = vmul.f32 1.442695, %v2266_v54  ;;  %v18285_v13 = vld [vmem:[#allocation168_spill] sm:$0xff] }
 0x637   : > { %6142 = vmatprep.mubr.f32.mxu1 %v18227_v25  ;;  %6591 = vmatprep.mubr.f32.mxu0 %v18227_v25  ;;  %v5007_v33 = vmul.f32 %v18277_v23, %v4823_v51  ;;  %9549 = vpow2.f32 %v3596_v48  ;;  %v18281_v23 = vld [vmem:[#allocation199_spill] sm:$0xff]  ;;  %v18286_v54 = vld [vmem:[#allocation164_spill] sm:$0xff] }
 0x638   : > { %4426 = vrot.lane.b32.xlu1 %v13607_v58, %s10109_s26  ;;  %3788 = vrot.lane.b32.xlu0 %v13599_v21, %s10108_s20  ;;  %v13632_v21 = vpop.eup %9543  ;;  %v18279_v58 = vld [vmem:[#allocation70_spill] sm:$0xff]  ;;  %9551 = vpow2.f32 %v3214_v28  ;;  %v18289_v28 = vld [vmem:[#allocation29_spill] sm:$0xff] }
 0x639   : > { %18278 = vst [vmem:[#allocation28_spill] sm:$0xff] %v13632_v21  ;;  %v4249_v57 = vadd.f32 %v18279_v58, %v3929_v22  ;;  %v5584_v48 = vsel %vm5576_vm1, %v18284_v9, %v5007_v33  ;;  %v3499_v58 = vsub.f32 %v18266_v5, %v18286_v54  ;;  %9553 = vpow2.f32 %v2348_v59  ;;  %v18297_v5 = vld [vmem:[#allocation131_spill] sm:$0xff] }
 0x63a   : > { %v13619_v56 = vpop.permute.xlu1 %4410  ;;  %v13621_v20 = vpop.permute.xlu0 %3772 }
 0x63c   : > { %5350 = vrot.lane.b32.xlu1 %v13584_v1, %s18129_s10  ;;  %5094 = vrot.lane.b32.xlu0 %v13584_v1, %s10112_s30 }
 0x63e   : > { %v5335_v24 = vpop.permute.xlu1 %5334  ;;  %v5079_v29 = vpop.permute.xlu0 %5078 }
 0x63f   : > { %v5519_v51 = vmul.f32 %v18280_v27, %v5335_v24  ;;  %v5263_v50 = vmul.f32 %v18281_v23, %v5079_v29  ;;  %v4569_v27 = vadd.f32 %v13178_v44, %v4249_v57  ;;  %v13649_v24 = vpop.eup %9545  ;;  %v2832_v44 = vmul.f32 1.442695, %v2732_v18  ;;  %v18288_v57 = vld [vmem:[#allocation101_spill] sm:$0xff]  ;;  %v18291_v18 = vld [vmem:[#allocation198_spill] sm:$0xff] }
 0x640   : > { %3376 = vrot.lane.b32.xlu1 %v18285_v13, %s18129_s10  ;;  %4108 = vrot.lane.b32.xlu0 %v13632_v21, %s18141_s7  ;;  %18287 = vst [vmem:[#allocation76_spill] sm:$0xff] %v13649_v24  ;;  %v13656_v23 = vpop.eup %9547  ;;  %v2267_v59 = vsub.f32 %v18289_v28, %v18288_v57  ;;  %v3116_v54 = vsub.f32 %v18283_v8, %v18291_v18  ;;  %v18293_v57 = vld [vmem:[#allocation212_spill] sm:$0xff]  ;;  %v18296_v21 = vld [vmem:[#allocation47_spill] sm:$0xff]  ;;  %v18298_v18 = vld [vmem:[#allocation110_spill] sm:$0xff] }
 0x641   : > { %v5649_v22 = vsel %vm5641_vm2, %v5584_v48, %v5263_v50  ;;  %v3598_v50 = vmul.f32 1.442695, %v3499_v58  ;;  %9555 = vrcp.f32 %v4569_v27  ;;  %v13672_v48 = vpop.eup %9549 }
 0x642   : > { %v13651_v47 = vpop.permute.xlu1 %3360  ;;  %v13653_v33 = vpop.permute.xlu0 %4092  ;;  %v5714_v29 = vsel %vm5706_vm3, %v5649_v22, %v5519_v51  ;;  %18290 = vst [vmem:[#allocation192_spill] sm:$0xff] %v13672_v48  ;;  %9557 = vpow2.f32 %v2832_v44  ;;  %v2350_v58 = vmul.f32 1.442695, %v2267_v59  ;;  %v18295_v44 = vld [vmem:[#allocation67_spill] sm:$0xff] }
 0x643   : > { %5779 = vst.msk [vmem:[%s13327_s18 + $0x38] sm:$0xff] %vm5771_vm4, %v5714_v29  ;;  %8303 = vmatmul.mubr.msk.f32.gmra.mrb[78].mxu1 %vm5771_vm4, %v5714_v29  ;;  %8367 = vmatmul.mubr.msk.f32.gmra.mrb[78].mxu0 %vm5771_vm4, %v5714_v29  ;;  %9559 = vpow2.f32 %v3598_v50  ;;  %v13682_v29 = vpop.eup %9551  ;;  %v2733_v13 = vsub.f32 %v18296_v21, %v18295_v44  ;;  %v3216_v50 = vmul.f32 1.442695, %v3116_v54 }
 0x644   : > { %3790 = vrot.lane.b32.xlu1 %v13649_v24, %s10108_s20  ;;  %4840 = vrot.lane.b32.xlu0 %v13656_v23, %s10110_s19  ;;  %18292 = vst [vmem:[#allocation163_spill] sm:$0xff] %v13682_v29  ;;  %v13685_v24 = vpop.eup %9553  ;;  %9561 = vpow2.f32 %v2350_v58  ;;  %v3500_v58 = vsub.f32 %v18283_v8, %v13196_v35  ;;  %v18304_v35 = vld [vmem:[#allocation92_spill] sm:$0xff] }
 0x645   : > { %6148 = vmatprep.mubr.f32.mxu1 %v18227_v25  ;;  %6597 = vmatprep.mubr.f32.mxu0 %v18227_v25  ;;  %18294 = vst [vmem:[#allocation201_spill] sm:$0xff] %v13685_v24  ;;  %v3930_v59 = vadd.f32 %v13685_v24, %v13180_v11  ;;  %v2834_v54 = vmul.f32 1.442695, %v2733_v13  ;;  %v18300_v11 = vld [vmem:[#allocation75_spill] sm:$0xff]  ;;  %9563 = vpow2.f32 %v3216_v50  ;;  %v18305_v50 = vld [vmem:[#allocation109_spill] sm:$0xff]  ;;  %v18315_v8 = vld [vmem:[#allocation24_spill] sm:$0xff] }
 0x646   : > { %v13670_v51 = vpop.permute.xlu1 %3774  ;;  %v4825_v9 = vpop.permute.xlu0 %4824  ;;  %v18316_v24 = vld [vmem:[#allocation207_spill] sm:$0xff] }
 0x647   : > { %v5008_v28 = vmul.f32 %v18293_v57, %v4825_v9  ;;  %v4688_v9 = vmul.f32 %v13200_v15, %v18298_v18  ;;  %9565 = vpow2.f32 %v2834_v54  ;;  %v18310_v54 = vld [vmem:[#allocation22_spill] sm:$0xff] }
 0x648   : > { %5096 = vrot.lane.b32.xlu1 %v13656_v23, %s10112_s30  ;;  %4428 = vrot.lane.b32.xlu0 %v13672_v48, %s10109_s26 }
 0x64a   : > { %v5081_v27 = vpop.permute.xlu1 %5080  ;;  %v13680_v22 = vpop.permute.xlu0 %4412 }
 0x64b   : > { %v5264_v4 = vmul.f32 %v18297_v5, %v5081_v27  ;;  %v13700_v48 = vpop.eup %9555  ;;  %v4250_v5 = vadd.f32 %v13198_v60, %v3930_v59  ;;  %v5585_v27 = vsel %vm5576_vm1, %v4688_v9, %v5008_v28  ;;  %v18306_v59 = vld [vmem:[#allocation32_spill] sm:$0xff] }
 0x64c   : > { %4110 = vrot.lane.b32.xlu1 %v13682_v29, %s18141_s7  ;;  %5352 = vrot.lane.b32.xlu0 %v13656_v23, %s18129_s10  ;;  %v18299_v29 = vld [vmem:[#allocation215_spill] sm:$0xff]  ;;  %v13714_v28 = vpop.eup %9557  ;;  %v2268_v9 = vsub.f32 %v18306_v59, %v18305_v50  ;;  %v18312_v50 = vld [vmem:[#allocation261_spill] sm:$0xff] }
 0x64d   : > { %v5650_v15 = vsel %vm5641_vm2, %v5585_v27, %v5264_v4  ;;  %v4570_v18 = vadd.f32 %v13210_v16, %v4250_v5  ;;  %18301 = vst [vmem:[#allocation89_spill] sm:$0xff] %v13714_v28  ;;  %v13722_v4 = vpop.eup %9559  ;;  %v3117_v16 = vsub.f32 %v18296_v21, %v18304_v35  ;;  %v4689_v59 = vmul.f32 %v13240_v62, %v18312_v50  ;;  %v18320_v62 = vld [vmem:[#allocation263_spill] sm:$0xff] }
 0x64e   : > { %v13698_v57 = vpop.permute.xlu1 %4094  ;;  %v5337_v44 = vpop.permute.xlu0 %5336  ;;  %18303 = vst [vmem:[#allocation88_spill] sm:$0xff] %v13722_v4  ;;  %v2352_v35 = vmul.f32 1.442695, %v2268_v9  ;;  %v18319_v9 = vld [vmem:[#allocation80_spill] sm:$0xff] }
 0x64f   : > { %v5520_v10 = vmul.f32 %v18299_v29, %v5337_v44  ;;  %9567 = vrcp.f32 %v4570_v18  ;;  %v13738_v27 = vpop.eup %9561 }
 0x650   : > { %4842 = vrot.lane.b32.xlu1 %v13700_v48, %s10110_s19  ;;  %3378 = vrot.lane.b32.xlu0 %v18300_v11, %s18129_s10  ;;  %18309 = vst [vmem:[#allocation27_spill] sm:$0xff] %v13738_v27  ;;  %v13749_v11 = vpop.eup %9563 }
 0x651   : > { %v5715_v60 = vsel %vm5706_vm3, %v5650_v15, %v5520_v10  ;;  %v3600_v10 = vmul.f32 1.442695, %v3500_v58  ;;  %v18311_v58 = vld [vmem:[#allocation120_spill] sm:$0xff]  ;;  %18313 = vst [vmem:[#allocation118_spill] sm:$0xff] %v13749_v11 }
 0x652   : > { %v4827_v29 = vpop.permute.xlu1 %4826  ;;  %5780 = vst.msk [vmem:[%s13327_s18 + $0x40] sm:$0xff] %vm5771_vm4, %v5715_v60  ;;  %8304 = vmatmul.mubr.msk.f32.gmra.mrb[80].mxu1 %vm5771_vm4, %v5715_v60  ;;  %8368 = vmatmul.mubr.msk.f32.gmra.mrb[80].mxu0 %vm5771_vm4, %v5715_v60  ;;  %v13720_v13 = vpop.permute.xlu0 %3362  ;;  %v3218_v60 = vmul.f32 1.442695, %v3117_v16  ;;  %v3931_v18 = vadd.f32 %v13738_v27, %v18311_v58  ;;  %v18317_v16 = vld [vmem:[#allocation20_spill] sm:$0xff] }
 0x653   : > { %18302 = vst [vmem:[#allocation17_spill] sm:$0xff] %v13720_v13  ;;  %6154 = vmatprep.mubr.f32.mxu1 %v18227_v25  ;;  %6603 = vmatprep.mubr.f32.mxu0 %v18227_v25  ;;  %v5009_v15 = vmul.f32 %v18310_v54, %v4827_v29  ;;  %9569 = vpow2.f32 %v3600_v10  ;;  %v18314_v29 = vld [vmem:[#allocation172_spill] sm:$0xff]  ;;  %v18318_v10 = vld [vmem:[#allocation50_spill] sm:$0xff] }
 0x654   : > { %4430 = vrot.lane.b32.xlu1 %v13722_v4, %s10109_s26  ;;  %3792 = vrot.lane.b32.xlu0 %v13714_v28, %s10108_s20  ;;  %v4251_v54 = vadd.f32 %v18314_v29, %v3931_v18  ;;  %v2734_v13 = vsub.f32 %v18318_v10, %v18317_v16  ;;  %9571 = vpow2.f32 %v3218_v60  ;;  %v3501_v18 = vsub.f32 %v18296_v21, %v18320_v62  ;;  %v18323_v60 = vld [vmem:[#allocation31_spill] sm:$0xff] }
 0x655   : > { %v5586_v58 = vsel %vm5576_vm1, %v4689_v59, %v5009_v15  ;;  %9573 = vpow2.f32 %v2352_v35 }
 0x656   : > { %v13734_v44 = vpop.permute.xlu1 %4414  ;;  %v13736_v5 = vpop.permute.xlu0 %3776 }
 0x657   : > { %18307 = vst [vmem:[#allocation108_spill] sm:$0xff] %v13734_v44  ;;  %18308 = vst [vmem:[#allocation93_spill] sm:$0xff] %v13736_v5 }
 0x658   : > { %5354 = vrot.lane.b32.xlu1 %v13700_v48, %s18129_s10  ;;  %5098 = vrot.lane.b32.xlu0 %v13700_v48, %s10112_s30 }
 0x65a   : > { %v5339_v28 = vpop.permute.xlu1 %5338  ;;  %v5083_v4 = vpop.permute.xlu0 %5082 }
 0x65b   : > { %v5521_v5 = vmul.f32 %v18315_v8, %v5339_v28  ;;  %v5265_v44 = vmul.f32 %v18316_v24, %v5083_v4  ;;  %v4571_v8 = vadd.f32 %v13236_v63, %v4251_v54  ;;  %v13765_v24 = vpop.eup %9565  ;;  %v2836_v63 = vmul.f32 1.442695, %v2734_v13  ;;  %v18326_v13 = vld [vmem:[#allocation203_spill] sm:$0xff] }
 0x65c   : > { %3380 = vrot.lane.b32.xlu1 %v18319_v9, %s18129_s10  ;;  %4112 = vrot.lane.b32.xlu0 %v13749_v11, %s18141_s7  ;;  %18321 = vst [vmem:[#allocation200_spill] sm:$0xff] %v13765_v24  ;;  %v13772_v59 = vpop.eup %9567  ;;  %v18332_v9 = vld [vmem:[#allocation221_spill] sm:$0xff] }
 0x65d   : > { %v5651_v28 = vsel %vm5641_vm2, %v5586_v58, %v5265_v44  ;;  %v3602_v44 = vmul.f32 1.442695, %v3501_v18  ;;  %9575 = vrcp.f32 %v4571_v8  ;;  %v13788_v16 = vpop.eup %9569  ;;  %v3118_v58 = vsub.f32 %v18318_v10, %v18326_v13 }
 0x65e   : > { %v13767_v4 = vpop.permute.xlu1 %3364  ;;  %v13769_v15 = vpop.permute.xlu0 %4096  ;;  %v5716_v50 = vsel %vm5706_vm3, %v5651_v28, %v5521_v5  ;;  %v18322_v5 = vld [vmem:[#allocation105_spill] sm:$0xff]  ;;  %18325 = vst [vmem:[#allocation204_spill] sm:$0xff] %v13788_v16  ;;  %9577 = vpow2.f32 %v2836_v63 }
 0x65f   : > { %5781 = vst.msk [vmem:[%s13327_s18 + $0x48] sm:$0xff] %vm5771_vm4, %v5716_v50  ;;  %8305 = vmatmul.mubr.msk.f32.gmra.mrb[82].mxu1 %vm5771_vm4, %v5716_v50  ;;  %8369 = vmatmul.mubr.msk.f32.gmra.mrb[82].mxu0 %vm5771_vm4, %v5716_v50  ;;  %v2269_v35 = vsub.f32 %v18323_v60, %v18322_v5  ;;  %9579 = vpow2.f32 %v3602_v44  ;;  %v13798_v28 = vpop.eup %9571  ;;  %v18328_v50 = vld [vmem:[#allocation218_spill] sm:$0xff]  ;;  %v18330_v63 = vld [vmem:[#allocation69_spill] sm:$0xff]  ;;  %v3220_v44 = vmul.f32 1.442695, %v3118_v58 }
 0x660   : > { %3794 = vrot.lane.b32.xlu1 %v13765_v24, %s10108_s20  ;;  %4844 = vrot.lane.b32.xlu0 %v13772_v59, %s10110_s19  ;;  %18327 = vst [vmem:[#allocation259_spill] sm:$0xff] %v13798_v28  ;;  %v13801_v60 = vpop.eup %9573  ;;  %v18331_v24 = vld [vmem:[#allocation49_spill] sm:$0xff] }
 0x661   : > { %6160 = vmatprep.mubr.f32.mxu1 %v18227_v25  ;;  %6609 = vmatprep.mubr.f32.mxu0 %v18227_v25  ;;  %v2354_v62 = vmul.f32 1.442695, %v2269_v35  ;;  %18329 = vst [vmem:[#allocation155_spill] sm:$0xff] %v13801_v60  ;;  %v2735_v11 = vsub.f32 %v18331_v24, %v18330_v63  ;;  %v18333_v35 = vld [vmem:[#allocation62_spill] sm:$0xff] }
 0x662   : > { %v13786_v29 = vpop.permute.xlu1 %3778  ;;  %v4829_v54 = vpop.permute.xlu0 %4828  ;;  %v3932_v13 = vadd.f32 %v13801_v60, %v18333_v35  ;;  %v18337_v35 = vld [vmem:[#allocation170_spill] sm:$0xff] }
 0x663   : > { %18324 = vst [vmem:[#allocation176_spill] sm:$0xff] %v13786_v29  ;;  %v5010_v5 = vmul.f32 %v18328_v50, %v4829_v54  ;;  %9581 = vpow2.f32 %v2354_v62  ;;  %v2838_v58 = vmul.f32 1.442695, %v2735_v11  ;;  %v18339_v60 = vld [vmem:[#allocation78_spill] sm:$0xff] }
 0x664   : > { %5100 = vrot.lane.b32.xlu1 %v13772_v59, %s10112_s30  ;;  %4432 = vrot.lane.b32.xlu0 %v13788_v16, %s10109_s26  ;;  %v18334_v16 = vld [vmem:[#allocation265_spill] sm:$0xff]  ;;  %9583 = vpow2.f32 %v3220_v44 }
 0x665   : > { %v4690_v54 = vmul.f32 %v13301_v55, %v18334_v16  ;;  %v18338_v16 = vld [vmem:[#allocation267_spill] sm:$0xff]  ;;  %9585 = vpow2.f32 %v2838_v58 }
 0x666   : > { %v5085_v18 = vpop.permute.xlu1 %5084  ;;  %v13796_v8 = vpop.permute.xlu0 %4416  ;;  %v3502_v62 = vsub.f32 %v18318_v10, %v18338_v16  ;;  %v18348_v58 = vld [vmem:[#allocation135_spill] sm:$0xff]  ;;  %v18352_v10 = vld [vmem:[#allocation225_spill] sm:$0xff] }
 0x667   : > { %v5266_v21 = vmul.f32 %v18332_v9, %v5085_v18  ;;  %v13816_v29 = vpop.eup %9575  ;;  %v4252_v9 = vadd.f32 %v13254_v12, %v3932_v13  ;;  %v5587_v18 = vsel %vm5576_vm1, %v4690_v54, %v5010_v5  ;;  %v18343_v13 = vld [vmem:[#allocation114_spill] sm:$0xff] }
 0x668   : > { %4114 = vrot.lane.b32.xlu1 %v13798_v28, %s18141_s7  ;;  %5356 = vrot.lane.b32.xlu0 %v13772_v59, %s18129_s10  ;;  %v18336_v28 = vld [vmem:[#allocation223_spill] sm:$0xff]  ;;  %v13830_v5 = vpop.eup %9577  ;;  %v3604_v44 = vmul.f32 1.442695, %v3502_v62  ;;  %v18344_v54 = vld [vmem:[#allocation34_spill] sm:$0xff] }
 0x669   : > { %v5652_v55 = vsel %vm5641_vm2, %v5587_v18, %v5266_v21  ;;  %18340 = vst [vmem:[#allocation12_spill] sm:$0xff] %v13830_v5  ;;  %v13838_v21 = vpop.eup %9579 }
 0x66a   : > { %v13814_v50 = vpop.permute.xlu1 %4098  ;;  %v5341_v63 = vpop.permute.xlu0 %5340  ;;  %18341 = vst [vmem:[#allocation102_spill] sm:$0xff] %v13838_v21 }
 0x66b   : > { %18335 = vst [vmem:[#allocation126_spill] sm:$0xff] %v13814_v50  ;;  %v5522_v27 = vmul.f32 %v18336_v28, %v5341_v63  ;;  %v4572_v50 = vadd.f32 %v18339_v60, %v4252_v9  ;;  %v2270_v63 = vsub.f32 %v18344_v54, %v18343_v13  ;;  %v4691_v13 = vmul.f32 %v13344_v53, %v13270_v3 }
 0x66c   : > { %4846 = vrot.lane.b32.xlu1 %v13816_v29, %s10110_s19  ;;  %3382 = vrot.lane.b32.xlu0 %v18337_v35, %s18129_s10  ;;  %v3503_v3 = vsub.f32 %v18331_v24, %v13281_v2 }
 0x66d   : > { %v5717_v12 = vsel %vm5706_vm3, %v5652_v55, %v5522_v27  ;;  %v18342_v27 = vld [vmem:[#allocation123_spill] sm:$0xff]  ;;  %9587 = vrcp.f32 %v4572_v50  ;;  %v13854_v55 = vpop.eup %9581  ;;  %v18349_v50 = vld [vmem:[#allocation169_spill] sm:$0xff] }
 0x66e   : > { %v4831_v28 = vpop.permute.xlu1 %4830  ;;  %5782 = vst.msk [vmem:[%s13327_s18 + $0x50] sm:$0xff] %vm5771_vm4, %v5717_v12  ;;  %8306 = vmatmul.mubr.msk.f32.gmra.mrb[84].mxu1 %vm5771_vm4, %v5717_v12  ;;  %8370 = vmatmul.mubr.msk.f32.gmra.mrb[84].mxu0 %vm5771_vm4, %v5717_v12  ;;  %v13836_v11 = vpop.permute.xlu0 %3366  ;;  %v3119_v60 = vsub.f32 %v18331_v24, %v18342_v27  ;;  %18347 = vst [vmem:[#allocation70_spill] sm:$0xff] %v13854_v55  ;;  %9589 = vpow2.f32 %v3604_v44  ;;  %v3933_v62 = vadd.f32 %v13854_v55, %v18349_v50  ;;  %v18354_v44 = vld [vmem:[#allocation52_spill] sm:$0xff] }
 0x66f   : > { %6166 = vmatprep.mubr.f32.mxu1 %v18227_v25  ;;  %6615 = vmatprep.mubr.f32.mxu0 %v18227_v25  ;;  %v5011_v16 = vmul.f32 %v18348_v58, %v4831_v28  ;;  %v2356_v27 = vmul.f32 1.442695, %v2270_v63  ;;  %v18351_v58 = vld [vmem:[#allocation26_spill] sm:$0xff]  ;;  %v18355_v63 = vld [vmem:[#allocation83_spill] sm:$0xff] }
 0x670   : > { %4434 = vrot.lane.b32.xlu1 %v13838_v21, %s10109_s26  ;;  %3796 = vrot.lane.b32.xlu0 %v13830_v5, %s10108_s20  ;;  %v3222_v12 = vmul.f32 1.442695, %v3119_v60  ;;  %v13865_v21 = vpop.eup %9583  ;;  %v4253_v28 = vadd.f32 %v13279_v61, %v3933_v62  ;;  %v18353_v60 = vld [vmem:[#allocation206_spill] sm:$0xff] }
 0x671   : > { %18350 = vst [vmem:[#allocation210_spill] sm:$0xff] %v13865_v21  ;;  %v5588_v50 = vsel %vm5576_vm1, %v4691_v13, %v5011_v16  ;;  %v18356_v61 = vld [vmem:[#allocation270_spill] sm:$0xff] }
 0x672   : > { %v13850_v9 = vpop.permute.xlu1 %4418  ;;  %v13852_v18 = vpop.permute.xlu0 %3780  ;;  %9591 = vpow2.f32 %v3222_v12  ;;  %v4573_v53 = vadd.f32 %v18356_v61, %v4253_v28  ;;  %v18359_v12 = vld [vmem:[#allocation33_spill] sm:$0xff] }
 0x673   : > { %18345 = vst [vmem:[#allocation30_spill] sm:$0xff] %v13850_v9  ;;  %18346 = vst [vmem:[#allocation18_spill] sm:$0xff] %v13852_v18  ;;  %v2736_v9 = vsub.f32 %v18354_v44, %v18353_v60  ;;  %9593 = vpow2.f32 %v2356_v27 }
 0x674   : > { %5358 = vrot.lane.b32.xlu1 %v13816_v29, %s18129_s10  ;;  %5102 = vrot.lane.b32.xlu0 %v13816_v29, %s10112_s30  ;;  %9595 = vrcp.f32 %v4573_v53 }
 0x675   : > { %v2840_v2 = vmul.f32 1.442695, %v2736_v9  ;;  %v18361_v9 = vld [vmem:[#allocation209_spill] sm:$0xff] }
 0x676   : > { %v5343_v54 = vpop.permute.xlu1 %5342  ;;  %v5087_v5 = vpop.permute.xlu0 %5086 }
 0x677   : > { %v5523_v35 = vmul.f32 %v18351_v58, %v5343_v54  ;;  %v5267_v18 = vmul.f32 %v18352_v10, %v5087_v5  ;;  %v13881_v10 = vpop.eup %9585  ;;  %9597 = vpow2.f32 %v2840_v2  ;;  %v18365_v2 = vld [vmem:[#allocation175_spill] sm:$0xff] }
 0x678   : > { %3384 = vrot.lane.b32.xlu1 %v18355_v63, %s18129_s10  ;;  %4116 = vrot.lane.b32.xlu0 %v13865_v21, %s18141_s7  ;;  %18357 = vst [vmem:[#allocation199_spill] sm:$0xff] %v13881_v10  ;;  %v13888_v54 = vpop.eup %9587  ;;  %v18367_v63 = vld [vmem:[#allocation231_spill] sm:$0xff] }
 0x679   : > { %v5653_v62 = vsel %vm5641_vm2, %v5588_v50, %v5267_v18  ;;  %v3606_v18 = vmul.f32 1.442695, %v3503_v3  ;;  %v13904_v60 = vpop.eup %9589  ;;  %v3120_v50 = vsub.f32 %v18354_v44, %v18361_v9 }
 0x67a   : > { %v13883_v5 = vpop.permute.xlu1 %3368  ;;  %v13885_v16 = vpop.permute.xlu0 %4100  ;;  %v5718_v13 = vsel %vm5706_vm3, %v5653_v62, %v5523_v35  ;;  %v18358_v35 = vld [vmem:[#allocation111_spill] sm:$0xff]  ;;  %18360 = vst [vmem:[#allocation178_spill] sm:$0xff] %v13904_v60 }
 0x67b   : > { %5783 = vst.msk [vmem:[%s13327_s18 + $0x58] sm:$0xff] %vm5771_vm4, %v5718_v13  ;;  %8307 = vmatmul.mubr.msk.f32.gmra.mrb[86].mxu1 %vm5771_vm4, %v5718_v13  ;;  %8371 = vmatmul.mubr.msk.f32.gmra.mrb[86].mxu0 %vm5771_vm4, %v5718_v13  ;;  %v2271_v27 = vsub.f32 %v18359_v12, %v18358_v35  ;;  %9599 = vpow2.f32 %v3606_v18  ;;  %v18363_v13 = vld [vmem:[#allocation228_spill] sm:$0xff]  ;;  %v3224_v18 = vmul.f32 1.442695, %v3120_v50 }
 0x67c   : > { %3798 = vrot.lane.b32.xlu1 %v13881_v10, %s10108_s20  ;;  %4848 = vrot.lane.b32.xlu0 %v13888_v54, %s10110_s19  ;;  %v13914_v62 = vpop.eup %9591  ;;  %v18366_v10 = vld [vmem:[#allocation51_spill] sm:$0xff] }
 0x67d   : > { %6172 = vmatprep.mubr.f32.mxu1 %v18227_v25  ;;  %6621 = vmatprep.mubr.f32.mxu0 %v18227_v25  ;;  %v2358_v3 = vmul.f32 1.442695, %v2271_v27  ;;  %18362 = vst [vmem:[#allocation148_spill] sm:$0xff] %v13914_v62  ;;  %v13917_v12 = vpop.eup %9593  ;;  %v2737_v21 = vsub.f32 %v18366_v10, %v18365_v2  ;;  %v18368_v27 = vld [vmem:[#allocation271_spill] sm:$0xff] }
 0x67e   : > { %v13902_v28 = vpop.permute.xlu1 %3782  ;;  %v4833_v58 = vpop.permute.xlu0 %4832  ;;  %18364 = vst [vmem:[#allocation164_spill] sm:$0xff] %v13917_v12  ;;  %v3934_v9 = vadd.f32 %v13917_v12, %v18368_v27  ;;  %v18370_v27 = vld [vmem:[#allocation91_spill] sm:$0xff] }
 0x67f   : > { %v5012_v35 = vmul.f32 %v18363_v13, %v4833_v58  ;;  %v4692_v58 = vmul.f32 %v13428_v14, %v13329_v52  ;;  %9601 = vpow2.f32 %v2358_v3  ;;  %v2842_v50 = vmul.f32 1.442695, %v2737_v21 }
 0x680   : > { %5104 = vrot.lane.b32.xlu1 %v13888_v54, %s10112_s30  ;;  %4436 = vrot.lane.b32.xlu0 %v13904_v60, %s10109_s26  ;;  %v13932_v60 = vpop.eup %9595  ;;  %9603 = vpow2.f32 %v3224_v18  ;;  %v3504_v14 = vsub.f32 %v18354_v44, %v13423_v32  ;;  %v18373_v32 = vld [vmem:[#allocation81_spill] sm:$0xff] }
 0x681   : > { %9605 = vpow2.f32 %v2842_v50  ;;  %v18374_v18 = vld [vmem:[#allocation121_spill] sm:$0xff]  ;;  %v18376_v50 = vld [vmem:[#allocation139_spill] sm:$0xff] }
 0x682   : > { %v5089_v61 = vpop.permute.xlu1 %5088  ;;  %v13912_v53 = vpop.permute.xlu0 %4420 }
 0x683   : > { %v5268_v24 = vmul.f32 %v18367_v63, %v5089_v61  ;;  %v4254_v63 = vadd.f32 %v13425_v36, %v3934_v9  ;;  %v5589_v61 = vsel %vm5576_vm1, %v4692_v58, %v5012_v35  ;;  %v13946_v35 = vpop.eup %9597  ;;  %v18375_v9 = vld [vmem:[#allocation36_spill] sm:$0xff] }
 0x684   : > { %4118 = vrot.lane.b32.xlu1 %v13914_v62, %s18141_s7  ;;  %5360 = vrot.lane.b32.xlu0 %v13888_v54, %s18129_s10  ;;  %v18369_v62 = vld [vmem:[#allocation233_spill] sm:$0xff]  ;;  %18371 = vst [vmem:[#allocation101_spill] sm:$0xff] %v13946_v35  ;;  %v2272_v58 = vsub.f32 %v18375_v9, %v18374_v18 }
 0x685   : > { %v5654_v52 = vsel %vm5641_vm2, %v5589_v61, %v5268_v24  ;;  %v4574_v3 = vadd.f32 %v13452_v42, %v4254_v63  ;;  %v13954_v24 = vpop.eup %9599  ;;  %v3121_v42 = vsub.f32 %v18366_v10, %v18373_v32  ;;  %v4693_v32 = vmul.f32 %v13470_v37, %v13383_v7 }
 0x686   : > { %v13930_v13 = vpop.permute.xlu1 %4102  ;;  %v5345_v2 = vpop.permute.xlu0 %5344  ;;  %18372 = vst [vmem:[#allocation29_spill] sm:$0xff] %v13954_v24  ;;  %v3505_v7 = vsub.f32 %v18366_v10, %v13491_v43 }
 0x687   : > { %v5524_v55 = vmul.f32 %v18369_v62, %v5345_v2  ;;  %9607 = vrcp.f32 %v4574_v3  ;;  %v2360_v3 = vmul.f32 1.442695, %v2272_v58  ;;  %v18382_v58 = vld [vmem:[#allocation96_spill] sm:$0xff] }
 0x688   : > { %4850 = vrot.lane.b32.xlu1 %v13932_v60, %s10110_s19  ;;  %3386 = vrot.lane.b32.xlu0 %v18370_v27, %s18129_s10  ;;  %v18379_v27 = vld [vmem:[#allocation235_spill] sm:$0xff] }
 0x689   : > { %v5719_v36 = vsel %vm5706_vm3, %v5654_v52, %v5524_v55  ;;  %v3608_v55 = vmul.f32 1.442695, %v3504_v14  ;;  %v13970_v61 = vpop.eup %9601 }
 0x68a   : > { %v4835_v62 = vpop.permute.xlu1 %4834  ;;  %5784 = vst.msk [vmem:[%s13327_s18 + $0x60] sm:$0xff] %vm5771_vm4, %v5719_v36  ;;  %8308 = vmatmul.mubr.msk.f32.gmra.mrb[88].mxu1 %vm5771_vm4, %v5719_v36  ;;  %8372 = vmatmul.mubr.msk.f32.gmra.mrb[88].mxu0 %vm5771_vm4, %v5719_v36  ;;  %v13952_v21 = vpop.permute.xlu0 %3370  ;;  %v3226_v36 = vmul.f32 1.442695, %v3121_v42  ;;  %v3935_v14 = vadd.f32 %v13970_v61, %v13442_v17  ;;  %v18380_v42 = vld [vmem:[#allocation211_spill] sm:$0xff] }
 0x68b   : > { %6178 = vmatprep.mubr.f32.mxu1 %v18227_v25  ;;  %6627 = vmatprep.mubr.f32.mxu0 %v18227_v25  ;;  %v5013_v52 = vmul.f32 %v18376_v50, %v4835_v62  ;;  %9609 = vpow2.f32 %v3608_v55  ;;  %v18378_v50 = vld [vmem:[#allocation236_spill] sm:$0xff]  ;;  %v18381_v55 = vld [vmem:[#allocation54_spill] sm:$0xff] }
 0x68c   : > { %4438 = vrot.lane.b32.xlu1 %v13954_v24, %s10109_s26  ;;  %3800 = vrot.lane.b32.xlu0 %v13946_v35, %s10108_s20  ;;  %v13981_v35 = vpop.eup %9603  ;;  %v4255_v62 = vadd.f32 %v13468_v45, %v3935_v14  ;;  %v2738_v12 = vsub.f32 %v18381_v55, %v18380_v42  ;;  %9611 = vpow2.f32 %v3226_v36 }
 0x68d   : > { %18377 = vst [vmem:[#allocation198_spill] sm:$0xff] %v13981_v35  ;;  %v5590_v17 = vsel %vm5576_vm1, %v4693_v32, %v5013_v52  ;;  %9613 = vpow2.f32 %v2360_v3 }
 0x68e   : > { %v13966_v2 = vpop.permute.xlu1 %4422  ;;  %v13968_v63 = vpop.permute.xlu0 %3784  ;;  %v4575_v45 = vadd.f32 %v13505_v19, %v4255_v62  ;;  %v2844_v43 = vmul.f32 1.442695, %v2738_v12  ;;  %v3610_v19 = vmul.f32 1.442695, %v3505_v7  ;;  %v18385_v12 = vld [vmem:[#allocation214_spill] sm:$0xff]  ;;  %v18387_v62 = vld [vmem:[#allocation35_spill] sm:$0xff] }
 0x68f   : > { %v3122_v3 = vsub.f32 %v18381_v55, %v18385_v12 }
 0x690   : > { %5362 = vrot.lane.b32.xlu1 %v13932_v60, %s18129_s10  ;;  %5106 = vrot.lane.b32.xlu0 %v13932_v60, %s10112_s30  ;;  %9615 = vrcp.f32 %v4575_v45  ;;  %v18389_v45 = vld [vmem:[#allocation239_spill] sm:$0xff] }
 0x691   : > { %9617 = vpow2.f32 %v2844_v43  ;;  %v18390_v43 = vld [vmem:[#allocation180_spill] sm:$0xff] }
 0x692   : > { %v5347_v18 = vpop.permute.xlu1 %5346  ;;  %v5091_v9 = vpop.permute.xlu0 %5090  ;;  %9619 = vpow2.f32 %v3610_v19  ;;  %v3228_v19 = vmul.f32 1.442695, %v3122_v3 }
 0x693   : > { %v5525_v24 = vmul.f32 %v18378_v50, %v5347_v18  ;;  %v5269_v44 = vmul.f32 %v18379_v27, %v5091_v9  ;;  %v13997_v27 = vpop.eup %9605  ;;  %v18386_v9 = vld [vmem:[#allocation119_spill] sm:$0xff] }
 0x694   : > { %3388 = vrot.lane.b32.xlu1 %v18382_v58, %s18129_s10  ;;  %4120 = vrot.lane.b32.xlu0 %v13981_v35, %s18141_s7  ;;  %18383 = vst [vmem:[#allocation212_spill] sm:$0xff] %v13997_v27  ;;  %v14004_v18 = vpop.eup %9607  ;;  %v2273_v50 = vsub.f32 %v18387_v62, %v18386_v9  ;;  %9621 = vpow2.f32 %v3228_v19  ;;  %v18397_v19 = vld [vmem:[#allocation128_spill] sm:$0xff] }
 0x695   : > { %v5655_v37 = vsel %vm5641_vm2, %v5590_v17, %v5269_v44  ;;  %v14018_v36 = vpop.eup %9609 }
 0x696   : > { %v13999_v14 = vpop.permute.xlu1 %3372  ;;  %v14001_v52 = vpop.permute.xlu0 %4104  ;;  %v5720_v32 = vsel %vm5706_vm3, %v5655_v37, %v5525_v24  ;;  %18384 = vst [vmem:[#allocation67_spill] sm:$0xff] %v14018_v36  ;;  %v2362_v9 = vmul.f32 1.442695, %v2273_v50 }
 0x697   : > { %5785 = vst.msk [vmem:[%s13327_s18 + $0x68] sm:$0xff] %vm5771_vm4, %v5720_v32  ;;  %8309 = vmatmul.mubr.msk.f32.gmra.mrb[90].mxu1 %vm5771_vm4, %v5720_v32  ;;  %8373 = vmatmul.mubr.msk.f32.gmra.mrb[90].mxu0 %vm5771_vm4, %v5720_v32  ;;  %v14030_v7 = vpop.eup %9611 }
 0x698   : > { %3802 = vrot.lane.b32.xlu1 %v13997_v27, %s10108_s20  ;;  %4852 = vrot.lane.b32.xlu0 %v14004_v18, %s10110_s19  ;;  %18388 = vst [vmem:[#allocation131_spill] sm:$0xff] %v14030_v7  ;;  %v14033_v32 = vpop.eup %9613  ;;  %v18391_v27 = vld [vmem:[#allocation53_spill] sm:$0xff]  ;;  %9623 = vpow2.f32 %v2362_v9 }
 0x699   : > { %6184 = vmatprep.mubr.f32.mxu1 %v18227_v25  ;;  %6633 = vmatprep.mubr.f32.mxu0 %v18227_v25  ;;  %v2739_v35 = vsub.f32 %v18391_v27, %v18390_v43  ;;  %v3936_v12 = vadd.f32 %v14033_v32, %v13507_v46  ;;  %v18394_v46 = vld [vmem:[#allocation13_spill] sm:$0xff] }
 0x69a   : > { %v14016_v44 = vpop.permute.xlu1 %3786  ;;  %v4837_v24 = vpop.permute.xlu0 %4836 }
 0x69b   : > { %v5014_v37 = vmul.f32 %v18389_v45, %v4837_v24  ;;  %v4694_v24 = vmul.f32 %v13542_v39, %v13457_v34  ;;  %v14048_v43 = vpop.eup %9615  ;;  %v2846_v3 = vmul.f32 1.442695, %v2739_v35  ;;  %v3506_v39 = vsub.f32 %v18381_v55, %v13537_v6 }
 0x69c   : > { %5108 = vrot.lane.b32.xlu1 %v14004_v18, %s10112_s30  ;;  %4440 = vrot.lane.b32.xlu0 %v14018_v36, %s10109_s26  ;;  %v18392_v36 = vld [vmem:[#allocation242_spill] sm:$0xff] }
 0x69d   : > { %9625 = vpow2.f32 %v2846_v3  ;;  %v3612_v6 = vmul.f32 1.442695, %v3506_v39  ;;  %v4695_v3 = vmul.f32 %v13584_v1, %v13509_v31 }
 0x69e   : > { %v5093_v42 = vpop.permute.xlu1 %5092  ;;  %v14028_v17 = vpop.permute.xlu0 %4424 }
 0x69f   : > { %v5270_v58 = vmul.f32 %v18392_v36, %v5093_v42  ;;  %v4256_v36 = vadd.f32 %v13539_v26, %v3936_v12  ;;  %v5591_v42 = vsel %vm5576_vm1, %v4694_v24, %v5014_v37  ;;  %v14062_v37 = vpop.eup %9617  ;;  %v18398_v24 = vld [vmem:[#allocation112_spill] sm:$0xff] }
 0x6a0   : > { %4122 = vrot.lane.b32.xlu1 %v14030_v7, %s18141_s7  ;;  %5364 = vrot.lane.b32.xlu0 %v14004_v18, %s18129_s10  ;;  %v18393_v7 = vld [vmem:[#allocation244_spill] sm:$0xff]  ;;  %18395 = vst [vmem:[#allocation110_spill] sm:$0xff] %v14062_v37  ;;  %v3123_v9 = vsub.f32 %v18391_v27, %v18398_v24 }
 0x6a1   : > { %v5656_v34 = vsel %vm5641_vm2, %v5591_v42, %v5270_v58  ;;  %v4576_v50 = vadd.f32 %v13566_v0, %v4256_v36  ;;  %v14070_v58 = vpop.eup %9619  ;;  %v18400_v36 = vld [vmem:[#allocation38_spill] sm:$0xff]  ;;  %v18405_v24 = vld [vmem:[#allocation56_spill] sm:$0xff] }
 0x6a2   : > { %v14046_v62 = vpop.permute.xlu1 %4106  ;;  %v5349_v45 = vpop.permute.xlu0 %5348  ;;  %18396 = vst [vmem:[#allocation215_spill] sm:$0xff] %v14070_v58  ;;  %v3230_v31 = vmul.f32 1.442695, %v3123_v9 }
 0x6a3   : > { %v5526_v10 = vmul.f32 %v18393_v7, %v5349_v45  ;;  %9627 = vrcp.f32 %v4576_v50  ;;  %v18399_v45 = vld [vmem:[#allocation124_spill] sm:$0xff]  ;;  %v14093_v50 = vpop.eup %9621 }
 0x6a4   : > { %4854 = vrot.lane.b32.xlu1 %v14048_v43, %s10110_s19  ;;  %3390 = vrot.lane.b32.xlu0 %v18394_v46, %s18129_s10  ;;  %9629 = vpow2.f32 %v3612_v6  ;;  %v2274_v42 = vsub.f32 %v18400_v36, %v18399_v45  ;;  %18401 = vst [vmem:[#allocation92_spill] sm:$0xff] %v14093_v50  ;;  %v18404_v46 = vld [vmem:[#allocation217_spill] sm:$0xff]  ;;  %v18406_v45 = vld [vmem:[#allocation171_spill] sm:$0xff] }
 0x6a5   : > { %v5721_v26 = vsel %vm5706_vm3, %v5656_v34, %v5526_v10  ;;  %v2740_v6 = vsub.f32 %v18405_v24, %v18404_v46  ;;  %9631 = vpow2.f32 %v3230_v31 }
 0x6a6   : > { %v4839_v35 = vpop.permute.xlu1 %4838  ;;  %5786 = vst.msk [vmem:[%s13327_s18 + $0x70] sm:$0xff] %vm5771_vm4, %v5721_v26  ;;  %8310 = vmatmul.mubr.msk.f32.gmra.mrb[92].mxu1 %vm5771_vm4, %v5721_v26  ;;  %8374 = vmatmul.mubr.msk.f32.gmra.mrb[92].mxu0 %vm5771_vm4, %v5721_v26  ;;  %v14068_v7 = vpop.permute.xlu0 %3374  ;;  %v18402_v26 = vld [vmem:[#allocation246_spill] sm:$0xff] }
 0x6a7   : > { %6190 = vmatprep.mubr.f32.mxu1 %v18227_v25  ;;  %6639 = vmatprep.mubr.f32.mxu0 %v18227_v25  ;;  %v5015_v12 = vmul.f32 %v18397_v19, %v4839_v35  ;;  %v18403_v19 = vld [vmem:[#allocation245_spill] sm:$0xff] }
 0x6a8   : > { %4442 = vrot.lane.b32.xlu1 %v14070_v58, %s10109_s26  ;;  %3804 = vrot.lane.b32.xlu0 %v14062_v37, %s10108_s20  ;;  %v14097_v58 = vpop.eup %9623 }
 0x6a9   : > { %v5592_v55 = vsel %vm5576_vm1, %v4695_v3, %v5015_v12  ;;  %v3937_v1 = vadd.f32 %v14097_v58, %v13556_v41  ;;  %v2848_v41 = vmul.f32 1.442695, %v2740_v6  ;;  %v18409_v6 = vld [vmem:[#allocation248_spill] sm:$0xff] }
 0x6aa   : > { %v14078_v0 = vpop.permute.xlu1 %4426  ;;  %v14080_v10 = vpop.permute.xlu0 %3788 }
 0x6ac   : > { %5366 = vrot.lane.b32.xlu1 %v14048_v43, %s18129_s10  ;;  %5110 = vrot.lane.b32.xlu0 %v14048_v43, %s10112_s30 }
 0x6ae   : > { %v5351_v34 = vpop.permute.xlu1 %5350  ;;  %v5095_v39 = vpop.permute.xlu0 %5094 }
 0x6af   : > { %v5527_v35 = vmul.f32 %v18402_v26, %v5351_v34  ;;  %v5271_v37 = vmul.f32 %v18403_v19, %v5095_v39  ;;  %v14109_v34 = vpop.eup %9625  ;;  %v2364_v39 = vmul.f32 1.442695, %v2274_v42  ;;  %v4257_v19 = vadd.f32 %v13582_v30, %v3937_v1  ;;  %v18410_v1 = vld [vmem:[#allocation250_spill] sm:$0xff] }
 0x6b0   : > { %3392 = vrot.lane.b32.xlu1 %v18406_v45, %s18129_s10  ;;  %4124 = vrot.lane.b32.xlu0 %v14093_v50, %s18141_s7  ;;  %18407 = vst [vmem:[#allocation109_spill] sm:$0xff] %v14109_v34  ;;  %v14116_v3 = vpop.eup %9627 }
 0x6b1   : > { %v5657_v36 = vsel %vm5641_vm2, %v5592_v55, %v5271_v37  ;;  %v3507_v55 = vsub.f32 %v18391_v27, %v13605_v38  ;;  %v4577_v37 = vadd.f32 %v13619_v56, %v4257_v19  ;;  %9633 = vpow2.f32 %v2364_v39  ;;  %v14134_v42 = vpop.eup %9629  ;;  %v18411_v39 = vld [vmem:[#allocation107_spill] sm:$0xff] }
 0x6b2   : > { %v14111_v26 = vpop.permute.xlu1 %3376  ;;  %v14113_v46 = vpop.permute.xlu0 %4108  ;;  %v5722_v12 = vsel %vm5706_vm3, %v5657_v36, %v5527_v35  ;;  %18408 = vst [vmem:[#allocation32_spill] sm:$0xff] %v14134_v42  ;;  %9635 = vpow2.f32 %v2848_v41  ;;  %v4696_v41 = vmul.f32 %v13656_v23, %v13571_v40 }
 0x6b3   : > { %5787 = vst.msk [vmem:[%s13327_s18 + $0x78] sm:$0xff] %vm5771_vm4, %v5722_v12  ;;  %8311 = vmatmul.mubr.msk.f32.gmra.mrb[94].mxu1 %vm5771_vm4, %v5722_v12  ;;  %8375 = vmatmul.mubr.msk.f32.gmra.mrb[94].mxu0 %vm5771_vm4, %v5722_v12  ;;  %v3614_v38 = vmul.f32 1.442695, %v3507_v55  ;;  %9637 = vrcp.f32 %v4577_v37  ;;  %v18412_v12 = vld [vmem:[#allocation185_spill] sm:$0xff]  ;;  %v18413_v55 = vld [vmem:[#allocation122_spill] sm:$0xff] }
 0x6b4   : > { %3806 = vrot.lane.b32.xlu1 %v14109_v34, %s10108_s20  ;;  %4856 = vrot.lane.b32.xlu0 %v14116_v3, %s10110_s19  ;;  %v3124_v19 = vsub.f32 %v18405_v24, %v18412_v12  ;;  %v18414_v37 = vld [vmem:[#allocation37_spill] sm:$0xff] }
 0x6b5   : > { %6196 = vmatprep.mubr.f32.mxu1 %v18227_v25  ;;  %6645 = vmatprep.mubr.f32.mxu0 %v18227_v25  ;;  %9639 = vpow2.f32 %v3614_v38  ;;  %v2275_v34 = vsub.f32 %v18414_v37, %v18413_v55  ;;  %v18418_v12 = vld [vmem:[#allocation97_spill] sm:$0xff]  ;;  %v18419_v38 = vld [vmem:[#allocation55_spill] sm:$0xff] }
 0x6b6   : > { %v14132_v30 = vpop.permute.xlu1 %3790  ;;  %v4841_v9 = vpop.permute.xlu0 %4840  ;;  %v2741_v27 = vsub.f32 %v18419_v38, %v18418_v12  ;;  %v3232_v23 = vmul.f32 1.442695, %v3124_v19 }
 0x6b7   : > { %v5016_v31 = vmul.f32 %v18409_v6, %v4841_v9  ;;  %v2366_v37 = vmul.f32 1.442695, %v2275_v34 }
 0x6b8   : > { %5112 = vrot.lane.b32.xlu1 %v14116_v3, %s10112_s30  ;;  %4444 = vrot.lane.b32.xlu0 %v14134_v42, %s10109_s26  ;;  %9641 = vpow2.f32 %v3232_v23 }
 0x6b9   : > { %v5593_v6 = vsel %vm5576_vm1, %v4696_v41, %v5016_v31  ;;  %9643 = vpow2.f32 %v2366_v37  ;;  %v18424_v37 = vld [vmem:[#allocation40_spill] sm:$0xff] }
 0x6ba   : > { %v5097_v56 = vpop.permute.xlu1 %5096  ;;  %v14140_v35 = vpop.permute.xlu0 %4428 }
 0x6bb   : > { %v5272_v36 = vmul.f32 %v18410_v1, %v5097_v56  ;;  %v14156_v56 = vpop.eup %9631  ;;  %v18416_v1 = vld [vmem:[#allocation138_spill] sm:$0xff] }
 0x6bc   : > { %5368 = vrot.lane.b32.xlu1 %v14116_v3, %s18129_s10  ;;  %3010 = vrot.lane.b32.xlu0 %v18411_v39, %s10112_s30  ;;  %18415 = vst [vmem:[#allocation22_spill] sm:$0xff] %v14156_v56  ;;  %v14160_v45 = vpop.eup %9633 }
 0x6bd   : > { %18417 = vst [vmem:[#allocation120_spill] sm:$0xff] %v14160_v45  ;;  %v5658_v40 = vsel %vm5641_vm2, %v5593_v6, %v5272_v36  ;;  %v3938_v55 = vadd.f32 %v14160_v45, %v13621_v20  ;;  %v14172_v41 = vpop.eup %9635  ;;  %v2850_v20 = vmul.f32 1.442695, %v2741_v27  ;;  %v18422_v27 = vld [vmem:[#allocation156_spill] sm:$0xff] }
 0x6be   : > { %v14154_v42 = vpop.permute.xlu1 %4110  ;;  %v5353_v9 = vpop.permute.xlu0 %5352  ;;  %18420 = vst [vmem:[#allocation261_spill] sm:$0xff] %v14172_v41 }
 0x6bf   : > { %v5528_v50 = vmul.f32 %v18416_v1, %v5353_v9  ;;  %v14180_v12 = vpop.eup %9637  ;;  %v4258_v36 = vadd.f32 %v13653_v33, %v3938_v55  ;;  %9645 = vpow2.f32 %v2850_v20  ;;  %v18425_v20 = vld [vmem:[#allocation157_spill] sm:$0xff] }
 0x6c0   : > { %3394 = vrot.lane.b32.xlu1 %v18411_v39, %s18129_s10  ;;  %4126 = vrot.lane.b32.xlu0 %v14156_v56, %s18141_s7  ;;  %v14196_v6 = vpop.eup %9639  ;;  %v18444_v39 = vld [vmem:[#allocation39_spill] sm:$0xff] }
 0x6c1   : > { %v5723_v31 = vsel %vm5706_vm3, %v5658_v40, %v5528_v50  ;;  %v3508_v50 = vsub.f32 %v18405_v24, %v13651_v47  ;;  %v4578_v34 = vadd.f32 %v13680_v22, %v4258_v36  ;;  %18421 = vst [vmem:[#allocation172_spill] sm:$0xff] %v14196_v6  ;;  %v4697_v47 = vmul.f32 %v13700_v48, %v13623_v49 }
 0x6c2   : > { %v4843_v9 = vpop.permute.xlu1 %4842  ;;  %5788 = vst.msk [vmem:[%s13327_s18 + $0x80] sm:$0xff] %vm5771_vm4, %v5723_v31  ;;  %8312 = vmatmul.mubr.msk.f32.gmra.mrb[96].mxu1 %vm5771_vm4, %v5723_v31  ;;  %8376 = vmatmul.mubr.msk.f32.gmra.mrb[96].mxu0 %vm5771_vm4, %v5723_v31  ;;  %v14178_v1 = vpop.permute.xlu0 %3378  ;;  %v18423_v31 = vld [vmem:[#allocation143_spill] sm:$0xff] }
 0x6c3   : > { %6202 = vmatprep.mubr.f32.mxu1 %v18227_v25  ;;  %6651 = vmatprep.mubr.f32.mxu0 %v18227_v25  ;;  %v5017_v40 = vmul.f32 %v18422_v27, %v4843_v9  ;;  %v3616_v23 = vmul.f32 1.442695, %v3508_v50  ;;  %9647 = vrcp.f32 %v4578_v34  ;;  %v2276_v36 = vsub.f32 %v18424_v37, %v18423_v31  ;;  %v18426_v9 = vld [vmem:[#allocation251_spill] sm:$0xff]  ;;  %v18427_v50 = vld [vmem:[#allocation173_spill] sm:$0xff]  ;;  %v18432_v37 = vld [vmem:[#allocation58_spill] sm:$0xff] }
 0x6c4   : > { %3808 = vrot.lane.b32.xlu1 %v14172_v41, %s10108_s20  ;;  %4858 = vrot.lane.b32.xlu0 %v14180_v12, %s10110_s19  ;;  %v18428_v34 = vld [vmem:[#allocation19_spill] sm:$0xff] }
 0x6c5   : > { %v5594_v56 = vsel %vm5576_vm1, %v4697_v47, %v5017_v40  ;;  %v3125_v49 = vsub.f32 %v18419_v38, %v18428_v34  ;;  %9649 = vpow2.f32 %v3616_v23  ;;  %v2368_v40 = vmul.f32 1.442695, %v2276_v36  ;;  %v18431_v23 = vld [vmem:[#allocation220_spill] sm:$0xff] }
 0x6c6   : > { %v14192_v19 = vpop.permute.xlu1 %4430  ;;  %v14194_v33 = vpop.permute.xlu0 %3792 }
 0x6c7   : > { %9651 = vpow2.f32 %v2368_v40 }
 0x6c8   : > { %5114 = vrot.lane.b32.xlu1 %v14180_v12, %s10112_s30  ;;  %4446 = vrot.lane.b32.xlu0 %v14196_v6, %s10109_s26 }
 0x6ca   : > { %v5355_v22 = vpop.permute.xlu1 %5354  ;;  %v5099_v55 = vpop.permute.xlu0 %5098 }
 0x6cb   : > { %v5529_v41 = vmul.f32 %v18425_v20, %v5355_v22  ;;  %v5273_v27 = vmul.f32 %v18426_v9, %v5099_v55  ;;  %v14222_v55 = vpop.eup %9641 }
 0x6cc   : > { %5370 = vrot.lane.b32.xlu1 %v14180_v12, %s18129_s10  ;;  %3012 = vrot.lane.b32.xlu0 %v18427_v50, %s10112_s30  ;;  %18429 = vst [vmem:[#allocation24_spill] sm:$0xff] %v14222_v55  ;;  %v14228_v47 = vpop.eup %9643 }
 0x6cd   : > { %v5659_v48 = vsel %vm5641_vm2, %v5594_v56, %v5273_v27  ;;  %18430 = vst [vmem:[#allocation207_spill] sm:$0xff] %v14228_v47  ;;  %v2742_v56 = vsub.f32 %v18432_v37, %v18431_v23  ;;  %v3939_v36 = vadd.f32 %v14228_v47, %v13670_v51  ;;  %v14240_v20 = vpop.eup %9645  ;;  %v18446_v47 = vld [vmem:[#allocation252_spill] sm:$0xff] }
 0x6ce   : > { %v14217_v6 = vpop.permute.xlu1 %3380  ;;  %v14219_v31 = vpop.permute.xlu0 %4112  ;;  %v5724_v22 = vsel %vm5706_vm3, %v5659_v48, %v5529_v41  ;;  %v3234_v41 = vmul.f32 1.442695, %v3125_v49  ;;  %18433 = vst [vmem:[#allocation20_spill] sm:$0xff] %v14240_v20 }
 0x6cf   : > { %5789 = vst.msk [vmem:[%s13327_s18 + $0x88] sm:$0xff] %vm5771_vm4, %v5724_v22  ;;  %8313 = vmatmul.mubr.msk.f32.gmra.mrb[98].mxu1 %vm5771_vm4, %v5724_v22  ;;  %8377 = vmatmul.mubr.msk.f32.gmra.mrb[98].mxu0 %vm5771_vm4, %v5724_v22  ;;  %v14246_v34 = vpop.eup %9647  ;;  %v4259_v48 = vadd.f32 %v13698_v57, %v3939_v36  ;;  %v2852_v23 = vmul.f32 1.442695, %v2742_v56 }
 0x6d0   : > { %3396 = vrot.lane.b32.xlu1 %v18427_v50, %s18129_s10  ;;  %4128 = vrot.lane.b32.xlu0 %v14222_v55, %s18141_s7  ;;  %18435 = vst [vmem:[#allocation105_spill] sm:$0xff] %v14246_v34  ;;  %9653 = vpow2.f32 %v3234_v41  ;;  %v18440_v50 = vld [vmem:[#allocation108_spill] sm:$0xff]  ;;  %v14264_v56 = vpop.eup %9649 }
 0x6d1   : > { %6208 = vmatprep.mubr.f32.mxu1 %v18227_v25  ;;  %6657 = vmatprep.mubr.f32.mxu0 %v18227_v25  ;;  %v4579_v57 = vadd.f32 %v18440_v50, %v4259_v48  ;;  %18442 = vst [vmem:[#allocation221_spill] sm:$0xff] %v14264_v56  ;;  %9655 = vpow2.f32 %v2852_v23  ;;  %v18451_v23 = vld [vmem:[#allocation201_spill] sm:$0xff] }
 0x6d2   : > { %v14242_v9 = vpop.permute.xlu1 %3794  ;;  %v14244_v27 = vpop.f32.mrb[64].mxu1 }
 0x6d3   : > { %18434 = vst [vmem:[#allocation263_spill] sm:$0xff] %v14244_v27  ;;  %v14249_v22 = vpop.f32.mrb[64].mxu0  ;;  %v4845_v49 = vpop.permute.xlu0 %4844  ;;  %v18439_v27 = vld [vmem:[#allocation17_spill] sm:$0xff]  ;;  %9657 = vrcp.f32 %v4579_v57 }
 0x6d4   : > { %18436 = vst [vmem:[#allocation31_spill] sm:$0xff] %v14249_v22  ;;  %v14251_v51 = vpop.f32.mrb[65].mxu1  ;;  %v14253_v55 = vpop.f32.mrb[65].mxu0  ;;  %3810 = vrot.lane.b32.xlu1 %v14240_v20, %s10108_s20  ;;  %4860 = vrot.lane.b32.xlu0 %v14246_v34, %s10110_s19  ;;  %v3509_v40 = vsub.f32 %v18419_v38, %v18439_v27  ;;  %v5018_v41 = vmul.f32 %v18446_v47, %v4845_v49 }
 0x6d5   : > { %18437 = vst [vmem:[#allocation203_spill] sm:$0xff] %v14251_v51  ;;  %18438 = vst [vmem:[#allocation218_spill] sm:$0xff] %v14253_v55  ;;  %v18443_v51 = vld [vmem:[#allocation125_spill] sm:$0xff]  ;;  %v4698_v47 = vmul.f32 %v13772_v59, %v18451_v23 }
 0x6d6   : > { %v5101_v36 = vpop.permute.xlu1 %5100  ;;  %v14262_v22 = vpop.f32.mrb[66].mxu1  ;;  %v2277_v55 = vsub.f32 %v18444_v39, %v18443_v51  ;;  %v3618_v50 = vmul.f32 1.442695, %v3509_v40  ;;  %v18449_v39 = vld [vmem:[#allocation161_spill] sm:$0xff]  ;;  %v18450_v51 = vld [vmem:[#allocation208_spill] sm:$0xff] }
 0x6d7   : > { %18441 = vst [vmem:[#allocation69_spill] sm:$0xff] %v14262_v22  ;;  %v14268_v24 = vpop.f32.mrb[66].mxu0  ;;  %v14270_v20 = vpop.permute.xlu0 %4432  ;;  %v5274_v48 = vmul.f32 %v18449_v39, %v5101_v36  ;;  %v18454_v40 = vld [vmem:[#allocation253_spill] sm:$0xff] }
 0x6d8   : > { %18445 = vst [vmem:[#allocation62_spill] sm:$0xff] %v14268_v24  ;;  %v14273_v45 = vpop.f32.mrb[67].mxu1  ;;  %v14275_v27 = vpop.f32.mrb[67].mxu0  ;;  %5116 = vrot.lane.b32.xlu1 %v14246_v34, %s10112_s30  ;;  %4448 = vrot.lane.b32.xlu0 %v14264_v56, %s10109_s26  ;;  %v3126_v24 = vsub.f32 %v18432_v37, %v18450_v51  ;;  %v5595_v56 = vsel %vm5576_vm1, %v4698_v47, %v5018_v41  ;;  %v18457_v59 = vld [vmem:[#allocation177_spill] sm:$0xff]  ;;  %9659 = vpow2.f32 %v3618_v50 }
 0x6d9   : > { %18447 = vst [vmem:[#allocation265_spill] sm:$0xff] %v14273_v45  ;;  %18448 = vst [vmem:[#allocation223_spill] sm:$0xff] %v14275_v27  ;;  %v2370_v27 = vmul.f32 1.442695, %v2277_v55  ;;  %v14302_v51 = vpop.eup %9651  ;;  %v18459_v55 = vld [vmem:[#allocation202_spill] sm:$0xff]  ;;  %v18460_v23 = vld [vmem:[#allocation57_spill] sm:$0xff]  ;;  %v5660_v41 = vsel %vm5641_vm2, %v5595_v56, %v5274_v48 }
 0x6da   : > { %v14286_v49 = vpop.permute.xlu1 %4114  ;;  %v14288_v22 = vpop.f32.mrb[68].mxu1  ;;  %18458 = vst [vmem:[#allocation34_spill] sm:$0xff] %v14302_v51  ;;  %v18461_v47 = vld [vmem:[#allocation93_spill] sm:$0xff] }
 0x6db   : > { %18452 = vst [vmem:[#allocation267_spill] sm:$0xff] %v14288_v22  ;;  %v14290_v45 = vpop.f32.mrb[68].mxu0  ;;  %v5357_v38 = vpop.permute.xlu0 %5356  ;;  %9661 = vpow2.f32 %v2370_v27 }
 0x6dc   : > { %18453 = vst [vmem:[#allocation78_spill] sm:$0xff] %v14290_v45  ;;  %v5530_v57 = vmul.f32 %v18454_v40, %v5357_v38  ;;  %v14294_v36 = vpop.f32.mrb[69].mxu1  ;;  %v14296_v39 = vpop.f32.mrb[69].mxu0  ;;  %5372 = vrot.lane.b32.xlu1 %v14246_v34, %s18129_s10  ;;  %3014 = vrot.lane.b32.xlu0 %v18457_v59, %s10112_s30  ;;  %v2743_v45 = vsub.f32 %v18460_v23, %v18459_v55  ;;  %v3236_v38 = vmul.f32 1.442695, %v3126_v24 }
 0x6dd   : > { %18455 = vst [vmem:[#allocation123_spill] sm:$0xff] %v14294_v36  ;;  %18456 = vst [vmem:[#allocation114_spill] sm:$0xff] %v14296_v39  ;;  %v3940_v40 = vadd.f32 %v14302_v51, %v18461_v47  ;;  %v14312_v34 = vpop.eup %9653 }
 0x6de   : > { %v4847_v22 = vpop.permute.xlu1 %4846  ;;  %v14309_v39 = vpop.f32.mrb[70].mxu1  ;;  %v5725_v36 = vsel %vm5706_vm3, %v5660_v41, %v5530_v57  ;;  %18463 = vst [vmem:[#allocation169_spill] sm:$0xff] %v14312_v34  ;;  %v2854_v27 = vmul.f32 1.442695, %v2743_v45  ;;  %9663 = vpow2.f32 %v3236_v38  ;;  %v18473_v38 = vld [vmem:[#allocation154_spill] sm:$0xff] }
 0x6df   : > { %18462 = vst [vmem:[#allocation135_spill] sm:$0xff] %v14309_v39  ;;  %5790 = vst.msk [vmem:[%s13327_s18 + $0x90] sm:$0xff] %vm5771_vm4, %v5725_v36  ;;  %8314 = vmatmul.mubr.msk.f32.gmra.mrb[100].mxu1 %vm5771_vm4, %v5725_v36  ;;  %v14317_v55 = vpop.f32.mrb[70].mxu0  ;;  %8378 = vmatmul.mubr.msk.f32.gmra.mrb[100].mxu0 %vm5771_vm4, %v5725_v36  ;;  %v14320_v24 = vpop.permute.xlu0 %3382  ;;  %v4260_v56 = vadd.f32 %v13769_v15, %v3940_v40  ;;  %v3510_v15 = vsub.f32 %v18432_v37, %v13767_v4  ;;  %v18470_v40 = vld [vmem:[#allocation147_spill] sm:$0xff]  ;;  %v18477_v37 = vld [vmem:[#allocation142_spill] sm:$0xff] }
 0x6e0   : > { %18464 = vst [vmem:[#allocation26_spill] sm:$0xff] %v14317_v55  ;;  %v14323_v50 = vpop.f32.mrb[71].mxu1  ;;  %v14325_v48 = vpop.f32.mrb[71].mxu0  ;;  %3398 = vrot.lane.b32.xlu1 %v18457_v59, %s18129_s10  ;;  %4130 = vrot.lane.b32.xlu0 %v14312_v34, %s18141_s7  ;;  %v18471_v55 = vld [vmem:[#allocation42_spill] sm:$0xff]  ;;  %9665 = vpow2.f32 %v2854_v27  ;;  %v5019_v4 = vmul.f32 %v18473_v38, %v4847_v22  ;;  %v18481_v27 = vld [vmem:[#allocation63_spill] sm:$0xff] }
 0x6e1   : > { %18465 = vst [vmem:[#allocation225_spill] sm:$0xff] %v14323_v50  ;;  %18466 = vst [vmem:[#allocation206_spill] sm:$0xff] %v14325_v48  ;;  %6214 = vmatprep.mubr.f32.mxu1 %v18227_v25  ;;  %6663 = vmatprep.mubr.f32.mxu0 %v18227_v25  ;;  %v14333_v57 = vpop.eup %9655  ;;  %v4580_v36 = vadd.f32 %v13796_v8, %v4260_v56  ;;  %v2278_v39 = vsub.f32 %v18471_v55, %v18470_v40  ;;  %v18474_v48 = vld [vmem:[#allocation205_spill] sm:$0xff]  ;;  %v3620_v56 = vmul.f32 1.442695, %v3510_v15  ;;  %v18476_v40 = vld [vmem:[#allocation27_spill] sm:$0xff] }
 0x6e2   : > { %18467 = vst [vmem:[#allocation270_spill] sm:$0xff] %v14333_v57  ;;  %v14338_v41 = vpop.permute.xlu1 %4434  ;;  %v14340_v47 = vpop.eup %9657  ;;  %v3127_v8 = vsub.f32 %v18460_v23, %v18474_v48  ;;  %v4699_v59 = vmul.f32 %v13816_v29, %v18476_v40  ;;  %v18480_v48 = vld [vmem:[#allocation222_spill] sm:$0xff] }
 0x6e3   : > { %18468 = vst [vmem:[#allocation111_spill] sm:$0xff] %v14338_v41  ;;  %18469 = vst [vmem:[#allocation33_spill] sm:$0xff] %v14340_v47  ;;  %v14344_v45 = vpop.permute.xlu0 %3796  ;;  %9667 = vrcp.f32 %v4580_v36  ;;  %v14353_v34 = vpop.eup %9659  ;;  %v2372_v55 = vmul.f32 1.442695, %v2278_v39  ;;  %v2744_v39 = vsub.f32 %v18481_v27, %v18480_v48 }
 0x6e4   : > { %18472 = vst [vmem:[#allocation209_spill] sm:$0xff] %v14344_v45  ;;  %3812 = vrot.lane.b32.xlu1 %v14333_v57, %s10108_s20  ;;  %4862 = vrot.lane.b32.xlu0 %v14340_v47, %s10110_s19  ;;  %18475 = vst [vmem:[#allocation228_spill] sm:$0xff] %v14353_v34  ;;  %v18478_v45 = vld [vmem:[#allocation160_spill] sm:$0xff]  ;;  %v5596_v15 = vsel %vm5576_vm1, %v4699_v59, %v5019_v4  ;;  %v3238_v29 = vmul.f32 1.442695, %v3127_v8  ;;  %9669 = vpow2.f32 %v3620_v56  ;;  %v18487_v4 = vld [vmem:[#allocation30_spill] sm:$0xff] }
 0x6e5   : > { %v14363_v22 = vpop.eup %9661  ;;  %9671 = vpow2.f32 %v2372_v55  ;;  %v2856_v59 = vmul.f32 1.442695, %v2744_v39 }
 0x6e6   : > { %v5359_v50 = vpop.permute.xlu1 %5358  ;;  %18479 = vst [vmem:[#allocation175_spill] sm:$0xff] %v14363_v22  ;;  %9673 = vpow2.f32 %v3238_v29 }
 0x6e7   : > { %v5531_v57 = vmul.f32 %v18477_v37, %v5359_v50  ;;  %v5103_v51 = vpop.permute.xlu0 %5102  ;;  %v18482_v37 = vld [vmem:[#allocation176_spill] sm:$0xff]  ;;  %9675 = vpow2.f32 %v2856_v59 }
 0x6e8   : > { %v5275_v41 = vmul.f32 %v18478_v45, %v5103_v51  ;;  %5118 = vrot.lane.b32.xlu1 %v14340_v47, %s10112_s30  ;;  %4450 = vrot.lane.b32.xlu0 %v14353_v34, %s10109_s26  ;;  %v3941_v50 = vadd.f32 %v14363_v22, %v18482_v37  ;;  %v14376_v40 = vpop.eup %9663  ;;  %v18484_v34 = vld [vmem:[#allocation126_spill] sm:$0xff]  ;;  %v18492_v37 = vld [vmem:[#allocation41_spill] sm:$0xff]  ;;  %v18500_v22 = vld [vmem:[#allocation144_spill] sm:$0xff] }
 0x6e9   : > { %18483 = vst [vmem:[#allocation231_spill] sm:$0xff] %v14376_v40 }
 0x6ea   : > { %v14370_v51 = vpop.permute.xlu1 %3384  ;;  %v5661_v36 = vsel %vm5641_vm2, %v5596_v15, %v5275_v41  ;;  %v4261_v48 = vadd.f32 %v18484_v34, %v3941_v50  ;;  %v3511_v34 = vsub.f32 %v18460_v23, %v13836_v11  ;;  %v14400_v39 = vpop.eup %9665  ;;  %v18491_v15 = vld [vmem:[#allocation127_spill] sm:$0xff]  ;;  %v18494_v11 = vld [vmem:[#allocation216_spill] sm:$0xff] }
 0x6eb   : > { %v14373_v45 = vpop.permute.xlu0 %4116  ;;  %v5726_v38 = vsel %vm5706_vm3, %v5661_v36, %v5531_v57  ;;  %18490 = vst [vmem:[#allocation36_spill] sm:$0xff] %v14400_v39  ;;  %v2279_v50 = vsub.f32 %v18492_v37, %v18491_v15 }
 0x6ec   : > { %5791 = vst.msk [vmem:[%s13327_s18 + $0x98] sm:$0xff] %vm5771_vm4, %v5726_v38  ;;  %8315 = vmatmul.mubr.msk.f32.gmra.mrb[102].mxu1 %vm5771_vm4, %v5726_v38  ;;  %8379 = vmatmul.mubr.msk.f32.gmra.mrb[102].mxu0 %vm5771_vm4, %v5726_v38  ;;  %v4581_v8 = vadd.f32 %v18487_v4, %v4261_v48  ;;  %v3128_v48 = vsub.f32 %v18481_v27, %v18494_v11  ;;  %v3622_v4 = vmul.f32 1.442695, %v3511_v34  ;;  %v18502_v11 = vld [vmem:[#allocation155_spill] sm:$0xff] }
 0x6ed   : > { %4132 = vrot.lane.b32.xlu1 %v14376_v40, %s18141_s7  ;;  %5374 = vrot.lane.b32.xlu0 %v14340_v47, %s18129_s10  ;;  %v14387_v41 = vpop.f32.mrb[72].mxu1  ;;  %v14389_v57 = vpop.f32.mrb[72].mxu0  ;;  %v18498_v40 = vld [vmem:[#allocation21_spill] sm:$0xff] }
 0x6ee   : > { %18485 = vst [vmem:[#allocation271_spill] sm:$0xff] %v14387_v41  ;;  %18486 = vst [vmem:[#allocation233_spill] sm:$0xff] %v14389_v57  ;;  %v14394_v56 = vpop.permute.xlu1 %3798  ;;  %v14396_v55 = vpop.f32.mrb[73].mxu1  ;;  %6220 = vmatprep.mubr.f32.mxu1 %v18227_v25  ;;  %6669 = vmatprep.mubr.f32.mxu0 %v18227_v25  ;;  %9677 = vrcp.f32 %v4581_v8  ;;  %v2374_v41 = vmul.f32 1.442695, %v2279_v50  ;;  %v18501_v8 = vld [vmem:[#allocation18_spill] sm:$0xff] }
 0x6ef   : > { %18488 = vst [vmem:[#allocation81_spill] sm:$0xff] %v14394_v56  ;;  %18489 = vst [vmem:[#allocation121_spill] sm:$0xff] %v14396_v55  ;;  %v14404_v36 = vpop.f32.mrb[73].mxu0  ;;  %v4849_v29 = vpop.permute.xlu0 %4848  ;;  %v3240_v34 = vmul.f32 1.442695, %v3128_v48  ;;  %9679 = vpow2.f32 %v3622_v4 }
 0x6f0   : > { %18493 = vst [vmem:[#allocation139_spill] sm:$0xff] %v14404_v36  ;;  %v14406_v38 = vpop.eup %9667  ;;  %v18496_v36 = vld [vmem:[#allocation165_spill] sm:$0xff]  ;;  %9681 = vpow2.f32 %v2374_v41  ;;  %v3512_v41 = vsub.f32 %v18481_v27, %v13883_v5  ;;  %v18520_v27 = vld [vmem:[#allocation255_spill] sm:$0xff] }
 0x6f1   : > { %3814 = vrot.lane.b32.xlu1 %v14400_v39, %s10108_s20  ;;  %4864 = vrot.lane.b32.xlu0 %v14406_v38, %s10110_s19  ;;  %v14416_v37 = vpop.eup %9669  ;;  %v5020_v55 = vmul.f32 %v18496_v36, %v4849_v29  ;;  %v18499_v39 = vld [vmem:[#allocation61_spill] sm:$0xff]  ;;  %v4700_v36 = vmul.f32 %v13888_v54, %v18502_v11  ;;  %9683 = vpow2.f32 %v3240_v34  ;;  %v18508_v11 = vld [vmem:[#allocation44_spill] sm:$0xff] }
 0x6f2   : > { %v5105_v57 = vpop.permute.xlu1 %5104  ;;  %18495 = vst [vmem:[#allocation236_spill] sm:$0xff] %v14416_v37  ;;  %v14419_v59 = vpop.eup %9671  ;;  %v2745_v23 = vsub.f32 %v18499_v39, %v18498_v40 }
 0x6f3   : > { %v14414_v15 = vpop.permute.xlu0 %4436  ;;  %18497 = vst [vmem:[#allocation235_spill] sm:$0xff] %v14419_v59  ;;  %v5276_v56 = vmul.f32 %v18500_v22, %v5105_v57  ;;  %v3942_v50 = vadd.f32 %v14419_v59, %v18501_v8  ;;  %v14434_v47 = vpop.eup %9673  ;;  %v5597_v57 = vsel %vm5576_vm1, %v4700_v36, %v5020_v55 }
 0x6f4   : > { %18503 = vst [vmem:[#allocation211_spill] sm:$0xff] %v14434_v47  ;;  %v2858_v4 = vmul.f32 1.442695, %v2745_v23  ;;  %v14450_v23 = vpop.eup %9675 }
 0x6f5   : > { %5120 = vrot.lane.b32.xlu1 %v14406_v38, %s10112_s30  ;;  %4452 = vrot.lane.b32.xlu0 %v14416_v37, %s10109_s26  ;;  %v4262_v22 = vadd.f32 %v13885_v16, %v3942_v50  ;;  %v18504_v37 = vld [vmem:[#allocation60_spill] sm:$0xff]  ;;  %v5662_v54 = vsel %vm5641_vm2, %v5597_v57, %v5276_v56  ;;  %18506 = vst [vmem:[#allocation119_spill] sm:$0xff] %v14450_v23 }
 0x6f6   : > { %v14432_v29 = vpop.permute.xlu1 %4118  ;;  %9685 = vpow2.f32 %v2858_v4  ;;  %v18516_v4 = vld [vmem:[#allocation224_spill] sm:$0xff] }
 0x6f7   : > { %v5361_v40 = vpop.permute.xlu0 %5360  ;;  %v4582_v8 = vadd.f32 %v13912_v53, %v4262_v22  ;;  %v18512_v22 = vld [vmem:[#allocation213_spill] sm:$0xff] }
 0x6f8   : > { %v5532_v48 = vmul.f32 %v18504_v37, %v5361_v40  ;;  %v18507_v37 = vld [vmem:[#allocation151_spill] sm:$0xff]  ;;  %v14462_v53 = vpop.eup %9677  ;;  %v3129_v57 = vsub.f32 %v18499_v39, %v18512_v22  ;;  %v18519_v22 = vld [vmem:[#allocation70_spill] sm:$0xff] }
 0x6f9   : > { %4134 = vrot.lane.b32.xlu1 %v14434_v47, %s18141_s7  ;;  %5376 = vrot.lane.b32.xlu0 %v14406_v38, %s18129_s10  ;;  %v2280_v36 = vsub.f32 %v18508_v11, %v18507_v37  ;;  %9687 = vrcp.f32 %v4582_v8  ;;  %v14480_v11 = vpop.eup %9679  ;;  %v4701_v47 = vmul.f32 %v13932_v60, %v18519_v22 }
 0x6fa   : > { %v4851_v16 = vpop.permute.xlu1 %4850  ;;  %v14447_v50 = vpop.f32.mrb[74].mxu1  ;;  %v5727_v55 = vsel %vm5706_vm3, %v5662_v54, %v5532_v48  ;;  %v3624_v48 = vmul.f32 1.442695, %v3512_v41  ;;  %18514 = vst [vmem:[#allocation244_spill] sm:$0xff] %v14480_v11  ;;  %v3242_v41 = vmul.f32 1.442695, %v3129_v57 }
 0x6fb   : > { %18505 = vst [vmem:[#allocation214_spill] sm:$0xff] %v14447_v50  ;;  %5792 = vst.msk [vmem:[%s13327_s18 + $0xa0] sm:$0xff] %vm5771_vm4, %v5727_v55  ;;  %8316 = vmatmul.mubr.msk.f32.gmra.mrb[104].mxu1 %vm5771_vm4, %v5727_v55  ;;  %v14457_v56 = vpop.f32.mrb[74].mxu0  ;;  %8380 = vmatmul.mubr.msk.f32.gmra.mrb[104].mxu0 %vm5771_vm4, %v5727_v55  ;;  %v14460_v5 = vpop.permute.xlu0 %3386  ;;  %v2376_v55 = vmul.f32 1.442695, %v2280_v36  ;;  %v18517_v50 = vld [vmem:[#allocation68_spill] sm:$0xff] }
 0x6fc   : > { %18509 = vst [vmem:[#allocation35_spill] sm:$0xff] %v14457_v56  ;;  %v14464_v34 = vpop.f32.mrb[75].mxu1  ;;  %v14466_v40 = vpop.f32.mrb[75].mxu0  ;;  %6226 = vmatprep.mubr.f32.mxu1 %v18227_v25  ;;  %6675 = vmatprep.mubr.f32.mxu0 %v18227_v25  ;;  %9689 = vpow2.f32 %v3624_v48 }
 0x6fd   : > { %18510 = vst [vmem:[#allocation239_spill] sm:$0xff] %v14464_v34  ;;  %18511 = vst [vmem:[#allocation180_spill] sm:$0xff] %v14466_v40  ;;  %3816 = vrot.lane.b32.xlu1 %v14450_v23, %s10108_s20  ;;  %4866 = vrot.lane.b32.xlu0 %v14462_v53, %s10110_s19  ;;  %v14482_v56 = vpop.eup %9681  ;;  %v2746_v40 = vsub.f32 %v18517_v50, %v18516_v4  ;;  %v18518_v34 = vld [vmem:[#allocation162_spill] sm:$0xff]  ;;  %9691 = vpow2.f32 %v2376_v55 }
 0x6fe   : > { %v14476_v54 = vpop.permute.xlu1 %4438  ;;  %18515 = vst [vmem:[#allocation128_spill] sm:$0xff] %v14482_v56  ;;  %v5021_v23 = vmul.f32 %v18518_v34, %v4851_v16  ;;  %v3943_v8 = vadd.f32 %v14482_v56, %v13902_v28  ;;  %v14496_v16 = vpop.eup %9683  ;;  %9693 = vpow2.f32 %v3242_v41  ;;  %v3513_v28 = vsub.f32 %v18499_v39, %v13952_v21 }
 0x6ff   : > { %v14478_v37 = vpop.permute.xlu0 %3800  ;;  %18521 = vst [vmem:[#allocation112_spill] sm:$0xff] %v14496_v16  ;;  %v2860_v57 = vmul.f32 1.442695, %v2746_v40  ;;  %v18524_v40 = vld [vmem:[#allocation181_spill] sm:$0xff] }
 0x700   : > { %18513 = vst [vmem:[#allocation242_spill] sm:$0xff] %v14478_v37  ;;  %v4263_v34 = vadd.f32 %v13930_v13, %v3943_v8  ;;  %v18522_v37 = vld [vmem:[#allocation254_spill] sm:$0xff]  ;;  %v5598_v48 = vsel %vm5576_vm1, %v4701_v47, %v5021_v23  ;;  %v18525_v47 = vld [vmem:[#allocation43_spill] sm:$0xff] }
 0x701   : > { %5122 = vrot.lane.b32.xlu1 %v14462_v53, %s10112_s30  ;;  %4454 = vrot.lane.b32.xlu0 %v14480_v11, %s10109_s26  ;;  %v2281_v23 = vsub.f32 %v18525_v47, %v18524_v40  ;;  %9695 = vpow2.f32 %v2860_v57  ;;  %v18532_v47 = vld [vmem:[#allocation219_spill] sm:$0xff] }
 0x702   : > { %v5363_v36 = vpop.permute.xlu1 %5362  ;;  %v4583_v60 = vadd.f32 %v13966_v2, %v4263_v34 }
 0x703   : > { %v5533_v4 = vmul.f32 %v18520_v27, %v5363_v36  ;;  %v5107_v59 = vpop.permute.xlu0 %5106  ;;  %v3626_v36 = vmul.f32 1.442695, %v3513_v28  ;;  %v2378_v34 = vmul.f32 1.442695, %v2281_v23 }
 0x704   : > { %v5277_v11 = vmul.f32 %v18522_v37, %v5107_v59  ;;  %v14511_v59 = vpop.eup %9685  ;;  %9697 = vrcp.f32 %v4583_v60 }
 0x705   : > { %4136 = vrot.lane.b32.xlu1 %v14496_v16, %s18141_s7  ;;  %5378 = vrot.lane.b32.xlu0 %v14462_v53, %s18129_s10  ;;  %18523 = vst [vmem:[#allocation124_spill] sm:$0xff] %v14511_v59  ;;  %v14518_v8 = vpop.eup %9687  ;;  %9699 = vpow2.f32 %v3626_v36  ;;  %v18536_v16 = vld [vmem:[#allocation187_spill] sm:$0xff]  ;;  %v18537_v36 = vld [vmem:[#allocation164_spill] sm:$0xff] }
 0x706   : > { %v14508_v27 = vpop.permute.xlu1 %3388  ;;  %v5663_v13 = vsel %vm5641_vm2, %v5598_v48, %v5277_v11  ;;  %v18528_v11 = vld [vmem:[#allocation182_spill] sm:$0xff]  ;;  %9701 = vpow2.f32 %v2378_v34 }
 0x707   : > { %v14515_v55 = vpop.permute.xlu0 %4120  ;;  %v5728_v37 = vsel %vm5706_vm3, %v5663_v13, %v5533_v4  ;;  %v3130_v41 = vsub.f32 %v18517_v50, %v18528_v11  ;;  %v14542_v13 = vpop.eup %9689 }
 0x708   : > { %5793 = vst.msk [vmem:[%s13327_s18 + $0xa8] sm:$0xff] %vm5771_vm4, %v5728_v37  ;;  %8317 = vmatmul.mubr.msk.f32.gmra.mrb[106].mxu1 %vm5771_vm4, %v5728_v37  ;;  %8381 = vmatmul.mubr.msk.f32.gmra.mrb[106].mxu0 %vm5771_vm4, %v5728_v37  ;;  %18531 = vst [vmem:[#allocation248_spill] sm:$0xff] %v14542_v13  ;;  %v14544_v40 = vpop.eup %9691  ;;  %v18533_v37 = vld [vmem:[#allocation66_spill] sm:$0xff] }
 0x709   : > { %3818 = vrot.lane.b32.xlu1 %v14511_v59, %s10108_s20  ;;  %4868 = vrot.lane.b32.xlu0 %v14518_v8, %s10110_s19  ;;  %v14528_v21 = vpop.f32.mrb[76].mxu1  ;;  %v14530_v2 = vpop.f32.mrb[76].mxu0  ;;  %v2747_v28 = vsub.f32 %v18533_v37, %v18532_v47  ;;  %v3244_v60 = vmul.f32 1.442695, %v3130_v41  ;;  %v3944_v23 = vadd.f32 %v14544_v40, %v13968_v63  ;;  %v18535_v47 = vld [vmem:[#allocation256_spill] sm:$0xff]  ;;  %v3514_v63 = vsub.f32 %v18517_v50, %v13999_v14 }
 0x70a   : > { %18526 = vst [vmem:[#allocation38_spill] sm:$0xff] %v14528_v21  ;;  %18527 = vst [vmem:[#allocation246_spill] sm:$0xff] %v14530_v2  ;;  %v14534_v22 = vpop.permute.xlu1 %3802  ;;  %v14536_v4 = vpop.f32.mrb[77].mxu1  ;;  %6232 = vmatprep.mubr.f32.mxu1 %v18227_v25  ;;  %6681 = vmatprep.mubr.f32.mxu0 %v18227_v25 }
 0x70b   : > { %18529 = vst [vmem:[#allocation245_spill] sm:$0xff] %v14536_v4  ;;  %v14540_v57 = vpop.f32.mrb[77].mxu0  ;;  %v4853_v48 = vpop.permute.xlu0 %4852  ;;  %v2862_v59 = vmul.f32 1.442695, %v2747_v28  ;;  %9703 = vpow2.f32 %v3244_v60  ;;  %v18540_v28 = vld [vmem:[#allocation46_spill] sm:$0xff] }
 0x70c   : > { %18530 = vst [vmem:[#allocation217_spill] sm:$0xff] %v14540_v57  ;;  %v14556_v21 = vpop.eup %9693  ;;  %v4264_v57 = vadd.f32 %v14001_v52, %v3944_v23  ;;  %v5022_v4 = vmul.f32 %v18535_v47, %v4853_v48  ;;  %v4702_v52 = vmul.f32 %v14004_v18, %v18537_v36  ;;  %v3628_v36 = vmul.f32 1.442695, %v3514_v63 }
 0x70d   : > { %5124 = vrot.lane.b32.xlu1 %v14518_v8, %s10112_s30  ;;  %4456 = vrot.lane.b32.xlu0 %v14542_v13, %s10109_s26  ;;  %18534 = vst [vmem:[#allocation250_spill] sm:$0xff] %v14556_v21  ;;  %v14572_v48 = vpop.eup %9695  ;;  %9705 = vpow2.f32 %v2862_v59 }
 0x70e   : > { %v5109_v11 = vpop.permute.xlu1 %5108  ;;  %v4584_v41 = vadd.f32 %v14028_v17, %v4264_v57  ;;  %18538 = vst [vmem:[#allocation185_spill] sm:$0xff] %v14572_v48  ;;  %v14576_v47 = vpop.eup %9697  ;;  %v5599_v60 = vsel %vm5576_vm1, %v4702_v52, %v5022_v4  ;;  %v18542_v17 = vld [vmem:[#allocation23_spill] sm:$0xff] }
 0x70f   : > { %v14554_v2 = vpop.permute.xlu0 %4440  ;;  %v5278_v56 = vmul.f32 %v18536_v16, %v5109_v11  ;;  %v18539_v16 = vld [vmem:[#allocation140_spill] sm:$0xff]  ;;  %v3131_v57 = vsub.f32 %v18533_v37, %v18542_v17  ;;  %v14598_v52 = vpop.eup %9699 }
 0x710   : > { %v2282_v23 = vsub.f32 %v18540_v28, %v18539_v16  ;;  %9707 = vrcp.f32 %v4584_v41  ;;  %18545 = vst [vmem:[#allocation138_spill] sm:$0xff] %v14598_v52 }
 0x711   : > { %4138 = vrot.lane.b32.xlu1 %v14556_v21, %s18141_s7  ;;  %5380 = vrot.lane.b32.xlu0 %v14518_v8, %s18129_s10  ;;  %v18541_v21 = vld [vmem:[#allocation257_spill] sm:$0xff]  ;;  %v5664_v18 = vsel %vm5641_vm2, %v5599_v60, %v5278_v56  ;;  %v18550_v60 = vld [vmem:[#allocation74_spill] sm:$0xff]  ;;  %9709 = vpow2.f32 %v3628_v36 }
 0x712   : > { %v14570_v34 = vpop.permute.xlu1 %4122 }
 0x713   : > { %v5365_v11 = vpop.permute.xlu0 %5364 }
 0x714   : > { %v5534_v14 = vmul.f32 %v18541_v21, %v5365_v11  ;;  %v2380_v21 = vmul.f32 1.442695, %v2282_v23  ;;  %v14606_v23 = vpop.eup %9701  ;;  %v18549_v11 = vld [vmem:[#allocation227_spill] sm:$0xff] }
 0x715   : > { %3820 = vrot.lane.b32.xlu1 %v14572_v48, %s10108_s20  ;;  %4870 = vrot.lane.b32.xlu0 %v14576_v47, %s10110_s19  ;;  %18548 = vst [vmem:[#allocation143_spill] sm:$0xff] %v14606_v23  ;;  %v3945_v17 = vadd.f32 %v14606_v23, %v14016_v44  ;;  %v3515_v44 = vsub.f32 %v18533_v37, %v14068_v7 }
 0x716   : > { %v4855_v16 = vpop.permute.xlu1 %4854  ;;  %v14587_v28 = vpop.f32.mrb[78].mxu1  ;;  %v5729_v4 = vsel %vm5706_vm3, %v5664_v18, %v5534_v14  ;;  %v2748_v14 = vsub.f32 %v18550_v60, %v18549_v11  ;;  %v3246_v18 = vmul.f32 1.442695, %v3131_v57  ;;  %9711 = vpow2.f32 %v2380_v21 }
 0x717   : > { %18543 = vst [vmem:[#allocation122_spill] sm:$0xff] %v14587_v28  ;;  %5794 = vst.msk [vmem:[%s13327_s18 + $0xb0] sm:$0xff] %vm5771_vm4, %v5729_v4  ;;  %8318 = vmatmul.mubr.msk.f32.gmra.mrb[108].mxu1 %vm5771_vm4, %v5729_v4  ;;  %v14593_v59 = vpop.f32.mrb[78].mxu0  ;;  %8382 = vmatmul.mubr.msk.f32.gmra.mrb[108].mxu0 %vm5771_vm4, %v5729_v4  ;;  %v14596_v56 = vpop.permute.xlu0 %3390  ;;  %v4265_v11 = vadd.f32 %v14046_v62, %v3945_v17  ;;  %v18555_v62 = vld [vmem:[#allocation45_spill] sm:$0xff] }
 0x718   : > { %18544 = vst [vmem:[#allocation37_spill] sm:$0xff] %v14593_v59  ;;  %v14600_v63 = vpop.f32.mrb[79].mxu1  ;;  %v14602_v41 = vpop.f32.mrb[79].mxu0  ;;  %6238 = vmatprep.mubr.f32.mxu1 %v18227_v25  ;;  %6687 = vmatprep.mubr.f32.mxu0 %v18227_v25  ;;  %9713 = vpow2.f32 %v3246_v18  ;;  %v18557_v18 = vld [vmem:[#allocation64_spill] sm:$0xff] }
 0x719   : > { %18546 = vst [vmem:[#allocation97_spill] sm:$0xff] %v14600_v63  ;;  %18547 = vst [vmem:[#allocation156_spill] sm:$0xff] %v14602_v41  ;;  %5126 = vrot.lane.b32.xlu1 %v14576_v47, %s10112_s30  ;;  %4458 = vrot.lane.b32.xlu0 %v14598_v52, %s10109_s26  ;;  %v14620_v28 = vpop.eup %9703  ;;  %v2864_v41 = vmul.f32 1.442695, %v2748_v14  ;;  %v18552_v63 = vld [vmem:[#allocation188_spill] sm:$0xff]  ;;  %v4585_v57 = vadd.f32 %v14078_v0, %v4265_v11  ;;  %v18554_v52 = vld [vmem:[#allocation183_spill] sm:$0xff] }
 0x71a   : > { %v14616_v4 = vpop.permute.xlu1 %4442  ;;  %18551 = vst [vmem:[#allocation40_spill] sm:$0xff] %v14620_v28  ;;  %v5023_v48 = vmul.f32 %v18552_v63, %v4855_v16  ;;  %v14631_v21 = vpop.eup %9705  ;;  %v2283_v14 = vsub.f32 %v18555_v62, %v18554_v52  ;;  %v4703_v16 = vmul.f32 %v14048_v43, %v13970_v61  ;;  %v18556_v63 = vld [vmem:[#allocation190_spill] sm:$0xff]  ;;  %v18558_v0 = vld [vmem:[#allocation25_spill] sm:$0xff]  ;;  %v3630_v43 = vmul.f32 1.442695, %v3515_v44 }
 0x71b   : > { %v14618_v59 = vpop.permute.xlu0 %3804  ;;  %18553 = vst [vmem:[#allocation157_spill] sm:$0xff] %v14631_v21  ;;  %v14638_v13 = vpop.eup %9707  ;;  %9715 = vpow2.f32 %v2864_v41  ;;  %v3132_v61 = vsub.f32 %v18550_v60, %v18558_v0  ;;  %v18561_v44 = vld [vmem:[#allocation226_spill] sm:$0xff] }
 0x71c   : > { %v5600_v7 = vsel %vm5576_vm1, %v4703_v16, %v5023_v48  ;;  %9717 = vrcp.f32 %v4585_v57  ;;  %v14654_v41 = vpop.eup %9709  ;;  %v18562_v57 = vld [vmem:[#allocation71_spill] sm:$0xff] }
 0x71d   : > { %4140 = vrot.lane.b32.xlu1 %v14620_v28, %s18141_s7  ;;  %5382 = vrot.lane.b32.xlu0 %v14576_v47, %s18129_s10  ;;  %18559 = vst [vmem:[#allocation251_spill] sm:$0xff] %v14654_v41  ;;  %v2749_v16 = vsub.f32 %v18562_v57, %v18561_v44  ;;  %9719 = vpow2.f32 %v3630_v43 }
 0x71e   : > { %v5367_v36 = vpop.permute.xlu1 %5366 }
 0x71f   : > { %v5535_v17 = vmul.f32 %v18556_v63, %v5367_v36  ;;  %v5111_v28 = vpop.permute.xlu0 %5110  ;;  %v2382_v36 = vmul.f32 1.442695, %v2283_v14  ;;  %v3248_v63 = vmul.f32 1.442695, %v3132_v61  ;;  %v2866_v43 = vmul.f32 1.442695, %v2749_v16 }
 0x720   : > { %v5279_v23 = vmul.f32 %v18557_v18, %v5111_v28  ;;  %v14660_v62 = vpop.eup %9711 }
 0x721   : > { %3822 = vrot.lane.b32.xlu1 %v14631_v21, %s10108_s20  ;;  %4872 = vrot.lane.b32.xlu0 %v14638_v13, %s10110_s19  ;;  %18560 = vst [vmem:[#allocation19_spill] sm:$0xff] %v14660_v62  ;;  %9721 = vpow2.f32 %v2382_v36  ;;  %v18573_v21 = vld [vmem:[#allocation65_spill] sm:$0xff] }
 0x722   : > { %v14648_v52 = vpop.permute.xlu1 %3392  ;;  %v5665_v11 = vsel %vm5641_vm2, %v5600_v7, %v5279_v23  ;;  %9723 = vpow2.f32 %v3248_v63 }
 0x723   : > { %v14651_v28 = vpop.permute.xlu0 %4124  ;;  %v5730_v48 = vsel %vm5706_vm3, %v5665_v11, %v5535_v17  ;;  %v3946_v17 = vadd.f32 %v14660_v62, %v14080_v10  ;;  %v3516_v10 = vsub.f32 %v18550_v60, %v14111_v26  ;;  %9725 = vpow2.f32 %v2866_v43  ;;  %v18579_v62 = vld [vmem:[#allocation82_spill] sm:$0xff] }
 0x724   : > { %5795 = vst.msk [vmem:[%s13327_s18 + $0xb8] sm:$0xff] %vm5771_vm4, %v5730_v48  ;;  %8319 = vmatmul.mubr.msk.f32.gmra.mrb[110].mxu1 %vm5771_vm4, %v5730_v48  ;;  %8383 = vmatmul.mubr.msk.f32.gmra.mrb[110].mxu0 %vm5771_vm4, %v5730_v48  ;;  %v14682_v48 = vpop.eup %9713  ;;  %v4704_v26 = vmul.f32 %v14116_v3, %v14033_v32 }
 0x725   : > { %5128 = vrot.lane.b32.xlu1 %v14638_v13, %s10112_s30  ;;  %4460 = vrot.lane.b32.xlu0 %v14654_v41, %s10109_s26  ;;  %v14668_v23 = vpop.f32.mrb[80].mxu1  ;;  %v14670_v14 = vpop.f32.mrb[80].mxu0  ;;  %18567 = vst [vmem:[#allocation39_spill] sm:$0xff] %v14682_v48  ;;  %v4266_v61 = vadd.f32 %v14113_v46, %v3946_v17  ;;  %v18571_v46 = vld [vmem:[#allocation195_spill] sm:$0xff]  ;;  %v3632_v63 = vmul.f32 1.442695, %v3516_v10 }
 0x726   : > { %18563 = vst [vmem:[#allocation220_spill] sm:$0xff] %v14668_v23  ;;  %18564 = vst [vmem:[#allocation17_spill] sm:$0xff] %v14670_v14  ;;  %v14674_v18 = vpop.permute.xlu1 %3806  ;;  %v14676_v7 = vpop.f32.mrb[81].mxu1  ;;  %6244 = vmatprep.mubr.f32.mxu1 %v18227_v25  ;;  %6693 = vmatprep.mubr.f32.mxu0 %v18227_v25  ;;  %v18569_v23 = vld [vmem:[#allocation145_spill] sm:$0xff] }
 0x727   : > { %18565 = vst [vmem:[#allocation108_spill] sm:$0xff] %v14676_v7  ;;  %v14680_v0 = vpop.f32.mrb[81].mxu0  ;;  %v4857_v11 = vpop.permute.xlu0 %4856  ;;  %v4586_v36 = vadd.f32 %v14140_v35, %v4266_v61  ;;  %v18574_v35 = vld [vmem:[#allocation229_spill] sm:$0xff]  ;;  %v18575_v61 = vld [vmem:[#allocation258_spill] sm:$0xff] }
 0x728   : > { %18566 = vst [vmem:[#allocation125_spill] sm:$0xff] %v14680_v0  ;;  %v14692_v14 = vpop.eup %9715  ;;  %v18570_v0 = vld [vmem:[#allocation48_spill] sm:$0xff]  ;;  %v5024_v16 = vmul.f32 %v18571_v46, %v4857_v11 }
 0x729   : > { %4142 = vrot.lane.b32.xlu1 %v14682_v48, %s18141_s7  ;;  %5384 = vrot.lane.b32.xlu0 %v14638_v13, %s18129_s10  ;;  %18568 = vst [vmem:[#allocation252_spill] sm:$0xff] %v14692_v14  ;;  %v2284_v7 = vsub.f32 %v18570_v0, %v18569_v23  ;;  %v14699_v48 = vpop.eup %9717  ;;  %v3133_v23 = vsub.f32 %v18562_v57, %v18574_v35  ;;  %9727 = vrcp.f32 %v4586_v36 }
 0x72a   : > { %v5113_v44 = vpop.permute.xlu1 %5112  ;;  %18572 = vst [vmem:[#allocation161_spill] sm:$0xff] %v14699_v48  ;;  %v14714_v32 = vpop.eup %9719  ;;  %9729 = vpow2.f32 %v3632_v63 }
 0x72b   : > { %v14697_v17 = vpop.permute.xlu0 %4444  ;;  %v5280_v41 = vmul.f32 %v18573_v21, %v5113_v44  ;;  %v2384_v11 = vmul.f32 1.442695, %v2284_v7  ;;  %v5601_v21 = vsel %vm5576_vm1, %v4704_v26, %v5024_v16  ;;  %18576 = vst [vmem:[#allocation208_spill] sm:$0xff] %v14714_v32  ;;  %v14717_v46 = vpop.eup %9721  ;;  %v3250_v10 = vmul.f32 1.442695, %v3133_v23 }
 0x72c   : > { %18577 = vst [vmem:[#allocation201_spill] sm:$0xff] %v14717_v46  ;;  %v3947_v36 = vadd.f32 %v14717_v46, %v14132_v30  ;;  %v14742_v30 = vpop.eup %9723  ;;  %v17411_v46 = vmov 0.0|0.0  }
 0x72d   : > { %3824 = vrot.lane.b32.xlu1 %v14692_v14, %s10108_s20  ;;  %4874 = vrot.lane.b32.xlu0 %v14699_v48, %s10110_s19  ;;  %v5666_v3 = vsel %vm5641_vm2, %v5601_v21, %v5280_v41  ;;  %v18578_v14 = vld [vmem:[#allocation230_spill] sm:$0xff]  ;;  %9731 = vpow2.f32 %v2384_v11  ;;  %18582 = vst [vmem:[#allocation93_spill] sm:$0xff] %v14742_v30  ;;  %v3517_v11 = vsub.f32 %v18562_v57, %v14178_v1  ;;  %v18589_v1 = vld [vmem:[#allocation240_spill] sm:$0xff] }
 0x72e   : > { %v5369_v0 = vpop.permute.xlu1 %5368  ;;  %v2750_v35 = vsub.f32 %v18579_v62, %v18578_v14  ;;  %v4267_v23 = vadd.f32 %v14154_v42, %v3947_v36  ;;  %9733 = vpow2.f32 %v3250_v10  ;;  %v14758_v42 = vpop.eup %9725  ;;  %8879 = vmatprep.subr.bf16.mxu1 %v17411_v46  ;;  %8927 = vmatprep.subr.bf16.mxu0 %v17411_v46 }
 0x72f   : > { %v5536_v43 = vmul.f32 %v18575_v61, %v5369_v0  ;;  %v14712_v44 = vpop.permute.xlu0 %3010  ;;  %18585 = vst [vmem:[#allocation154_spill] sm:$0xff] %v14758_v42  ;;  %v3634_v10 = vmul.f32 1.442695, %v3517_v11 }
 0x730   : > { %v2868_v21 = vmul.f32 1.442695, %v2750_v35  ;;  %v4587_v61 = vadd.f32 %v14192_v19, %v4267_v23  ;;  %v3134_v19 = vsub.f32 %v18579_v62, %v18589_v1 }
 0x731   : > { %5130 = vrot.lane.b32.xlu1 %v14699_v48, %s10112_s30  ;;  %4462 = vrot.lane.b32.xlu0 %v14714_v32, %s10109_s26  ;;  %v5731_v7 = vsel %vm5706_vm3, %v5666_v3, %v5536_v43  ;;  %v18586_v3 = vld [vmem:[#allocation129_spill] sm:$0xff]  ;;  %v18592_v32 = vld [vmem:[#allocation260_spill] sm:$0xff] }
 0x732   : > { %v14728_v16 = vpop.permute.xlu1 %3394  ;;  %v14730_v41 = vpop.f32.mrb[82].mxu1  ;;  %5796 = vst.msk [vmem:[%s13327_s18 + $0xc0] sm:$0xff] %vm5771_vm4, %v5731_v7  ;;  %8320 = vmatmul.mubr.msk.f32.gmra.mrb[112].mxu1 %vm5771_vm4, %v5731_v7  ;;  %8384 = vmatmul.mubr.msk.f32.gmra.mrb[112].mxu0 %vm5771_vm4, %v5731_v7  ;;  %v18587_v7 = vld [vmem:[#allocation47_spill] sm:$0xff]  ;;  %9735 = vpow2.f32 %v2868_v21 }
 0x733   : > { %18580 = vst [vmem:[#allocation253_spill] sm:$0xff] %v14730_v41  ;;  %v14736_v14 = vpop.f32.mrb[82].mxu0  ;;  %v14738_v26 = vpop.permute.xlu0 %4126  ;;  %6250 = vmatprep.mubr.f32.mxu1 %v18227_v25  ;;  %6699 = vmatprep.mubr.f32.mxu0 %v18227_v25  ;;  %v2285_v36 = vsub.f32 %v18587_v7, %v18586_v3  ;;  %9737 = vrcp.f32 %v4587_v61  ;;  %v7190_v7 = vld [vmem:[#allocation5] sm:$0xff]  ;;  %v18594_v61 = vld [vmem:[#allocation184_spill] sm:$0xff] }
 0x734   : > { %18581 = vst [vmem:[#allocation202_spill] sm:$0xff] %v14736_v14  ;;  %v14745_v63 = vpop.f32.mrb[83].mxu1  ;;  %v14747_v0 = vpop.f32.mrb[83].mxu0  ;;  %9739 = vpow2.f32 %v3634_v10 }
 0x735   : > { %18583 = vst [vmem:[#allocation147_spill] sm:$0xff] %v14745_v63  ;;  %18584 = vst [vmem:[#allocation42_spill] sm:$0xff] %v14747_v0  ;;  %4144 = vrot.lane.b32.xlu1 %v14742_v30, %s18141_s7  ;;  %5386 = vrot.lane.b32.xlu0 %v14699_v48, %s18129_s10  ;;  %v14762_v14 = vpop.eup %9727  ;;  %v2386_v41 = vmul.f32 1.442695, %v2285_v36  ;;  %v18590_v0 = vld [vmem:[#allocation193_spill] sm:$0xff]  ;;  %v7191_v30 = vld [vmem:[#allocation5 + $0x8] sm:$0xff] }
 0x736   : > { %v14756_v43 = vpop.permute.xlu1 %3808  ;;  %18588 = vst [vmem:[#allocation205_spill] sm:$0xff] %v14762_v14  ;;  %v14773_v21 = vpop.eup %9729  ;;  %v8880_v48 = vpack.c.bf16 %v7191_v30, %v7190_v7  ;;  %v18595_v36 = vld [vmem:[#allocation79_spill] sm:$0xff]  ;;  %v18596_v7 = vld [vmem:[#allocation197_spill] sm:$0xff] }
 0x737   : > { %v4859_v35 = vpop.permute.xlu0 %4858  ;;  %18591 = vst [vmem:[#allocation27_spill] sm:$0xff] %v14773_v21  ;;  %v14778_v11 = vpop.eup %9731  ;;  %v2751_v1 = vsub.f32 %v18595_v36, %v18594_v61  ;;  %9741 = vpow2.f32 %v2386_v41 }
 0x738   : > { %v5025_v63 = vmul.f32 %v18590_v0, %v4859_v35  ;;  %18593 = vst [vmem:[#allocation142_spill] sm:$0xff] %v14778_v11  ;;  %v4705_v0 = vmul.f32 %v14180_v12, %v14097_v58  ;;  %v3948_v30 = vadd.f32 %v14778_v11, %v14194_v33  ;;  %8881 = vmatpush1.bf16.msra.mxu1 %v8880_v48  ;;  %v18597_v58 = vmov 0.0|0.0   ;;  %v14795_v12 = vpop.eup %9733  ;;  %v7223_v11 = vld [vmem:[#allocation5 + $0x108] sm:$0xff] }
 0x739   : > { %3826 = vrot.lane.b32.xlu1 %v14758_v42, %s10108_s20  ;;  %4876 = vrot.lane.b32.xlu0 %v14762_v14, %s10110_s19  ;;  %18598 = vst [vmem:[#allocation160_spill] sm:$0xff] %v14795_v12 }
 0x73a   : > { %v5115_v23 = vpop.permute.xlu1 %5114  ;;  %8882 = vmatprep.subr.bf16.mxu1 %v18597_v58 }
 0x73b   : > { %v14771_v3 = vpop.permute.xlu0 %4446  ;;  %v5281_v42 = vmul.f32 %v18592_v32, %v5115_v23  ;;  %v3252_v32 = vmul.f32 1.442695, %v3134_v19  ;;  %v5602_v23 = vsel %vm5576_vm1, %v4705_v0, %v5025_v63  ;;  %v4268_v19 = vadd.f32 %v14219_v31, %v3948_v30  ;;  %v18603_v30 = vld [vmem:[#allocation149_spill] sm:$0xff] }
 0x73c   : > { %v3518_v63 = vsub.f32 %v18579_v62, %v14217_v6  ;;  %v14819_v0 = vpop.eup %9735 }
 0x73d   : > { %5132 = vrot.lane.b32.xlu1 %v14762_v14, %s10112_s30  ;;  %4464 = vrot.lane.b32.xlu0 %v14773_v21, %s10109_s26  ;;  %v5667_v10 = vsel %vm5641_vm2, %v5602_v23, %v5281_v42  ;;  %v2870_v21 = vmul.f32 1.442695, %v2751_v1  ;;  %9743 = vpow2.f32 %v3252_v32  ;;  %v4588_v31 = vadd.f32 %v14270_v20, %v4268_v19  ;;  %18602 = vst [vmem:[#allocation30_spill] sm:$0xff] %v14819_v0  ;;  %v14829_v20 = vpop.eup %9737 }
 0x73e   : > { %v5371_v35 = vpop.permute.xlu1 %5370  ;;  %18606 = vst [vmem:[#allocation41_spill] sm:$0xff] %v14829_v20  ;;  %v3636_v19 = vmul.f32 1.442695, %v3518_v63 }
 0x73f   : > { %v5537_v61 = vmul.f32 %v18596_v7, %v5371_v35  ;;  %v14792_v46 = vpop.permute.xlu0 %3012  ;;  %v18604_v35 = vld [vmem:[#allocation50_spill] sm:$0xff]  ;;  %9745 = vpow2.f32 %v2870_v21  ;;  %v18607_v7 = vld [vmem:[#allocation237_spill] sm:$0xff]  ;;  %v18611_v21 = vld [vmem:[#allocation232_spill] sm:$0xff] }
 0x740   : > { %v2286_v32 = vsub.f32 %v18604_v35, %v18603_v30  ;;  %9747 = vrcp.f32 %v4588_v31  ;;  %v14839_v35 = vpop.eup %9739 }
 0x741   : > { %4146 = vrot.lane.b32.xlu1 %v14795_v12, %s18141_s7  ;;  %5388 = vrot.lane.b32.xlu0 %v14762_v14, %s18129_s10  ;;  %v14803_v33 = vpop.f32.mrb[84].mxu1  ;;  %v14805_v48 = vpop.f32.mrb[84].mxu0  ;;  %v5732_v41 = vsel %vm5706_vm3, %v5667_v10, %v5537_v61  ;;  %v3135_v61 = vsub.f32 %v18595_v36, %v18607_v7  ;;  %18609 = vst [vmem:[#allocation165_spill] sm:$0xff] %v14839_v35  ;;  %9749 = vpow2.f32 %v3636_v19  ;;  %v7222_v12 = vld [vmem:[#allocation5 + $0x100] sm:$0xff]  ;;  %v7193_v19 = vld [vmem:[#allocation5 + $0x18] sm:$0xff] }
 0x742   : > { %18599 = vst [vmem:[#allocation222_spill] sm:$0xff] %v14803_v33  ;;  %18600 = vst [vmem:[#allocation176_spill] sm:$0xff] %v14805_v48  ;;  %v14811_v42 = vpop.permute.xlu1 %3396  ;;  %v14813_v1 = vpop.f32.mrb[85].mxu1  ;;  %8321 = vmatmul.mubr.msk.f32.gmra.mrb[114].mxu1 %vm5771_vm4, %v5732_v41  ;;  %8385 = vmatmul.mubr.msk.f32.gmra.mrb[114].mxu0 %vm5771_vm4, %v5732_v41  ;;  %v18612_v33 = vld [vmem:[#allocation90_spill] sm:$0xff] }
 0x743   : > { %18601 = vst [vmem:[#allocation126_spill] sm:$0xff] %v14813_v1  ;;  %5797 = vst.msk [vmem:[%s13327_s18 + $0xc8] sm:$0xff] %vm5771_vm4, %v5732_v41  ;;  %v14823_v23 = vpop.f32.mrb[85].mxu0  ;;  %v14825_v6 = vpop.permute.xlu0 %4128  ;;  %6256 = vmatprep.mubr.f32.mxu1 %v18227_v25  ;;  %6705 = vmatprep.mubr.f32.mxu0 %v18227_v25  ;;  %v2388_v41 = vmul.f32 1.442695, %v2286_v32  ;;  %v18613_v32 = vld [vmem:[#allocation59_spill] sm:$0xff] }
 0x744   : > { %18605 = vst [vmem:[#allocation127_spill] sm:$0xff] %v14823_v23  ;;  %v14841_v48 = vpop.eup %9741  ;;  %v2752_v23 = vsub.f32 %v18612_v33, %v18611_v21  ;;  %v3254_v7 = vmul.f32 1.442695, %v3135_v61  ;;  %v7192_v21 = vld [vmem:[#allocation5 + $0x10] sm:$0xff]  ;;  %v14858_v61 = vpack.c.bf16 %v7223_v11, %v7222_v12 }
 0x745   : > { %3828 = vrot.lane.b32.xlu1 %v14819_v0, %s10108_s20  ;;  %4878 = vrot.lane.b32.xlu0 %v14829_v20, %s10110_s19  ;;  %18610 = vst [vmem:[#allocation21_spill] sm:$0xff] %v14841_v48  ;;  %v3949_v63 = vadd.f32 %v14841_v48, %v14242_v9  ;;  %9751 = vpow2.f32 %v2388_v41  ;;  %v18617_v9 = vld [vmem:[#allocation120_spill] sm:$0xff]  ;;  %v18618_v48 = vld [vmem:[#allocation105_spill] sm:$0xff] }
 0x746   : > { %v14837_v10 = vpop.permute.xlu1 %3810  ;;  %18616 = vst [vmem:[#allocation144_spill] sm:$0xff] %v14858_v61  ;;  %v2872_v57 = vmul.f32 1.442695, %v2752_v23  ;;  %v4706_v41 = vmul.f32 %v18618_v48, %v18617_v9  ;;  %9753 = vpow2.f32 %v3254_v7  ;;  %8929 = vmatpush1.bf16.msra.mxu0 %v14858_v61  ;;  %v18622_v48 = vld [vmem:[#allocation133_spill] sm:$0xff] }
 0x747   : > { %18608 = vst [vmem:[#allocation216_spill] sm:$0xff] %v14837_v10  ;;  %v4861_v30 = vpop.permute.xlu0 %4860  ;;  %v14854_v14 = vpop.eup %9743  ;;  %v4269_v62 = vadd.f32 %v14286_v49, %v3949_v63  ;;  %v18615_v10 = vld [vmem:[#allocation262_spill] sm:$0xff]  ;;  %v3519_v49 = vsub.f32 %v18595_v36, %v14320_v24  ;;  %v18619_v63 = vld [vmem:[#allocation111_spill] sm:$0xff]  ;;  %8930 = vmatprep.subr.bf16.mxu0 %v18597_v58 }
 0x748   : > { %v5026_v1 = vmul.f32 %v18613_v32, %v4861_v30  ;;  %18614 = vst [vmem:[#allocation61_spill] sm:$0xff] %v14854_v14  ;;  %v8883_v30 = vpack.c.bf16 %v7193_v19, %v7192_v21  ;;  %9755 = vpow2.f32 %v2872_v57 }
 0x749   : > { %5134 = vrot.lane.b32.xlu1 %v14829_v20, %s10112_s30  ;;  %4466 = vrot.lane.b32.xlu0 %v14839_v35, %s10109_s26  ;;  %v14872_v23 = vpop.eup %9745 }
 0x74a   : > { %v5117_v31 = vpop.permute.xlu1 %5116  ;;  %18621 = vst [vmem:[#allocation155_spill] sm:$0xff] %v14872_v23  ;;  %v5603_v9 = vsel %vm5576_vm1, %v4706_v41, %v5026_v1  ;;  %8884 = vmatpush1.bf16.msra.mxu1 %v8883_v30  ;;  %v14883_v24 = vpop.eup %9747  ;;  %v18629_v1 = vld [vmem:[#allocation247_spill] sm:$0xff]  ;;  %v3638_v30 = vmul.f32 1.442695, %v3519_v49 }
 0x74b   : > { %v14852_v0 = vpop.permute.xlu0 %4448  ;;  %v5282_v35 = vmul.f32 %v18615_v10, %v5117_v31  ;;  %v4589_v10 = vadd.f32 %v18619_v63, %v4269_v62  ;;  %v18623_v31 = vld [vmem:[#allocation49_spill] sm:$0xff]  ;;  %18626 = vst [vmem:[#allocation151_spill] sm:$0xff] %v14883_v24  ;;  %8885 = vmatprep.subr.bf16.mxu1 %v18597_v58  ;;  %v3136_v41 = vsub.f32 %v18612_v33, %v18629_v1  ;;  %v18632_v49 = vld [vmem:[#allocation243_spill] sm:$0xff] }
 0x74c   : > { %v2287_v32 = vsub.f32 %v18623_v31, %v18622_v48  ;;  %v14908_v31 = vpop.eup %9749 }
 0x74d   : > { %4148 = vrot.lane.b32.xlu1 %v14854_v14, %s18141_s7  ;;  %5390 = vrot.lane.b32.xlu0 %v14829_v20, %s18129_s10  ;;  %v18624_v14 = vld [vmem:[#allocation72_spill] sm:$0xff]  ;;  %v5668_v48 = vsel %vm5641_vm2, %v5603_v9, %v5282_v35  ;;  %9757 = vrcp.f32 %v4589_v10  ;;  %18630 = vst [vmem:[#allocation224_spill] sm:$0xff] %v14908_v31  ;;  %v18633_v10 = vld [vmem:[#allocation87_spill] sm:$0xff] }
 0x74e   : > { %v5373_v11 = vpop.permute.xlu1 %5372  ;;  %v14869_v12 = vpop.f32.mrb[86].mxu1  ;;  %v2390_v57 = vmul.f32 1.442695, %v2287_v32  ;;  %v3256_v32 = vmul.f32 1.442695, %v3136_v41  ;;  %9759 = vpow2.f32 %v3638_v30  ;;  %v7224_v41 = vld [vmem:[#allocation5 + $0x110] sm:$0xff] }
 0x74f   : > { %18620 = vst [vmem:[#allocation18_spill] sm:$0xff] %v14869_v12  ;;  %v5538_v21 = vmul.f32 %v18624_v14, %v5373_v11  ;;  %v14878_v7 = vpop.f32.mrb[86].mxu0  ;;  %v14880_v19 = vpop.permute.xlu0 %3014  ;;  %v7225_v30 = vld [vmem:[#allocation5 + $0x118] sm:$0xff] }
 0x750   : > { %18625 = vst [vmem:[#allocation60_spill] sm:$0xff] %v14878_v7  ;;  %v14885_v62 = vpop.f32.mrb[87].mxu1  ;;  %v14887_v63 = vpop.f32.mrb[87].mxu0  ;;  %9761 = vpow2.f32 %v2390_v57 }
 0x751   : > { %18627 = vst [vmem:[#allocation44_spill] sm:$0xff] %v14885_v62  ;;  %18628 = vst [vmem:[#allocation213_spill] sm:$0xff] %v14887_v63  ;;  %3830 = vrot.lane.b32.xlu1 %v14872_v23, %s10108_s20  ;;  %4880 = vrot.lane.b32.xlu0 %v14883_v24, %s10110_s19  ;;  %v5733_v14 = vsel %vm5706_vm3, %v5668_v48, %v5538_v21  ;;  %v14910_v9 = vpop.eup %9751  ;;  %v2753_v21 = vsub.f32 %v18633_v10, %v18632_v49  ;;  %v18634_v48 = vld [vmem:[#allocation209_spill] sm:$0xff]  ;;  %v7194_v62 = vld [vmem:[#allocation5 + $0x20] sm:$0xff]  ;;  %9763 = vpow2.f32 %v3256_v32 }
 0x752   : > { %v14898_v11 = vpop.permute.xlu1 %3398  ;;  %5798 = vst.msk [vmem:[%s13327_s18 + $0xd0] sm:$0xff] %vm5771_vm4, %v5733_v14  ;;  %8322 = vmatmul.mubr.msk.f32.gmra.mrb[116].mxu1 %vm5771_vm4, %v5733_v14  ;;  %8386 = vmatmul.mubr.msk.f32.gmra.mrb[116].mxu0 %vm5771_vm4, %v5733_v14  ;;  %18631 = vst [vmem:[#allocation68_spill] sm:$0xff] %v14910_v9  ;;  %v3950_v14 = vadd.f32 %v14910_v9, %v18634_v48  ;;  %v14922_v12 = vpop.eup %9753  ;;  %v3520_v48 = vsub.f32 %v18612_v33, %v14370_v51  ;;  %v18641_v32 = vld [vmem:[#allocation167_spill] sm:$0xff]  ;;  %v18642_v51 = vld [vmem:[#allocation264_spill] sm:$0xff] }
 0x753   : > { %v14904_v35 = vpop.permute.xlu0 %4130  ;;  %6262 = vmatprep.mubr.f32.mxu1 %v18227_v25  ;;  %6711 = vmatprep.mubr.f32.mxu0 %v18227_v25  ;;  %18635 = vst [vmem:[#allocation162_spill] sm:$0xff] %v14922_v12  ;;  %v2874_v49 = vmul.f32 1.442695, %v2753_v21  ;;  %v14932_v23 = vpack.c.bf16 %v7225_v30, %v7224_v41  ;;  %v14934_v21 = vpop.eup %9755  ;;  %v18674_v33 = vld [vmem:[#allocation95_spill] sm:$0xff] }
 0x754   : > { %v4270_v63 = vadd.f32 %v14373_v45, %v3950_v14  ;;  %v7195_v45 = vld [vmem:[#allocation5 + $0x28] sm:$0xff]  ;;  %18637 = vst [vmem:[#allocation255_spill] sm:$0xff] %v14934_v21  ;;  %v18638_v14 = vld [vmem:[#allocation153_spill] sm:$0xff]  ;;  %v3640_v30 = vmul.f32 1.442695, %v3520_v48 }
 0x755   : > { %5136 = vrot.lane.b32.xlu1 %v14883_v24, %s10112_s30  ;;  %4468 = vrot.lane.b32.xlu0 %v14908_v31, %s10109_s26  ;;  %18636 = vst [vmem:[#allocation70_spill] sm:$0xff] %v14932_v23  ;;  %9765 = vpow2.f32 %v2874_v49 }
 0x756   : > { %v14920_v1 = vpop.permute.xlu1 %3812  ;;  %v4590_v57 = vadd.f32 %v14414_v15, %v4270_v63  ;;  %8932 = vmatpush1.bf16.msra.mxu0 %v14932_v23  ;;  %v18655_v23 = vld [vmem:[#allocation81_spill] sm:$0xff] }
 0x757   : > { %v4863_v7 = vpop.permute.xlu0 %4862  ;;  %v14940_v20 = vpop.eup %9757  ;;  %8933 = vmatprep.subr.bf16.mxu0 %v18597_v58 }
 0x758   : > { %18640 = vst [vmem:[#allocation254_spill] sm:$0xff] %v14940_v20  ;;  %v5027_v36 = vmul.f32 %v18641_v32, %v4863_v7  ;;  %9767 = vrcp.f32 %v4590_v57  ;;  %v18646_v7 = vld [vmem:[#allocation207_spill] sm:$0xff]  ;;  %v18651_v57 = vld [vmem:[#allocation266_spill] sm:$0xff] }
 0x759   : > { %4150 = vrot.lane.b32.xlu1 %v14922_v12, %s18141_s7  ;;  %5392 = vrot.lane.b32.xlu0 %v14883_v24, %s18129_s10  ;;  %v18639_v12 = vld [vmem:[#allocation52_spill] sm:$0xff]  ;;  %v8886_v24 = vpack.c.bf16 %v7195_v45, %v7194_v62  ;;  %v18645_v62 = vld [vmem:[#allocation130_spill] sm:$0xff]  ;;  %v18647_v45 = vld [vmem:[#allocation33_spill] sm:$0xff]  ;;  %9769 = vpow2.f32 %v3640_v30 }
 0x75a   : > { %v5119_v61 = vpop.permute.xlu1 %5118  ;;  %v2288_v31 = vsub.f32 %v18639_v12, %v18638_v14  ;;  %v3137_v41 = vsub.f32 %v18633_v10, %v18645_v62  ;;  %v4707_v49 = vmul.f32 %v18647_v45, %v18646_v7  ;;  %v14965_v62 = vpop.eup %9759 }
 0x75b   : > { %v14938_v9 = vpop.permute.xlu0 %4450  ;;  %v5283_v15 = vmul.f32 %v18642_v51, %v5119_v61  ;;  %8887 = vmatpush1.bf16.msra.mxu1 %v8886_v24  ;;  %18650 = vst [vmem:[#allocation66_spill] sm:$0xff] %v14965_v62  ;;  %v14969_v45 = vpop.eup %9761 }
 0x75c   : > { %v2392_v32 = vmul.f32 1.442695, %v2288_v31  ;;  %8888 = vmatprep.subr.bf16.mxu1 %v18597_v58  ;;  %v5604_v48 = vsel %vm5576_vm1, %v4707_v49, %v5027_v36  ;;  %18652 = vst [vmem:[#allocation256_spill] sm:$0xff] %v14969_v45  ;;  %v3951_v36 = vadd.f32 %v14969_v45, %v18655_v23  ;;  %v7196_v45 = vld [vmem:[#allocation5 + $0x30] sm:$0xff] }
 0x75d   : > { %3832 = vrot.lane.b32.xlu1 %v14934_v21, %s10108_s20  ;;  %4882 = vrot.lane.b32.xlu0 %v14940_v20, %s10110_s19  ;;  %v14949_v63 = vpop.f32.mrb[88].mxu1  ;;  %v14951_v12 = vpop.f32.mrb[88].mxu0  ;;  %v5669_v31 = vsel %vm5641_vm2, %v5604_v48, %v5283_v15  ;;  %v18659_v48 = vld [vmem:[#allocation51_spill] sm:$0xff]  ;;  %v18662_v21 = vld [vmem:[#allocation134_spill] sm:$0xff] }
 0x75e   : > { %18643 = vst [vmem:[#allocation181_spill] sm:$0xff] %v14949_v63  ;;  %18644 = vst [vmem:[#allocation43_spill] sm:$0xff] %v14951_v12  ;;  %v14957_v14 = vpop.f32.mrb[89].mxu1  ;;  %v14959_v61 = vpop.f32.mrb[89].mxu0  ;;  %v18653_v12 = vld [vmem:[#allocation234_spill] sm:$0xff]  ;;  %9771 = vpow2.f32 %v2392_v32  ;;  %v4271_v15 = vadd.f32 %v14432_v29, %v3951_v36  ;;  %v18658_v29 = vld [vmem:[#allocation137_spill] sm:$0xff] }
 0x75f   : > { %18648 = vst [vmem:[#allocation182_spill] sm:$0xff] %v14957_v14  ;;  %18649 = vst [vmem:[#allocation219_spill] sm:$0xff] %v14959_v61  ;;  %v14962_v51 = vpop.permute.xlu1 %4132  ;;  %v5375_v63 = vpop.permute.xlu0 %5374  ;;  %v18654_v61 = vld [vmem:[#allocation98_spill] sm:$0xff]  ;;  %v3258_v14 = vmul.f32 1.442695, %v3137_v41  ;;  %v3521_v41 = vsub.f32 %v18633_v10, %v14460_v5 }
 0x760   : > { %v5539_v7 = vmul.f32 %v18651_v57, %v5375_v63  ;;  %v2754_v24 = vsub.f32 %v18654_v61, %v18653_v12  ;;  %v14987_v57 = vpop.eup %9763  ;;  %v4591_v30 = vadd.f32 %v14476_v54, %v4271_v15  ;;  %v18664_v15 = vld [vmem:[#allocation34_spill] sm:$0xff] }
 0x761   : > { %5138 = vrot.lane.b32.xlu1 %v14940_v20, %s10112_s30  ;;  %4470 = vrot.lane.b32.xlu0 %v14965_v62, %s10109_s26  ;;  %18656 = vst [vmem:[#allocation187_spill] sm:$0xff] %v14987_v57  ;;  %9773 = vpow2.f32 %v3258_v14  ;;  %v14999_v32 = vpop.eup %9765  ;;  %v3138_v14 = vsub.f32 %v18654_v61, %v18662_v21  ;;  %v18663_v62 = vld [vmem:[#allocation269_spill] sm:$0xff]  ;;  %v3642_v54 = vmul.f32 1.442695, %v3521_v41 }
 0x762   : > { %v5734_v63 = vsel %vm5706_vm3, %v5669_v31, %v5539_v7  ;;  %v2876_v23 = vmul.f32 1.442695, %v2754_v24  ;;  %18657 = vst [vmem:[#allocation164_spill] sm:$0xff] %v14999_v32  ;;  %v2289_v7 = vsub.f32 %v18659_v48, %v18658_v29  ;;  %v15005_v24 = vpop.eup %9767  ;;  %v4708_v29 = vmul.f32 %v14406_v38, %v18664_v15  ;;  %v18669_v41 = vld [vmem:[#allocation77_spill] sm:$0xff] }
 0x763   : > { %v14981_v49 = vpop.permute.xlu1 %3814  ;;  %5799 = vst.msk [vmem:[%s13327_s18 + $0xd8] sm:$0xff] %vm5771_vm4, %v5734_v63  ;;  %8323 = vmatmul.mubr.msk.f32.gmra.mrb[118].mxu1 %vm5771_vm4, %v5734_v63  ;;  %8387 = vmatmul.mubr.msk.f32.gmra.mrb[118].mxu0 %vm5771_vm4, %v5734_v63  ;;  %v4865_v12 = vpop.permute.xlu0 %4864  ;;  %v18661_v63 = vld [vmem:[#allocation268_spill] sm:$0xff] }
 0x764   : > { %6268 = vmatprep.mubr.f32.mxu1 %v18227_v25  ;;  %6717 = vmatprep.mubr.f32.mxu0 %v18227_v25  ;;  %9775 = vpow2.f32 %v2876_v23  ;;  %v2394_v23 = vmul.f32 1.442695, %v2289_v7  ;;  %v7197_v7 = vld [vmem:[#allocation5 + $0x38] sm:$0xff] }
 0x765   : > { %4152 = vrot.lane.b32.xlu1 %v14987_v57, %s18141_s7  ;;  %5394 = vrot.lane.b32.xlu0 %v14940_v20, %s18129_s10  ;;  %v5028_v57 = vmul.f32 %v18661_v63, %v4865_v12  ;;  %9777 = vrcp.f32 %v4591_v30 }
 0x766   : > { %9779 = vpow2.f32 %v3642_v54  ;;  %v18677_v54 = vld [vmem:[#allocation158_spill] sm:$0xff] }
 0x767   : > { %v5121_v31 = vpop.permute.xlu1 %5120  ;;  %v15003_v36 = vpop.permute.xlu0 %4452  ;;  %v5605_v20 = vsel %vm5576_vm1, %v4708_v29, %v5028_v57  ;;  %v18675_v29 = vld [vmem:[#allocation242_spill] sm:$0xff]  ;;  %9781 = vpow2.f32 %v2394_v23 }
 0x768   : > { %18660 = vst [vmem:[#allocation140_spill] sm:$0xff] %v15003_v36  ;;  %v5284_v5 = vmul.f32 %v18663_v62, %v5121_v31  ;;  %v7226_v62 = vld [vmem:[#allocation5 + $0x120] sm:$0xff]  ;;  %v7227_v31 = vld [vmem:[#allocation5 + $0x128] sm:$0xff]  ;;  %v3260_v36 = vmul.f32 1.442695, %v3138_v14 }
 0x769   : > { %3834 = vrot.lane.b32.xlu1 %v14999_v32, %s10108_s20  ;;  %4884 = vrot.lane.b32.xlu0 %v15005_v24, %s10110_s19  ;;  %v15023_v32 = vpop.eup %9769  ;;  %v15031_v15 = vpack.c.bf16 %v7227_v31, %v7226_v62  ;;  %v8889_v31 = vpack.c.bf16 %v7197_v7, %v7196_v45  ;;  %v18678_v45 = vld [vmem:[#allocation54_spill] sm:$0xff] }
 0x76a   : > { %v15017_v48 = vpop.f32.mrb[90].mxu1  ;;  %v15019_v12 = vpop.f32.mrb[90].mxu0  ;;  %18668 = vst [vmem:[#allocation227_spill] sm:$0xff] %v15023_v32  ;;  %v5670_v57 = vsel %vm5641_vm2, %v5605_v20, %v5284_v5  ;;  %v2290_v23 = vsub.f32 %v18678_v45, %v18677_v54  ;;  %9783 = vpow2.f32 %v3260_v36  ;;  %v18681_v54 = vld [vmem:[#allocation191_spill] sm:$0xff] }
 0x76b   : > { %18665 = vst [vmem:[#allocation46_spill] sm:$0xff] %v15017_v48  ;;  %18666 = vst [vmem:[#allocation257_spill] sm:$0xff] %v15019_v12  ;;  %v15021_v63 = vpop.permute.xlu1 %4134  ;;  %v5377_v21 = vpop.permute.xlu0 %5376  ;;  %v18673_v48 = vld [vmem:[#allocation249_spill] sm:$0xff]  ;;  %8935 = vmatpush1.bf16.msra.mxu0 %v15031_v15  ;;  %8890 = vmatpush1.bf16.msra.mxu1 %v8889_v31 }
 0x76c   : > { %18667 = vst [vmem:[#allocation23_spill] sm:$0xff] %v15021_v63  ;;  %v5540_v30 = vmul.f32 %v18669_v41, %v5377_v21  ;;  %v15027_v10 = vpop.f32.mrb[91].mxu1  ;;  %v15029_v38 = vpop.f32.mrb[91].mxu0  ;;  %18672 = vst [vmem:[#allocation183_spill] sm:$0xff] %v15031_v15  ;;  %v2755_v63 = vsub.f32 %v18674_v33, %v18673_v48  ;;  %8936 = vmatprep.subr.bf16.mxu0 %v18597_v58  ;;  %8891 = vmatprep.subr.bf16.mxu1 %v18597_v58  ;;  %v2396_v36 = vmul.f32 1.442695, %v2290_v23 }
 0x76d   : > { %18670 = vst [vmem:[#allocation74_spill] sm:$0xff] %v15027_v10  ;;  %18671 = vst [vmem:[#allocation188_spill] sm:$0xff] %v15029_v38  ;;  %v15033_v12 = vpop.eup %9771  ;;  %5140 = vrot.lane.b32.xlu1 %v15005_v24, %s10112_s30  ;;  %4472 = vrot.lane.b32.xlu0 %v15023_v32, %s10109_s26  ;;  %v18684_v10 = vld [vmem:[#allocation175_spill] sm:$0xff]  ;;  %v18716_v32 = vld [vmem:[#allocation196_spill] sm:$0xff] }
 0x76e   : > { %v3952_v21 = vadd.f32 %v15033_v12, %v18675_v29  ;;  %v5735_v62 = vsel %vm5706_vm3, %v5670_v57, %v5540_v30  ;;  %v15052_v20 = vpop.eup %9773  ;;  %v2878_v41 = vmul.f32 1.442695, %v2755_v63  ;;  %v3522_v30 = vsub.f32 %v18654_v61, %v14508_v27 }
 0x76f   : > { %v15046_v48 = vpop.permute.xlu1 %3816  ;;  %5800 = vst.msk [vmem:[%s13327_s18 + $0xe0] sm:$0xff] %vm5771_vm4, %v5735_v62  ;;  %8324 = vmatmul.mubr.msk.f32.gmra.mrb[120].mxu1 %vm5771_vm4, %v5735_v62  ;;  %8388 = vmatmul.mubr.msk.f32.gmra.mrb[120].mxu0 %vm5771_vm4, %v5735_v62  ;;  %v4867_v14 = vpop.permute.xlu0 %4866  ;;  %18676 = vst [vmem:[#allocation45_spill] sm:$0xff] %v15052_v20  ;;  %v2297_v27 = vsub.f32 %v18499_v39, %v18681_v54 }
 0x770   : > { %v4272_v5 = vadd.f32 %v14515_v55, %v3952_v21  ;;  %6274 = vmatprep.mubr.f32.mxu1 %v18227_v25  ;;  %6723 = vmatprep.mubr.f32.mxu0 %v18227_v25  ;;  %v15067_v7 = vpop.eup %9775  ;;  %v18680_v21 = vld [vmem:[#allocation73_spill] sm:$0xff]  ;;  %9785 = vpow2.f32 %v2878_v41  ;;  %v3644_v38 = vmul.f32 1.442695, %v3522_v30  ;;  %v18688_v30 = vld [vmem:[#allocation106_spill] sm:$0xff] }
 0x771   : > { %4154 = vrot.lane.b32.xlu1 %v15052_v20, %s18141_s7  ;;  %5396 = vrot.lane.b32.xlu0 %v15005_v24, %s18129_s10  ;;  %18679 = vst [vmem:[#allocation190_spill] sm:$0xff] %v15067_v7  ;;  %v15072_v63 = vpop.eup %9777  ;;  %v5029_v62 = vmul.f32 %v18680_v21, %v4867_v14  ;;  %v4709_v14 = vmul.f32 %v14462_v53, %v18684_v10  ;;  %v18686_v21 = vld [vmem:[#allocation113_spill] sm:$0xff]  ;;  %v2410_v15 = vmul.f32 1.442695, %v2297_v27  ;;  %v18706_v20 = vld [vmem:[#allocation15_spill] sm:$0xff] }
 0x772   : > { %v4592_v55 = vadd.f32 %v14554_v2, %v4272_v5  ;;  %v18682_v2 = vld [vmem:[#allocation174_spill] sm:$0xff]  ;;  %v18683_v5 = vld [vmem:[#allocation132_spill] sm:$0xff]  ;;  %v15088_v41 = vpop.eup %9779 }
 0x773   : > { %v5123_v57 = vpop.permute.xlu1 %5122  ;;  %v15069_v29 = vpop.permute.xlu0 %4454  ;;  %v3139_v45 = vsub.f32 %v18674_v33, %v18683_v5  ;;  %18685 = vst [vmem:[#allocation64_spill] sm:$0xff] %v15088_v41  ;;  %v18687_v5 = vld [vmem:[#allocation238_spill] sm:$0xff] }
 0x774   : > { %v5285_v31 = vmul.f32 %v18682_v2, %v5123_v57  ;;  %9787 = vrcp.f32 %v4592_v55  ;;  %v5606_v57 = vsel %vm5576_vm1, %v4709_v14, %v5029_v62  ;;  %v15092_v2 = vpop.eup %9781  ;;  %v2756_v55 = vsub.f32 %v18688_v30, %v18687_v5 }
 0x775   : > { %3836 = vrot.lane.b32.xlu1 %v15067_v7, %s10108_s20  ;;  %4886 = vrot.lane.b32.xlu0 %v15072_v63, %s10110_s19  ;;  %9789 = vpow2.f32 %v2396_v36  ;;  %v3262_v14 = vmul.f32 1.442695, %v3139_v45  ;;  %v3953_v36 = vadd.f32 %v15092_v2, %v14534_v22  ;;  %v7228_v45 = vld [vmem:[#allocation5 + $0x130] sm:$0xff] }
 0x776   : > { %v5671_v62 = vsel %vm5641_vm2, %v5606_v57, %v5285_v31  ;;  %9791 = vpow2.f32 %v3644_v38  ;;  %v7229_v38 = vld [vmem:[#allocation5 + $0x138] sm:$0xff]  ;;  %v7198_v57 = vld [vmem:[#allocation5 + $0x40] sm:$0xff] }
 0x777   : > { %v15086_v23 = vpop.permute.xlu1 %4136  ;;  %v5379_v39 = vpop.permute.xlu0 %5378  ;;  %v4273_v22 = vadd.f32 %v14570_v34, %v3953_v36  ;;  %9793 = vpow2.f32 %v2410_v15  ;;  %v3523_v34 = vsub.f32 %v18674_v33, %v14596_v56  ;;  %v18699_v56 = vld [vmem:[#allocation166_spill] sm:$0xff] }
 0x778   : > { %v5541_v54 = vmul.f32 %v18686_v21, %v5379_v39  ;;  %9795 = vpow2.f32 %v3262_v14 }
 0x779   : > { %5142 = vrot.lane.b32.xlu1 %v15072_v63, %s10112_s30  ;;  %4474 = vrot.lane.b32.xlu0 %v15088_v41, %s10109_s26  ;;  %v15100_v53 = vpop.f32.mrb[92].mxu1  ;;  %v15102_v10 = vpop.f32.mrb[92].mxu0  ;;  %v4593_v36 = vadd.f32 %v14616_v4, %v4273_v22  ;;  %v2298_v4 = vsub.f32 %v18517_v50, %v18699_v56 }
 0x77a   : > { %18689 = vst [vmem:[#allocation25_spill] sm:$0xff] %v15100_v53  ;;  %18690 = vst [vmem:[#allocation226_spill] sm:$0xff] %v15102_v10  ;;  %v15107_v27 = vpop.f32.mrb[93].mxu1  ;;  %v5736_v39 = vsel %vm5706_vm3, %v5671_v62, %v5541_v54  ;;  %v15110_v21 = vpop.f32.mrb[93].mxu0  ;;  %v15123_v54 = vpack.c.bf16 %v7229_v38, %v7228_v45  ;;  %v7199_v62 = vld [vmem:[#allocation5 + $0x48] sm:$0xff]  ;;  %v18695_v53 = vld [vmem:[#allocation141_spill] sm:$0xff] }
 0x77b   : > { %18691 = vst [vmem:[#allocation145_spill] sm:$0xff] %v15107_v27  ;;  %18692 = vst [vmem:[#allocation48_spill] sm:$0xff] %v15110_v21  ;;  %v15112_v5 = vpop.permute.xlu1 %3818  ;;  %8325 = vmatmul.mubr.msk.f32.gmra.mrb[122].mxu1 %vm5771_vm4, %v5736_v39  ;;  %8389 = vmatmul.mubr.msk.f32.gmra.mrb[122].mxu0 %vm5771_vm4, %v5736_v39  ;;  %v4869_v31 = vpop.permute.xlu0 %4868  ;;  %v18696_v21 = vld [vmem:[#allocation53_spill] sm:$0xff]  ;;  %v8892_v7 = vpack.c.bf16 %v7199_v62, %v7198_v57  ;;  %v18700_v57 = vld [vmem:[#allocation99_spill] sm:$0xff] }
 0x77c   : > { %5801 = vst.msk [vmem:[%s13327_s18 + $0xe8] sm:$0xff] %vm5771_vm4, %v5736_v39  ;;  %v15118_v10 = vpop.eup %9783  ;;  %6280 = vmatprep.mubr.f32.mxu1 %v18227_v25  ;;  %6729 = vmatprep.mubr.f32.mxu0 %v18227_v25  ;;  %18694 = vst [vmem:[#allocation65_spill] sm:$0xff] %v15123_v54  ;;  %v2291_v27 = vsub.f32 %v18696_v21, %v18695_v53  ;;  %v2880_v39 = vmul.f32 1.442695, %v2756_v55  ;;  %v18698_v21 = vld [vmem:[#allocation84_spill] sm:$0xff] }
 0x77d   : > { %18693 = vst [vmem:[#allocation195_spill] sm:$0xff] %v15118_v10  ;;  %4156 = vrot.lane.b32.xlu1 %v15118_v10, %s18141_s7  ;;  %5398 = vrot.lane.b32.xlu0 %v15072_v63, %s18129_s10  ;;  %v15135_v45 = vpop.eup %9785  ;;  %v5030_v38 = vmul.f32 %v18698_v21, %v4869_v31  ;;  %v18702_v31 = vld [vmem:[#allocation235_spill] sm:$0xff] }
 0x77e   : > { %8938 = vmatpush1.bf16.msra.mxu0 %v15123_v54  ;;  %18697 = vst [vmem:[#allocation229_spill] sm:$0xff] %v15135_v45  ;;  %8893 = vmatpush1.bf16.msra.mxu1 %v8892_v7  ;;  %v15140_v55 = vpop.eup %9787  ;;  %v2398_v14 = vmul.f32 1.442695, %v2291_v27  ;;  %9797 = vpow2.f32 %v2880_v39  ;;  %v18701_v7 = vld [vmem:[#allocation159_spill] sm:$0xff]  ;;  %v3646_v54 = vmul.f32 1.442695, %v3523_v34  ;;  %v4710_v27 = vmul.f32 %v14518_v8, %v18702_v31 }
 0x77f   : > { %v5125_v53 = vpop.permute.xlu1 %5124  ;;  %v15137_v15 = vpop.permute.xlu0 %4456  ;;  %8939 = vmatprep.subr.bf16.mxu0 %v18597_v58  ;;  %8894 = vmatprep.subr.bf16.mxu1 %v18597_v58  ;;  %v3140_v62 = vsub.f32 %v18688_v30, %v18701_v7  ;;  %9799 = vrcp.f32 %v4593_v36  ;;  %v2412_v34 = vmul.f32 1.442695, %v2298_v4 }
 0x780   : > { %v5286_v22 = vmul.f32 %v18700_v57, %v5125_v53  ;;  %v15155_v21 = vpop.eup %9789  ;;  %v18704_v53 = vld [vmem:[#allocation136_spill] sm:$0xff]  ;;  %v18705_v57 = vld [vmem:[#allocation103_spill] sm:$0xff]  ;;  %v5607_v10 = vsel %vm5576_vm1, %v4710_v27, %v5030_v38  ;;  %9801 = vpow2.f32 %v2398_v14 }
 0x781   : > { %3838 = vrot.lane.b32.xlu1 %v15135_v45, %s10108_s20  ;;  %4888 = vrot.lane.b32.xlu0 %v15140_v55, %s10110_s19  ;;  %v15157_v56 = vpop.eup %9791  ;;  %v2757_v45 = vsub.f32 %v18705_v57, %v18704_v53  ;;  %v3954_v36 = vadd.f32 %v15155_v21, %v14618_v59  ;;  %v3264_v7 = vmul.f32 1.442695, %v3140_v62  ;;  %9803 = vpow2.f32 %v3646_v54 }
 0x782   : > { %18703 = vst [vmem:[#allocation258_spill] sm:$0xff] %v15157_v56  ;;  %v5672_v8 = vsel %vm5641_vm2, %v5607_v10, %v5286_v22  ;;  %v15175_v14 = vpop.eup %9793  ;;  %9805 = vpow2.f32 %v2412_v34 }
 0x783   : > { %v4139_v50 = vpop.permute.xlu1 %4138  ;;  %v5381_v39 = vpop.permute.xlu0 %5380  ;;  %v4274_v59 = vadd.f32 %v14651_v28, %v3954_v36  ;;  %v2882_v22 = vmul.f32 1.442695, %v2757_v45  ;;  %v18712_v28 = vld [vmem:[#allocation150_spill] sm:$0xff]  ;;  %v7231_v45 = vld [vmem:[#allocation5 + $0x148] sm:$0xff]  ;;  %9807 = vpow2.f32 %v3264_v7 }
 0x784   : > { %v5542_v41 = vmul.f32 %v18706_v20, %v5381_v39  ;;  %v15184_v54 = vpop.eup %9795  ;;  %v18713_v39 = vld [vmem:[#allocation56_spill] sm:$0xff] }
 0x785   : > { %5144 = vrot.lane.b32.xlu1 %v15140_v55, %s10112_s30  ;;  %4476 = vrot.lane.b32.xlu0 %v15157_v56, %s10109_s26  ;;  %18709 = vst [vmem:[#allocation47_spill] sm:$0xff] %v15184_v54  ;;  %v2292_v53 = vsub.f32 %v18713_v39, %v18712_v28  ;;  %v4594_v36 = vadd.f32 %v14697_v17, %v4274_v59  ;;  %v7201_v28 = vld [vmem:[#allocation5 + $0x58] sm:$0xff]  ;;  %9809 = vpow2.f32 %v2882_v22 }
 0x786   : > { %v15170_v31 = vpop.f32.mrb[94].mxu1  ;;  %v5737_v38 = vsel %vm5706_vm3, %v5672_v8, %v5542_v41  ;;  %v15173_v20 = vpop.f32.mrb[94].mxu0  ;;  %v3961_v41 = vadd.f32 %v15175_v14, %v15112_v5  ;;  %v7230_v5 = vld [vmem:[#allocation5 + $0x140] sm:$0xff]  ;;  %v7200_v8 = vld [vmem:[#allocation5 + $0x50] sm:$0xff] }
 0x787   : > { %18707 = vst [vmem:[#allocation230_spill] sm:$0xff] %v15170_v31  ;;  %18708 = vst [vmem:[#allocation129_spill] sm:$0xff] %v15173_v20  ;;  %v15178_v4 = vpop.permute.xlu1 %3820  ;;  %8326 = vmatmul.mubr.msk.f32.gmra.mrb[124].mxu1 %vm5771_vm4, %v5737_v38  ;;  %8390 = vmatmul.mubr.msk.f32.gmra.mrb[124].mxu0 %vm5771_vm4, %v5737_v38  ;;  %v4871_v10 = vpop.permute.xlu0 %4870  ;;  %v15203_v31 = vpack.c.bf16 %v7231_v45, %v7230_v5  ;;  %v8895_v39 = vpack.c.bf16 %v7201_v28, %v7200_v8  ;;  %v2400_v7 = vmul.f32 1.442695, %v2292_v53  ;;  %v18720_v45 = vld [vmem:[#allocation116_spill] sm:$0xff] }
 0x788   : > { %5802 = vst.msk [vmem:[%s13327_s18 + $0xf0] sm:$0xff] %vm5771_vm4, %v5737_v38  ;;  %v15188_v62 = vpop.f32.mrb[95].mxu1  ;;  %v15190_v27 = vpop.f32.mrb[95].mxu0  ;;  %6286 = vmatprep.mubr.f32.mxu1 %v18227_v25  ;;  %6735 = vmatprep.mubr.f32.mxu0 %v18227_v25  ;;  %v3524_v38 = vsub.f32 %v18688_v30, %v14648_v52  ;;  %v4281_v20 = vadd.f32 %v4139_v50, %v3961_v41  ;;  %9811 = vrcp.f32 %v4594_v36  ;;  %v18717_v50 = vld [vmem:[#allocation11_spill] sm:$0xff]  ;;  %v18719_v36 = vld [vmem:[#allocation241_spill] sm:$0xff] }
 0x789   : > { %18710 = vst [vmem:[#allocation240_spill] sm:$0xff] %v15188_v62  ;;  %18711 = vst [vmem:[#allocation193_spill] sm:$0xff] %v15190_v27  ;;  %4158 = vrot.lane.b32.xlu1 %v15184_v54, %s18141_s7  ;;  %5400 = vrot.lane.b32.xlu0 %v15140_v55, %s18129_s10  ;;  %v15205_v34 = vpop.eup %9797  ;;  %v18715_v62 = vld [vmem:[#allocation179_spill] sm:$0xff]  ;;  %v2299_v52 = vsub.f32 %v18533_v37, %v18716_v32  ;;  %v2758_v8 = vsub.f32 %v18720_v45, %v18719_v36 }
 0x78a   : > { %18714 = vst [vmem:[#allocation260_spill] sm:$0xff] %v15203_v31  ;;  %v15207_v27 = vpop.eup %9799  ;;  %v5031_v54 = vmul.f32 %v18715_v62, %v4871_v10  ;;  %8941 = vmatpush1.bf16.msra.mxu0 %v15203_v31  ;;  %v3648_v5 = vmul.f32 1.442695, %v3524_v38  ;;  %v3141_v10 = vsub.f32 %v18705_v57, %v14712_v44  ;;  %8896 = vmatpush1.bf16.msra.mxu1 %v8895_v39  ;;  %v18721_v38 = vld [vmem:[#allocation16_spill] sm:$0xff] }
 0x78b   : > { %v5127_v17 = vpop.permute.xlu1 %5126  ;;  %v4459_v59 = vpop.permute.xlu0 %4458  ;;  %8942 = vmatprep.subr.bf16.mxu0 %v18597_v58  ;;  %8897 = vmatprep.subr.bf16.mxu1 %v18597_v58  ;;  %v18753_v31 = vld [vmem:[#allocation216_spill] sm:$0xff] }
 0x78c   : > { %v4601_v56 = vadd.f32 %v4459_v59, %v4281_v20  ;;  %v5287_v41 = vmul.f32 %v18717_v50, %v5127_v17  ;;  %v18718_v20 = vld [vmem:[#allocation128_spill] sm:$0xff]  ;;  %v15223_v37 = vpop.eup %9801  ;;  %v3266_v59 = vmul.f32 1.442695, %v3141_v10 }
 0x78d   : > { %3840 = vrot.lane.b32.xlu1 %v15205_v34, %s10108_s20  ;;  %4890 = vrot.lane.b32.xlu0 %v15207_v27, %s10110_s19  ;;  %v4711_v22 = vmul.f32 %v14576_v47, %v18718_v20  ;;  %v15226_v53 = vpop.eup %9803  ;;  %v3955_v28 = vadd.f32 %v15223_v37, %v14674_v18  ;;  %v2884_v20 = vmul.f32 1.442695, %v2758_v8 }
 0x78e   : > { %9813 = vrcp.f32 %v4601_v56  ;;  %v2414_v56 = vmul.f32 1.442695, %v2299_v52 }
 0x78f   : > { %v4141_v32 = vpop.permute.xlu1 %4140  ;;  %v5383_v62 = vpop.permute.xlu0 %5382  ;;  %v5608_v44 = vsel %vm5576_vm1, %v4711_v22, %v5031_v54  ;;  %9815 = vpow2.f32 %v2400_v7  ;;  %v4275_v7 = vadd.f32 %v14738_v26, %v3955_v28 }
 0x790   : > { %v5543_v47 = vmul.f32 %v18721_v38, %v5383_v62  ;;  %v5673_v17 = vsel %vm5641_vm2, %v5608_v44, %v5287_v41  ;;  %9817 = vpow2.f32 %v3648_v5  ;;  %v15240_v54 = vpop.eup %9805  ;;  %v18722_v41 = vld [vmem:[#allocation146_spill] sm:$0xff]  ;;  %v18723_v5 = vld [vmem:[#allocation55_spill] sm:$0xff] }
 0x791   : > { %5146 = vrot.lane.b32.xlu1 %v15207_v27, %s10112_s30  ;;  %4478 = vrot.lane.b32.xlu0 %v15226_v53, %s10109_s26  ;;  %v15249_v50 = vpop.eup %9807  ;;  %v2293_v10 = vsub.f32 %v18723_v5, %v18722_v41  ;;  %v3962_v22 = vadd.f32 %v15240_v54, %v15178_v4  ;;  %9819 = vpow2.f32 %v2414_v56  ;;  %v4595_v26 = vadd.f32 %v14771_v3, %v4275_v7  ;;  %v18728_v7 = vld [vmem:[#allocation86_spill] sm:$0xff] }
 0x792   : > { %v5738_v39 = vsel %vm5706_vm3, %v5673_v17, %v5543_v47  ;;  %v15266_v8 = vpop.eup %9809  ;;  %9821 = vpow2.f32 %v3266_v59  ;;  %v3525_v4 = vsub.f32 %v18705_v57, %v14728_v16  ;;  %v18729_v59 = vld [vmem:[#allocation168_spill] sm:$0xff] }
 0x793   : > { %v15243_v52 = vpop.permute.xlu1 %3822  ;;  %5803 = vst.msk [vmem:[%s13327_s18 + $0xf8] sm:$0xff] %vm5771_vm4, %v5738_v39  ;;  %8327 = vmatmul.mubr.msk.f32.gmra.mrb[126].mxu1 %vm5771_vm4, %v5738_v39  ;;  %8391 = vmatmul.mubr.msk.f32.gmra.mrb[126].mxu0 %vm5771_vm4, %v5738_v39  ;;  %v4873_v18 = vpop.permute.xlu0 %4872  ;;  %v4282_v44 = vadd.f32 %v4141_v32, %v3962_v22  ;;  %v2402_v39 = vmul.f32 1.442695, %v2293_v10  ;;  %9823 = vpow2.f32 %v2884_v20  ;;  %v18730_v16 = vld [vmem:[#allocation104_spill] sm:$0xff] }
 0x794   : > { %6292 = vmatprep.mubr.f32.mxu1 %v18227_v25  ;;  %6741 = vmatprep.mubr.f32.mxu0 %v18227_v25  ;;  %v15274_v47 = vpop.eup %9811  ;;  %v5032_v41 = vmul.f32 %v18728_v7, %v4873_v18  ;;  %9825 = vrcp.f32 %v4595_v26  ;;  %v3650_v10 = vmul.f32 1.442695, %v3525_v4  ;;  %v3142_v18 = vsub.f32 %v18720_v45, %v14792_v46  ;;  %v7202_v7 = vld [vmem:[#allocation5 + $0x60] sm:$0xff] }
 0x795   : > { %4160 = vrot.lane.b32.xlu1 %v15249_v50, %s18141_s7  ;;  %5402 = vrot.lane.b32.xlu0 %v15207_v27, %s18129_s10  ;;  %v15262_v62 = vpop.f32.mrb[96].mxu1  ;;  %v15264_v36 = vpop.f32.mrb[96].mxu0 }
 0x796   : > { %18724 = vst [vmem:[#allocation184_spill] sm:$0xff] %v15262_v62  ;;  %18725 = vst [vmem:[#allocation197_spill] sm:$0xff] %v15264_v36  ;;  %v15270_v38 = vpop.f32.mrb[97].mxu1  ;;  %v15272_v3 = vpop.f32.mrb[97].mxu0  ;;  %v2300_v36 = vsub.f32 %v18550_v60, %v18729_v59  ;;  %v4712_v60 = vmul.f32 %v14638_v13, %v14544_v40  ;;  %v7203_v13 = vld [vmem:[#allocation5 + $0x68] sm:$0xff] }
 0x797   : > { %18726 = vst [vmem:[#allocation149_spill] sm:$0xff] %v15270_v38  ;;  %18727 = vst [vmem:[#allocation50_spill] sm:$0xff] %v15272_v3  ;;  %v5129_v56 = vpop.permute.xlu1 %5128  ;;  %v4461_v28 = vpop.permute.xlu0 %4460  ;;  %v18733_v3 = vld [vmem:[#allocation85_spill] sm:$0xff] }
 0x798   : > { %v15276_v17 = vpop.eup %9813  ;;  %v4602_v5 = vadd.f32 %v4461_v28, %v4282_v44  ;;  %v5288_v32 = vmul.f32 %v18730_v16, %v5129_v56  ;;  %v7232_v56 = vld [vmem:[#allocation5 + $0x150] sm:$0xff]  ;;  %v7233_v28 = vld [vmem:[#allocation5 + $0x158] sm:$0xff]  ;;  %v5609_v4 = vsel %vm5576_vm1, %v4712_v60, %v5032_v41  ;;  %v2416_v40 = vmul.f32 1.442695, %v2300_v36 }
 0x799   : > { %3842 = vrot.lane.b32.xlu1 %v15266_v8, %s10108_s20  ;;  %4892 = vrot.lane.b32.xlu0 %v15274_v47, %s10110_s19  ;;  %v15288_v22 = vmul.f32 %v15276_v17, %v15175_v14  ;;  %v15294_v20 = vpop.eup %9815  ;;  %v18731_v16 = vld [vmem:[#allocation186_spill] sm:$0xff]  ;;  %v18732_v14 = vld [vmem:[#allocation115_spill] sm:$0xff]  ;;  %v15302_v38 = vpack.c.bf16 %v7233_v28, %v7232_v56  ;;  %v3268_v41 = vmul.f32 1.442695, %v3142_v18  ;;  %v8898_v60 = vpack.c.bf16 %v7203_v13, %v7202_v7  ;;  %v18735_v36 = vld [vmem:[#allocation189_spill] sm:$0xff] }
 0x79a   : > { %9827 = vrcp.f32 %v4602_v5  ;;  %v15296_v59 = vpop.eup %9817  ;;  %v2759_v62 = vsub.f32 %v18732_v14, %v18731_v16  ;;  %v3956_v5 = vadd.f32 %v15294_v20, %v14756_v43  ;;  %v5674_v16 = vsel %vm5641_vm2, %v5609_v4, %v5288_v32 }
 0x79b   : > { %v4143_v26 = vpop.permute.xlu1 %4142  ;;  %v5385_v44 = vpop.permute.xlu0 %5384  ;;  %18734 = vst [vmem:[#allocation237_spill] sm:$0xff] %v15302_v38  ;;  %9829 = vpow2.f32 %v2402_v39  ;;  %8944 = vmatpush1.bf16.msra.mxu0 %v15302_v38  ;;  %8899 = vmatpush1.bf16.msra.mxu1 %v8898_v60 }
 0x79c   : > { %v5544_v46 = vmul.f32 %v18733_v3, %v5385_v44  ;;  %9831 = vpow2.f32 %v3650_v10  ;;  %v15313_v39 = vpop.eup %9819  ;;  %v18736_v44 = vld [vmem:[#allocation58_spill] sm:$0xff]  ;;  %v4276_v56 = vadd.f32 %v14825_v6, %v3956_v5  ;;  %v2886_v18 = vmul.f32 1.442695, %v2759_v62  ;;  %8945 = vmatprep.subr.bf16.mxu0 %v18597_v58  ;;  %v18742_v5 = vld [vmem:[#allocation57_spill] sm:$0xff]  ;;  %8900 = vmatprep.subr.bf16.mxu1 %v18597_v58 }
 0x79d   : > { %5148 = vrot.lane.b32.xlu1 %v15274_v47, %s10112_s30  ;;  %4480 = vrot.lane.b32.xlu0 %v15296_v59, %s10109_s26  ;;  %v2294_v43 = vsub.f32 %v18736_v44, %v18735_v36  ;;  %v15324_v10 = vpop.eup %9821  ;;  %v3963_v7 = vadd.f32 %v15313_v39, %v15243_v52  ;;  %9833 = vpow2.f32 %v2416_v40  ;;  %v3526_v62 = vsub.f32 %v18720_v45, %v14811_v42  ;;  %v18741_v40 = vld [vmem:[#allocation152_spill] sm:$0xff]  ;;  %v18743_v42 = vld [vmem:[#allocation14_spill] sm:$0xff] }
 0x79e   : > { %v5739_v3 = vsel %vm5706_vm3, %v5674_v16, %v5544_v46  ;;  %18737 = vst [vmem:[#allocation232_spill] sm:$0xff] %v15324_v10  ;;  %v4596_v6 = vadd.f32 %v14852_v0, %v4276_v56  ;;  %v15335_v4 = vpop.eup %9823  ;;  %9835 = vpow2.f32 %v3268_v41  ;;  %v2295_v16 = vsub.f32 %v18742_v5, %v18741_v40  ;;  %v18748_v40 = vld [vmem:[#allocation100_spill] sm:$0xff]  ;;  %v18749_v5 = vld [vmem:[#allocation143_spill] sm:$0xff] }
 0x79f   : > { %v15318_v28 = vpop.permute.xlu1 %3824  ;;  %5804 = vst.msk [vmem:[%s13327_s18 + $0x100] sm:$0xff] %vm5771_vm4, %v5739_v3  ;;  %8328 = vmatmul.mubr.msk.f32.gmra.mrb[128].mxu1 %vm5771_vm4, %v5739_v3  ;;  %8392 = vmatmul.mubr.msk.f32.gmra.mrb[128].mxu0 %vm5771_vm4, %v5739_v3  ;;  %v4875_v32 = vpop.permute.xlu0 %4874  ;;  %18738 = vst [vmem:[#allocation59_spill] sm:$0xff] %v15335_v4  ;;  %v4283_v52 = vadd.f32 %v4143_v26, %v3963_v7  ;;  %v2404_v3 = vmul.f32 1.442695, %v2294_v43  ;;  %9837 = vpow2.f32 %v2886_v18  ;;  %v3652_v18 = vmul.f32 1.442695, %v3526_v62 }
 0x7a0   : > { %6298 = vmatprep.mubr.f32.mxu1 %v18227_v25  ;;  %6747 = vmatprep.mubr.f32.mxu0 %v18227_v25  ;;  %v15344_v0 = vpop.eup %9825  ;;  %v5033_v26 = vmul.f32 %v18743_v42, %v4875_v32  ;;  %9839 = vrcp.f32 %v4596_v6 }
 0x7a1   : > { %4162 = vrot.lane.b32.xlu1 %v15324_v10, %s18141_s7  ;;  %5404 = vrot.lane.b32.xlu0 %v15274_v47, %s18129_s10 }
 0x7a2   : > { %v15339_v46 = vpop.f32.mrb[98].mxu1  ;;  %v15341_v13 = vpop.f32.mrb[98].mxu0 }
 0x7a3   : > { %18739 = vst [vmem:[#allocation262_spill] sm:$0xff] %v15339_v46  ;;  %18740 = vst [vmem:[#allocation120_spill] sm:$0xff] %v15341_v13  ;;  %v5131_v36 = vpop.permute.xlu1 %5130  ;;  %v4463_v44 = vpop.permute.xlu0 %4462  ;;  %v18746_v13 = vld [vmem:[#allocation75_spill] sm:$0xff] }
 0x7a4   : > { %v15349_v41 = vpop.eup %9827  ;;  %v4603_v56 = vadd.f32 %v4463_v44, %v4283_v52  ;;  %v15352_v7 = vpop.f32.mrb[99].mxu1  ;;  %v18747_v46 = vld [vmem:[#allocation71_spill] sm:$0xff]  ;;  %v5289_v43 = vmul.f32 %v18748_v40, %v5131_v36  ;;  %v3143_v52 = vsub.f32 %v18732_v14, %v14880_v19  ;;  %v18750_v44 = vld [vmem:[#allocation161_spill] sm:$0xff] }
 0x7a5   : > { %18744 = vst [vmem:[#allocation105_spill] sm:$0xff] %v15352_v7  ;;  %v15354_v60 = vpop.f32.mrb[99].mxu0  ;;  %v2301_v38 = vsub.f32 %v18747_v46, %v18746_v13  ;;  %3844 = vrot.lane.b32.xlu1 %v15335_v4, %s10108_s20  ;;  %4894 = vrot.lane.b32.xlu0 %v15344_v0, %s10110_s19  ;;  %v15365_v32 = vmul.f32 %v15349_v41, %v15240_v54  ;;  %v15371_v6 = vpop.eup %9829  ;;  %v2406_v13 = vmul.f32 1.442695, %v2295_v16 }
 0x7a6   : > { %18745 = vst [vmem:[#allocation111_spill] sm:$0xff] %v15354_v60  ;;  %v4713_v46 = vmul.f32 %v18750_v44, %v18749_v5  ;;  %9841 = vrcp.f32 %v4603_v56  ;;  %v15373_v40 = vpop.eup %9831  ;;  %v3527_v54 = vsub.f32 %v18732_v14, %v14898_v11  ;;  %v18752_v60 = vld [vmem:[#allocation94_spill] sm:$0xff]  ;;  %v3957_v56 = vadd.f32 %v15371_v6, %v18753_v31 }
 0x7a7   : > { %9843 = vpow2.f32 %v2404_v3  ;;  %v4145_v36 = vpop.permute.xlu1 %4144  ;;  %v5387_v42 = vpop.permute.xlu0 %5386  ;;  %18751 = vst [vmem:[#allocation133_spill] sm:$0xff] %v15373_v40  ;;  %v2418_v7 = vmul.f32 1.442695, %v2301_v38  ;;  %v3270_v3 = vmul.f32 1.442695, %v3143_v52  ;;  %v18755_v38 = vld [vmem:[#allocation63_spill] sm:$0xff] }
 0x7a8   : > { %v5610_v62 = vsel %vm5576_vm1, %v4713_v46, %v5033_v26  ;;  %v5545_v19 = vmul.f32 %v18752_v60, %v5387_v42  ;;  %9845 = vpow2.f32 %v3652_v18  ;;  %v15387_v5 = vpop.eup %9833  ;;  %v18754_v26 = vld [vmem:[#allocation194_spill] sm:$0xff]  ;;  %v4277_v31 = vadd.f32 %v14904_v35, %v3957_v56  ;;  %v7234_v18 = vld [vmem:[#allocation5 + $0x160] sm:$0xff]  ;;  %v7235_v52 = vld [vmem:[#allocation5 + $0x168] sm:$0xff] }
 0x7a9   : > { %5150 = vrot.lane.b32.xlu1 %v15344_v0, %s10112_s30  ;;  %4482 = vrot.lane.b32.xlu0 %v15373_v40, %s10109_s26  ;;  %v5675_v16 = vsel %vm5641_vm2, %v5610_v62, %v5289_v43  ;;  %9847 = vpow2.f32 %v2406_v13  ;;  %v2296_v60 = vsub.f32 %v18755_v38, %v18754_v26  ;;  %v7204_v46 = vld [vmem:[#allocation5 + $0x70] sm:$0xff]  ;;  %v15398_v42 = vpop.eup %9835  ;;  %v3654_v13 = vmul.f32 1.442695, %v3527_v54  ;;  %v7209_v40 = vld [vmem:[#allocation5 + $0x98] sm:$0xff] }
 0x7aa   : > { %v5740_v11 = vsel %vm5706_vm3, %v5675_v16, %v5545_v19  ;;  %18756 = vst [vmem:[#allocation49_spill] sm:$0xff] %v15398_v42  ;;  %v3964_v62 = vadd.f32 %v15387_v5, %v15318_v28  ;;  %v15404_v35 = vpack.c.bf16 %v7235_v52, %v7234_v18  ;;  %v7205_v19 = vld [vmem:[#allocation5 + $0x78] sm:$0xff]  ;;  %9849 = vpow2.f32 %v2418_v7  ;;  %v15411_v16 = vpop.eup %9837 }
 0x7ab   : > { %v15392_v44 = vpop.permute.xlu1 %3826  ;;  %5805 = vst.msk [vmem:[%s13327_s18 + $0x108] sm:$0xff] %vm5771_vm4, %v5740_v11  ;;  %8329 = vmatmul.mubr.msk.f32.gmra.mrb[130].mxu1 %vm5771_vm4, %v5740_v11  ;;  %8393 = vmatmul.mubr.msk.f32.gmra.mrb[130].mxu0 %vm5771_vm4, %v5740_v11  ;;  %v4877_v43 = vpop.permute.xlu0 %4876  ;;  %v4597_v56 = vadd.f32 %v14938_v9, %v4277_v31  ;;  %v8901_v54 = vpack.c.bf16 %v7205_v19, %v7204_v46  ;;  %18758 = vst [vmem:[#allocation247_spill] sm:$0xff] %v15411_v16  ;;  %9851 = vpow2.f32 %v3270_v3  ;;  %v18759_v3 = vld [vmem:[#allocation80_spill] sm:$0xff]  ;;  %v18761_v46 = vld [vmem:[#allocation117_spill] sm:$0xff] }
 0x7ac   : > { %6304 = vmatprep.mubr.f32.mxu1 %v18227_v25  ;;  %6753 = vmatprep.mubr.f32.mxu0 %v18227_v25  ;;  %18757 = vst [vmem:[#allocation72_spill] sm:$0xff] %v15404_v35  ;;  %v4284_v28 = vadd.f32 %v4145_v36, %v3964_v62  ;;  %v15414_v11 = vpop.eup %9839  ;;  %v2408_v26 = vmul.f32 1.442695, %v2296_v60  ;;  %9853 = vpow2.f32 %v3654_v13  ;;  %v18760_v36 = vld [vmem:[#allocation82_spill] sm:$0xff]  ;;  %v5034_v62 = vmul.f32 %v18761_v46, %v4877_v43  ;;  %v18762_v19 = vld [vmem:[#allocation28_spill] sm:$0xff]  ;;  %v18765_v43 = vld [vmem:[#allocation19_spill] sm:$0xff] }
 0x7ad   : > { %4164 = vrot.lane.b32.xlu1 %v15398_v42, %s18141_s7  ;;  %5406 = vrot.lane.b32.xlu0 %v15344_v0, %s18129_s10  ;;  %v2302_v52 = vsub.f32 %v18760_v36, %v18759_v3  ;;  %9855 = vrcp.f32 %v4597_v56 }
 0x7ae   : > { %8947 = vmatpush1.bf16.msra.mxu0 %v15404_v35  ;;  %8902 = vmatpush1.bf16.msra.mxu1 %v8901_v54 }
 0x7af   : > { %v5133_v38 = vpop.permute.xlu1 %5132  ;;  %v4465_v7 = vpop.permute.xlu0 %4464  ;;  %8948 = vmatprep.subr.bf16.mxu0 %v18597_v58  ;;  %8903 = vmatprep.subr.bf16.mxu1 %v18597_v58 }
 0x7b0   : > { %v15417_v9 = vpop.eup %9841  ;;  %v4604_v31 = vadd.f32 %v4465_v7, %v4284_v28  ;;  %v5290_v54 = vmul.f32 %v18762_v19, %v5133_v38  ;;  %v18766_v7 = vld [vmem:[#allocation205_spill] sm:$0xff] }
 0x7b1   : > { %v15420_v18 = vpop.eup %9843  ;;  %3846 = vrot.lane.b32.xlu1 %v15411_v16, %s10108_s20  ;;  %4896 = vrot.lane.b32.xlu0 %v15414_v11, %s10110_s19  ;;  %v15431_v60 = vmul.f32 %v15417_v9, %v15313_v39  ;;  %v4714_v3 = vmul.f32 %v18766_v7, %v18765_v43  ;;  %s19098_s20 = sshll.u32 %s10297_s12, 9 }
 0x7b2   : > { %v3958_v13 = vadd.f32 %v15420_v18, %v14920_v1  ;;  %9857 = vrcp.f32 %v4604_v31  ;;  %v15436_v28 = vpop.f32.mrb[100].mxu1  ;;  %v15438_v56 = vpop.f32.mrb[100].mxu0  ;;  %v2420_v31 = vmul.f32 1.442695, %v2302_v52 }
 0x7b3   : > { %18763 = vst [vmem:[#allocation243_spill] sm:$0xff] %v15436_v28  ;;  %18764 = vst [vmem:[#allocation209_spill] sm:$0xff] %v15438_v56  ;;  %9859 = vpow2.f32 %v2408_v26  ;;  %v4147_v36 = vpop.permute.xlu1 %4146  ;;  %v15442_v46 = vpop.f32.mrb[101].mxu1  ;;  %v5611_v19 = vsel %vm5576_vm1, %v4714_v3, %v5034_v62  ;;  %v18770_v26 = vld [vmem:[#allocation192_spill] sm:$0xff] }
 0x7b4   : > { %18767 = vst [vmem:[#allocation153_spill] sm:$0xff] %v15442_v46  ;;  %v15444_v35 = vpop.eup %9845  ;;  %v4278_v39 = vadd.f32 %v14962_v51, %v3958_v13  ;;  %v15447_v16 = vpop.f32.mrb[101].mxu0  ;;  %v18771_v13 = vld [vmem:[#allocation140_spill] sm:$0xff]  ;;  %v5676_v7 = vsel %vm5641_vm2, %v5611_v19, %v5290_v54  ;;  %9861 = vpow2.f32 %v2420_v31 }
 0x7b5   : > { %18768 = vst [vmem:[#allocation52_spill] sm:$0xff] %v15444_v35  ;;  %18769 = vst [vmem:[#allocation167_spill] sm:$0xff] %v15447_v16  ;;  %v5389_v1 = vpop.permute.xlu0 %5388  ;;  %v15449_v38 = vpop.eup %9847  ;;  %5152 = vrot.lane.b32.xlu1 %v15414_v11, %s10112_s30  ;;  %4484 = vrot.lane.b32.xlu0 %v15444_v35, %s10109_s26  ;;  %v18776_v16 = vld [vmem:[#allocation79_spill] sm:$0xff] }
 0x7b6   : > { %v5546_v56 = vmul.f32 %v18770_v26, %v5389_v1  ;;  %v3959_v51 = vadd.f32 %v15449_v38, %v14981_v49  ;;  %v4598_v43 = vadd.f32 %v18771_v13, %v4278_v39  ;;  %v15461_v28 = vpop.eup %9849  ;;  %v18773_v1 = vld [vmem:[#allocation23_spill] sm:$0xff]  ;;  %v7237_v13 = vld [vmem:[#allocation5 + $0x178] sm:$0xff] }
 0x7b7   : > { %v15463_v52 = vpop.permute.xlu1 %3828  ;;  %v15466_v3 = vpop.eup %9851  ;;  %v3965_v54 = vadd.f32 %v15461_v28, %v15392_v44  ;;  %v7236_v44 = vld [vmem:[#allocation5 + $0x170] sm:$0xff] }
 0x7b8   : > { %v5741_v62 = vsel %vm5706_vm3, %v5676_v7, %v5546_v56  ;;  %18772 = vst [vmem:[#allocation264_spill] sm:$0xff] %v15466_v3  ;;  %v4279_v26 = vadd.f32 %v18773_v1, %v3959_v51  ;;  %v15479_v56 = vpop.eup %9853  ;;  %9863 = vrcp.f32 %v4598_v43  ;;  %v7206_v7 = vld [vmem:[#allocation5 + $0x80] sm:$0xff]  ;;  %v18775_v1 = vld [vmem:[#allocation170_spill] sm:$0xff] }
 0x7b9   : > { %5806 = vst.msk [vmem:[%s13327_s18 + $0x110] sm:$0xff] %vm5771_vm4, %v5741_v62  ;;  %8330 = vmatmul.mubr.msk.f32.gmra.mrb[132].mxu1 %vm5771_vm4, %v5741_v62  ;;  %8394 = vmatmul.mubr.msk.f32.gmra.mrb[132].mxu0 %vm5771_vm4, %v5741_v62  ;;  %v4879_v49 = vpop.permute.xlu0 %4878  ;;  %18774 = vst [vmem:[#allocation130_spill] sm:$0xff] %v15479_v56  ;;  %v15484_v19 = vpop.eup %9855  ;;  %v4285_v31 = vadd.f32 %v4147_v36, %v3965_v54  ;;  %v2303_v46 = vsub.f32 %v18776_v16, %v18775_v1 }
 0x7ba   : > { %4166 = vrot.lane.b32.xlu1 %v15466_v3, %s18141_s7  ;;  %5408 = vrot.lane.b32.xlu0 %v15414_v11, %s18129_s10  ;;  %v4599_v39 = vadd.f32 %v15069_v29, %v4279_v26  ;;  %v18777_v3 = vld [vmem:[#allocation76_spill] sm:$0xff]  ;;  %v15491_v29 = vpack.c.bf16 %v7237_v13, %v7236_v44  ;;  %s8089_s7 = scalar_lea.sflag [#allocation4], %s10297_s12 }
 0x7bb   : > { %6310 = vmatprep.mubr.f32.mxu1 %v18227_v25  ;;  %6759 = vmatprep.mubr.f32.mxu0 %v18227_v25  ;;  %v5135_v51 = vpop.permute.xlu1 %5134  ;;  %v5035_v43 = vmul.f32 %v18777_v3, %v4879_v49  ;;  %v7207_v26 = vld [vmem:[#allocation5 + $0x88] sm:$0xff]  ;;  %v18779_v3 = vld [vmem:[#allocation163_spill] sm:$0xff] }
 0x7bc   : > { %v15486_v62 = vpop.eup %9857  ;;  %18778 = vst [vmem:[#allocation207_spill] sm:$0xff] %v15491_v29  ;;  %v8904_v36 = vpack.c.bf16 %v7207_v26, %v7206_v7  ;;  %9865 = vrcp.f32 %v4599_v39  ;;  %v5291_v49 = vmul.f32 %v18779_v3, %v5135_v51  ;;  %8950 = vmatpush1.bf16.msra.mxu0 %v15491_v29  ;;  %v2422_v39 = vmul.f32 1.442695, %v2303_v46  ;;  %v18784_v26 = vld [vmem:[#allocation88_spill] sm:$0xff] }
 0x7bd   : > { %v4467_v35 = vpop.permute.xlu0 %4466  ;;  %v15493_v42 = vpop.eup %9859  ;;  %v15501_v54 = vmul.f32 %v15486_v62, %v15387_v5  ;;  %8951 = vmatprep.subr.bf16.mxu0 %v18597_v58 }
 0x7be   : > { %v4605_v4 = vadd.f32 %v4467_v35, %v4285_v31  ;;  %4486 = vrot.lane.b32.xlu1 %v15479_v56, %s10109_s26  ;;  %4898 = vrot.lane.b32.xlu0 %v15484_v19, %s10110_s19  ;;  %v3960_v16 = vadd.f32 %v15493_v42, %v15046_v48  ;;  %v18780_v35 = vld [vmem:[#allocation201_spill] sm:$0xff]  ;;  %s16799_s26 = scalar_lea.vmem [#allocation7], %s19098_s20 }
 0x7bf   : > { %v18781_v31 = vld [vmem:[#allocation41_spill] sm:$0xff]  ;;  %v4149_v13 = vpop.permute.xlu1 %4148  ;;  %v15509_v1 = vpop.f32.mrb[102].mxu1  ;;  %8905 = vmatpush1.bf16.msra.mxu1 %v8904_v36 }
 0x7c0   : > { %v4715_v44 = vmul.f32 %v18781_v31, %v18780_v35  ;;  %9867 = vrcp.f32 %v4605_v4  ;;  %18782 = vst [vmem:[#allocation33_spill] sm:$0xff] %v15509_v1  ;;  %v4280_v5 = vadd.f32 %v15086_v23, %v3960_v16  ;;  %v15513_v7 = vpop.f32.mrb[102].mxu0  ;;  %8906 = vmatprep.subr.bf16.mxu1 %v18597_v58  ;;  %v15518_v4 = vpop.f32.mrb[103].mxu1  ;;  %v18791_v1 = vld [vmem:[#allocation142_spill] sm:$0xff] }
 0x7c1   : > { %18783 = vst [vmem:[#allocation266_spill] sm:$0xff] %v15513_v7  ;;  %v5391_v48 = vpop.permute.xlu0 %5390  ;;  %18785 = vst [vmem:[#allocation234_spill] sm:$0xff] %v15518_v4  ;;  %v15520_v35 = vpop.f32.mrb[103].mxu0  ;;  %9869 = vpow2.f32 %v2422_v39  ;;  %v18790_v7 = vld [vmem:[#allocation118_spill] sm:$0xff] }
 0x7c2   : > { %v5612_v51 = vsel %vm5576_vm1, %v4715_v44, %v5035_v43  ;;  %v5547_v3 = vmul.f32 %v18784_v26, %v5391_v48  ;;  %18786 = vst [vmem:[#allocation98_spill] sm:$0xff] %v15520_v35  ;;  %5410 = vrot.lane.b32.xlu1 %v15484_v19, %s18129_s10  ;;  %5154 = vrot.lane.b32.xlu0 %v15484_v19, %s10112_s30  ;;  %v15528_v16 = vpop.eup %9861  ;;  %v18787_v26 = vld [vmem:[#allocation89_spill] sm:$0xff]  ;;  %v18792_v35 = vld [vmem:[#allocation151_spill] sm:$0xff] }
 0x7c3   : > { %v4600_v23 = vadd.f32 %v15137_v15, %v4280_v5  ;;  %v5677_v36 = vsel %vm5641_vm2, %v5612_v51, %v5291_v49  ;;  %v3831_v46 = vpop.permute.xlu1 %3830  ;;  %v15531_v31 = vpop.eup %9863  ;;  %v3966_v15 = vadd.f32 %v15528_v16, %v15463_v52  ;;  %v4716_v4 = vmul.f32 %v18792_v35, %v18791_v1 }
 0x7c4   : > { %v5742_v43 = vsel %vm5706_vm3, %v5677_v36, %v5547_v3  ;;  %v18789_v36 = vld [vmem:[#allocation90_spill] sm:$0xff] }
 0x7c5   : > { %5807 = vst.msk [vmem:[%s13327_s18 + $0x118] sm:$0xff] %vm5771_vm4, %v5742_v43  ;;  %8331 = vmatmul.mubr.msk.f32.gmra.mrb[134].mxu1 %vm5771_vm4, %v5742_v43  ;;  %8395 = vmatmul.mubr.msk.f32.gmra.mrb[134].mxu0 %vm5771_vm4, %v5742_v43  ;;  %v4881_v44 = vpop.permute.xlu0 %4880  ;;  %9871 = vrcp.f32 %v4600_v23  ;;  %v4286_v49 = vadd.f32 %v4149_v13, %v3966_v15  ;;  %v18788_v23 = vld [vmem:[#allocation83_spill] sm:$0xff] }
 0x7c6   : > { %5156 = vrot.lane.b32.xlu1 %v15531_v31, %s10112_s30  ;;  %4900 = vrot.lane.b32.xlu0 %v15531_v31, %s10110_s19  ;;  %v15545_v48 = vpop.eup %9865  ;;  %v5036_v52 = vmul.f32 %v18787_v26, %v4881_v44  ;;  %v2304_v43 = vsub.f32 %v18789_v36, %v18788_v23  ;;  %v7208_v26 = vld [vmem:[#allocation5 + $0x90] sm:$0xff]  ;;  %v18794_v36 = vld [vmem:[#allocation204_spill] sm:$0xff] }
 0x7c7   : > { %6316 = vmatprep.mubr.f32.mxu1 %v18227_v25  ;;  %6765 = vmatprep.mubr.f32.mxu0 %v18227_v25  ;;  %v5137_v5 = vpop.permute.xlu1 %5136 }
 0x7c8   : > { %v5292_v13 = vmul.f32 %v18790_v7, %v5137_v5  ;;  %v5613_v23 = vsel %vm5576_vm1, %v4716_v4, %v5036_v52  ;;  %v2424_v1 = vmul.f32 1.442695, %v2304_v43 }
 0x7c9   : > { %v4469_v51 = vpop.permute.xlu0 %4468 }
 0x7ca   : > { %v15547_v39 = vpop.eup %9867  ;;  %v4606_v3 = vadd.f32 %v4469_v51, %v4286_v49  ;;  %4902 = vrot.lane.b32.xlu1 %v15545_v48, %s10110_s19  ;;  %5412 = vrot.lane.b32.xlu0 %v15531_v31, %s18129_s10  ;;  %v7238_v49 = vld [vmem:[#allocation5 + $0x180] sm:$0xff]  ;;  %v7239_v51 = vld [vmem:[#allocation5 + $0x188] sm:$0xff] }
 0x7cb   : > { %v15559_v15 = vmul.f32 %v15547_v39, %v15461_v28  ;;  %v4151_v44 = vpop.permute.xlu1 %4150  ;;  %v15563_v56 = vpack.c.bf16 %v7239_v51, %v7238_v49  ;;  %v8907_v28 = vpack.c.bf16 %v7209_v40, %v7208_v26  ;;  %v15577_v4 = vpop.eup %9869 }
 0x7cc   : > { %9873 = vrcp.f32 %v4606_v3  ;;  %v5678_v3 = vsel %vm5641_vm2, %v5613_v23, %v5292_v13  ;;  %v3967_v51 = vadd.f32 %v15577_v4, %v3831_v46 }
 0x7cd   : > { %v5393_v29 = vpop.permute.xlu0 %5392  ;;  %18793 = vst [vmem:[#allocation81_spill] sm:$0xff] %v15563_v56  ;;  %8953 = vmatpush1.bf16.msra.mxu0 %v15563_v56  ;;  %8908 = vmatpush1.bf16.msra.mxu1 %v8907_v28  ;;  %9875 = vpow2.f32 %v2424_v1  ;;  %v18799_v28 = vld [vmem:[#allocation200_spill] sm:$0xff]  ;;  %v18800_v1 = vld [vmem:[#allocation91_spill] sm:$0xff] }
 0x7ce   : > { %v5548_v7 = vmul.f32 %v18794_v36, %v5393_v29  ;;  %5414 = vrot.lane.b32.xlu1 %v15545_v48, %s18129_s10  ;;  %5158 = vrot.lane.b32.xlu0 %v15545_v48, %s10112_s30  ;;  %v15571_v35 = vpop.f32.mrb[104].mxu1  ;;  %v15573_v5 = vpop.f32.mrb[104].mxu0  ;;  %v4287_v26 = vadd.f32 %v4151_v44, %v3967_v51 }
 0x7cf   : > { %18795 = vst [vmem:[#allocation137_spill] sm:$0xff] %v15571_v35  ;;  %18796 = vst [vmem:[#allocation51_spill] sm:$0xff] %v15573_v5  ;;  %v3833_v29 = vpop.permute.xlu1 %3832  ;;  %v15579_v52 = vpop.f32.mrb[105].mxu1  ;;  %8954 = vmatprep.subr.bf16.mxu0 %v18597_v58  ;;  %8909 = vmatprep.subr.bf16.mxu1 %v18597_v58  ;;  %v18802_v35 = vld [vmem:[#allocation259_spill] sm:$0xff] }
 0x7d0   : > { %18797 = vst [vmem:[#allocation268_spill] sm:$0xff] %v15579_v52  ;;  %v5743_v49 = vsel %vm5706_vm3, %v5678_v3, %v5548_v7  ;;  %v15583_v40 = vpop.eup %9871  ;;  %v15588_v43 = vpop.f32.mrb[105].mxu0  ;;  %v18804_v52 = vld [vmem:[#allocation254_spill] sm:$0xff] }
 0x7d1   : > { %5808 = vst.msk [vmem:[%s13327_s18 + $0x120] sm:$0xff] %vm5771_vm4, %v5743_v49  ;;  %8332 = vmatmul.mubr.msk.f32.gmra.mrb[136].mxu1 %vm5771_vm4, %v5743_v49  ;;  %18798 = vst [vmem:[#allocation134_spill] sm:$0xff] %v15588_v43  ;;  %8396 = vmatmul.mubr.msk.f32.gmra.mrb[136].mxu0 %vm5771_vm4, %v5743_v49  ;;  %v4883_v13 = vpop.permute.xlu0 %4882  ;;  %v18801_v49 = vld [vmem:[#allocation87_spill] sm:$0xff]  ;;  %v18803_v43 = vld [vmem:[#allocation21_spill] sm:$0xff] }
 0x7d2   : > { %5160 = vrot.lane.b32.xlu1 %v15583_v40, %s10112_s30  ;;  %4904 = vrot.lane.b32.xlu0 %v15583_v40, %s10110_s19  ;;  %v5037_v46 = vmul.f32 %v18799_v28, %v4883_v13  ;;  %v2305_v5 = vsub.f32 %v18801_v49, %v18800_v1  ;;  %v4717_v56 = vmul.f32 %v18804_v52, %v18803_v43  ;;  %v18805_v28 = vld [vmem:[#allocation102_spill] sm:$0xff]  ;;  %v7240_v43 = vld [vmem:[#allocation5 + $0x190] sm:$0xff] }
 0x7d3   : > { %6322 = vmatprep.mubr.f32.mxu1 %v18227_v25  ;;  %6771 = vmatprep.mubr.f32.mxu0 %v18227_v25  ;;  %v5139_v23 = vpop.permute.xlu1 %5138 }
 0x7d4   : > { %v5293_v44 = vmul.f32 %v18802_v35, %v5139_v23  ;;  %v2426_v35 = vmul.f32 1.442695, %v2305_v5 }
 0x7d5   : > { %v4471_v36 = vpop.permute.xlu0 %4470 }
 0x7d6   : > { %v15599_v7 = vpop.eup %9873  ;;  %v4607_v3 = vadd.f32 %v4471_v36, %v4287_v26  ;;  %5416 = vrot.lane.b32.xlu0 %v15583_v40, %s18129_s10  ;;  %4906 = vrot.lane.b32.xlu1 %v15276_v17, %s10110_s19  ;;  %v5614_v36 = vsel %vm5576_vm1, %v4717_v56, %v5037_v46  ;;  %v7210_v46 = vld [vmem:[#allocation5 + $0xa0] sm:$0xff] }
 0x7d7   : > { %v15611_v51 = vmul.f32 %v15599_v7, %v15528_v16  ;;  %v4153_v13 = vpop.permute.xlu1 %4152  ;;  %v5679_v16 = vsel %vm5641_vm2, %v5614_v36, %v5293_v44  ;;  %v15625_v49 = vpop.eup %9875  ;;  %v7211_v44 = vld [vmem:[#allocation5 + $0xa8] sm:$0xff] }
 0x7d8   : > { %9877 = vrcp.f32 %v4607_v3  ;;  %v7241_v3 = vld [vmem:[#allocation5 + $0x198] sm:$0xff] }
 0x7d9   : > { %v5395_v26 = vpop.permute.xlu0 %5394  ;;  %v15633_v5 = vpack.c.bf16 %v7241_v3, %v7240_v43  ;;  %9879 = vpow2.f32 %v2426_v35  ;;  %v18810_v3 = vld [vmem:[#allocation12_spill] sm:$0xff] }
 0x7da   : > { %v5549_v10 = vmul.f32 %v18805_v28, %v5395_v26  ;;  %5162 = vrot.lane.b32.xlu0 %v15276_v17, %s10112_s30  ;;  %5418 = vrot.lane.b32.xlu1 %v15276_v17, %s18129_s10  ;;  %v3968_v26 = vadd.f32 %v15625_v49, %v3833_v29  ;;  %v8910_v28 = vpack.c.bf16 %v7211_v44, %v7210_v46  ;;  %v18812_v44 = vld [vmem:[#allocation210_spill] sm:$0xff] }
 0x7db   : > { %v3835_v23 = vpop.permute.xlu1 %3834  ;;  %v15622_v1 = vpop.f32.mrb[106].mxu1  ;;  %8956 = vmatpush1.bf16.msra.mxu0 %v15633_v5 }
 0x7dc   : > { %18806 = vst [vmem:[#allocation269_spill] sm:$0xff] %v15622_v1  ;;  %v5744_v52 = vsel %vm5706_vm3, %v5679_v16, %v5549_v10  ;;  %v15630_v56 = vpop.f32.mrb[106].mxu0  ;;  %v15636_v10 = vpop.f32.mrb[107].mxu1  ;;  %v4288_v16 = vadd.f32 %v4153_v13, %v3968_v26  ;;  %8911 = vmatpush1.bf16.msra.mxu1 %v8910_v28  ;;  %8957 = vmatprep.subr.bf16.mxu0 %v18597_v58  ;;  %v18811_v13 = vld [vmem:[#allocation96_spill] sm:$0xff] }
 0x7dd   : > { %5809 = vst.msk [vmem:[%s13327_s18 + $0x128] sm:$0xff] %vm5771_vm4, %v5744_v52  ;;  %8333 = vmatmul.mubr.msk.f32.gmra.mrb[138].mxu1 %vm5771_vm4, %v5744_v52  ;;  %18807 = vst [vmem:[#allocation34_spill] sm:$0xff] %v15630_v56  ;;  %8397 = vmatmul.mubr.msk.f32.gmra.mrb[138].mxu0 %vm5771_vm4, %v5744_v52  ;;  %v4885_v17 = vpop.permute.xlu0 %4884  ;;  %v15638_v36 = vpop.f32.mrb[107].mxu0  ;;  %v2306_v35 = vsub.f32 %v18654_v61, %v18811_v13  ;;  %v18813_v1 = vld [vmem:[#allocation68_spill] sm:$0xff] }
 0x7de   : > { %18808 = vst [vmem:[#allocation77_spill] sm:$0xff] %v15636_v10  ;;  %18809 = vst [vmem:[#allocation249_spill] sm:$0xff] %v15638_v36  ;;  %5164 = vrot.lane.b32.xlu1 %v15349_v41, %s10112_s30  ;;  %4908 = vrot.lane.b32.xlu0 %v15349_v41, %s10110_s19  ;;  %v5038_v56 = vmul.f32 %v18810_v3, %v4885_v17  ;;  %v4718_v17 = vmul.f32 %v15005_v24, %v18813_v1  ;;  %v18814_v3 = vld [vmem:[#allocation178_spill] sm:$0xff] }
 0x7df   : > { %6328 = vmatprep.mubr.f32.mxu1 %v18227_v25  ;;  %6777 = vmatprep.mubr.f32.mxu0 %v18227_v25  ;;  %v5141_v52 = vpop.permute.xlu1 %5140  ;;  %v2428_v61 = vmul.f32 1.442695, %v2306_v35 }
 0x7e0   : > { %8912 = vmatprep.subr.bf16.mxu1 %v18597_v58  ;;  %v5294_v26 = vmul.f32 %v18812_v44, %v5141_v52 }
 0x7e1   : > { %v4473_v29 = vpop.permute.xlu0 %4472 }
 0x7e2   : > { %v15649_v43 = vpop.eup %9877  ;;  %v4608_v46 = vadd.f32 %v4473_v29, %v4288_v16  ;;  %5420 = vrot.lane.b32.xlu0 %v15349_v41, %s18129_s10  ;;  %4910 = vrot.lane.b32.xlu1 %v15417_v9, %s10110_s19  ;;  %v5615_v41 = vsel %vm5576_vm1, %v4718_v17, %v5038_v56  ;;  %v7212_v17 = vld [vmem:[#allocation5 + $0xb0] sm:$0xff] }
 0x7e3   : > { %v15661_v28 = vmul.f32 %v15649_v43, %v15577_v4  ;;  %v4155_v16 = vpop.permute.xlu1 %4154  ;;  %v5680_v4 = vsel %vm5641_vm2, %v5615_v41, %v5294_v26  ;;  %v15673_v24 = vpop.eup %9879  ;;  %v7243_v26 = vld [vmem:[#allocation5 + $0x1a8] sm:$0xff] }
 0x7e4   : > { %9881 = vrcp.f32 %v4608_v46  ;;  %v3969_v56 = vadd.f32 %v15673_v24, %v3835_v23  ;;  %v7242_v23 = vld [vmem:[#allocation5 + $0x1a0] sm:$0xff] }
 0x7e5   : > { %v5397_v29 = vpop.permute.xlu0 %5396  ;;  %9883 = vpow2.f32 %v2428_v61  ;;  %v7213_v61 = vld [vmem:[#allocation5 + $0xb8] sm:$0xff] }
 0x7e6   : > { %v5550_v36 = vmul.f32 %v18814_v3, %v5397_v29  ;;  %5166 = vrot.lane.b32.xlu0 %v15417_v9, %s10112_s30  ;;  %5422 = vrot.lane.b32.xlu1 %v15417_v9, %s18129_s10  ;;  %v4289_v46 = vadd.f32 %v4155_v16, %v3969_v56  ;;  %v15694_v3 = vpack.c.bf16 %v7243_v26, %v7242_v23  ;;  %v18820_v56 = vld [vmem:[#allocation13_spill] sm:$0xff] }
 0x7e7   : > { %v3837_v52 = vpop.permute.xlu1 %3836  ;;  %v8913_v16 = vpack.c.bf16 %v7213_v61, %v7212_v17 }
 0x7e8   : > { %v5745_v13 = vsel %vm5706_vm3, %v5680_v4, %v5550_v36  ;;  %8959 = vmatpush1.bf16.msra.mxu0 %v15694_v3 }
 0x7e9   : > { %5810 = vst.msk [vmem:[%s13327_s18 + $0x130] sm:$0xff] %vm5771_vm4, %v5745_v13  ;;  %8334 = vmatmul.mubr.msk.f32.gmra.mrb[140].mxu1 %vm5771_vm4, %v5745_v13  ;;  %8398 = vmatmul.mubr.msk.f32.gmra.mrb[140].mxu0 %vm5771_vm4, %v5745_v13  ;;  %v4887_v1 = vpop.permute.xlu0 %4886  ;;  %v18819_v13 = vld [vmem:[#allocation199_spill] sm:$0xff] }
 0x7ea   : > { %5168 = vrot.lane.b32.xlu1 %v15486_v62, %s10112_s30  ;;  %4912 = vrot.lane.b32.xlu0 %v15486_v62, %s10110_s19  ;;  %v15684_v9 = vpop.f32.mrb[108].mxu1  ;;  %v15686_v36 = vpop.f32.mrb[108].mxu0 }
 0x7eb   : > { %18815 = vst [vmem:[#allocation95_spill] sm:$0xff] %v15684_v9  ;;  %18816 = vst [vmem:[#allocation242_spill] sm:$0xff] %v15686_v36  ;;  %6334 = vmatprep.mubr.f32.mxu1 %v18227_v25  ;;  %6783 = vmatprep.mubr.f32.mxu0 %v18227_v25  ;;  %v5143_v35 = vpop.permute.xlu1 %5142  ;;  %v15690_v44 = vpop.f32.mrb[109].mxu1  ;;  %v5039_v36 = vmul.f32 %v18819_v13, %v4887_v1  ;;  %v18822_v1 = vld [vmem:[#allocation256_spill] sm:$0xff] }
 0x7ec   : > { %18817 = vst [vmem:[#allocation158_spill] sm:$0xff] %v15690_v44  ;;  %v15692_v29 = vpop.f32.mrb[109].mxu0  ;;  %v2307_v44 = vsub.f32 %v18674_v33, %v18820_v56  ;;  %8914 = vmatpush1.bf16.msra.mxu1 %v8913_v16  ;;  %8960 = vmatprep.subr.bf16.mxu0 %v18597_v58 }
 0x7ed   : > { %18818 = vst [vmem:[#allocation54_spill] sm:$0xff] %v15692_v29  ;;  %v4475_v41 = vpop.permute.xlu0 %4474  ;;  %v18821_v29 = vld [vmem:[#allocation148_spill] sm:$0xff]  ;;  %8915 = vmatprep.subr.bf16.mxu1 %v18597_v58 }
 0x7ee   : > { %v15696_v4 = vpop.eup %9881  ;;  %v4609_v9 = vadd.f32 %v4475_v41, %v4289_v46  ;;  %5424 = vrot.lane.b32.xlu0 %v15486_v62, %s18129_s10  ;;  %4914 = vrot.lane.b32.xlu1 %v15547_v39, %s10110_s19  ;;  %v5295_v10 = vmul.f32 %v18821_v29, %v5143_v35  ;;  %v4719_v46 = vmul.f32 %v15072_v63, %v18822_v1  ;;  %v18823_v35 = vld [vmem:[#allocation29_spill] sm:$0xff]  ;;  %v2430_v63 = vmul.f32 1.442695, %v2307_v44 }
 0x7ef   : > { %v15709_v23 = vmul.f32 %v15696_v4, %v15625_v49  ;;  %v4157_v62 = vpop.permute.xlu1 %4156  ;;  %v15723_v41 = vpop.eup %9883 }
 0x7f0   : > { %9885 = vrcp.f32 %v4609_v9  ;;  %v5616_v33 = vsel %vm5576_vm1, %v4719_v46, %v5039_v36  ;;  %v3970_v61 = vadd.f32 %v15723_v41, %v3837_v52  ;;  %v18825_v52 = vld [vmem:[#allocation101_spill] sm:$0xff] }
 0x7f1   : > { %v5399_v26 = vpop.permute.xlu0 %5398  ;;  %v5681_v49 = vsel %vm5641_vm2, %v5616_v33, %v5295_v10  ;;  %9887 = vpow2.f32 %v2430_v63 }
 0x7f2   : > { %v5551_v17 = vmul.f32 %v18823_v35, %v5399_v26  ;;  %5170 = vrot.lane.b32.xlu0 %v15547_v39, %s10112_s30  ;;  %5426 = vrot.lane.b32.xlu1 %v15547_v39, %s18129_s10  ;;  %v4290_v39 = vadd.f32 %v4157_v62, %v3970_v61  ;;  %v18826_v62 = vld [vmem:[#allocation171_spill] sm:$0xff]  ;;  %v7244_v61 = vld [vmem:[#allocation5 + $0x1b0] sm:$0xff] }
 0x7f3   : > { %v3839_v9 = vpop.permute.xlu1 %3838  ;;  %v2308_v35 = vsub.f32 %v18688_v30, %v18826_v62 }
 0x7f4   : > { %v5746_v29 = vsel %vm5706_vm3, %v5681_v49, %v5551_v17  ;;  %v18827_v17 = vld [vmem:[#allocation198_spill] sm:$0xff] }
 0x7f5   : > { %5811 = vst.msk [vmem:[%s13327_s18 + $0x138] sm:$0xff] %vm5771_vm4, %v5746_v29  ;;  %8335 = vmatmul.mubr.msk.f32.gmra.mrb[142].mxu1 %vm5771_vm4, %v5746_v29  ;;  %8399 = vmatmul.mubr.msk.f32.gmra.mrb[142].mxu0 %vm5771_vm4, %v5746_v29  ;;  %v4889_v36 = vpop.permute.xlu0 %4888  ;;  %v4720_v29 = vmul.f32 %v15140_v55, %v15033_v12  ;;  %v2432_v55 = vmul.f32 1.442695, %v2308_v35 }
 0x7f6   : > { %5172 = vrot.lane.b32.xlu1 %v15599_v7, %s10112_s30  ;;  %4916 = vrot.lane.b32.xlu0 %v15599_v7, %s10110_s19  ;;  %v5040_v1 = vmul.f32 %v18825_v52, %v4889_v36 }
 0x7f7   : > { %6340 = vmatprep.mubr.f32.mxu1 %v18227_v25  ;;  %6789 = vmatprep.mubr.f32.mxu0 %v18227_v25  ;;  %v5145_v10 = vpop.permute.xlu1 %5144  ;;  %v15736_v44 = vpop.f32.mrb[110].mxu1 }
 0x7f8   : > { %v15738_v13 = vpop.f32.mrb[110].mxu0  ;;  %v15743_v26 = vpop.f32.mrb[111].mxu1  ;;  %v5296_v63 = vmul.f32 %v18827_v17, %v5145_v10  ;;  %v5617_v30 = vsel %vm5576_vm1, %v4720_v29, %v5040_v1  ;;  %v18828_v10 = vld [vmem:[#allocation67_spill] sm:$0xff] }
 0x7f9   : > { %18824 = vst [vmem:[#allocation73_spill] sm:$0xff] %v15738_v13  ;;  %v4477_v16 = vpop.permute.xlu0 %4476  ;;  %v15745_v33 = vpop.f32.mrb[111].mxu0  ;;  %v7215_v13 = vld [vmem:[#allocation5 + $0xc8] sm:$0xff] }
 0x7fa   : > { %v15740_v56 = vpop.eup %9885  ;;  %v4610_v46 = vadd.f32 %v4477_v16, %v4290_v39  ;;  %5428 = vrot.lane.b32.xlu0 %v15599_v7, %s18129_s10  ;;  %4918 = vrot.lane.b32.xlu1 %v15649_v43, %s10110_s19  ;;  %v7245_v39 = vld [vmem:[#allocation5 + $0x1b8] sm:$0xff]  ;;  %v7214_v7 = vld [vmem:[#allocation5 + $0xc0] sm:$0xff] }
 0x7fb   : > { %v15756_v49 = vmul.f32 %v15740_v56, %v15673_v24  ;;  %v4159_v36 = vpop.permute.xlu1 %4158  ;;  %v15760_v52 = vpack.c.bf16 %v7245_v39, %v7244_v61  ;;  %v8916_v12 = vpack.c.bf16 %v7215_v13, %v7214_v7  ;;  %v5682_v24 = vsel %vm5641_vm2, %v5617_v30, %v5296_v63  ;;  %v15772_v1 = vpop.eup %9887  ;;  %v18829_v39 = vld [vmem:[#allocation212_spill] sm:$0xff] }
 0x7fc   : > { %9889 = vrcp.f32 %v4610_v46  ;;  %v3971_v13 = vadd.f32 %v15772_v1, %v3839_v9 }
 0x7fd   : > { %v5401_v16 = vpop.permute.xlu0 %5400  ;;  %8962 = vmatpush1.bf16.msra.mxu0 %v15760_v52  ;;  %8917 = vmatpush1.bf16.msra.mxu1 %v8916_v12  ;;  %9891 = vpow2.f32 %v2432_v55 }
 0x7fe   : > { %v5552_v62 = vmul.f32 %v18828_v10, %v5401_v16  ;;  %5174 = vrot.lane.b32.xlu0 %v15649_v43, %s10112_s30  ;;  %5430 = vrot.lane.b32.xlu1 %v15649_v43, %s18129_s10  ;;  %v4291_v35 = vadd.f32 %v4159_v36, %v3971_v13  ;;  %v18831_v10 = vld [vmem:[#allocation107_spill] sm:$0xff] }
 0x7ff   : > { %v3841_v46 = vpop.permute.xlu1 %3840  ;;  %8963 = vmatprep.subr.bf16.mxu0 %v18597_v58  ;;  %8918 = vmatprep.subr.bf16.mxu1 %v18597_v58  ;;  %v2309_v36 = vsub.f32 %v18705_v57, %v18831_v10 }
 0x800   : > { %v5747_v17 = vsel %vm5706_vm3, %v5682_v24, %v5552_v62  ;;  %v18832_v62 = vld [vmem:[#allocation131_spill] sm:$0xff] }
 0x801   : > { %5812 = vst.msk [vmem:[%s13327_s18 + $0x140] sm:$0xff] %vm5771_vm4, %v5747_v17  ;;  %8336 = vmatmul.mubr.msk.f32.gmra.mrb[144].mxu1 %vm5771_vm4, %v5747_v17  ;;  %8400 = vmatmul.mubr.msk.f32.gmra.mrb[144].mxu0 %vm5771_vm4, %v5747_v17  ;;  %v4891_v43 = vpop.permute.xlu0 %4890 }
 0x802   : > { %5176 = vrot.lane.b32.xlu1 %v15696_v4, %s10112_s30  ;;  %4920 = vrot.lane.b32.xlu0 %v15696_v4, %s10110_s19  ;;  %v5041_v7 = vmul.f32 %v18829_v39, %v4891_v43 }
 0x803   : > { %6346 = vmatprep.mubr.f32.mxu1 %v18227_v25  ;;  %6795 = vmatprep.mubr.f32.mxu0 %v18227_v25  ;;  %v5147_v63 = vpop.permute.xlu1 %5146 }
 0x804   : > { %v5297_v12 = vmul.f32 %v18832_v62, %v5147_v63  ;;  %v2434_v63 = vmul.f32 1.442695, %v2309_v36  ;;  %v7216_v36 = vld [vmem:[#allocation5 + $0xd0] sm:$0xff] }
 0x805   : > { %v4479_v29 = vpop.permute.xlu0 %4478  ;;  %v15791_v16 = vpop.f32.mrb[112].mxu1 }
 0x806   : > { %v9890_v61 = vpop.eup %9889  ;;  %v4611_v9 = vadd.f32 %v4479_v29, %v4291_v35  ;;  %5432 = vrot.lane.b32.xlu0 %v15696_v4, %s18129_s10  ;;  %4922 = vrot.lane.b32.xlu1 %v15740_v56, %s10110_s19  ;;  %v15793_v30 = vpop.f32.mrb[112].mxu0  ;;  %v4721_v4 = vmul.f32 %v15207_v27, %v15092_v2  ;;  %v18833_v29 = vld [vmem:[#allocation215_spill] sm:$0xff]  ;;  %v7247_v27 = vld [vmem:[#allocation5 + $0x1c8] sm:$0xff] }
 0x807   : > { %18830 = vst [vmem:[#allocation191_spill] sm:$0xff] %v15793_v30  ;;  %v15798_v55 = vpop.f32.mrb[113].mxu1  ;;  %v15800_v24 = vpop.f32.mrb[113].mxu0  ;;  %v15803_v17 = vmul.f32 %v9890_v61, %v15723_v41  ;;  %v7246_v2 = vld [vmem:[#allocation5 + $0x1c0] sm:$0xff] }
 0x808   : > { %9893 = vrcp.f32 %v4611_v9  ;;  %v4161_v43 = vpop.permute.xlu1 %4160  ;;  %v5618_v35 = vsel %vm5576_vm1, %v4721_v4, %v5041_v7  ;;  %v15815_v9 = vpop.eup %9891  ;;  %v15821_v62 = vpack.c.bf16 %v7247_v27, %v7246_v2  ;;  %v18836_v27 = vld [vmem:[#allocation92_spill] sm:$0xff] }
 0x809   : > { %v5403_v13 = vpop.permute.xlu0 %5402  ;;  %v5683_v41 = vsel %vm5641_vm2, %v5618_v35, %v5297_v12  ;;  %v7217_v12 = vld [vmem:[#allocation5 + $0xd8] sm:$0xff]  ;;  %9895 = vpow2.f32 %v2434_v63  ;;  %v18835_v63 = vld [vmem:[#allocation173_spill] sm:$0xff] }
 0x80a   : > { %v5553_v57 = vmul.f32 %v18833_v29, %v5403_v13  ;;  %5178 = vrot.lane.b32.xlu0 %v15740_v56, %s10112_s30  ;;  %5434 = vrot.lane.b32.xlu1 %v15740_v56, %s18129_s10  ;;  %v3972_v56 = vadd.f32 %v15815_v9, %v3841_v46  ;;  %v8919_v4 = vpack.c.bf16 %v7217_v12, %v7216_v36 }
 0x80b   : > { %8965 = vmatpush1.bf16.msra.mxu0 %v15821_v62  ;;  %v2310_v2 = vsub.f32 %v18720_v45, %v18835_v63  ;;  %v4722_v36 = vmul.f32 %v15274_v47, %v15155_v21 }
 0x80c   : > { %v3843_v39 = vpop.permute.xlu1 %3842  ;;  %v5748_v10 = vsel %vm5706_vm3, %v5683_v41, %v5553_v57  ;;  %v4292_v13 = vadd.f32 %v4161_v43, %v3972_v56  ;;  %8920 = vmatpush1.bf16.msra.mxu1 %v8919_v4  ;;  %8966 = vmatprep.subr.bf16.mxu0 %v18597_v58  ;;  %v18834_v57 = vld [vmem:[#allocation110_spill] sm:$0xff]  ;;  %v18837_v4 = vld [vmem:[#allocation32_spill] sm:$0xff] }
 0x80d   : > { %5813 = vst.msk [vmem:[%s13327_s18 + $0x148] sm:$0xff] %vm5771_vm4, %v5748_v10  ;;  %8337 = vmatmul.mubr.msk.f32.gmra.mrb[146].mxu1 %vm5771_vm4, %v5748_v10  ;;  %8401 = vmatmul.mubr.msk.f32.gmra.mrb[146].mxu0 %vm5771_vm4, %v5748_v10  ;;  %v4893_v7 = vpop.permute.xlu0 %4892 }
 0x80e   : > { %5180 = vrot.lane.b32.xlu1 %v9890_v61, %s10112_s30  ;;  %4924 = vrot.lane.b32.xlu0 %v9890_v61, %s10110_s19  ;;  %v5042_v41 = vmul.f32 %v18834_v57, %v4893_v7 }
 0x80f   : > { %6352 = vmatprep.mubr.f32.mxu1 %v18227_v25  ;;  %6801 = vmatprep.mubr.f32.mxu0 %v18227_v25 }
 0x810   : > { %v5149_v35 = vpop.permute.xlu1 %5148  ;;  %8921 = vmatprep.subr.bf16.mxu1 %v18597_v58 }
 0x811   : > { %v4481_v29 = vpop.permute.xlu0 %4480  ;;  %v5298_v43 = vmul.f32 %v18836_v27, %v5149_v35 }
 0x812   : > { %v9894_v46 = vpop.eup %9893  ;;  %v4612_v10 = vadd.f32 %v4481_v29, %v4292_v13  ;;  %5436 = vrot.lane.b32.xlu0 %v9890_v61, %s18129_s10  ;;  %v5619_v61 = vsel %vm5576_vm1, %v4722_v36, %v5042_v41  ;;  %v2436_v29 = vmul.f32 1.442695, %v2310_v2  ;;  %v18842_v2 = vld [vmem:[#allocation177_spill] sm:$0xff]  ;;  %v7249_v36 = vld [vmem:[#allocation5 + $0x1d8] sm:$0xff] }
 0x813   : > { %4926 = vrot.lane.b32.xlu1 %v9894_v46, %s10110_s19  ;;  %v15838_v56 = vmul.f32 %v9894_v46, %v15772_v1  ;;  %v5684_v1 = vsel %vm5641_vm2, %v5619_v61, %v5298_v43  ;;  %v2311_v27 = vsub.f32 %v18732_v14, %v18842_v2  ;;  %v7248_v43 = vld [vmem:[#allocation5 + $0x1d0] sm:$0xff] }
 0x814   : > { %9897 = vrcp.f32 %v4612_v10  ;;  %v4163_v7 = vpop.permute.xlu1 %4162  ;;  %v15856_v10 = vpop.eup %9895  ;;  %v15867_v61 = vpack.c.bf16 %v7249_v36, %v7248_v43 }
 0x815   : > { %v5405_v12 = vpop.permute.xlu0 %5404  ;;  %v15845_v45 = vpop.f32.mrb[114].mxu1  ;;  %9899 = vpow2.f32 %v2436_v29  ;;  %v2438_v2 = vmul.f32 1.442695, %v2311_v27  ;;  %v4723_v29 = vmul.f32 %v15344_v0, %v15223_v37 }
 0x816   : > { %v5554_v13 = vmul.f32 %v18837_v4, %v5405_v12  ;;  %5182 = vrot.lane.b32.xlu0 %v9894_v46, %s10112_s30  ;;  %18838 = vst [vmem:[#allocation174_spill] sm:$0xff] %v15845_v45  ;;  %v15847_v35 = vpop.f32.mrb[114].mxu0  ;;  %v15851_v21 = vpop.f32.mrb[115].mxu1  ;;  %v7218_v12 = vld [vmem:[#allocation5 + $0xe0] sm:$0xff]  ;;  %v7219_v4 = vld [vmem:[#allocation5 + $0xe8] sm:$0xff]  ;;  %8968 = vmatpush1.bf16.msra.mxu0 %v15867_v61 }
 0x817   : > { %18839 = vst [vmem:[#allocation132_spill] sm:$0xff] %v15847_v35  ;;  %5438 = vrot.lane.b32.xlu1 %v9894_v46, %s18129_s10  ;;  %18840 = vst [vmem:[#allocation175_spill] sm:$0xff] %v15851_v21  ;;  %v15853_v47 = vpop.f32.mrb[115].mxu0  ;;  %v3973_v46 = vadd.f32 %v15856_v10, %v3843_v39  ;;  %v18843_v39 = vld [vmem:[#allocation109_spill] sm:$0xff]  ;;  %8969 = vmatprep.subr.bf16.mxu0 %v18597_v58  ;;  %v18844_v21 = vld [vmem:[#allocation22_spill] sm:$0xff] }
 0x818   : > { %18841 = vst [vmem:[#allocation113_spill] sm:$0xff] %v15853_v47  ;;  %v3845_v57 = vpop.permute.xlu1 %3844  ;;  %v5749_v41 = vsel %vm5706_vm3, %v5684_v1, %v5554_v13 }
 0x819   : > { %5814 = vst.msk [vmem:[%s13327_s18 + $0x150] sm:$0xff] %vm5771_vm4, %v5749_v41  ;;  %8338 = vmatmul.mubr.msk.f32.gmra.mrb[148].mxu1 %vm5771_vm4, %v5749_v41  ;;  %8402 = vmatmul.mubr.msk.f32.gmra.mrb[148].mxu0 %vm5771_vm4, %v5749_v41  ;;  %v4895_v63 = vpop.permute.xlu0 %4894  ;;  %v4293_v13 = vadd.f32 %v4163_v7, %v3973_v46  ;;  %v8922_v41 = vpack.c.bf16 %v7219_v4, %v7218_v12 }
 0x81a   : > { %6358 = vmatprep.mubr.f32.mxu1 %v18227_v25  ;;  %6807 = vmatprep.mubr.f32.mxu0 %v18227_v25  ;;  %v5043_v45 = vmul.f32 %v18843_v39, %v4895_v63 }
 0x81b   : > { %8923 = vmatpush1.bf16.msra.mxu1 %v8922_v41 }
 0x81c   : > { %v5151_v1 = vpop.permute.xlu1 %5150  ;;  %8924 = vmatprep.subr.bf16.mxu1 %v18597_v58  ;;  %v5620_v63 = vsel %vm5576_vm1, %v4723_v29, %v5043_v45 }
 0x81d   : > { %v4483_v35 = vpop.permute.xlu0 %4482  ;;  %v5299_v30 = vmul.f32 %v18844_v21, %v5151_v1  ;;  %v18845_v21 = vld [vmem:[#allocation172_spill] sm:$0xff] }
 0x81e   : > { %v9898_v14 = vpop.eup %9897  ;;  %v4613_v47 = vadd.f32 %v4483_v35, %v4293_v13 }
 0x81f   : > { %5184 = vrot.lane.b32.xlu1 %v9898_v14, %s10112_s30  ;;  %4928 = vrot.lane.b32.xlu0 %v9898_v14, %s10110_s19  ;;  %v15876_v7 = vmul.f32 %v9898_v14, %v15815_v9  ;;  %v5685_v43 = vsel %vm5641_vm2, %v5620_v63, %v5299_v30  ;;  %v15886_v12 = vpop.eup %9899 }
 0x820   : > { %9901 = vrcp.f32 %v4613_v47  ;;  %v4165_v27 = vpop.permute.xlu1 %4164  ;;  %v3974_v0 = vadd.f32 %v15886_v12, %v3845_v57  ;;  %v18849_v57 = vld [vmem:[#allocation24_spill] sm:$0xff] }
 0x821   : > { %v5407_v35 = vpop.permute.xlu0 %5406  ;;  %9903 = vpow2.f32 %v2438_v2  ;;  %v18848_v2 = vld [vmem:[#allocation261_spill] sm:$0xff] }
 0x822   : > { %v5555_v46 = vmul.f32 %v18845_v21, %v5407_v35  ;;  %v4294_v13 = vadd.f32 %v4165_v27, %v3974_v0  ;;  %v4724_v27 = vmul.f32 %v15414_v11, %v15294_v20 }
 0x823   : > { %5440 = vrot.lane.b32.xlu0 %v9898_v14, %s18129_s10 }
 0x824   : > { %v3847_v36 = vpop.permute.xlu1 %3846  ;;  %v5750_v9 = vsel %vm5706_vm3, %v5685_v43, %v5555_v46  ;;  %v7250_v43 = vld [vmem:[#allocation5 + $0x1e0] sm:$0xff] }
 0x825   : > { %5815 = vst.msk [vmem:[%s13327_s18 + $0x158] sm:$0xff] %vm5771_vm4, %v5750_v9  ;;  %8339 = vmatmul.mubr.msk.f32.gmra.mrb[150].mxu1 %vm5771_vm4, %v5750_v9  ;;  %8403 = vmatmul.mubr.msk.f32.gmra.mrb[150].mxu0 %vm5771_vm4, %v5750_v9  ;;  %v4897_v37 = vpop.permute.xlu0 %4896  ;;  %v15893_v45 = vpop.f32.mrb[116].mxu1  ;;  %v7251_v9 = vld [vmem:[#allocation5 + $0x1e8] sm:$0xff] }
 0x826   : > { %18846 = vst [vmem:[#allocation238_spill] sm:$0xff] %v15893_v45  ;;  %v15895_v47 = vpop.f32.mrb[116].mxu0  ;;  %6364 = vmatprep.mubr.f32.mxu1 %v18227_v25  ;;  %6813 = vmatprep.mubr.f32.mxu0 %v18227_v25  ;;  %v15899_v30 = vpop.f32.mrb[117].mxu1  ;;  %v5044_v39 = vmul.f32 %v18848_v2, %v4897_v37  ;;  %v7220_v37 = vld [vmem:[#allocation5 + $0xf0] sm:$0xff] }
 0x827   : > { %18847 = vst [vmem:[#allocation106_spill] sm:$0xff] %v15895_v47  ;;  %v15901_v4 = vpop.f32.mrb[117].mxu0  ;;  %v18850_v2 = vld [vmem:[#allocation221_spill] sm:$0xff] }
 0x828   : > { %v5153_v1 = vpop.permute.xlu1 %5152 }
 0x829   : > { %v4485_v41 = vpop.permute.xlu0 %4484  ;;  %v5300_v35 = vmul.f32 %v18849_v57, %v5153_v1  ;;  %v15915_v1 = vpack.c.bf16 %v7251_v9, %v7250_v43 }
 0x82a   : > { %v9902_v14 = vpop.eup %9901  ;;  %v4614_v29 = vadd.f32 %v4485_v41, %v4294_v13  ;;  %v7221_v41 = vld [vmem:[#allocation5 + $0xf8] sm:$0xff] }
 0x82b   : > { %5186 = vrot.lane.b32.xlu0 %v9902_v14, %s10112_s30  ;;  %4930 = vrot.lane.b32.xlu1 %v9902_v14, %s10110_s19  ;;  %v15908_v63 = vmul.f32 %v9902_v14, %v15856_v10  ;;  %v15910_v21 = vpop.eup %9903  ;;  %v5621_v10 = vsel %vm5576_vm1, %v4724_v27, %v5044_v39  ;;  %v8925_v47 = vpack.c.bf16 %v7221_v41, %v7220_v37  ;;  %v18852_v27 = vld [vmem:[#allocation228_spill] sm:$0xff]  ;;  %v18853_v37 = vld [vmem:[#allocation169_spill] sm:$0xff] }
 0x82c   : > { %9905 = vrcp.f32 %v4614_v29  ;;  %v4167_v46 = vpop.permute.xlu1 %4166  ;;  %v3975_v0 = vadd.f32 %v15910_v21, %v3847_v36  ;;  %v5686_v45 = vsel %vm5641_vm2, %v5621_v10, %v5300_v35  ;;  %8971 = vmatpush1.bf16.msra.mxu0 %v15915_v1 }
 0x82d   : > { %v5409_v13 = vpop.permute.xlu0 %5408  ;;  %8926 = vmatpush1.bf16.msra.mxu1 %v8925_v47  ;;  %8972 = vmatprep.subr.bf16.mxu0 %v18597_v58  ;;  %v4725_v47 = vmul.f32 %v15484_v19, %v15371_v6 }
 0x82e   : > { %v5556_v57 = vmul.f32 %v18850_v2, %v5409_v13  ;;  %v4295_v20 = vadd.f32 %v4167_v46, %v3975_v0  ;;  %8975 = vmatprep.subr.bf16.mxu1 %v18597_v58 }
 0x82f   : > { %5442 = vrot.lane.b32.xlu1 %v9902_v14, %s18129_s10  ;;  %v18851_v14 = vld [vmem:[#allocation20_spill] sm:$0xff] }
 0x830   : > { %v4487_v11 = vpop.permute.xlu1 %4486  ;;  %v5751_v36 = vsel %vm5706_vm3, %v5686_v45, %v5556_v57 }
 0x831   : > { %v4615_v29 = vadd.f32 %v4487_v11, %v4295_v20  ;;  %5816 = vst.msk [vmem:[%s13327_s18 + $0x160] sm:$0xff] %vm5771_vm4, %v5751_v36  ;;  %8340 = vmatmul.mubr.msk.f32.gmra.mrb[152].mxu1 %vm5771_vm4, %v5751_v36  ;;  %8404 = vmatmul.mubr.msk.f32.gmra.mrb[152].mxu0 %vm5771_vm4, %v5751_v36  ;;  %v4899_v39 = vpop.permute.xlu0 %4898  ;;  %v7252_v20 = vld [vmem:[#allocation5 + $0x1f0] sm:$0xff]  ;;  %v7253_v11 = vld [vmem:[#allocation5 + $0x1f8] sm:$0xff] }
 0x832   : > { %6370 = vmatprep.mubr.f32.mxu1 %v18227_v25  ;;  %6819 = vmatprep.mubr.f32.mxu0 %v18227_v25  ;;  %v5045_v35 = vmul.f32 %v18851_v14, %v4899_v39  ;;  %v15952_v14 = vpack.c.bf16 %v7253_v11, %v7252_v20 }
 0x833   : > { %9907 = vrcp.f32 %v4615_v29 }
 0x834   : > { %v5411_v45 = vpop.permute.xlu1 %5410  ;;  %v5622_v13 = vsel %vm5576_vm1, %v4725_v47, %v5045_v35  ;;  %v4726_v35 = vmul.f32 %v15531_v31, %v15420_v18  ;;  %v18855_v47 = vld [vmem:[#allocation231_spill] sm:$0xff]  ;;  %8974 = vmatpush1.bf16.msra.mxu0 %v15952_v14 }
 0x835   : > { %v5557_v46 = vmul.f32 %v18852_v27, %v5411_v45  ;;  %v5155_v43 = vpop.permute.xlu0 %5154  ;;  %v18854_v45 = vld [vmem:[#allocation270_spill] sm:$0xff] }
 0x836   : > { %v9906_v9 = vpop.eup %9905  ;;  %v5301_v0 = vmul.f32 %v18853_v37, %v5155_v43  ;;  %v15939_v41 = vpop.f32.mrb[118].mxu1  ;;  %v18856_v37 = vld [vmem:[#allocation236_spill] sm:$0xff] }
 0x837   : > { %5188 = vrot.lane.b32.xlu1 %v9906_v9, %s10112_s30  ;;  %4932 = vrot.lane.b32.xlu0 %v9906_v9, %s10110_s19  ;;  %v15941_v10 = vpop.f32.mrb[118].mxu0  ;;  %v15944_v2 = vmul.f32 %v9906_v9, %v15886_v12  ;;  %v15947_v19 = vpop.f32.mrb[119].mxu1 }
 0x838   : > { %v5687_v6 = vsel %vm5641_vm2, %v5622_v13, %v5301_v0  ;;  %v15949_v57 = vpop.f32.mrb[119].mxu0  ;;  %v5157_v36 = vpop.permute.xlu1 %5156 }
 0x839   : > { %v4901_v29 = vpop.permute.xlu0 %4900  ;;  %v5752_v39 = vsel %vm5706_vm3, %v5687_v6, %v5557_v46  ;;  %v5302_v27 = vmul.f32 %v18855_v47, %v5157_v36  ;;  %v4727_v36 = vmul.f32 %v15545_v48, %v15449_v38 }
 0x83a   : > { %v5046_v12 = vmul.f32 %v18854_v45, %v4901_v29  ;;  %5817 = vst.msk [vmem:[%s13327_s18 + $0x168] sm:$0xff] %vm5771_vm4, %v5752_v39  ;;  %8341 = vmatmul.mubr.msk.f32.gmra.mrb[154].mxu1 %vm5771_vm4, %v5752_v39  ;;  %8405 = vmatmul.mubr.msk.f32.gmra.mrb[154].mxu0 %vm5771_vm4, %v5752_v39  ;;  %v18858_v39 = vld [vmem:[#allocation244_spill] sm:$0xff]  ;;  %v18859_v45 = vld [vmem:[#allocation211_spill] sm:$0xff] }
 0x83b   : > { %5444 = vrot.lane.b32.xlu0 %v9906_v9, %s18129_s10  ;;  %6376 = vmatprep.mubr.f32.mxu1 %v18227_v25  ;;  %v18857_v9 = vld [vmem:[#allocation36_spill] sm:$0xff] }
 0x83c   : > { %v5623_v46 = vsel %vm5576_vm1, %v4726_v35, %v5046_v12  ;;  %6825 = vmatprep.mubr.f32.mxu0 %v18227_v25  ;;  %v4903_v31 = vpop.permute.xlu1 %4902 }
 0x83d   : > { %v9908_v18 = vpop.eup %9907  ;;  %v5413_v43 = vpop.permute.xlu0 %5412  ;;  %v5047_v6 = vmul.f32 %v18857_v9, %v4903_v31  ;;  %v5688_v20 = vsel %vm5641_vm2, %v5623_v46, %v5302_v27  ;;  %v18860_v9 = vld [vmem:[#allocation119_spill] sm:$0xff] }
 0x83e   : > { %v5558_v0 = vmul.f32 %v18856_v37, %v5413_v43  ;;  %4934 = vrot.lane.b32.xlu1 %v9908_v18, %s10110_s19  ;;  %v15970_v13 = vmul.f32 %v9908_v18, %v15910_v21  ;;  %s8107_s19 = sshll.u32 %s16799_s26, 4  ;;  %s16916_s19 = int_to_ptr.vmem [resolvable:$true] %s8107_s19 }
 0x83f   : > { %5190 = vrot.lane.b32.xlu0 %v9908_v18, %s10112_s30  ;;  %v5624_v47 = vsel %vm5576_vm1, %v4727_v36, %v5047_v6  ;;  %s10031_s27 = scalar_lea.vmem %s16916_s19, 8192 }
 0x840   : > { %v5753_v11 = vsel %vm5706_vm3, %v5688_v20, %v5558_v0  ;;  %v5415_v29 = vpop.permute.xlu1 %5414  ;;  %v4728_v0 = vmul.f32 %v15583_v40, %v15493_v42  ;;  %v18861_v20 = vld [vmem:[#allocation112_spill] sm:$0xff]  ;;  %p10032_p6 = scmp.ne.s32.totalorder %s16916_s19, %s10031_s27 }
 0x841   : > { %5818 = vst.msk [vmem:[%s13327_s18 + $0x170] sm:$0xff] %vm5771_vm4, %v5753_v11  ;;  %8342 = vmatmul.mubr.msk.f32.gmra.mrb[156].mxu1 %vm5771_vm4, %v5753_v11  ;;  %8406 = vmatmul.mubr.msk.f32.gmra.mrb[156].mxu0 %vm5771_vm4, %v5753_v11  ;;  %v5159_v21 = vpop.permute.xlu0 %5158  ;;  %v5559_v35 = vmul.f32 %v18858_v39, %v5415_v29  ;;  %v18862_v42 = vld [vmem:[#allocation248_spill] sm:$0xff] }
 0x842   : > { %v5303_v12 = vmul.f32 %v18859_v45, %v5159_v21  ;;  %5446 = vrot.lane.b32.xlu1 %v9908_v18, %s18129_s10  ;;  %6382 = vmatprep.mubr.f32.mxu1 %v18227_v25  ;;  %v15987_v38 = vpop.f32.mrb[120].mxu1  ;;  %v15989_v48 = vpop.f32.mrb[120].mxu0  ;;  %v18863_v39 = vld [vmem:[#allocation124_spill] sm:$0xff]  ;;  %p10033_p8 = pnand %p10032_p6, %p10246_p12 }
 0x843   : > { %6831 = vmatprep.mubr.f32.mxu0 %v18227_v25  ;;  %v15993_v46 = vpop.f32.mrb[121].mxu1  ;;  %v15995_v31 = vpop.f32.mrb[121].mxu0 }
 0x844   : > { %v5689_v27 = vsel %vm5641_vm2, %v5624_v47, %v5303_v12  ;;  %v5161_v43 = vpop.permute.xlu1 %5160  ;;  %p10034_p10 = pneg %p10033_p8 }
 0x845   : > { %v4905_v37 = vpop.permute.xlu0 %4904  ;;  %v5754_v18 = vsel %vm5706_vm3, %v5689_v27, %v5559_v35  ;;  %v5304_v11 = vmul.f32 %v18861_v20, %v5161_v43  ;;  %v18864_v43 = vld [vmem:[#allocation138_spill] sm:$0xff] }
 0x846   : > { %v5048_v6 = vmul.f32 %v18860_v9, %v4905_v37  ;;  %5819 = vst.msk [vmem:[%s13327_s18 + $0x178] sm:$0xff] %vm5771_vm4, %v5754_v18  ;;  %8343 = vmatmul.mubr.msk.f32.gmra.mrb[158].mxu1 %vm5771_vm4, %v5754_v18  ;;  %8407 = vmatmul.mubr.msk.f32.gmra.mrb[158].mxu0 %vm5771_vm4, %v5754_v18  ;;  %v18865_v18 = vld [vmem:[#allocation250_spill] sm:$0xff] }
 0x847   : > { %6388 = vmatprep.mubr.f32.mxu1 %v18227_v25  ;;  %6837 = vmatprep.mubr.f32.mxu0 %v18227_v25 }
 0x848   : > { %v5625_v36 = vsel %vm5576_vm1, %v4728_v0, %v5048_v6  ;;  %v4907_v29 = vpop.permute.xlu1 %4906 }
 0x849   : > { %v5417_v21 = vpop.permute.xlu0 %5416  ;;  %v5049_v35 = vmul.f32 %v18863_v39, %v4907_v29  ;;  %v5690_v45 = vsel %vm5641_vm2, %v5625_v36, %v5304_v11  ;;  %v18866_v39 = vld [vmem:[#allocation185_spill] sm:$0xff] }
 0x84a   : > { %v5560_v40 = vmul.f32 %v18862_v42, %v5417_v21 }
 0x84b   : > { %v5626_v9 = vsel %vm5576_vm1, %v15288_v22, %v5049_v35  ;;  %v18867_v22 = vld [vmem:[#allocation40_spill] sm:$0xff] }
 0x84c   : > { %v5755_v12 = vsel %vm5706_vm3, %v5690_v45, %v5560_v40  ;;  %v5419_v47 = vpop.permute.xlu1 %5418 }
 0x84d   : > { %5820 = vst.msk [vmem:[%s13327_s18 + $0x180] sm:$0xff] %vm5771_vm4, %v5755_v12  ;;  %8344 = vmatmul.mubr.msk.f32.gmra.mrb[160].mxu1 %vm5771_vm4, %v5755_v12  ;;  %8408 = vmatmul.mubr.msk.f32.gmra.mrb[160].mxu0 %vm5771_vm4, %v5755_v12  ;;  %v5163_v27 = vpop.permute.xlu0 %5162  ;;  %v5561_v37 = vmul.f32 %v18864_v43, %v5419_v47  ;;  %v18868_v43 = vld [vmem:[#allocation251_spill] sm:$0xff] }
 0x84e   : > { %v5305_v0 = vmul.f32 %v18865_v18, %v5163_v27  ;;  %6394 = vmatprep.mubr.f32.mxu1 %v18227_v25  ;;  %6843 = vmatprep.mubr.f32.mxu0 %v18227_v25  ;;  %v16023_v6 = vpop.f32.mrb[122].mxu1  ;;  %v16025_v20 = vpop.f32.mrb[122].mxu0  ;;  %v18869_v18 = vld [vmem:[#allocation157_spill] sm:$0xff] }
 0x84f   : > { %v16028_v36 = vpop.f32.mrb[123].mxu1  ;;  %v16030_v29 = vpop.f32.mrb[123].mxu0 }
 0x850   : > { %v5691_v11 = vsel %vm5641_vm2, %v5626_v9, %v5305_v0  ;;  %v5165_v21 = vpop.permute.xlu1 %5164 }
 0x851   : > { %v4909_v42 = vpop.permute.xlu0 %4908  ;;  %v5756_v40 = vsel %vm5706_vm3, %v5691_v11, %v5561_v37  ;;  %v5306_v35 = vmul.f32 %v18867_v22, %v5165_v21 }
 0x852   : > { %v5050_v45 = vmul.f32 %v18866_v39, %v4909_v42  ;;  %5821 = vst.msk [vmem:[%s13327_s18 + $0x188] sm:$0xff] %vm5771_vm4, %v5756_v40  ;;  %8345 = vmatmul.mubr.msk.f32.gmra.mrb[162].mxu1 %vm5771_vm4, %v5756_v40  ;;  %8409 = vmatmul.mubr.msk.f32.gmra.mrb[162].mxu0 %vm5771_vm4, %v5756_v40  ;;  %v18871_v39 = vld [vmem:[#allocation39_spill] sm:$0xff] }
 0x853   : > { %6400 = vmatprep.mubr.f32.mxu1 %v18227_v25  ;;  %6849 = vmatprep.mubr.f32.mxu0 %v18227_v25 }
 0x854   : > { %v5627_v12 = vsel %vm5576_vm1, %v15365_v32, %v5050_v45  ;;  %v4911_v47 = vpop.permute.xlu1 %4910  ;;  %v18870_v32 = vld [vmem:[#allocation208_spill] sm:$0xff] }
 0x855   : > { %v5421_v27 = vpop.permute.xlu0 %5420  ;;  %v5051_v0 = vmul.f32 %v18869_v18, %v4911_v47  ;;  %v5692_v9 = vsel %vm5641_vm2, %v5627_v12, %v5306_v35 }
 0x856   : > { %v5562_v37 = vmul.f32 %v18868_v43, %v5421_v27 }
 0x857   : > { %v5628_v22 = vsel %vm5576_vm1, %v15431_v60, %v5051_v0  ;;  %v18874_v60 = vld [vmem:[#allocation93_spill] sm:$0xff] }
 0x858   : > { %v5757_v11 = vsel %vm5706_vm3, %v5692_v9, %v5562_v37  ;;  %v5423_v42 = vpop.permute.xlu1 %5422 }
 0x859   : > { %5822 = vst.msk [vmem:[%s13327_s18 + $0x190] sm:$0xff] %vm5771_vm4, %v5757_v11  ;;  %8346 = vmatmul.mubr.msk.f32.gmra.mrb[164].mxu1 %vm5771_vm4, %v5757_v11  ;;  %8410 = vmatmul.mubr.msk.f32.gmra.mrb[164].mxu0 %vm5771_vm4, %v5757_v11  ;;  %v5167_v21 = vpop.permute.xlu0 %5166  ;;  %v5563_v40 = vmul.f32 %v18870_v32, %v5423_v42  ;;  %v18873_v11 = vld [vmem:[#allocation252_spill] sm:$0xff] }
 0x85a   : > { %v5307_v45 = vmul.f32 %v18871_v39, %v5167_v21  ;;  %6406 = vmatprep.mubr.f32.mxu1 %v18227_v25  ;;  %6855 = vmatprep.mubr.f32.mxu0 %v18227_v25  ;;  %v16057_v35 = vpop.f32.mrb[124].mxu1  ;;  %v16059_v12 = vpop.f32.mrb[124].mxu0  ;;  %v18875_v39 = vld [vmem:[#allocation27_spill] sm:$0xff] }
 0x85b   : > { %18872 = vst [vmem:[#allocation141_spill] sm:$0xff] %v16059_v12  ;;  %v16062_v27 = vpop.f32.mrb[125].mxu1  ;;  %v16064_v43 = vpop.f32.mrb[125].mxu0 }
 0x85c   : > { %v5693_v47 = vsel %vm5641_vm2, %v5628_v22, %v5307_v45  ;;  %v5169_v37 = vpop.permute.xlu1 %5168  ;;  %v18876_v22 = vld [vmem:[#allocation154_spill] sm:$0xff] }
 0x85d   : > { %v4913_v18 = vpop.permute.xlu0 %4912  ;;  %v5758_v9 = vsel %vm5706_vm3, %v5693_v47, %v5563_v40  ;;  %v5308_v0 = vmul.f32 %v18874_v60, %v5169_v37  ;;  %v18878_v60 = vld [vmem:[#allocation160_spill] sm:$0xff] }
 0x85e   : > { %v5052_v42 = vmul.f32 %v18873_v11, %v4913_v18  ;;  %5823 = vst.msk [vmem:[%s13327_s18 + $0x198] sm:$0xff] %vm5771_vm4, %v5758_v9  ;;  %8347 = vmatmul.mubr.msk.f32.gmra.mrb[166].mxu1 %vm5771_vm4, %v5758_v9  ;;  %8411 = vmatmul.mubr.msk.f32.gmra.mrb[166].mxu0 %vm5771_vm4, %v5758_v9 }
 0x85f   : > { %6412 = vmatprep.mubr.f32.mxu1 %v18227_v25  ;;  %6861 = vmatprep.mubr.f32.mxu0 %v18227_v25 }
 0x860   : > { %v5629_v21 = vsel %vm5576_vm1, %v15501_v54, %v5052_v42  ;;  %v4915_v32 = vpop.permute.xlu1 %4914  ;;  %v18877_v54 = vld [vmem:[#allocation165_spill] sm:$0xff] }
 0x861   : > { %v5425_v40 = vpop.permute.xlu0 %5424  ;;  %v5053_v47 = vmul.f32 %v18876_v22, %v4915_v32  ;;  %v5694_v18 = vsel %vm5641_vm2, %v5629_v21, %v5308_v0 }
 0x862   : > { %v5564_v45 = vmul.f32 %v18875_v39, %v5425_v40 }
 0x863   : > { %v5630_v0 = vsel %vm5576_vm1, %v15559_v15, %v5053_v47  ;;  %v18882_v15 = vld [vmem:[#allocation61_spill] sm:$0xff] }
 0x864   : > { %v5759_v11 = vsel %vm5706_vm3, %v5694_v18, %v5564_v45  ;;  %v5427_v9 = vpop.permute.xlu1 %5426 }
 0x865   : > { %5824 = vst.msk [vmem:[%s13327_s18 + $0x1a0] sm:$0xff] %vm5771_vm4, %v5759_v11  ;;  %8348 = vmatmul.mubr.msk.f32.gmra.mrb[168].mxu1 %vm5771_vm4, %v5759_v11  ;;  %8412 = vmatmul.mubr.msk.f32.gmra.mrb[168].mxu0 %vm5771_vm4, %v5759_v11  ;;  %v5171_v37 = vpop.permute.xlu0 %5170  ;;  %v5565_v42 = vmul.f32 %v18877_v54, %v5427_v9  ;;  %v18881_v9 = vld [vmem:[#allocation30_spill] sm:$0xff] }
 0x866   : > { %v5309_v12 = vmul.f32 %v18878_v60, %v5171_v37  ;;  %6418 = vmatprep.mubr.f32.mxu1 %v18227_v25  ;;  %6867 = vmatprep.mubr.f32.mxu0 %v18227_v25  ;;  %v16091_v21 = vpop.f32.mrb[126].mxu1  ;;  %v16093_v32 = vpop.f32.mrb[126].mxu0  ;;  %v18883_v60 = vld [vmem:[#allocation224_spill] sm:$0xff] }
 0x867   : > { %18879 = vst [vmem:[#allocation53_spill] sm:$0xff] %v16091_v21  ;;  %18880 = vst [vmem:[#allocation84_spill] sm:$0xff] %v16093_v32  ;;  %v16096_v39 = vpop.f32.mrb[127].mxu1  ;;  %v16098_v45 = vpop.f32.mrb[127].mxu0 }
 0x868   : > { %v5695_v40 = vsel %vm5641_vm2, %v5630_v0, %v5309_v12  ;;  %v5173_v22 = vpop.permute.xlu1 %5172 }
 0x869   : > { %v4917_v18 = vpop.permute.xlu0 %4916  ;;  %v5760_v11 = vsel %vm5706_vm3, %v5695_v40, %v5565_v42  ;;  %v5310_v47 = vmul.f32 %v18882_v15, %v5173_v22  ;;  %v18884_v40 = vld [vmem:[#allocation155_spill] sm:$0xff]  ;;  %v18886_v15 = vld [vmem:[#allocation162_spill] sm:$0xff] }
 0x86a   : > { %v5054_v37 = vmul.f32 %v18881_v9, %v4917_v18  ;;  %5825 = vst.msk [vmem:[%s13327_s18 + $0x1a8] sm:$0xff] %vm5771_vm4, %v5760_v11  ;;  %8349 = vmatmul.mubr.msk.f32.gmra.mrb[170].mxu1 %vm5771_vm4, %v5760_v11  ;;  %8413 = vmatmul.mubr.msk.f32.gmra.mrb[170].mxu0 %vm5771_vm4, %v5760_v11 }
 0x86b   : > { %6424 = vmatprep.mubr.f32.mxu1 %v18227_v25  ;;  %6873 = vmatprep.mubr.f32.mxu0 %v18227_v25 }
 0x86c   : > { %v5631_v12 = vsel %vm5576_vm1, %v15611_v51, %v5054_v37  ;;  %v4919_v54 = vpop.permute.xlu1 %4918  ;;  %v18885_v51 = vld [vmem:[#allocation66_spill] sm:$0xff] }
 0x86d   : > { %v5429_v42 = vpop.permute.xlu0 %5428  ;;  %v5055_v18 = vmul.f32 %v18884_v40, %v4919_v54  ;;  %v5696_v9 = vsel %vm5641_vm2, %v5631_v12, %v5310_v47 }
 0x86e   : > { %v5566_v0 = vmul.f32 %v18883_v60, %v5429_v42 }
 0x86f   : > { %v5632_v47 = vsel %vm5576_vm1, %v15661_v28, %v5055_v18  ;;  %v18890_v28 = vld [vmem:[#allocation187_spill] sm:$0xff] }
 0x870   : > { %v5761_v32 = vsel %vm5706_vm3, %v5696_v9, %v5566_v0  ;;  %v5431_v11 = vpop.permute.xlu1 %5430 }
 0x871   : > { %5826 = vst.msk [vmem:[%s13327_s18 + $0x1b0] sm:$0xff] %vm5771_vm4, %v5761_v32  ;;  %8350 = vmatmul.mubr.msk.f32.gmra.mrb[172].mxu1 %vm5771_vm4, %v5761_v32  ;;  %8414 = vmatmul.mubr.msk.f32.gmra.mrb[172].mxu0 %vm5771_vm4, %v5761_v32  ;;  %v5175_v22 = vpop.permute.xlu0 %5174  ;;  %v5567_v37 = vmul.f32 %v18885_v51, %v5431_v11  ;;  %v18889_v11 = vld [vmem:[#allocation255_spill] sm:$0xff] }
 0x872   : > { %v5311_v21 = vmul.f32 %v18886_v15, %v5175_v22  ;;  %6430 = vmatprep.mubr.f32.mxu1 %v18227_v25  ;;  %6879 = vmatprep.mubr.f32.mxu0 %v18227_v25  ;;  %v16125_v12 = vpop.f32.mrb[128].mxu1  ;;  %v16127_v54 = vpop.f32.mrb[128].mxu0  ;;  %v18891_v15 = vld [vmem:[#allocation227_spill] sm:$0xff] }
 0x873   : > { %18887 = vst [vmem:[#allocation166_spill] sm:$0xff] %v16125_v12  ;;  %18888 = vst [vmem:[#allocation99_spill] sm:$0xff] %v16127_v54  ;;  %v16130_v32 = vpop.f32.mrb[129].mxu1  ;;  %v16132_v60 = vpop.f32.mrb[129].mxu0 }
 0x874   : > { %v5697_v42 = vsel %vm5641_vm2, %v5632_v47, %v5311_v21  ;;  %v5177_v0 = vpop.permute.xlu1 %5176 }
 0x875   : > { %v4921_v40 = vpop.permute.xlu0 %4920  ;;  %v5762_v9 = vsel %vm5706_vm3, %v5697_v42, %v5567_v37  ;;  %v5312_v18 = vmul.f32 %v18890_v28, %v5177_v0  ;;  %v18892_v42 = vld [vmem:[#allocation164_spill] sm:$0xff]  ;;  %v18894_v28 = vld [vmem:[#allocation45_spill] sm:$0xff] }
 0x876   : > { %v5056_v22 = vmul.f32 %v18889_v11, %v4921_v40  ;;  %5827 = vst.msk [vmem:[%s13327_s18 + $0x1b8] sm:$0xff] %vm5771_vm4, %v5762_v9  ;;  %8351 = vmatmul.mubr.msk.f32.gmra.mrb[174].mxu1 %vm5771_vm4, %v5762_v9  ;;  %8415 = vmatmul.mubr.msk.f32.gmra.mrb[174].mxu0 %vm5771_vm4, %v5762_v9 }
 0x877   : > { %6436 = vmatprep.mubr.f32.mxu1 %v18227_v25  ;;  %6885 = vmatprep.mubr.f32.mxu0 %v18227_v25 }
 0x878   : > { %v5633_v21 = vsel %vm5576_vm1, %v15709_v23, %v5056_v22  ;;  %v4923_v51 = vpop.permute.xlu1 %4922  ;;  %v18893_v23 = vld [vmem:[#allocation64_spill] sm:$0xff] }
 0x879   : > { %v5433_v37 = vpop.permute.xlu0 %5432  ;;  %v5057_v40 = vmul.f32 %v18892_v42, %v4923_v51  ;;  %v5698_v11 = vsel %vm5641_vm2, %v5633_v21, %v5312_v18 }
 0x87a   : > { %v5568_v47 = vmul.f32 %v18891_v15, %v5433_v37 }
 0x87b   : > { %v5634_v18 = vsel %vm5576_vm1, %v15756_v49, %v5057_v40  ;;  %v18897_v49 = vld [vmem:[#allocation195_spill] sm:$0xff] }
 0x87c   : > { %v5763_v54 = vsel %vm5706_vm3, %v5698_v11, %v5568_v47  ;;  %v5435_v9 = vpop.permute.xlu1 %5434 }
 0x87d   : > { %5828 = vst.msk [vmem:[%s13327_s18 + $0x1c0] sm:$0xff] %vm5771_vm4, %v5763_v54  ;;  %8352 = vmatmul.mubr.msk.f32.gmra.mrb[176].mxu1 %vm5771_vm4, %v5763_v54  ;;  %8416 = vmatmul.mubr.msk.f32.gmra.mrb[176].mxu0 %vm5771_vm4, %v5763_v54  ;;  %v5179_v0 = vpop.permute.xlu0 %5178  ;;  %v5569_v22 = vmul.f32 %v18893_v23, %v5435_v9  ;;  %v18896_v9 = vld [vmem:[#allocation190_spill] sm:$0xff] }
 0x87e   : > { %v5313_v12 = vmul.f32 %v18894_v28, %v5179_v0  ;;  %6442 = vmatprep.mubr.f32.mxu1 %v18227_v25  ;;  %6891 = vmatprep.mubr.f32.mxu0 %v18227_v25  ;;  %v16159_v21 = vpop.f32.mrb[130].mxu1  ;;  %v16161_v51 = vpop.f32.mrb[130].mxu0  ;;  %v18898_v28 = vld [vmem:[#allocation258_spill] sm:$0xff] }
 0x87f   : > { %18895 = vst [vmem:[#allocation159_spill] sm:$0xff] %v16161_v51  ;;  %v16164_v54 = vpop.f32.mrb[131].mxu1  ;;  %v16166_v15 = vpop.f32.mrb[131].mxu0 }
 0x880   : > { %v5699_v37 = vsel %vm5641_vm2, %v5634_v18, %v5313_v12  ;;  %v5181_v47 = vpop.permute.xlu1 %5180 }
 0x881   : > { %v4925_v42 = vpop.permute.xlu0 %4924  ;;  %v5764_v11 = vsel %vm5706_vm3, %v5699_v37, %v5569_v22  ;;  %v5314_v40 = vmul.f32 %v18897_v49, %v5181_v47  ;;  %v18899_v37 = vld [vmem:[#allocation229_spill] sm:$0xff] }
 0x882   : > { %v5058_v0 = vmul.f32 %v18896_v9, %v4925_v42  ;;  %5829 = vst.msk [vmem:[%s13327_s18 + $0x1c8] sm:$0xff] %vm5771_vm4, %v5764_v11  ;;  %8353 = vmatmul.mubr.msk.f32.gmra.mrb[178].mxu1 %vm5771_vm4, %v5764_v11  ;;  %8417 = vmatmul.mubr.msk.f32.gmra.mrb[178].mxu0 %vm5771_vm4, %v5764_v11 }
 0x883   : > { %6448 = vmatprep.mubr.f32.mxu1 %v18227_v25  ;;  %6897 = vmatprep.mubr.f32.mxu0 %v18227_v25 }
 0x884   : > { %v5635_v12 = vsel %vm5576_vm1, %v15803_v17, %v5058_v0  ;;  %v18900_v0 = vld [vmem:[#allocation47_spill] sm:$0xff] }
 0x885   : > { %v4927_v23 = vpop.permute.xlu1 %4926  ;;  %v5437_v22 = vpop.permute.xlu0 %5436  ;;  %v5700_v9 = vsel %vm5641_vm2, %v5635_v12, %v5314_v40 }
 0x886   : > { %v5570_v18 = vmul.f32 %v18898_v28, %v5437_v22  ;;  %v5059_v42 = vmul.f32 %v18899_v37, %v4927_v23 }
 0x888   : > { %v5765_v51 = vsel %vm5706_vm3, %v5700_v9, %v5570_v18  ;;  %v5636_v40 = vsel %vm5576_vm1, %v15838_v56, %v5059_v42 }
 0x889   : > { %v5439_v11 = vpop.permute.xlu1 %5438  ;;  %5830 = vst.msk [vmem:[%s13327_s18 + $0x1d0] sm:$0xff] %vm5771_vm4, %v5765_v51  ;;  %8354 = vmatmul.mubr.msk.f32.gmra.mrb[180].mxu1 %vm5771_vm4, %v5765_v51  ;;  %8418 = vmatmul.mubr.msk.f32.gmra.mrb[180].mxu0 %vm5771_vm4, %v5765_v51  ;;  %v5183_v47 = vpop.permute.xlu0 %5182 }
 0x88a   : > { %v5571_v17 = vmul.f32 %v15226_v53, %v5439_v11  ;;  %v5315_v49 = vmul.f32 %v18900_v0, %v5183_v47  ;;  %6454 = vmatprep.mubr.f32.mxu1 %v18227_v25  ;;  %6903 = vmatprep.mubr.f32.mxu0 %v18227_v25 }
 0x88c   : > { %v5701_v12 = vsel %vm5641_vm2, %v5636_v40, %v5315_v49  ;;  %v16194_v23 = vpop.f32.mrb[132].mxu1  ;;  %v16196_v22 = vpop.f32.mrb[132].mxu0 }
 0x88d   : > { %v16198_v28 = vpop.f32.mrb[133].mxu1  ;;  %v16200_v51 = vpop.f32.mrb[133].mxu0  ;;  %v5766_v53 = vsel %vm5706_vm3, %v5701_v12, %v5571_v17 }
 0x88e   : > { %5831 = vst.msk [vmem:[%s13327_s18 + $0x1d8] sm:$0xff] %vm5771_vm4, %v5766_v53  ;;  %8355 = vmatmul.mubr.msk.f32.gmra.mrb[182].mxu1 %vm5771_vm4, %v5766_v53  ;;  %8419 = vmatmul.mubr.msk.f32.gmra.mrb[182].mxu0 %vm5771_vm4, %v5766_v53  ;;  %v18902_v53 = vld [vmem:[#allocation232_spill] sm:$0xff] }
 0x88f   : > { %6460 = vmatprep.mubr.f32.mxu1 %v18227_v25  ;;  %6909 = vmatprep.mubr.f32.mxu0 %v18227_v25 }
 0x891   : > { %v5185_v56 = vpop.permute.xlu1 %5184  ;;  %v4929_v18 = vpop.permute.xlu0 %4928 }
 0x892   : > { %v5060_v37 = vmul.f32 %v15205_v34, %v4929_v18  ;;  %v5316_v42 = vmul.f32 %v15249_v50, %v5185_v56 }
 0x894   : > { %v5637_v9 = vsel %vm5576_vm1, %v15876_v7, %v5060_v37 }
 0x895   : > { %v5441_v11 = vpop.permute.xlu0 %5440  ;;  %v5702_v17 = vsel %vm5641_vm2, %v5637_v9, %v5316_v42  ;;  %v18903_v42 = vld [vmem:[#allocation133_spill] sm:$0xff] }
 0x896   : > { %v5572_v47 = vmul.f32 %v15296_v59, %v5441_v11 }
 0x898   : > { %v16215_v0 = vpop.f32.mrb[134].mxu1  ;;  %v16217_v49 = vpop.f32.mrb[134].mxu0  ;;  %v5767_v40 = vsel %vm5706_vm3, %v5702_v17, %v5572_v47 }
 0x899   : > { %18901 = vst [vmem:[#allocation235_spill] sm:$0xff] %v16217_v49  ;;  %v16220_v12 = vpop.f32.mrb[135].mxu1  ;;  %5832 = vst.msk [vmem:[%s13327_s18 + $0x1e0] sm:$0xff] %vm5771_vm4, %v5767_v40  ;;  %8356 = vmatmul.mubr.msk.f32.gmra.mrb[184].mxu1 %vm5771_vm4, %v5767_v40  ;;  %v16225_v34 = vpop.f32.mrb[135].mxu0  ;;  %8420 = vmatmul.mubr.msk.f32.gmra.mrb[184].mxu0 %vm5771_vm4, %v5767_v40 }
 0x89a   : > { %6466 = vmatprep.mubr.f32.mxu1 %v18227_v25  ;;  %6915 = vmatprep.mubr.f32.mxu0 %v18227_v25 }
 0x89d   : > { %v4931_v50 = vpop.permute.xlu1 %4930  ;;  %v5187_v59 = vpop.permute.xlu0 %5186 }
 0x89e   : > { %v5061_v7 = vmul.f32 %v15266_v8, %v4931_v50  ;;  %v5317_v56 = vmul.f32 %v18902_v53, %v5187_v59  ;;  %v18907_v59 = vld [vmem:[#allocation59_spill] sm:$0xff]  ;;  %v18908_v53 = vld [vmem:[#allocation49_spill] sm:$0xff] }
 0x8a0   : > { %v5638_v18 = vsel %vm5576_vm1, %v15908_v63, %v5061_v7 }
 0x8a1   : > { %v5443_v37 = vpop.permute.xlu1 %5442  ;;  %v5703_v11 = vsel %vm5641_vm2, %v5638_v18, %v5317_v56 }
 0x8a2   : > { %v5573_v9 = vmul.f32 %v18903_v42, %v5443_v37  ;;  %v18909_v42 = vld [vmem:[#allocation52_spill] sm:$0xff] }
 0x8a4   : > { %v16236_v47 = vpop.f32.mrb[136].mxu1  ;;  %v16238_v17 = vpop.f32.mrb[136].mxu0  ;;  %v5768_v40 = vsel %vm5706_vm3, %v5703_v11, %v5573_v9 }
 0x8a5   : > { %18904 = vst [vmem:[#allocation136_spill] sm:$0xff] %v16236_v47  ;;  %18905 = vst [vmem:[#allocation103_spill] sm:$0xff] %v16238_v17  ;;  %v16241_v49 = vpop.f32.mrb[137].mxu1  ;;  %8357 = vmatmul.mubr.msk.f32.gmra.mrb[186].mxu1 %vm5771_vm4, %v5768_v40  ;;  %v16246_v8 = vpop.f32.mrb[137].mxu0  ;;  %8421 = vmatmul.mubr.msk.f32.gmra.mrb[186].mxu0 %vm5771_vm4, %v5768_v40 }
 0x8a6   : > { %5833 = vst.msk [vmem:[%s13327_s18 + $0x1e8] sm:$0xff] %vm5771_vm4, %v5768_v40  ;;  %18906 = vst [vmem:[#allocation15_spill] sm:$0xff] %v16246_v8  ;;  %6472 = vmatprep.mubr.f32.mxu1 %v18227_v25  ;;  %6921 = vmatprep.mubr.f32.mxu0 %v18227_v25 }
 0x8a9   : > { %v5189_v63 = vpop.permute.xlu1 %5188  ;;  %v4933_v50 = vpop.permute.xlu0 %4932 }
 0x8aa   : > { %v5062_v7 = vmul.f32 %v18907_v59, %v4933_v50  ;;  %v5318_v56 = vmul.f32 %v18908_v53, %v5189_v63  ;;  %v18914_v59 = vld [vmem:[#allocation247_spill] sm:$0xff]  ;;  %v18915_v53 = vld [vmem:[#allocation264_spill] sm:$0xff] }
 0x8ac   : > { %v5639_v18 = vsel %vm5576_vm1, %v15944_v2, %v5062_v7 }
 0x8ad   : > { %v5445_v37 = vpop.permute.xlu0 %5444  ;;  %v5704_v11 = vsel %vm5641_vm2, %v5639_v18, %v5318_v56 }
 0x8ae   : > { %v5574_v9 = vmul.f32 %v18909_v42, %v5445_v37  ;;  %v18916_v42 = vld [vmem:[#allocation130_spill] sm:$0xff] }
 0x8b0   : > { %v16257_v40 = vpop.f32.mrb[138].mxu1  ;;  %v16259_v17 = vpop.f32.mrb[138].mxu0  ;;  %v5769_v47 = vsel %vm5706_vm3, %v5704_v11, %v5574_v9 }
 0x8b1   : > { %18910 = vst [vmem:[#allocation150_spill] sm:$0xff] %v16257_v40  ;;  %18911 = vst [vmem:[#allocation56_spill] sm:$0xff] %v16259_v17  ;;  %v16262_v8 = vpop.f32.mrb[139].mxu1  ;;  %v16264_v50 = vpop.f32.mrb[139].mxu0  ;;  %8358 = vmatmul.mubr.msk.f32.gmra.mrb[188].mxu1 %vm5771_vm4, %v5769_v47  ;;  %8422 = vmatmul.mubr.msk.f32.gmra.mrb[188].mxu0 %vm5771_vm4, %v5769_v47  ;;  %v18917_v17 = vld [vmem:[#allocation203_spill] sm:$0xff] }
 0x8b2   : > { %18912 = vst [vmem:[#allocation179_spill] sm:$0xff] %v16262_v8  ;;  %18913 = vst [vmem:[#allocation196_spill] sm:$0xff] %v16264_v50  ;;  %v4935_v2 = vpop.permute.xlu1 %4934  ;;  %v5191_v63 = vpop.permute.xlu0 %5190  ;;  %6478 = vmatprep.mubr.f32.mxu1 %v18227_v25  ;;  %6927 = vmatprep.mubr.f32.mxu0 %v18227_v25  ;;  %v18918_v50 = vld [vmem:[#allocation218_spill] sm:$0xff] }
 0x8b3   : > { %5834 = vst.msk [vmem:[%s13327_s18 + $0x1f0] sm:$0xff] %vm5771_vm4, %v5769_v47  ;;  %v5063_v7 = vmul.f32 %v18914_v59, %v4935_v2  ;;  %v5319_v56 = vmul.f32 %v18915_v53, %v5191_v63  ;;  %v9909_v47 = vld [vmem:[%s10303_s11] sm:$0xff]  ;;  %v18923_v53 = vld [vmem:[#allocation265_spill] sm:$0xff] }
 0x8b4   : > { %v6935_v40 = vmul.f32 %v9909_v47, %v18917_v17  ;;  %v6937_v8 = vmul.f32 %v9909_v47, %v18918_v50  ;;  %v18920_v63 = vld [vmem:[#allocation31_spill] sm:$0xff]  ;;  %v9910_v50 = vld [vmem:[%s10303_s11 + $0x8] sm:$0xff] }
 0x8b5   : > { %v5640_v18 = vsel %vm5576_vm1, %v15970_v13, %v5063_v7  ;;  %v18919_v13 = vld [vmem:[#allocation263_spill] sm:$0xff]  ;;  %v6936_v59 = vmul.f32 %v9909_v47, %v18920_v63 }
 0x8b6   : > { %v5447_v37 = vpop.permute.xlu1 %5446  ;;  %v5705_v11 = vsel %vm5641_vm2, %v5640_v18, %v5319_v56  ;;  %v6934_v2 = vmul.f32 %v9909_v47, %v18919_v13  ;;  %v6939_v56 = vmul.f32 %v9910_v50, %v18923_v53  ;;  %v18928_v47 = vld [vmem:[#allocation62_spill] sm:$0xff]  ;;  %v9911_v13 = vld [vmem:[%s10303_s11 + $0x10] sm:$0xff]  ;;  %v18929_v63 = vld [vmem:[#allocation123_spill] sm:$0xff] }
 0x8b7   : > { %v5575_v9 = vmul.f32 %v18916_v42, %v5447_v37  ;;  %v18925_v42 = vld [vmem:[#allocation223_spill] sm:$0xff]  ;;  %v6943_v53 = vmul.f32 %v9911_v13, %v18929_v63 }
 0x8b9   : > { %v5770_v25 = vsel %vm5706_vm3, %v5705_v11, %v5575_v9  ;;  %v6941_v9 = vmul.f32 %v9910_v50, %v18925_v42  ;;  %v18932_v42 = vld [vmem:[#allocation78_spill] sm:$0xff] }
 0x8ba   : > { %5835 = vst.msk [vmem:[%s13327_s18 + $0x1f8] sm:$0xff] %vm5771_vm4, %v5770_v25  ;;  %8359 = vmatmul.mubr.msk.f32.gmra.mrb[190].mxu1 %vm5771_vm4, %v5770_v25  ;;  %8423 = vmatmul.mubr.msk.f32.gmra.mrb[190].mxu0 %vm5771_vm4, %v5770_v25  ;;  %v6940_v25 = vmul.f32 %v9910_v50, %v18928_v47  ;;  %v18935_v47 = vld [vmem:[#allocation206_spill] sm:$0xff] }
 0x8bb   : > { %7318 = vmatprep.mubr.f32.mxu1 %v6935_v40  ;;  %7703 = vmatprep.mubr.f32.mxu0 %v6937_v8  ;;  %v18926_v8 = vld [vmem:[#allocation144_spill] sm:$0xff]  ;;  %v18927_v40 = vld [vmem:[#allocation69_spill] sm:$0xff] }
 0x8bc   : > { %v16288_v7 = vpop.f32.mrb[140].mxu1  ;;  %v16290_v17 = vpop.f32.mrb[140].mxu0  ;;  %v6938_v11 = vmul.f32 %v9910_v50, %v18927_v40  ;;  %v9912_v50 = vld [vmem:[%s10303_s11 + $0x18] sm:$0xff] }
 0x8bd   : > { %18921 = vst [vmem:[#allocation11_spill] sm:$0xff] %v16288_v7  ;;  %18922 = vst [vmem:[#allocation128_spill] sm:$0xff] %v16290_v17  ;;  %v16294_v18 = vpop.f32.mrb[141].mxu1  ;;  %v16296_v37 = vpop.f32.mrb[141].mxu0  ;;  %v18930_v17 = vld [vmem:[#allocation114_spill] sm:$0xff] }
 0x8be   : > { %18924 = vst [vmem:[#allocation241_spill] sm:$0xff] %v16296_v37  ;;  %7319 = vmatmul.mubr.f32.vlgmr.msra.gmra.mrb[192].mxu1 %v6934_v2  ;;  %7704 = vmatmul.mubr.f32.vlgmr.msra.gmra.mrb[192].mxu0 %v6936_v59  ;;  %v6945_v7 = vmul.f32 %v9911_v13, %v18930_v17  ;;  %v18931_v2 = vld [vmem:[#allocation267_spill] sm:$0xff]  ;;  %v6949_v37 = vmul.f32 %v9912_v50, %v18935_v47 }
 0x8bf   : > { %8991 = vmatpush1.bf16.msra.mxu1 %v18926_v8  ;;  %7323 = vmatprep.mubr.f32.mxu1 %v6939_v56  ;;  %v6942_v59 = vmul.f32 %v9911_v13, %v18931_v2  ;;  %v6944_v56 = vmul.f32 %v9911_v13, %v18932_v42  ;;  %v18933_v8 = vld [vmem:[#allocation70_spill] sm:$0xff]  ;;  %v18936_v17 = vld [vmem:[#allocation135_spill] sm:$0xff]  ;;  %v18941_v42 = vld [vmem:[#allocation121_spill] sm:$0xff] }
 0x8c0   : > { %7708 = vmatprep.mubr.f32.mxu0 %v6941_v9  ;;  %8976 = vmatprep.subr.bf16.mxu1 %v18597_v58  ;;  %v18934_v9 = vld [vmem:[#allocation225_spill] sm:$0xff]  ;;  %v9913_v2 = vld [vmem:[%s10303_s11 + $0x20] sm:$0xff] }
 0x8c1   : > { %v6947_v40 = vmul.f32 %v9912_v50, %v18934_v9  ;;  %v18942_v9 = vld [vmem:[#allocation139_spill] sm:$0xff] }
 0x8c2   : > { %7324 = vmatmul.mubr.f32.gmra.mrb[194].mxu1 %v6938_v11  ;;  %7709 = vmatmul.mubr.f32.gmra.mrb[194].mxu0 %v6940_v25  ;;  %v18937_v11 = vld [vmem:[#allocation26_spill] sm:$0xff]  ;;  %v6953_v47 = vmul.f32 %v9913_v2, %v18942_v9 }
 0x8c3   : > { %7328 = vmatprep.mubr.f32.mxu1 %v6943_v53  ;;  %7713 = vmatprep.mubr.f32.mxu0 %v6945_v7  ;;  %v6946_v7 = vmul.f32 %v9912_v50, %v18936_v17  ;;  %v6948_v25 = vmul.f32 %v9912_v50, %v18937_v11  ;;  %v18940_v53 = vld [vmem:[#allocation183_spill] sm:$0xff]  ;;  %v18947_v11 = vld [vmem:[#allocation65_spill] sm:$0xff] }
 0x8c4   : > { %8992 = vmatpush1.bf16.msra.mxu1 %v18933_v8  ;;  %v6951_v8 = vmul.f32 %v9913_v2, %v18941_v42  ;;  %v18948_v42 = vld [vmem:[#allocation239_spill] sm:$0xff] }
 0x8c5   : > { %8977 = vmatprep.subr.bf16.mxu1 %v18597_v58 }
 0x8c6   : > { %7329 = vmatmul.mubr.f32.gmra.mrb[196].mxu1 %v6942_v59  ;;  %7714 = vmatmul.mubr.f32.gmra.mrb[196].mxu0 %v6944_v56 }
 0x8c7   : > { %7333 = vmatprep.mubr.f32.mxu1 %v6947_v40  ;;  %7718 = vmatprep.mubr.f32.mxu0 %v6949_v37  ;;  %v18945_v37 = vld [vmem:[#allocation271_spill] sm:$0xff]  ;;  %v18946_v40 = vld [vmem:[#allocation233_spill] sm:$0xff] }
 0x8c8   : > { %v16315_v63 = vpop.f32.mrb[142].mxu1  ;;  %v16317_v13 = vpop.f32.mrb[142].mxu0  ;;  %8993 = vmatpush1.bf16.msra.mxu1 %v18940_v53  ;;  %v6950_v50 = vmul.f32 %v9913_v2, %v18945_v37  ;;  %v6952_v17 = vmul.f32 %v9913_v2, %v18946_v40  ;;  %v9914_v53 = vld [vmem:[%s10303_s11 + $0x28] sm:$0xff]  ;;  %v9915_v2 = vld [vmem:[%s10303_s11 + $0x30] sm:$0xff] }
 0x8c9   : > { %18938 = vst [vmem:[#allocation116_spill] sm:$0xff] %v16315_v63  ;;  %18939 = vst [vmem:[#allocation16_spill] sm:$0xff] %v16317_v13  ;;  %v16323_v59 = vpop.f32.mrb[143].mxu1  ;;  %v16325_v56 = vpop.f32.mrb[143].mxu0  ;;  %8978 = vmatprep.subr.bf16.mxu1 %v18597_v58  ;;  %v6955_v9 = vmul.f32 %v9914_v53, %v18948_v42  ;;  %v18949_v13 = vld [vmem:[#allocation180_spill] sm:$0xff]  ;;  %v18953_v40 = vld [vmem:[#allocation245_spill] sm:$0xff] }
 0x8ca   : > { %18943 = vst [vmem:[#allocation146_spill] sm:$0xff] %v16323_v59  ;;  %18944 = vst [vmem:[#allocation55_spill] sm:$0xff] %v16325_v56  ;;  %7334 = vmatmul.mubr.f32.gmra.mrb[198].mxu1 %v6946_v7  ;;  %7719 = vmatmul.mubr.f32.gmra.mrb[198].mxu0 %v6948_v25  ;;  %v6957_v63 = vmul.f32 %v9914_v53, %v18949_v13  ;;  %v18950_v7 = vld [vmem:[#allocation214_spill] sm:$0xff]  ;;  %v18952_v37 = vld [vmem:[#allocation260_spill] sm:$0xff] }
 0x8cb   : > { %7338 = vmatprep.mubr.f32.mxu1 %v6951_v8  ;;  %7723 = vmatprep.mubr.f32.mxu0 %v6953_v47  ;;  %v6954_v25 = vmul.f32 %v9914_v53, %v18950_v7  ;;  %v18951_v8 = vld [vmem:[#allocation35_spill] sm:$0xff]  ;;  %v18954_v56 = vld [vmem:[#allocation217_spill] sm:$0xff]  ;;  %v18955_v13 = vld [vmem:[#allocation38_spill] sm:$0xff] }
 0x8cc   : > { %8994 = vmatpush1.bf16.msra.mxu1 %v18947_v11  ;;  %v6956_v47 = vmul.f32 %v9914_v53, %v18951_v8  ;;  %v6959_v11 = vmul.f32 %v9915_v2, %v18953_v40  ;;  %v6961_v42 = vmul.f32 %v9915_v2, %v18954_v56  ;;  %v18959_v7 = vld [vmem:[#allocation237_spill] sm:$0xff]  ;;  %v9916_v8 = vld [vmem:[%s10303_s11 + $0x38] sm:$0xff]  ;;  %v18961_v40 = vld [vmem:[#allocation156_spill] sm:$0xff] }
 0x8cd   : > { %8979 = vmatprep.subr.bf16.mxu1 %v18597_v58  ;;  %v6965_v59 = vmul.f32 %v9916_v8, %v18961_v40 }
 0x8ce   : > { %7339 = vmatmul.mubr.f32.gmra.mrb[200].mxu1 %v6950_v50  ;;  %7724 = vmatmul.mubr.f32.gmra.mrb[200].mxu0 %v6952_v17  ;;  %v18956_v50 = vld [vmem:[#allocation246_spill] sm:$0xff] }
 0x8cf   : > { %7343 = vmatprep.mubr.f32.mxu1 %v6955_v9  ;;  %7728 = vmatprep.mubr.f32.mxu0 %v6957_v63  ;;  %v6958_v63 = vmul.f32 %v9915_v2, %v18955_v13  ;;  %v6960_v17 = vmul.f32 %v9915_v2, %v18956_v50  ;;  %v18964_v2 = vld [vmem:[#allocation122_spill] sm:$0xff]  ;;  %v18966_v50 = vld [vmem:[#allocation72_spill] sm:$0xff] }
 0x8d0   : > { %8995 = vmatpush1.bf16.msra.mxu1 %v18952_v37  ;;  %v18960_v37 = vld [vmem:[#allocation97_spill] sm:$0xff] }
 0x8d1   : > { %8980 = vmatprep.subr.bf16.mxu1 %v18597_v58  ;;  %v6963_v56 = vmul.f32 %v9916_v8, %v18960_v37  ;;  %v18967_v37 = vld [vmem:[#allocation108_spill] sm:$0xff] }
 0x8d2   : > { %7344 = vmatmul.mubr.f32.gmra.mrb[202].mxu1 %v6954_v25  ;;  %7729 = vmatmul.mubr.f32.gmra.mrb[202].mxu0 %v6956_v47 }
 0x8d3   : > { %7348 = vmatprep.mubr.f32.mxu1 %v6959_v11  ;;  %7733 = vmatprep.mubr.f32.mxu0 %v6961_v42  ;;  %v6962_v11 = vmul.f32 %v9916_v8, %v18964_v2  ;;  %v18965_v42 = vld [vmem:[#allocation37_spill] sm:$0xff]  ;;  %v18971_v2 = vld [vmem:[#allocation207_spill] sm:$0xff] }
 0x8d4   : > { %v16344_v9 = vpop.f32.mrb[144].mxu1  ;;  %v16346_v53 = vpop.f32.mrb[144].mxu0  ;;  %8996 = vmatpush1.bf16.msra.mxu1 %v18959_v7  ;;  %v6964_v13 = vmul.f32 %v9916_v8, %v18965_v42  ;;  %v9917_v7 = vld [vmem:[%s10303_s11 + $0x40] sm:$0xff]  ;;  %v9918_v8 = vld [vmem:[%s10303_s11 + $0x48] sm:$0xff] }
 0x8d5   : > { %18957 = vst [vmem:[#allocation86_spill] sm:$0xff] %v16344_v9  ;;  %18958 = vst [vmem:[#allocation168_spill] sm:$0xff] %v16346_v53  ;;  %v16352_v25 = vpop.f32.mrb[145].mxu1  ;;  %v16354_v47 = vpop.f32.mrb[145].mxu0  ;;  %8981 = vmatprep.subr.bf16.mxu1 %v18597_v58  ;;  %v6967_v40 = vmul.f32 %v9917_v7, %v18967_v37  ;;  %v18968_v53 = vld [vmem:[#allocation125_spill] sm:$0xff]  ;;  %v18972_v42 = vld [vmem:[#allocation147_spill] sm:$0xff] }
 0x8d6   : > { %18962 = vst [vmem:[#allocation104_spill] sm:$0xff] %v16352_v25  ;;  %18963 = vst [vmem:[#allocation186_spill] sm:$0xff] %v16354_v47  ;;  %7349 = vmatmul.mubr.f32.gmra.mrb[204].mxu1 %v6958_v63  ;;  %7734 = vmatmul.mubr.f32.gmra.mrb[204].mxu0 %v6960_v17  ;;  %v6969_v9 = vmul.f32 %v9917_v7, %v18968_v53  ;;  %v18969_v63 = vld [vmem:[#allocation220_spill] sm:$0xff]  ;;  %v18973_v47 = vld [vmem:[#allocation42_spill] sm:$0xff] }
 0x8d7   : > { %7353 = vmatprep.mubr.f32.mxu1 %v6963_v56  ;;  %7738 = vmatprep.mubr.f32.mxu0 %v6965_v59  ;;  %v6966_v17 = vmul.f32 %v9917_v7, %v18969_v63  ;;  %v18970_v59 = vld [vmem:[#allocation17_spill] sm:$0xff]  ;;  %v6973_v37 = vmul.f32 %v9918_v8, %v18973_v47 }
 0x8d8   : > { %8997 = vmatpush1.bf16.msra.mxu1 %v18966_v50  ;;  %v6968_v56 = vmul.f32 %v9917_v7, %v18970_v59  ;;  %v6971_v50 = vmul.f32 %v9918_v8, %v18972_v42  ;;  %v18974_v53 = vld [vmem:[#allocation253_spill] sm:$0xff]  ;;  %v18979_v42 = vld [vmem:[#allocation127_spill] sm:$0xff] }
 0x8d9   : > { %8982 = vmatprep.subr.bf16.mxu1 %v18597_v58  ;;  %v18977_v63 = vld [vmem:[#allocation81_spill] sm:$0xff] }
 0x8da   : > { %7354 = vmatmul.mubr.f32.gmra.mrb[206].mxu1 %v6962_v11  ;;  %7739 = vmatmul.mubr.f32.gmra.mrb[206].mxu0 %v6964_v13  ;;  %v18975_v11 = vld [vmem:[#allocation202_spill] sm:$0xff]  ;;  %v9919_v59 = vld [vmem:[%s10303_s11 + $0x50] sm:$0xff] }
 0x8db   : > { %7358 = vmatprep.mubr.f32.mxu1 %v6967_v40  ;;  %7743 = vmatprep.mubr.f32.mxu0 %v6969_v9  ;;  %v6970_v9 = vmul.f32 %v9918_v8, %v18974_v53  ;;  %v6972_v13 = vmul.f32 %v9918_v8, %v18975_v11  ;;  %v6977_v25 = vmul.f32 %v9919_v59, %v18979_v42  ;;  %v18980_v8 = vld [vmem:[#allocation222_spill] sm:$0xff]  ;;  %v18983_v42 = vld [vmem:[#allocation213_spill] sm:$0xff] }
 0x8dc   : > { %8998 = vmatpush1.bf16.msra.mxu1 %v18971_v2  ;;  %v18978_v2 = vld [vmem:[#allocation126_spill] sm:$0xff] }
 0x8dd   : > { %8983 = vmatprep.subr.bf16.mxu1 %v18597_v58  ;;  %v6975_v47 = vmul.f32 %v9919_v59, %v18978_v2  ;;  %v9920_v11 = vld [vmem:[%s10303_s11 + $0x58] sm:$0xff] }
 0x8de   : > { %7359 = vmatmul.mubr.f32.gmra.mrb[208].mxu1 %v6966_v17  ;;  %7744 = vmatmul.mubr.f32.gmra.mrb[208].mxu0 %v6968_v56 }
 0x8df   : > { %7363 = vmatprep.mubr.f32.mxu1 %v6971_v50  ;;  %7748 = vmatprep.mubr.f32.mxu0 %v6973_v37  ;;  %v6974_v50 = vmul.f32 %v9919_v59, %v18980_v8  ;;  %v18981_v37 = vld [vmem:[#allocation176_spill] sm:$0xff] }
 0x8e0   : > { %v16373_v40 = vpop.f32.mrb[146].mxu1  ;;  %v16375_v7 = vpop.f32.mrb[146].mxu0  ;;  %8999 = vmatpush1.bf16.msra.mxu1 %v18977_v63  ;;  %v6976_v53 = vmul.f32 %v9919_v59, %v18981_v37  ;;  %v18982_v63 = vld [vmem:[#allocation44_spill] sm:$0xff]  ;;  %v9921_v59 = vld [vmem:[%s10303_s11 + $0x60] sm:$0xff] }
 0x8e1   : > { %18976 = vst [vmem:[#allocation115_spill] sm:$0xff] %v16375_v7  ;;  %v16381_v17 = vpop.f32.mrb[147].mxu1  ;;  %v16383_v56 = vpop.f32.mrb[147].mxu0  ;;  %8984 = vmatprep.subr.bf16.mxu1 %v18597_v58  ;;  %v6979_v2 = vmul.f32 %v9920_v11, %v18982_v63  ;;  %v6981_v7 = vmul.f32 %v9920_v11, %v18983_v42  ;;  %v18987_v37 = vld [vmem:[#allocation219_spill] sm:$0xff] }
 0x8e2   : > { %7364 = vmatmul.mubr.f32.gmra.mrb[210].mxu1 %v6970_v9  ;;  %7749 = vmatmul.mubr.f32.gmra.mrb[210].mxu0 %v6972_v13  ;;  %v18984_v9 = vld [vmem:[#allocation18_spill] sm:$0xff]  ;;  %v6985_v63 = vmul.f32 %v9921_v59, %v18987_v37 }
 0x8e3   : > { %7368 = vmatprep.mubr.f32.mxu1 %v6975_v47  ;;  %7753 = vmatprep.mubr.f32.mxu0 %v6977_v25  ;;  %v6978_v13 = vmul.f32 %v9920_v11, %v18984_v9  ;;  %v18985_v25 = vld [vmem:[#allocation60_spill] sm:$0xff]  ;;  %v18991_v9 = vld [vmem:[#allocation74_spill] sm:$0xff] }
 0x8e4   : > { %9000 = vmatpush1.bf16.msra.mxu1 %v15633_v5  ;;  %v6980_v47 = vmul.f32 %v9920_v11, %v18985_v25  ;;  %v18986_v5 = vld [vmem:[#allocation182_spill] sm:$0xff] }
 0x8e5   : > { %8985 = vmatprep.subr.bf16.mxu1 %v18597_v58  ;;  %v6983_v8 = vmul.f32 %v9921_v59, %v18986_v5  ;;  %v18992_v5 = vld [vmem:[#allocation188_spill] sm:$0xff] }
 0x8e6   : > { %7369 = vmatmul.mubr.f32.gmra.mrb[212].mxu1 %v6974_v50  ;;  %7754 = vmatmul.mubr.f32.gmra.mrb[212].mxu0 %v6976_v53  ;;  %v18988_v50 = vld [vmem:[#allocation181_spill] sm:$0xff]  ;;  %v18989_v53 = vld [vmem:[#allocation43_spill] sm:$0xff] }
 0x8e7   : > { %7373 = vmatprep.mubr.f32.mxu1 %v6979_v2  ;;  %7758 = vmatprep.mubr.f32.mxu0 %v6981_v7  ;;  %v6982_v7 = vmul.f32 %v9921_v59, %v18988_v50  ;;  %v6984_v2 = vmul.f32 %v9921_v59, %v18989_v53  ;;  %v18993_v59 = vld [vmem:[#allocation46_spill] sm:$0xff]  ;;  %v9923_v50 = vld [vmem:[%s10303_s11 + $0x70] sm:$0xff] }
 0x8e8   : > { %9001 = vmatpush1.bf16.msra.mxu1 %v15694_v3  ;;  %v9922_v3 = vld [vmem:[%s10303_s11 + $0x68] sm:$0xff]  ;;  %v18995_v53 = vld [vmem:[#allocation145_spill] sm:$0xff] }
 0x8e9   : > { %8986 = vmatprep.subr.bf16.mxu1 %v18597_v58  ;;  %v6987_v25 = vmul.f32 %v9922_v3, %v18991_v9  ;;  %v6989_v37 = vmul.f32 %v9922_v3, %v18992_v5  ;;  %v6991_v9 = vmul.f32 %v9923_v50, %v18995_v53  ;;  %v18996_v5 = vld [vmem:[#allocation48_spill] sm:$0xff] }
 0x8ea   : > { %7374 = vmatmul.mubr.f32.gmra.mrb[214].mxu1 %v6978_v13  ;;  %7759 = vmatmul.mubr.f32.gmra.mrb[214].mxu0 %v6980_v47 }
 0x8eb   : > { %7378 = vmatprep.mubr.f32.mxu1 %v6983_v8  ;;  %7763 = vmatprep.mubr.f32.mxu0 %v6985_v63  ;;  %v6986_v8 = vmul.f32 %v9922_v3, %v18993_v59  ;;  %v18994_v63 = vld [vmem:[#allocation257_spill] sm:$0xff] }
 0x8ec   : > { %v16402_v42 = vpop.f32.mrb[148].mxu1  ;;  %v16404_v11 = vpop.f32.mrb[148].mxu0  ;;  %9002 = vmatpush1.bf16.msra.mxu1 %v15760_v52  ;;  %v6988_v52 = vmul.f32 %v9922_v3, %v18994_v63  ;;  %v9924_v3 = vld [vmem:[%s10303_s11 + $0x78] sm:$0xff]  ;;  %v19000_v63 = vld [vmem:[#allocation193_spill] sm:$0xff] }
 0x8ed   : > { %18990 = vst [vmem:[#allocation85_spill] sm:$0xff] %v16404_v11  ;;  %v16410_v13 = vpop.f32.mrb[149].mxu1  ;;  %v16412_v47 = vpop.f32.mrb[149].mxu0  ;;  %8987 = vmatprep.subr.bf16.mxu1 %v18597_v58  ;;  %v6993_v11 = vmul.f32 %v9923_v50, %v18996_v5  ;;  %v6997_v53 = vmul.f32 %v9924_v3, %v19000_v63 }
 0x8ee   : > { %7379 = vmatmul.mubr.f32.gmra.mrb[216].mxu1 %v6982_v7  ;;  %7764 = vmatmul.mubr.f32.gmra.mrb[216].mxu0 %v6984_v2  ;;  %v18997_v7 = vld [vmem:[#allocation25_spill] sm:$0xff] }
 0x8ef   : > { %7383 = vmatprep.mubr.f32.mxu1 %v6987_v25  ;;  %7768 = vmatprep.mubr.f32.mxu0 %v6989_v37  ;;  %v6990_v2 = vmul.f32 %v9923_v50, %v18997_v7  ;;  %v18998_v25 = vld [vmem:[#allocation226_spill] sm:$0xff]  ;;  %v19005_v7 = vld [vmem:[#allocation149_spill] sm:$0xff] }
 0x8f0   : > { %9003 = vmatpush1.bf16.msra.mxu1 %v15821_v62  ;;  %v6992_v37 = vmul.f32 %v9923_v50, %v18998_v25  ;;  %v18999_v62 = vld [vmem:[#allocation240_spill] sm:$0xff] }
 0x8f1   : > { %8988 = vmatprep.subr.bf16.mxu1 %v18597_v58  ;;  %v6995_v59 = vmul.f32 %v9924_v3, %v18999_v62  ;;  %v19006_v62 = vld [vmem:[#allocation50_spill] sm:$0xff] }
 0x8f2   : > { %7384 = vmatmul.mubr.f32.gmra.mrb[218].mxu1 %v6986_v8  ;;  %7769 = vmatmul.mubr.f32.gmra.mrb[218].mxu0 %v6988_v52  ;;  %v19001_v8 = vld [vmem:[#allocation230_spill] sm:$0xff]  ;;  %v19002_v52 = vld [vmem:[#allocation129_spill] sm:$0xff] }
 0x8f3   : > { %7388 = vmatprep.mubr.f32.mxu1 %v6991_v9  ;;  %7773 = vmatprep.mubr.f32.mxu0 %v6993_v11  ;;  %v6994_v11 = vmul.f32 %v9924_v3, %v19001_v8  ;;  %v6996_v9 = vmul.f32 %v9924_v3, %v19002_v52  ;;  %v19008_v3 = vld [vmem:[#allocation184_spill] sm:$0xff]  ;;  %v19010_v52 = vld [vmem:[#allocation105_spill] sm:$0xff] }
 0x8f4   : > { %9004 = vmatpush1.bf16.msra.mxu1 %v15867_v61  ;;  %v9925_v61 = vld [vmem:[%s10303_s11 + $0x80] sm:$0xff]  ;;  %v9926_v8 = vld [vmem:[%s10303_s11 + $0x88] sm:$0xff] }
 0x8f5   : > { %8989 = vmatprep.subr.bf16.mxu1 %v18597_v58  ;;  %v6999_v25 = vmul.f32 %v9925_v61, %v19005_v7  ;;  %v7001_v63 = vmul.f32 %v9925_v61, %v19006_v62  ;;  %v7003_v7 = vmul.f32 %v9926_v8, %v19010_v52  ;;  %v19011_v62 = vld [vmem:[#allocation111_spill] sm:$0xff] }
 0x8f6   : > { %7389 = vmatmul.mubr.f32.gmra.mrb[220].mxu1 %v6990_v2  ;;  %7774 = vmatmul.mubr.f32.gmra.mrb[220].mxu0 %v6992_v37 }
 0x8f7   : > { %7393 = vmatprep.mubr.f32.mxu1 %v6995_v59  ;;  %7778 = vmatprep.mubr.f32.mxu0 %v6997_v53  ;;  %v6998_v59 = vmul.f32 %v9925_v61, %v19008_v3  ;;  %v19009_v53 = vld [vmem:[#allocation197_spill] sm:$0xff] }
 0x8f8   : > { %v16431_v5 = vpop.f32.mrb[150].mxu1  ;;  %v16433_v50 = vpop.f32.mrb[150].mxu0  ;;  %9005 = vmatpush1.bf16.msra.mxu1 %v15915_v1  ;;  %v7000_v1 = vmul.f32 %v9925_v61, %v19009_v53  ;;  %v19014_v3 = vld [vmem:[#allocation153_spill] sm:$0xff]  ;;  %v19015_v61 = vld [vmem:[#allocation167_spill] sm:$0xff] }
 0x8f9   : > { %19003 = vst [vmem:[#allocation189_spill] sm:$0xff] %v16431_v5  ;;  %19004 = vst [vmem:[#allocation58_spill] sm:$0xff] %v16433_v50  ;;  %v16439_v2 = vpop.f32.mrb[151].mxu1  ;;  %v16441_v37 = vpop.f32.mrb[151].mxu0  ;;  %8990 = vmatprep.subr.bf16.mxu1 %v18597_v58  ;;  %v7005_v50 = vmul.f32 %v9926_v8, %v19011_v62  ;;  %v19012_v58 = vld [vmem:[#allocation262_spill] sm:$0xff] }
 0x8fa   : > { %19007 = vst [vmem:[#allocation152_spill] sm:$0xff] %v16441_v37  ;;  %7394 = vmatmul.mubr.f32.gmra.mrb[222].mxu1 %v6994_v11  ;;  %7779 = vmatmul.mubr.f32.gmra.mrb[222].mxu0 %v6996_v9  ;;  %v7002_v11 = vmul.f32 %v9926_v8, %v19012_v58  ;;  %v19013_v9 = vld [vmem:[#allocation120_spill] sm:$0xff]  ;;  %v9928_v62 = vld [vmem:[%s10303_s11 + $0x98] sm:$0xff] }
 0x8fb   : > { %7398 = vmatprep.mubr.f32.mxu1 %v6999_v25  ;;  %7783 = vmatprep.mubr.f32.mxu0 %v7001_v63  ;;  %v7004_v25 = vmul.f32 %v9926_v8, %v19013_v9  ;;  %v9927_v63 = vld [vmem:[%s10303_s11 + $0x90] sm:$0xff]  ;;  %v19020_v8 = vld [vmem:[#allocation234_spill] sm:$0xff] }
 0x8fc   : > { %9006 = vmatpush1.bf16.msra.mxu1 %v15952_v14  ;;  %v7007_v5 = vmul.f32 %v9927_v63, %v19014_v3  ;;  %v7009_v53 = vmul.f32 %v9927_v63, %v19015_v61  ;;  %v19016_v14 = vld [vmem:[#allocation243_spill] sm:$0xff]  ;;  %v7011_v58 = vmul.f32 %v9928_v62, %v19020_v8  ;;  %v19021_v9 = vld [vmem:[#allocation98_spill] sm:$0xff] }
 0x8fd   : > { %v7013_v3 = vmul.f32 %v9928_v62, %v19021_v9  ;;  %v19028_v9 = vld [vmem:[#allocation137_spill] sm:$0xff] }
 0x8fe   : > { %7399 = vmatmul.mubr.f32.gmra.mrb[224].mxu1 %v6998_v59  ;;  %7784 = vmatmul.mubr.f32.gmra.mrb[224].mxu0 %v7000_v1  ;;  %v7006_v59 = vmul.f32 %v9927_v63, %v19016_v14  ;;  %v19017_v1 = vld [vmem:[#allocation209_spill] sm:$0xff]  ;;  %v19026_v14 = vld [vmem:[#allocation268_spill] sm:$0xff] }
 0x8ff   : > { %7403 = vmatprep.mubr.f32.mxu1 %v7003_v7  ;;  %7788 = vmatprep.mubr.f32.mxu0 %v7005_v50  ;;  %v7008_v52 = vmul.f32 %v9927_v63, %v19017_v1  ;;  %v19025_v63 = vld [vmem:[#allocation266_spill] sm:$0xff] }
 0x900   : > { %v7012_v61 = vmul.f32 %v9928_v62, %v19025_v63 }
 0x902   : > { %7404 = vmatmul.mubr.f32.gmra.mrb[226].mxu1 %v7002_v11  ;;  %7789 = vmatmul.mubr.f32.gmra.mrb[226].mxu0 %v7004_v25 }
 0x903   : > { %7408 = vmatprep.mubr.f32.mxu1 %v7007_v5  ;;  %7793 = vmatprep.mubr.f32.mxu0 %v7009_v53  ;;  %v19024_v5 = vld [vmem:[#allocation33_spill] sm:$0xff]  ;;  %v9929_v53 = vld [vmem:[%s10303_s11 + $0xa0] sm:$0xff] }
 0x904   : > { %v16457_v7 = vpop.f32.mrb[152].mxu1  ;;  %v16459_v50 = vpop.f32.mrb[152].mxu0  ;;  %v7010_v25 = vmul.f32 %v9928_v62, %v19024_v5  ;;  %v7015_v1 = vmul.f32 %v9929_v53, %v19026_v14  ;;  %v19031_v5 = vld [vmem:[#allocation249_spill] sm:$0xff]  ;;  %v19035_v14 = vld [vmem:[#allocation34_spill] sm:$0xff] }
 0x905   : > { %19018 = vst [vmem:[#allocation57_spill] sm:$0xff] %v16457_v7  ;;  %19019 = vst [vmem:[#allocation14_spill] sm:$0xff] %v16459_v50  ;;  %v16464_v37 = vpop.f32.mrb[153].mxu1  ;;  %v16466_v11 = vpop.f32.mrb[153].mxu0  ;;  %v19027_v50 = vld [vmem:[#allocation134_spill] sm:$0xff]  ;;  %v7014_v7 = vmul.f32 %v9929_v53, %v19028_v9 }
 0x906   : > { %19022 = vst [vmem:[#allocation75_spill] sm:$0xff] %v16464_v37  ;;  %19023 = vst [vmem:[#allocation71_spill] sm:$0xff] %v16466_v11  ;;  %7409 = vmatmul.mubr.f32.gmra.mrb[228].mxu1 %v7006_v59  ;;  %7794 = vmatmul.mubr.f32.gmra.mrb[228].mxu0 %v7008_v52  ;;  %v7017_v8 = vmul.f32 %v9929_v53, %v19027_v50  ;;  %v19029_v59 = vld [vmem:[#allocation51_spill] sm:$0xff]  ;;  %v19036_v9 = vld [vmem:[#allocation158_spill] sm:$0xff] }
 0x907   : > { %7413 = vmatprep.mubr.f32.mxu1 %v7011_v58  ;;  %7798 = vmatprep.mubr.f32.mxu0 %v7013_v3  ;;  %v7016_v52 = vmul.f32 %v9929_v53, %v19029_v59  ;;  %v9930_v58 = vld [vmem:[%s10303_s11 + $0xa8] sm:$0xff]  ;;  %v19030_v3 = vld [vmem:[#allocation77_spill] sm:$0xff] }
 0x908   : > { %v7019_v11 = vmul.f32 %v9930_v58, %v19030_v3  ;;  %v7021_v37 = vmul.f32 %v9930_v58, %v19031_v5  ;;  %v19037_v3 = vld [vmem:[#allocation54_spill] sm:$0xff] }
 0x90a   : > { %7414 = vmatmul.mubr.f32.gmra.mrb[230].mxu1 %v7010_v25  ;;  %7799 = vmatmul.mubr.f32.gmra.mrb[230].mxu0 %v7012_v61  ;;  %v19034_v61 = vld [vmem:[#allocation269_spill] sm:$0xff] }
 0x90b   : > { %7418 = vmatprep.mubr.f32.mxu1 %v7015_v1  ;;  %7803 = vmatprep.mubr.f32.mxu0 %v7017_v8  ;;  %v7018_v53 = vmul.f32 %v9930_v58, %v19034_v61  ;;  %v7020_v1 = vmul.f32 %v9930_v58, %v19035_v14  ;;  %v9931_v8 = vld [vmem:[%s10303_s11 + $0xb0] sm:$0xff]  ;;  %v9932_v61 = vld [vmem:[%s10303_s11 + $0xb8] sm:$0xff] }
 0x90c   : > { %v7023_v59 = vmul.f32 %v9931_v8, %v19036_v9  ;;  %v7025_v5 = vmul.f32 %v9931_v8, %v19037_v3  ;;  %v7027_v58 = vmul.f32 %v9932_v61, %v15743_v26  ;;  %v7029_v14 = vmul.f32 %v9932_v61, %v15745_v33 }
 0x90d   : > { %v16478_v62 = vpop.f32.mrb[154].mxu1  ;;  %v16480_v63 = vpop.f32.mrb[154].mxu0 }
 0x90e   : > { %19032 = vst [vmem:[#allocation100_spill] sm:$0xff] %v16478_v62  ;;  %19033 = vst [vmem:[#allocation143_spill] sm:$0xff] %v16480_v63  ;;  %7419 = vmatmul.mubr.f32.gmra.mrb[232].mxu1 %v7014_v7  ;;  %7804 = vmatmul.mubr.f32.gmra.mrb[232].mxu0 %v7016_v52  ;;  %v16482_v50 = vpop.f32.mrb[155].mxu1  ;;  %v16484_v25 = vpop.f32.mrb[155].mxu0  ;;  %v19038_v7 = vld [vmem:[#allocation95_spill] sm:$0xff]  ;;  %v19039_v63 = vld [vmem:[#allocation242_spill] sm:$0xff] }
 0x90f   : > { %7423 = vmatprep.mubr.f32.mxu1 %v7019_v11  ;;  %7808 = vmatprep.mubr.f32.mxu0 %v7021_v37  ;;  %v7022_v52 = vmul.f32 %v9931_v8, %v19038_v7  ;;  %v7024_v62 = vmul.f32 %v9931_v8, %v19039_v63  ;;  %v7026_v63 = vmul.f32 %v9932_v61, %v15736_v44 }
 0x912   : > { %7424 = vmatmul.mubr.f32.gmra.mrb[234].mxu1 %v7018_v53  ;;  %7809 = vmatmul.mubr.f32.gmra.mrb[234].mxu0 %v7020_v1  ;;  %v19040_v1 = vld [vmem:[#allocation73_spill] sm:$0xff] }
 0x913   : > { %7428 = vmatprep.mubr.f32.mxu1 %v7023_v59  ;;  %7813 = vmatprep.mubr.f32.mxu0 %v7025_v5  ;;  %v7028_v8 = vmul.f32 %v9932_v61, %v19040_v1  ;;  %v9933_v59 = vld [vmem:[%s10303_s11 + $0xc0] sm:$0xff] }
 0x914   : > { %v16493_v11 = vpop.f32.mrb[156].mxu1  ;;  %v16495_v37 = vpop.f32.mrb[156].mxu0  ;;  %v7031_v3 = vmul.f32 %v9933_v59, %v15798_v55  ;;  %v7033_v26 = vmul.f32 %v9933_v59, %v15800_v24  ;;  %v7030_v44 = vmul.f32 %v9933_v59, %v15791_v16  ;;  %v9934_v55 = vld [vmem:[%s10303_s11 + $0xc8] sm:$0xff]  ;;  %v9935_v16 = vld [vmem:[%s10303_s11 + $0xd0] sm:$0xff] }
 0x915   : > { %v16500_v9 = vpop.f32.mrb[157].mxu1  ;;  %v16502_v53 = vpop.f32.mrb[157].mxu0 }
 0x916   : > { %7429 = vmatmul.mubr.f32.gmra.mrb[236].mxu1 %v7022_v52  ;;  %7814 = vmatmul.mubr.f32.gmra.mrb[236].mxu0 %v7024_v62  ;;  %v19043_v52 = vld [vmem:[#allocation191_spill] sm:$0xff] }
 0x917   : > { %7433 = vmatprep.mubr.f32.mxu1 %v7027_v58  ;;  %7818 = vmatprep.mubr.f32.mxu0 %v7029_v14  ;;  %v7032_v61 = vmul.f32 %v9933_v59, %v19043_v52  ;;  %v19044_v58 = vld [vmem:[#allocation175_spill] sm:$0xff]  ;;  %v19045_v14 = vld [vmem:[#allocation113_spill] sm:$0xff]  ;;  %v7039_v59 = vmul.f32 %v9935_v16, %v15899_v30  ;;  %v7041_v52 = vmul.f32 %v9935_v16, %v15901_v4 }
 0x918   : > { %v7035_v24 = vmul.f32 %v9934_v55, %v19044_v58  ;;  %v7037_v1 = vmul.f32 %v9934_v55, %v19045_v14  ;;  %v9936_v14 = vld [vmem:[%s10303_s11 + $0xd8] sm:$0xff] }
 0x919   : > { %v16509_v5 = vpop.f32.mrb[158].mxu1  ;;  %v16511_v33 = vpop.f32.mrb[158].mxu0  ;;  %v7045_v30 = vmul.f32 %v9936_v14, %v15949_v57 }
 0x91a   : > { %19041 = vst [vmem:[#allocation161_spill] sm:$0xff] %v16509_v5  ;;  %19042 = vst [vmem:[#allocation94_spill] sm:$0xff] %v16511_v33  ;;  %7434 = vmatmul.mubr.f32.gmra.mrb[238].mxu1 %v7026_v63  ;;  %7819 = vmatmul.mubr.f32.gmra.mrb[238].mxu0 %v7028_v8  ;;  %v16513_v7 = vpop.f32.mrb[159].mxu1  ;;  %v16515_v62 = vpop.f32.mrb[159].mxu0  ;;  %v19046_v63 = vld [vmem:[#allocation174_spill] sm:$0xff]  ;;  %v19047_v33 = vld [vmem:[#allocation132_spill] sm:$0xff] }
 0x91b   : > { %7438 = vmatprep.mubr.f32.mxu1 %v7031_v3  ;;  %7823 = vmatprep.mubr.f32.mxu0 %v7033_v26  ;;  %v7034_v8 = vmul.f32 %v9934_v55, %v19046_v63  ;;  %v7036_v5 = vmul.f32 %v9934_v55, %v19047_v33  ;;  %v19049_v55 = vld [vmem:[#allocation106_spill] sm:$0xff] }
 0x91e   : > { %7439 = vmatmul.mubr.f32.gmra.mrb[240].mxu1 %v7030_v44  ;;  %7824 = vmatmul.mubr.f32.gmra.mrb[240].mxu0 %v7032_v61  ;;  %v19048_v61 = vld [vmem:[#allocation238_spill] sm:$0xff] }
 0x91f   : > { %7443 = vmatprep.mubr.f32.mxu1 %v7035_v24  ;;  %7828 = vmatprep.mubr.f32.mxu0 %v7037_v1  ;;  %v7038_v33 = vmul.f32 %v9935_v16, %v19048_v61  ;;  %v7040_v24 = vmul.f32 %v9935_v16, %v19049_v55  ;;  %v7043_v1 = vmul.f32 %v9936_v14, %v15947_v19  ;;  %v9937_v19 = vld [vmem:[%s10303_s11 + $0xe0] sm:$0xff] }
 0x920   : > { %v16524_v3 = vpop.f32.mrb[160].mxu1  ;;  %v16526_v26 = vpop.f32.mrb[160].mxu0  ;;  %v7042_v16 = vmul.f32 %v9936_v14, %v15939_v41  ;;  %v7047_v57 = vmul.f32 %v9937_v19, %v15993_v46  ;;  %v7046_v61 = vmul.f32 %v9937_v19, %v15987_v38  ;;  %v9938_v41 = vld [vmem:[%s10303_s11 + $0xe8] sm:$0xff] }
 0x921   : > { %v16531_v58 = vpop.f32.mrb[161].mxu1  ;;  %v16533_v44 = vpop.f32.mrb[161].mxu0  ;;  %v7053_v46 = vmul.f32 %v9938_v41, %v16030_v29  ;;  %v7050_v38 = vmul.f32 %v9938_v41, %v16023_v6 }
 0x922   : > { %7444 = vmatmul.mubr.f32.gmra.mrb[242].mxu1 %v7034_v8  ;;  %7829 = vmatmul.mubr.f32.gmra.mrb[242].mxu0 %v7036_v5 }
 0x923   : > { %7448 = vmatprep.mubr.f32.mxu1 %v7039_v59  ;;  %7833 = vmatprep.mubr.f32.mxu0 %v7041_v52  ;;  %v7044_v59 = vmul.f32 %v9936_v14, %v15941_v10  ;;  %v7049_v52 = vmul.f32 %v9937_v19, %v15995_v31  ;;  %v7051_v10 = vmul.f32 %v9938_v41, %v16028_v36 }
 0x925   : > { %v16540_v63 = vpop.f32.mrb[162].mxu1  ;;  %v16542_v4 = vpop.f32.mrb[162].mxu0 }
 0x926   : > { %7449 = vmatmul.mubr.f32.gmra.mrb[244].mxu1 %v7038_v33  ;;  %7834 = vmatmul.mubr.f32.gmra.mrb[244].mxu0 %v7040_v24  ;;  %v16544_v8 = vpop.f32.mrb[163].mxu1  ;;  %v16546_v5 = vpop.f32.mrb[163].mxu0  ;;  %v7048_v33 = vmul.f32 %v9937_v19, %v15989_v48  ;;  %v7052_v48 = vmul.f32 %v9938_v41, %v16025_v20  ;;  %v19050_v20 = vld [vmem:[#allocation141_spill] sm:$0xff]  ;;  %v19052_v41 = vld [vmem:[#allocation84_spill] sm:$0xff] }
 0x927   : > { %7453 = vmatprep.mubr.f32.mxu1 %v7043_v1  ;;  %7838 = vmatprep.mubr.f32.mxu0 %v7045_v30  ;;  %v9939_v1 = vld [vmem:[%s10303_s11 + $0xf0] sm:$0xff] }
 0x928   : > { %v7055_v30 = vmul.f32 %v9939_v1, %v16062_v27  ;;  %v7057_v36 = vmul.f32 %v9939_v1, %v16064_v43  ;;  %v7054_v6 = vmul.f32 %v9939_v1, %v16057_v35  ;;  %v9940_v27 = vld [vmem:[%s10303_s11 + $0xf8] sm:$0xff]  ;;  %v9941_v35 = vld [vmem:[%s10303_s11 + $0x100] sm:$0xff] }
 0x929   : > { %v7059_v43 = vmul.f32 %v9940_v27, %v16096_v39  ;;  %v7065_v39 = vmul.f32 %v9941_v35, %v16132_v60 }
 0x92a   : > { %7454 = vmatmul.mubr.f32.gmra.mrb[246].mxu1 %v7042_v16  ;;  %7839 = vmatmul.mubr.f32.gmra.mrb[246].mxu0 %v7044_v59 }
 0x92b   : > { %7458 = vmatprep.mubr.f32.mxu1 %v7047_v57  ;;  %7843 = vmatprep.mubr.f32.mxu0 %v7049_v52  ;;  %v7056_v57 = vmul.f32 %v9939_v1, %v19050_v20  ;;  %v7061_v52 = vmul.f32 %v9940_v27, %v16098_v45 }
 0x92c   : > { %v16555_v55 = vpop.f32.mrb[164].mxu1  ;;  %v16557_v24 = vpop.f32.mrb[164].mxu0 }
 0x92d   : > { %v16562_v14 = vpop.f32.mrb[165].mxu1  ;;  %v16564_v31 = vpop.f32.mrb[165].mxu0 }
 0x92e   : > { %7459 = vmatmul.mubr.f32.gmra.mrb[248].mxu1 %v7046_v61  ;;  %7844 = vmatmul.mubr.f32.gmra.mrb[248].mxu0 %v7048_v33  ;;  %v19051_v61 = vld [vmem:[#allocation53_spill] sm:$0xff] }
 0x92f   : > { %7463 = vmatprep.mubr.f32.mxu1 %v7051_v10  ;;  %7848 = vmatprep.mubr.f32.mxu0 %v7053_v46  ;;  %v7058_v33 = vmul.f32 %v9940_v27, %v19051_v61  ;;  %v7060_v10 = vmul.f32 %v9940_v27, %v19052_v41  ;;  %v19055_v41 = vld [vmem:[#allocation159_spill] sm:$0xff] }
 0x931   : > { %v16571_v16 = vpop.f32.mrb[166].mxu1  ;;  %v16573_v29 = vpop.f32.mrb[166].mxu0 }
 0x932   : > { %7464 = vmatmul.mubr.f32.gmra.mrb[250].mxu1 %v7050_v38  ;;  %7849 = vmatmul.mubr.f32.gmra.mrb[250].mxu0 %v7052_v48  ;;  %v16575_v59 = vpop.f32.mrb[167].mxu1  ;;  %v16577_v19 = vpop.f32.mrb[167].mxu0  ;;  %v7063_v48 = vmul.f32 %v9941_v35, %v16130_v32 }
 0x933   : > { %7468 = vmatprep.mubr.f32.mxu1 %v7055_v30  ;;  %7853 = vmatprep.mubr.f32.mxu0 %v7057_v36  ;;  %v19053_v30 = vld [vmem:[#allocation166_spill] sm:$0xff] }
 0x934   : > { %v7062_v36 = vmul.f32 %v9941_v35, %v19053_v30 }
 0x936   : > { %7469 = vmatmul.mubr.f32.gmra.mrb[252].mxu1 %v7054_v6  ;;  %7854 = vmatmul.mubr.f32.gmra.mrb[252].mxu0 %v7056_v57  ;;  %v19054_v6 = vld [vmem:[#allocation99_spill] sm:$0xff]  ;;  %v9942_v57 = vld [vmem:[%s10303_s11 + $0x108] sm:$0xff] }
 0x937   : > { %7473 = vmatprep.mubr.f32.mxu1 %v7059_v43  ;;  %7858 = vmatprep.mubr.f32.mxu0 %v7061_v52  ;;  %v7064_v20 = vmul.f32 %v9941_v35, %v19054_v6  ;;  %v7067_v27 = vmul.f32 %v9942_v57, %v16164_v54  ;;  %v7069_v32 = vmul.f32 %v9942_v57, %v16166_v15  ;;  %v9943_v54 = vld [vmem:[%s10303_s11 + $0x110] sm:$0xff] }
 0x938   : > { %v16586_v46 = vpop.f32.mrb[168].mxu1  ;;  %v16588_v38 = vpop.f32.mrb[168].mxu0  ;;  %v7071_v15 = vmul.f32 %v9943_v54, %v16198_v28  ;;  %v7073_v35 = vmul.f32 %v9943_v54, %v16200_v51 }
 0x939   : > { %v16593_v1 = vpop.f32.mrb[169].mxu1  ;;  %v16595_v45 = vpop.f32.mrb[169].mxu0 }
 0x93a   : > { %7474 = vmatmul.mubr.f32.gmra.mrb[254].mxu1 %v7058_v33  ;;  %7859 = vmatmul.mubr.f32.gmra.mrb[254].mxu0 %v7060_v10  ;;  %v7066_v33 = vmul.f32 %v9942_v57, %v16159_v21  ;;  %v7068_v10 = vmul.f32 %v9942_v57, %v19055_v41  ;;  %v9944_v21 = vld [vmem:[%s10303_s11 + $0x118] sm:$0xff] }
 0x93b   : > { %7478 = vmatprep.mubr.f32.mxu1 %v7063_v48  ;;  %7863 = vmatprep.mubr.f32.mxu0 %v7065_v39  ;;  %v7070_v48 = vmul.f32 %v9943_v54, %v16194_v23  ;;  %v7072_v39 = vmul.f32 %v9943_v54, %v16196_v22  ;;  %v7075_v6 = vmul.f32 %v9944_v21, %v16220_v12  ;;  %v19056_v22 = vld [vmem:[#allocation235_spill] sm:$0xff] }
 0x93c   : > { %v7077_v28 = vmul.f32 %v9944_v21, %v16225_v34  ;;  %v7074_v23 = vmul.f32 %v9944_v21, %v16215_v0  ;;  %v7076_v57 = vmul.f32 %v9944_v21, %v19056_v22  ;;  %v19059_v0 = vld [vmem:[#allocation136_spill] sm:$0xff] }
 0x93d   : > { %v16602_v43 = vpop.f32.mrb[170].mxu1  ;;  %v16604_v60 = vpop.f32.mrb[170].mxu0 }
 0x93e   : > { %7479 = vmatmul.mubr.f32.gmra.mrb[0].mxu1 %v7062_v36  ;;  %7864 = vmatmul.mubr.f32.gmra.mrb[0].mxu0 %v7064_v20  ;;  %v16606_v52 = vpop.f32.mrb[171].mxu1  ;;  %v16608_v61 = vpop.f32.mrb[171].mxu0 }
 0x93f   : > { %7483 = vmatprep.mubr.f32.mxu1 %v7067_v27  ;;  %7868 = vmatprep.mubr.f32.mxu0 %v7069_v32  ;;  %v9945_v27 = vld [vmem:[%s10303_s11 + $0x120] sm:$0xff] }
 0x940   : > { %v7079_v32 = vmul.f32 %v9945_v27, %v16241_v49  ;;  %v9946_v49 = vld [vmem:[%s10303_s11 + $0x128] sm:$0xff] }
 0x942   : > { %7484 = vmatmul.mubr.f32.gmra.mrb[2].mxu1 %v7066_v33  ;;  %7869 = vmatmul.mubr.f32.gmra.mrb[2].mxu0 %v7068_v10  ;;  %v19057_v33 = vld [vmem:[#allocation15_spill] sm:$0xff] }
 0x943   : > { %7488 = vmatprep.mubr.f32.mxu1 %v7071_v15  ;;  %7873 = vmatprep.mubr.f32.mxu0 %v7073_v35  ;;  %v7081_v12 = vmul.f32 %v9945_v27, %v19057_v33  ;;  %v7078_v15 = vmul.f32 %v9945_v27, %v19059_v0  ;;  %v19060_v35 = vld [vmem:[#allocation103_spill] sm:$0xff]  ;;  %v9947_v0 = vld [vmem:[%s10303_s11 + $0x130] sm:$0xff] }
 0x944   : > { %v16617_v30 = vpop.f32.mrb[172].mxu1  ;;  %v16619_v36 = vpop.f32.mrb[172].mxu0 }
 0x945   : > { %v16624_v20 = vpop.f32.mrb[173].mxu1  ;;  %v16626_v51 = vpop.f32.mrb[173].mxu0 }
 0x946   : > { %7489 = vmatmul.mubr.f32.gmra.mrb[4].mxu1 %v7070_v48  ;;  %7874 = vmatmul.mubr.f32.gmra.mrb[4].mxu0 %v7072_v39  ;;  %v7080_v48 = vmul.f32 %v9945_v27, %v19060_v35  ;;  %v19061_v39 = vld [vmem:[#allocation179_spill] sm:$0xff]  ;;  %v7087_v27 = vmul.f32 %v9947_v0, %v16294_v18  ;;  %v19067_v35 = vld [vmem:[#allocation241_spill] sm:$0xff] }
 0x947   : > { %7493 = vmatprep.mubr.f32.mxu1 %v7075_v6  ;;  %7878 = vmatprep.mubr.f32.mxu0 %v7077_v28  ;;  %v7083_v21 = vmul.f32 %v9946_v49, %v19061_v39  ;;  %v19062_v6 = vld [vmem:[#allocation196_spill] sm:$0xff]  ;;  %v7089_v39 = vmul.f32 %v9947_v0, %v19067_v35 }
 0x948   : > { %v7085_v28 = vmul.f32 %v9946_v49, %v19062_v6 }
 0x949   : > { %v16633_v41 = vpop.f32.mrb[174].mxu1  ;;  %v16635_v34 = vpop.f32.mrb[174].mxu0 }
 0x94a   : > { %19058 = vst [vmem:[#allocation216_spill] sm:$0xff] %v16635_v34  ;;  %7494 = vmatmul.mubr.f32.gmra.mrb[6].mxu1 %v7074_v23  ;;  %7879 = vmatmul.mubr.f32.gmra.mrb[6].mxu0 %v7076_v57  ;;  %v16637_v10 = vpop.f32.mrb[175].mxu1  ;;  %v16639_v54 = vpop.f32.mrb[175].mxu0  ;;  %v19063_v23 = vld [vmem:[#allocation150_spill] sm:$0xff]  ;;  %v19064_v57 = vld [vmem:[#allocation56_spill] sm:$0xff] }
 0x94b   : > { %7498 = vmatprep.mubr.f32.mxu1 %v7079_v32  ;;  %7883 = vmatprep.mubr.f32.mxu0 %v7081_v12  ;;  %v7082_v22 = vmul.f32 %v9946_v49, %v19063_v23  ;;  %v7084_v33 = vmul.f32 %v9946_v49, %v19064_v57  ;;  %v19071_v23 = vld [vmem:[#allocation146_spill] sm:$0xff] }
 0x94e   : > { %7499 = vmatmul.mubr.f32.gmra.mrb[8].mxu1 %v7078_v15  ;;  %7884 = vmatmul.mubr.f32.gmra.mrb[8].mxu0 %v7080_v48  ;;  %v19069_v48 = vld [vmem:[#allocation11_spill] sm:$0xff] }
 0x94f   : > { %7503 = vmatprep.mubr.f32.mxu1 %v7083_v21  ;;  %7888 = vmatprep.mubr.f32.mxu0 %v7085_v28  ;;  %v7086_v49 = vmul.f32 %v9947_v0, %v19069_v48  ;;  %v19070_v21 = vld [vmem:[#allocation128_spill] sm:$0xff]  ;;  %v9948_v28 = vld [vmem:[%s10303_s11 + $0x138] sm:$0xff] }
 0x950   : > { %v16648_v32 = vpop.f32.mrb[176].mxu1  ;;  %v16650_v12 = vpop.f32.mrb[176].mxu0  ;;  %v7088_v6 = vmul.f32 %v9947_v0, %v19070_v21  ;;  %v7091_v57 = vmul.f32 %v9948_v28, %v19071_v23  ;;  %v9949_v21 = vld [vmem:[%s10303_s11 + $0x140] sm:$0xff]  ;;  %v19078_v23 = vld [vmem:[#allocation104_spill] sm:$0xff] }
 0x951   : > { %19065 = vst [vmem:[#allocation194_spill] sm:$0xff] %v16648_v32  ;;  %19066 = vst [vmem:[#allocation63_spill] sm:$0xff] %v16650_v12  ;;  %v16655_v34 = vpop.f32.mrb[177].mxu1  ;;  %v16657_v15 = vpop.f32.mrb[177].mxu0  ;;  %v19072_v12 = vld [vmem:[#allocation55_spill] sm:$0xff] }
 0x952   : > { %19068 = vst [vmem:[#allocation80_spill] sm:$0xff] %v16657_v15  ;;  %7504 = vmatmul.mubr.f32.gmra.mrb[10].mxu1 %v7082_v22  ;;  %7889 = vmatmul.mubr.f32.gmra.mrb[10].mxu0 %v7084_v33  ;;  %v7093_v18 = vmul.f32 %v9948_v28, %v19072_v12  ;;  %v7095_v12 = vmul.f32 %v9949_v21, %v19078_v23  ;;  %v19079_v15 = vld [vmem:[#allocation186_spill] sm:$0xff] }
 0x953   : > { %7508 = vmatprep.mubr.f32.mxu1 %v7087_v27  ;;  %7893 = vmatprep.mubr.f32.mxu0 %v7089_v39  ;;  %v19076_v27 = vld [vmem:[#allocation116_spill] sm:$0xff] }
 0x954   : > { %v7090_v0 = vmul.f32 %v9948_v28, %v19076_v27  ;;  %v19077_v39 = vld [vmem:[#allocation16_spill] sm:$0xff] }
 0x955   : > { %v16664_v32 = vpop.f32.mrb[178].mxu1  ;;  %v16666_v35 = vpop.f32.mrb[178].mxu0  ;;  %v7092_v48 = vmul.f32 %v9948_v28, %v19077_v39  ;;  %v9950_v27 = vld [vmem:[%s10303_s11 + $0x148] sm:$0xff] }
 0x956   : > { %19073 = vst [vmem:[#allocation82_spill] sm:$0xff] %v16664_v32  ;;  %19074 = vst [vmem:[#allocation117_spill] sm:$0xff] %v16666_v35  ;;  %7509 = vmatmul.mubr.f32.gmra.mrb[12].mxu1 %v7086_v49  ;;  %7894 = vmatmul.mubr.f32.gmra.mrb[12].mxu0 %v7088_v6  ;;  %v16668_v22 = vpop.f32.mrb[179].mxu1  ;;  %v16670_v33 = vpop.f32.mrb[179].mxu0  ;;  %v7097_v32 = vmul.f32 %v9949_v21, %v19079_v15  ;;  %v19080_v49 = vld [vmem:[#allocation86_spill] sm:$0xff]  ;;  %v19081_v35 = vld [vmem:[#allocation168_spill] sm:$0xff]  ;;  %v7099_v28 = vmul.f32 %v9950_v27, %v16381_v17 }
 0x957   : > { %19075 = vst [vmem:[#allocation28_spill] sm:$0xff] %v16670_v33  ;;  %7513 = vmatprep.mubr.f32.mxu1 %v7091_v57  ;;  %7898 = vmatprep.mubr.f32.mxu0 %v7093_v18  ;;  %v7094_v6 = vmul.f32 %v9949_v21, %v19080_v49  ;;  %v7096_v33 = vmul.f32 %v9949_v21, %v19081_v35  ;;  %v19082_v35 = vld [vmem:[#allocation115_spill] sm:$0xff] }
 0x958   : > { %v7101_v39 = vmul.f32 %v9950_v27, %v16383_v56 }
 0x95a   : > { %7514 = vmatmul.mubr.f32.gmra.mrb[14].mxu1 %v7090_v0  ;;  %7899 = vmatmul.mubr.f32.gmra.mrb[14].mxu0 %v7092_v48  ;;  %v7100_v0 = vmul.f32 %v9950_v27, %v19082_v35  ;;  %v9951_v48 = vld [vmem:[%s10303_s11 + $0x150] sm:$0xff] }
 0x95b   : > { %7518 = vmatprep.mubr.f32.mxu1 %v7095_v12  ;;  %7903 = vmatprep.mubr.f32.mxu0 %v7097_v32  ;;  %v7098_v32 = vmul.f32 %v9950_v27, %v16373_v40  ;;  %v7103_v21 = vmul.f32 %v9951_v48, %v16410_v13  ;;  %v7105_v17 = vmul.f32 %v9951_v48, %v16412_v47  ;;  %v9952_v13 = vld [vmem:[%s10303_s11 + $0x158] sm:$0xff] }
 0x95c   : > { %v16679_v57 = vpop.f32.mrb[180].mxu1  ;;  %v16681_v18 = vpop.f32.mrb[180].mxu0  ;;  %v7102_v40 = vmul.f32 %v9951_v48, %v16402_v42  ;;  %v7107_v47 = vmul.f32 %v9952_v13, %v16439_v2  ;;  %v19091_v42 = vld [vmem:[#allocation71_spill] sm:$0xff]  ;;  %v19092_v2 = vld [vmem:[#allocation57_spill] sm:$0xff] }
 0x95d   : > { %v16686_v23 = vpop.f32.mrb[181].mxu1  ;;  %v16688_v15 = vpop.f32.mrb[181].mxu0 }
 0x95e   : > { %7519 = vmatmul.mubr.f32.gmra.mrb[16].mxu1 %v7094_v6  ;;  %7904 = vmatmul.mubr.f32.gmra.mrb[16].mxu0 %v7096_v33  ;;  %v19086_v6 = vld [vmem:[#allocation85_spill] sm:$0xff] }
 0x95f   : > { %7523 = vmatprep.mubr.f32.mxu1 %v7099_v28  ;;  %7908 = vmatprep.mubr.f32.mxu0 %v7101_v39  ;;  %v7104_v27 = vmul.f32 %v9951_v48, %v19086_v6  ;;  %v19087_v28 = vld [vmem:[#allocation152_spill] sm:$0xff] }
 0x960   : > { %v7109_v39 = vmul.f32 %v9952_v13, %v19087_v28  ;;  %v9954_v28 = vld [vmem:[%s10303_s11 + $0x168] sm:$0xff] }
 0x961   : > { %v16695_v12 = vpop.f32.mrb[182].mxu1  ;;  %v16697_v56 = vpop.f32.mrb[182].mxu0 }
 0x962   : > { %19083 = vst [vmem:[#allocation19_spill] sm:$0xff] %v16695_v12  ;;  %19084 = vst [vmem:[#allocation205_spill] sm:$0xff] %v16697_v56  ;;  %7524 = vmatmul.mubr.f32.gmra.mrb[18].mxu1 %v7098_v32  ;;  %7909 = vmatmul.mubr.f32.gmra.mrb[18].mxu0 %v7100_v0  ;;  %v16699_v33 = vpop.f32.mrb[183].mxu1  ;;  %v16701_v49 = vpop.f32.mrb[183].mxu0  ;;  %v19088_v32 = vld [vmem:[#allocation189_spill] sm:$0xff]  ;;  %v19089_v0 = vld [vmem:[#allocation58_spill] sm:$0xff] }
 0x963   : > { %19085 = vst [vmem:[#allocation192_spill] sm:$0xff] %v16701_v49  ;;  %7528 = vmatprep.mubr.f32.mxu1 %v7103_v21  ;;  %7913 = vmatprep.mubr.f32.mxu0 %v7105_v17  ;;  %v7106_v35 = vmul.f32 %v9952_v13, %v19088_v32  ;;  %v7108_v56 = vmul.f32 %v9952_v13, %v19089_v0  ;;  %v9953_v21 = vld [vmem:[%s10303_s11 + $0x160] sm:$0xff] }
 0x964   : > { %v19090_v17 = vld [vmem:[#allocation75_spill] sm:$0xff]  ;;  %v7113_v49 = vmul.f32 %v9953_v21, %v19091_v42  ;;  %v7110_v48 = vmul.f32 %v9953_v21, %v19092_v2  ;;  %v7115_v13 = vmul.f32 %v9954_v28, %v16482_v50  ;;  %v9956_v2 = vld [vmem:[%s10303_s11 + $0x178] sm:$0xff] }
 0x965   : > { %v7111_v12 = vmul.f32 %v9953_v21, %v19090_v17 }
 0x966   : > { %7529 = vmatmul.mubr.f32.gmra.mrb[20].mxu1 %v7102_v40  ;;  %7914 = vmatmul.mubr.f32.gmra.mrb[20].mxu0 %v7104_v27  ;;  %v19093_v40 = vld [vmem:[#allocation14_spill] sm:$0xff] }
 0x967   : > { %7533 = vmatprep.mubr.f32.mxu1 %v7107_v47  ;;  %7918 = vmatprep.mubr.f32.mxu0 %v7109_v39  ;;  %v7112_v6 = vmul.f32 %v9953_v21, %v19093_v40  ;;  %v7117_v39 = vmul.f32 %v9954_v28, %v16484_v25  ;;  %v9955_v21 = vld [vmem:[%s10303_s11 + $0x170] sm:$0xff]  ;;  %v7125_v40 = vmul.f32 %v9956_v2, %v16515_v62 }
 0x968   : > { %v7119_v17 = vmul.f32 %v9955_v21, %v16500_v9  ;;  %v7121_v50 = vmul.f32 %v9955_v21, %v16502_v53  ;;  %v7118_v25 = vmul.f32 %v9955_v21, %v16493_v11  ;;  %v7120_v42 = vmul.f32 %v9955_v21, %v16495_v37  ;;  %v19096_v9 = vld [vmem:[#allocation161_spill] sm:$0xff]  ;;  %v9957_v11 = vld [vmem:[%s10303_s11 + $0x180] sm:$0xff] }
 0x969   : > { %v7122_v53 = vmul.f32 %v9956_v2, %v19096_v9  ;;  %v7127_v37 = vmul.f32 %v9957_v11, %v16531_v58 }
 0x96a   : > { %7534 = vmatmul.mubr.f32.gmra.mrb[22].mxu1 %v7106_v35  ;;  %7919 = vmatmul.mubr.f32.gmra.mrb[22].mxu0 %v7108_v56 }
 0x96b   : > { %7538 = vmatprep.mubr.f32.mxu1 %v7111_v12  ;;  %7923 = vmatprep.mubr.f32.mxu0 %v7113_v49  ;;  %v19094_v12 = vld [vmem:[#allocation100_spill] sm:$0xff]  ;;  %v19095_v49 = vld [vmem:[#allocation143_spill] sm:$0xff] }
 0x96c   : > { %v16715_v27 = vpop.f32.mrb[184].mxu1  ;;  %v16717_v47 = vpop.f32.mrb[184].mxu0  ;;  %v7114_v56 = vmul.f32 %v9954_v28, %v19094_v12  ;;  %v7116_v0 = vmul.f32 %v9954_v28, %v19095_v49  ;;  %v7128_v49 = vmul.f32 %v9957_v11, %v16526_v26 }
 0x96d   : > { %v16722_v32 = vpop.f32.mrb[185].mxu1  ;;  %v16724_v35 = vpop.f32.mrb[185].mxu0 }
 0x96e   : > { %7539 = vmatmul.mubr.f32.gmra.mrb[24].mxu1 %v7110_v48  ;;  %7924 = vmatmul.mubr.f32.gmra.mrb[24].mxu0 %v7112_v6  ;;  %v7123_v48 = vmul.f32 %v9956_v2, %v16513_v7  ;;  %v19097_v6 = vld [vmem:[#allocation94_spill] sm:$0xff]  ;;  %v7129_v7 = vmul.f32 %v9957_v11, %v16533_v44 }
 0x96f   : > { %7543 = vmatprep.mubr.f32.mxu1 %v7115_v13  ;;  %7928 = vmatprep.mubr.f32.mxu0 %v7117_v39  ;;  %v7124_v28 = vmul.f32 %v9956_v2, %v19097_v6 }
 0x972   : > { %7544 = vmatmul.mubr.f32.gmra.mrb[26].mxu1 %v7114_v56  ;;  %7929 = vmatmul.mubr.f32.gmra.mrb[26].mxu0 %v7116_v0  ;;  %v7126_v56 = vmul.f32 %v9957_v11, %v16524_v3  ;;  %v9958_v0 = vld [vmem:[%s10303_s11 + $0x188] sm:$0xff] }
 0x973   : > { %7548 = vmatprep.mubr.f32.mxu1 %v7119_v17  ;;  %7933 = vmatprep.mubr.f32.mxu0 %v7121_v50  ;;  %v7131_v21 = vmul.f32 %v9958_v0, %v16544_v8  ;;  %v7133_v58 = vmul.f32 %v9958_v0, %v16546_v5  ;;  %v7130_v44 = vmul.f32 %v9958_v0, %v16540_v63  ;;  %v9959_v50 = vld [vmem:[%s10303_s11 + $0x190] sm:$0xff]  ;;  %v9960_v63 = vld [vmem:[%s10303_s11 + $0x198] sm:$0xff] }
 0x974   : > { %v7132_v17 = vmul.f32 %v9958_v0, %v16542_v4  ;;  %v7137_v3 = vmul.f32 %v9959_v50, %v16564_v31  ;;  %v7134_v26 = vmul.f32 %v9959_v50, %v16555_v55  ;;  %v7136_v8 = vmul.f32 %v9959_v50, %v16557_v24 }
 0x975   : > { %v7139_v4 = vmul.f32 %v9960_v63, %v16575_v59  ;;  %v7138_v55 = vmul.f32 %v9960_v63, %v16571_v16  ;;  %v7140_v24 = vmul.f32 %v9960_v63, %v16573_v29 }
 0x976   : > { %7549 = vmatmul.mubr.f32.gmra.mrb[28].mxu1 %v7118_v25  ;;  %7934 = vmatmul.mubr.f32.gmra.mrb[28].mxu0 %v7120_v42  ;;  %v7135_v25 = vmul.f32 %v9959_v50, %v16562_v14  ;;  %v7141_v14 = vmul.f32 %v9960_v63, %v16577_v19 }
 0x977   : > { %7553 = vmatprep.mubr.f32.mxu1 %v7123_v48  ;;  %7938 = vmatprep.mubr.f32.mxu0 %v7125_v40  ;;  %v9961_v48 = vld [vmem:[%s10303_s11 + $0x1a0] sm:$0xff] }
 0x978   : > { %v16738_v13 = vpop.f32.mrb[186].mxu1  ;;  %v16740_v39 = vpop.f32.mrb[186].mxu0  ;;  %v7143_v40 = vmul.f32 %v9961_v48, %v16593_v1  ;;  %v7145_v59 = vmul.f32 %v9961_v48, %v16595_v45  ;;  %v7142_v19 = vmul.f32 %v9961_v48, %v16586_v46  ;;  %v7144_v9 = vmul.f32 %v9961_v48, %v16588_v38 }
 0x979   : > { %v16745_v12 = vpop.f32.mrb[187].mxu1  ;;  %v16747_v62 = vpop.f32.mrb[187].mxu0 }
 0x97a   : > { %7554 = vmatmul.mubr.f32.gmra.mrb[30].mxu1 %v7122_v53  ;;  %7939 = vmatmul.mubr.f32.gmra.mrb[30].mxu0 %v7124_v28  ;;  %v9962_v53 = vld [vmem:[%s10303_s11 + $0x1a8] sm:$0xff] }
 0x97b   : > { %7558 = vmatprep.mubr.f32.mxu1 %v7127_v37  ;;  %7943 = vmatprep.mubr.f32.mxu0 %v7129_v7  ;;  %v7147_v6 = vmul.f32 %v9962_v53, %v16606_v52  ;;  %v7149_v16 = vmul.f32 %v9962_v53, %v16608_v61  ;;  %v7146_v46 = vmul.f32 %v9962_v53, %v16602_v43  ;;  %v9963_v52 = vld [vmem:[%s10303_s11 + $0x1b0] sm:$0xff] }
 0x97c   : > { %v7148_v38 = vmul.f32 %v9962_v53, %v16604_v60  ;;  %v7151_v61 = vmul.f32 %v9963_v52, %v16624_v20  ;;  %v7153_v11 = vmul.f32 %v9963_v52, %v16626_v51  ;;  %v7150_v43 = vmul.f32 %v9963_v52, %v16617_v30  ;;  %v9964_v60 = vld [vmem:[%s10303_s11 + $0x1b8] sm:$0xff] }
 0x97d   : > { %v7155_v20 = vmul.f32 %v9964_v60, %v16637_v10  ;;  %v7157_v51 = vmul.f32 %v9964_v60, %v16639_v54  ;;  %v19100_v54 = vld [vmem:[#allocation80_spill] sm:$0xff] }
 0x97e   : > { %7559 = vmatmul.mubr.f32.gmra.mrb[32].mxu1 %v7126_v56  ;;  %7944 = vmatmul.mubr.f32.gmra.mrb[32].mxu0 %v7128_v49 }
 0x97f   : > { %7563 = vmatprep.mubr.f32.mxu1 %v7131_v21  ;;  %7948 = vmatprep.mubr.f32.mxu0 %v7133_v58  ;;  %v7152_v21 = vmul.f32 %v9963_v52, %v16619_v36  ;;  %v7154_v36 = vmul.f32 %v9964_v60, %v16633_v41  ;;  %v19101_v41 = vld [vmem:[#allocation194_spill] sm:$0xff] }
 0x982   : > { %7564 = vmatmul.mubr.f32.gmra.mrb[34].mxu1 %v7130_v44  ;;  %7949 = vmatmul.mubr.f32.gmra.mrb[34].mxu0 %v7132_v17 }
 0x983   : > { %7568 = vmatprep.mubr.f32.mxu1 %v7135_v25  ;;  %7953 = vmatprep.mubr.f32.mxu0 %v7137_v3  ;;  %v19099_v25 = vld [vmem:[#allocation216_spill] sm:$0xff] }
 0x984   : > { %v16761_v5 = vpop.f32.mrb[188].mxu1  ;;  %v16763_v42 = vpop.f32.mrb[188].mxu0  ;;  %v7156_v3 = vmul.f32 %v9964_v60, %v19099_v25 }
 0x985   : > { %v16768_v2 = vpop.f32.mrb[189].mxu1  ;;  %v16770_v31 = vpop.f32.mrb[189].mxu0 }
 0x986   : > { %7569 = vmatmul.mubr.f32.gmra.mrb[36].mxu1 %v7134_v26  ;;  %7954 = vmatmul.mubr.f32.gmra.mrb[36].mxu0 %v7136_v8  ;;  %v9965_v26 = vld [vmem:[%s10303_s11 + $0x1c0] sm:$0xff] }
 0x987   : > { %7573 = vmatprep.mubr.f32.mxu1 %v7139_v4  ;;  %7958 = vmatprep.mubr.f32.mxu0 %v7141_v14  ;;  %v7159_v10 = vmul.f32 %v9965_v26, %v16655_v34  ;;  %v7161_v8 = vmul.f32 %v9965_v26, %v19100_v54  ;;  %v7158_v48 = vmul.f32 %v9965_v26, %v19101_v41  ;;  %v9969_v54 = vld [vmem:[%s10303_s11 + $0x1e0] sm:$0xff] }
 0x988   : > { %v7174_v41 = vmul.f32 %v9969_v54, %v16715_v27 }
 0x98a   : > { %7574 = vmatmul.mubr.f32.gmra.mrb[38].mxu1 %v7138_v55  ;;  %7959 = vmatmul.mubr.f32.gmra.mrb[38].mxu0 %v7140_v24 }
 0x98b   : > { %7578 = vmatprep.mubr.f32.mxu1 %v7143_v40  ;;  %7963 = vmatprep.mubr.f32.mxu0 %v7145_v59  ;;  %v19102_v40 = vld [vmem:[#allocation63_spill] sm:$0xff] }
 0x98c   : > { %v7160_v59 = vmul.f32 %v9965_v26, %v19102_v40  ;;  %v9970_v40 = vld [vmem:[%s10303_s11 + $0x1e8] sm:$0xff] }
 0x98d   : > { %v16782_v29 = vpop.f32.mrb[190].mxu1  ;;  %v16784_v28 = vpop.f32.mrb[190].mxu0  ;;  %v7178_v27 = vmul.f32 %v9970_v40, %v16738_v13 }
 0x98e   : > { %v16786_v1 = vpop.f32.mrb[191].mxu1  ;;  %v16788_v45 = vpop.f32.mrb[191].mxu0  ;;  %7579 = vmatmul.mubr.f32.gmra.mrb[40].mxu1 %v7142_v19  ;;  %7964 = vmatmul.mubr.f32.gmra.mrb[40].mxu0 %v7144_v9  ;;  %v9966_v19 = vld [vmem:[%s10303_s11 + $0x1c8] sm:$0xff] }
 0x98f   : > { %7583 = vmatprep.mubr.f32.mxu1 %v7147_v6  ;;  %7968 = vmatprep.mubr.f32.mxu0 %v7149_v16  ;;  %v7163_v34 = vmul.f32 %v9966_v19, %v16668_v22  ;;  %v19103_v9 = vld [vmem:[#allocation28_spill] sm:$0xff] }
 0x990   : > { %v7165_v53 = vmul.f32 %v9966_v19, %v19103_v9 }
 0x991   : > { %v7320_v37 = vpop.f32.mrb[192].mxu1  ;;  %v7705_v7 = vpop.f32.mrb[192].mxu0 }
 0x992   : > { %v7706_v56 = vadd.f32 %v7705_v7, %v7320_v37  ;;  %v7322_v49 = vpop.f32.mrb[193].mxu1  ;;  %7584 = vmatmul.mubr.f32.gmra.mrb[42].mxu1 %v7146_v46  ;;  %v7707_v0 = vpop.f32.mrb[193].mxu0  ;;  %7969 = vmatmul.mubr.f32.gmra.mrb[42].mxu0 %v7148_v38  ;;  %v19105_v37 = vld [vmem:[#allocation117_spill] sm:$0xff] }
 0x993   : > { %7588 = vmatprep.mubr.f32.mxu1 %v7151_v61  ;;  %7973 = vmatprep.mubr.f32.mxu0 %v7153_v11  ;;  %v19104_v61 = vld [vmem:[#allocation82_spill] sm:$0xff]  ;;  %v7164_v7 = vmul.f32 %v9966_v19, %v19105_v37 }
 0x994   : > { %8024 = vst [vmem:[%s16799_s26] sm:$0xff] %v7706_v56  ;;  %v7162_v11 = vmul.f32 %v9966_v19, %v19104_v61  ;;  %v9967_v56 = vld [vmem:[%s10303_s11 + $0x1d0] sm:$0xff] }
 0x995   : > { %v7325_v58 = vpop.f32.mrb[194].mxu1  ;;  %v7710_v44 = vpop.f32.mrb[194].mxu0  ;;  %v7167_v22 = vmul.f32 %v9967_v56, %v16686_v23  ;;  %v7169_v49 = vmul.f32 %v9967_v56, %v16688_v15  ;;  %v19106_v15 = vld [vmem:[#allocation192_spill] sm:$0xff] }
 0x996   : > { %v7711_v17 = vadd.f32 %v7710_v44, %v7325_v58  ;;  %v7327_v50 = vpop.f32.mrb[195].mxu1  ;;  %7589 = vmatmul.mubr.f32.gmra.mrb[44].mxu1 %v7150_v43  ;;  %v7712_v30 = vpop.f32.mrb[195].mxu0  ;;  %7974 = vmatmul.mubr.f32.gmra.mrb[44].mxu0 %v7152_v21  ;;  %v7168_v58 = vmul.f32 %v9967_v56, %v16681_v18  ;;  %v9968_v44 = vld [vmem:[%s10303_s11 + $0x1d8] sm:$0xff]  ;;  %v19108_v18 = vld [vmem:[#allocation205_spill] sm:$0xff] }
 0x997   : > { %7593 = vmatprep.mubr.f32.mxu1 %v7155_v20  ;;  %7978 = vmatprep.mubr.f32.mxu0 %v7157_v51  ;;  %v7166_v51 = vmul.f32 %v9967_v56, %v16679_v57  ;;  %v7171_v23 = vmul.f32 %v9968_v44, %v16699_v33  ;;  %v19107_v57 = vld [vmem:[#allocation19_spill] sm:$0xff]  ;;  %v7175_v33 = vmul.f32 %v9969_v54, %v16722_v32 }
 0x998   : > { %8025 = vst [vmem:[%s16799_s26 + $0x8] sm:$0xff] %v7711_v17  ;;  %v7173_v17 = vmul.f32 %v9968_v44, %v19106_v15  ;;  %v7170_v26 = vmul.f32 %v9968_v44, %v19107_v57  ;;  %v7179_v32 = vmul.f32 %v9970_v40, %v16745_v12 }
 0x999   : > { %v7330_v63 = vpop.f32.mrb[196].mxu1  ;;  %v7715_v4 = vpop.f32.mrb[196].mxu0 }
 0x99a   : > { %v7716_v14 = vadd.f32 %v7715_v4, %v7330_v63  ;;  %v7332_v55 = vpop.f32.mrb[197].mxu1  ;;  %7594 = vmatmul.mubr.f32.gmra.mrb[46].mxu1 %v7154_v36  ;;  %v7717_v24 = vpop.f32.mrb[197].mxu0  ;;  %7979 = vmatmul.mubr.f32.gmra.mrb[46].mxu0 %v7156_v3 }
 0x99b   : > { %7598 = vmatprep.mubr.f32.mxu1 %v7159_v10  ;;  %7983 = vmatprep.mubr.f32.mxu0 %v7161_v8  ;;  %v7172_v10 = vmul.f32 %v9968_v44, %v19108_v18  ;;  %v7177_v8 = vmul.f32 %v9969_v54, %v16724_v35  ;;  %v7181_v35 = vmul.f32 %v9970_v40, %v16747_v62 }
 0x99c   : > { %8026 = vst [vmem:[%s16799_s26 + $0x10] sm:$0xff] %v7716_v14 }
 0x99d   : > { %v7335_v6 = vpop.f32.mrb[198].mxu1  ;;  %v7720_v16 = vpop.f32.mrb[198].mxu0 }
 0x99e   : > { %v7721_v46 = vadd.f32 %v7720_v16, %v7335_v6  ;;  %v7337_v38 = vpop.f32.mrb[199].mxu1  ;;  %7599 = vmatmul.mubr.f32.gmra.mrb[48].mxu1 %v7158_v48  ;;  %v7722_v52 = vpop.f32.mrb[199].mxu0  ;;  %7984 = vmatmul.mubr.f32.gmra.mrb[48].mxu0 %v7160_v59  ;;  %v7176_v48 = vmul.f32 %v9969_v54, %v16717_v47  ;;  %v7180_v47 = vmul.f32 %v9970_v40, %v16740_v39  ;;  %v9971_v6 = vld [vmem:[%s10303_s11 + $0x1f0] sm:$0xff] }
 0x99f   : > { %7603 = vmatprep.mubr.f32.mxu1 %v7163_v34  ;;  %7988 = vmatprep.mubr.f32.mxu0 %v7165_v53  ;;  %v7183_v12 = vmul.f32 %v9971_v6, %v16768_v2  ;;  %v7182_v61 = vmul.f32 %v9971_v6, %v16761_v5 }
 0x9a0   : > { %8027 = vst [vmem:[%s16799_s26 + $0x18] sm:$0xff] %v7721_v46 }
 0x9a1   : > { %v7340_v0 = vpop.f32.mrb[200].mxu1  ;;  %v7725_v43 = vpop.f32.mrb[200].mxu0 }
 0x9a2   : > { %v7726_v21 = vadd.f32 %v7725_v43, %v7340_v0  ;;  %v7342_v60 = vpop.f32.mrb[201].mxu1  ;;  %7604 = vmatmul.mubr.f32.gmra.mrb[50].mxu1 %v7162_v11  ;;  %v7727_v20 = vpop.f32.mrb[201].mxu0  ;;  %7989 = vmatmul.mubr.f32.gmra.mrb[50].mxu0 %v7164_v7  ;;  %v9972_v11 = vld [vmem:[%s10303_s11 + $0x1f8] sm:$0xff]  ;;  %s8430_s11 = sshll.u32 %s10173_s25, 13  ;;  %s10115_s25 = smov [#allocation7]  }
 0x9a3   : > { %7608 = vmatprep.mubr.f32.mxu1 %v7167_v22  ;;  %7993 = vmatprep.mubr.f32.mxu0 %v7169_v49  ;;  %v7187_v13 = vmul.f32 %v9972_v11, %v16786_v1  ;;  %v7186_v22 = vmul.f32 %v9972_v11, %v16782_v29  ;;  %v7185_v49 = vmul.f32 %v9971_v6, %v16770_v31  ;;  %s16914_s10 = scalar_lea.hbm %s16967_s5, %s8430_s11  ;;  %s10035_s8 = sshll.u32 %s10115_s25, 4  ;;  %s10036_s8 = int_to_ptr.vmem [resolvable:$false] %s10035_s8 }
 0x9a4   : > { %8028 = vst [vmem:[%s16799_s26 + $0x20] sm:$0xff] %v7726_v21  ;;  %v7184_v60 = vmul.f32 %v9971_v6, %v16763_v42  ;;  %v7189_v20 = vmul.f32 %v9972_v11, %v16788_v45  ;;  %v7188_v31 = vmul.f32 %v9972_v11, %v16784_v28  ;;  %s10037_s15 = scalar_lea.vmem %s10036_s8, 16384  ;;  %p10038_p13 = scmp.lt.s32.totalorder %s16916_s19, %s10036_s8 }
 0x9a5   : > { %v7345_v50 = vpop.f32.mrb[202].mxu1  ;;  %v7730_v30 = vpop.f32.mrb[202].mxu0  ;;  %p10039_p3 = scmp.lt.s32.totalorder %s10037_s15, %s10031_s27 }
 0x9a6   : > { %v7731_v36 = vadd.f32 %v7730_v30, %v7345_v50  ;;  %v7347_v25 = vpop.f32.mrb[203].mxu1  ;;  %7609 = vmatmul.mubr.f32.gmra.mrb[52].mxu1 %v7166_v51  ;;  %v7732_v3 = vpop.f32.mrb[203].mxu0  ;;  %7994 = vmatmul.mubr.f32.gmra.mrb[52].mxu0 %v7168_v58 }
 0x9a7   : > { %7613 = vmatprep.mubr.f32.mxu1 %v7171_v23  ;;  %7998 = vmatprep.mubr.f32.mxu0 %v7173_v17  ;;  %p10040_p7 = por %p10039_p3, %p10038_p13 }
 0x9a8   : > { %8029 = vst [vmem:[%s16799_s26 + $0x28] sm:$0xff] %v7731_v36 }
 0x9a9   : > { %v7350_v63 = vpop.f32.mrb[204].mxu1  ;;  %v7735_v4 = vpop.f32.mrb[204].mxu0  ;;  %p10041_p9 = pnand %p10040_p7, %p10034_p10 }
 0x9aa   : > { %v7736_v14 = vadd.f32 %v7735_v4, %v7350_v63  ;;  %v7352_v55 = vpop.f32.mrb[205].mxu1  ;;  %7614 = vmatmul.mubr.f32.gmra.mrb[54].mxu1 %v7170_v26  ;;  %v7737_v24 = vpop.f32.mrb[205].mxu0  ;;  %7999 = vmatmul.mubr.f32.gmra.mrb[54].mxu0 %v7172_v10 }
 0x9ab   : > { %7618 = vmatprep.mubr.f32.mxu1 %v7175_v33  ;;  %8003 = vmatprep.mubr.f32.mxu0 %v7177_v8 }
 0x9ac   : > { %8030 = vst [vmem:[%s16799_s26 + $0x30] sm:$0xff] %v7736_v14 }
 0x9ad   : > { %v7355_v59 = vpop.f32.mrb[206].mxu1  ;;  %v7740_v19 = vpop.f32.mrb[206].mxu0 }
 0x9ae   : > { %v7741_v34 = vadd.f32 %v7740_v19, %v7355_v59  ;;  %v7357_v9 = vpop.f32.mrb[207].mxu1  ;;  %7619 = vmatmul.mubr.f32.gmra.mrb[56].mxu1 %v7174_v41  ;;  %v7742_v53 = vpop.f32.mrb[207].mxu0  ;;  %8004 = vmatmul.mubr.f32.gmra.mrb[56].mxu0 %v7176_v48 }
 0x9af   : > { %7623 = vmatprep.mubr.f32.mxu1 %v7179_v32  ;;  %8008 = vmatprep.mubr.f32.mxu0 %v7181_v35 }
 0x9b0   : > { %8031 = vst [vmem:[%s16799_s26 + $0x38] sm:$0xff] %v7741_v34 }
 0x9b1   : > { %v7360_v62 = vpop.f32.mrb[208].mxu1  ;;  %v7745_v16 = vpop.f32.mrb[208].mxu0 }
 0x9b2   : > { %v7746_v46 = vadd.f32 %v7745_v16, %v7360_v62  ;;  %v7362_v38 = vpop.f32.mrb[209].mxu1  ;;  %7624 = vmatmul.mubr.f32.gmra.mrb[58].mxu1 %v7178_v27  ;;  %v7747_v52 = vpop.f32.mrb[209].mxu0  ;;  %8009 = vmatmul.mubr.f32.gmra.mrb[58].mxu0 %v7180_v47 }
 0x9b3   : > { %7628 = vmatprep.mubr.f32.mxu1 %v7183_v12 }
 0x9b4   : > { %8032 = vst [vmem:[%s16799_s26 + $0x40] sm:$0xff] %v7746_v46 }
 0x9b5   : > { %v7365_v39 = vpop.f32.mrb[210].mxu1  ;;  %v7750_v37 = vpop.f32.mrb[210].mxu0 }
 0x9b6   : > { %v7751_v7 = vadd.f32 %v7750_v37, %v7365_v39  ;;  %v7367_v2 = vpop.f32.mrb[211].mxu1  ;;  %7629 = vmatmul.mubr.f32.gmra.mrb[60].mxu1 %v7182_v61  ;;  %v7752_v56 = vpop.f32.mrb[211].mxu0 }
 0x9b7   : > { %7633 = vmatprep.mubr.f32.mxu1 %v7187_v13 }
 0x9b8   : > { %8033 = vst [vmem:[%s16799_s26 + $0x48] sm:$0xff] %v7751_v7 }
 0x9b9   : > { %v7370_v0 = vpop.f32.mrb[212].mxu1  ;;  %v7755_v43 = vpop.f32.mrb[212].mxu0 }
 0x9ba   : > { %v7756_v5 = vadd.f32 %v7755_v43, %v7370_v0  ;;  %v7372_v21 = vpop.f32.mrb[213].mxu1  ;;  %7634 = vmatmul.mubr.f32.gmra.mrb[62].mxu1 %v7186_v22  ;;  %v7757_v1 = vpop.f32.mrb[213].mxu0 }
 0x9bb   : > { %8013 = vmatprep.mubr.f32.mxu1 %v7185_v49 }
 0x9bc   : > { %8034 = vst [vmem:[%s16799_s26 + $0x50] sm:$0xff] %v7756_v5 }
 0x9bd   : > { %v7375_v51 = vpop.f32.mrb[214].mxu1  ;;  %v7760_v58 = vpop.f32.mrb[214].mxu0 }
 0x9be   : > { %v7761_v29 = vadd.f32 %v7760_v58, %v7375_v51  ;;  %v7377_v44 = vpop.f32.mrb[215].mxu1  ;;  %v7762_v23 = vpop.f32.mrb[215].mxu0  ;;  %8014 = vmatmul.mubr.f32.vlgmr.msra.gmra.mrb[60].mxu1 %v7184_v60 }
 0x9bf   : > { %8018 = vmatprep.mubr.f32.mxu1 %v7189_v20 }
 0x9c0   : > { %8035 = vst [vmem:[%s16799_s26 + $0x58] sm:$0xff] %v7761_v29 }
 0x9c1   : > { %v7380_v15 = vpop.f32.mrb[216].mxu1  ;;  %v7765_v17 = vpop.f32.mrb[216].mxu0 }
 0x9c2   : > { %v7766_v50 = vadd.f32 %v7765_v17, %v7380_v15  ;;  %v7382_v42 = vpop.f32.mrb[217].mxu1  ;;  %v7767_v30 = vpop.f32.mrb[217].mxu0  ;;  %8019 = vmatmul.mubr.f32.gmra.mrb[62].mxu1 %v7188_v31 }
 0x9c4   : > { %8036 = vst [vmem:[%s16799_s26 + $0x60] sm:$0xff] %v7766_v50 }
 0x9c5   : > { %v7385_v45 = vpop.f32.mrb[218].mxu1  ;;  %v7770_v36 = vpop.f32.mrb[218].mxu0 }
 0x9c6   : > { %v7771_v25 = vadd.f32 %v7770_v36, %v7385_v45  ;;  %v7387_v3 = vpop.f32.mrb[219].mxu1  ;;  %v7772_v57 = vpop.f32.mrb[219].mxu0 }
 0x9c8   : > { %8037 = vst [vmem:[%s16799_s26 + $0x68] sm:$0xff] %v7771_v25 }
 0x9c9   : > { %v7390_v26 = vpop.f32.mrb[220].mxu1  ;;  %v7775_v18 = vpop.f32.mrb[220].mxu0 }
 0x9ca   : > { %v7776_v28 = vadd.f32 %v7775_v18, %v7390_v26  ;;  %v7392_v10 = vpop.f32.mrb[221].mxu1  ;;  %v7777_v54 = vpop.f32.mrb[221].mxu0 }
 0x9cc   : > { %8038 = vst [vmem:[%s16799_s26 + $0x70] sm:$0xff] %v7776_v28 }
 0x9cd   : > { %v7395_v33 = vpop.f32.mrb[222].mxu1  ;;  %v7780_v8 = vpop.f32.mrb[222].mxu0 }
 0x9ce   : > { %v7781_v63 = vadd.f32 %v7780_v8, %v7395_v33  ;;  %v7397_v4 = vpop.f32.mrb[223].mxu1  ;;  %v7782_v14 = vpop.f32.mrb[223].mxu0 }
 0x9d0   : > { %8039 = vst [vmem:[%s16799_s26 + $0x78] sm:$0xff] %v7781_v63 }
 0x9d1   : > { %v7400_v55 = vpop.f32.mrb[224].mxu1  ;;  %v7785_v24 = vpop.f32.mrb[224].mxu0 }
 0x9d2   : > { %v7786_v41 = vadd.f32 %v7785_v24, %v7400_v55  ;;  %v7402_v48 = vpop.f32.mrb[225].mxu1  ;;  %v7787_v40 = vpop.f32.mrb[225].mxu0 }
 0x9d4   : > { %8040 = vst [vmem:[%s16799_s26 + $0x80] sm:$0xff] %v7786_v41 }
 0x9d5   : > { %v7405_v32 = vpop.f32.mrb[226].mxu1  ;;  %v7790_v35 = vpop.f32.mrb[226].mxu0 }
 0x9d6   : > { %v7791_v59 = vadd.f32 %v7790_v35, %v7405_v32  ;;  %v7407_v19 = vpop.f32.mrb[227].mxu1  ;;  %v7792_v34 = vpop.f32.mrb[227].mxu0 }
 0x9d8   : > { %8041 = vst [vmem:[%s16799_s26 + $0x88] sm:$0xff] %v7791_v59 }
 0x9d9   : > { %v7410_v9 = vpop.f32.mrb[228].mxu1  ;;  %v7795_v53 = vpop.f32.mrb[228].mxu0 }
 0x9da   : > { %v7796_v27 = vadd.f32 %v7795_v53, %v7410_v9  ;;  %v7412_v47 = vpop.f32.mrb[229].mxu1  ;;  %v7797_v6 = vpop.f32.mrb[229].mxu0 }
 0x9dc   : > { %8042 = vst [vmem:[%s16799_s26 + $0x90] sm:$0xff] %v7796_v27 }
 0x9dd   : > { %v7415_v12 = vpop.f32.mrb[230].mxu1  ;;  %v7800_v62 = vpop.f32.mrb[230].mxu0 }
 0x9de   : > { %v7801_v16 = vadd.f32 %v7800_v62, %v7415_v12  ;;  %v7417_v46 = vpop.f32.mrb[231].mxu1  ;;  %v7802_v38 = vpop.f32.mrb[231].mxu0 }
 0x9e0   : > { %8043 = vst [vmem:[%s16799_s26 + $0x98] sm:$0xff] %v7801_v16 }
 0x9e1   : > { %v7420_v52 = vpop.f32.mrb[232].mxu1  ;;  %v7805_v61 = vpop.f32.mrb[232].mxu0 }
 0x9e2   : > { %v7806_v11 = vadd.f32 %v7805_v61, %v7420_v52  ;;  %v7422_v13 = vpop.f32.mrb[233].mxu1  ;;  %v7807_v39 = vpop.f32.mrb[233].mxu0 }
 0x9e4   : > { %8044 = vst [vmem:[%s16799_s26 + $0xa0] sm:$0xff] %v7806_v11 }
 0x9e5   : > { %v7425_v37 = vpop.f32.mrb[234].mxu1  ;;  %v7810_v7 = vpop.f32.mrb[234].mxu0 }
 0x9e6   : > { %v7811_v2 = vadd.f32 %v7810_v7, %v7425_v37  ;;  %v7427_v56 = vpop.f32.mrb[235].mxu1  ;;  %v7812_v22 = vpop.f32.mrb[235].mxu0 }
 0x9e8   : > { %8045 = vst [vmem:[%s16799_s26 + $0xa8] sm:$0xff] %v7811_v2 }
 0x9e9   : > { %v7430_v49 = vpop.f32.mrb[236].mxu1  ;;  %v7815_v0 = vpop.f32.mrb[236].mxu0 }
 0x9ea   : > { %v7816_v43 = vadd.f32 %v7815_v0, %v7430_v49  ;;  %v7432_v5 = vpop.f32.mrb[237].mxu1  ;;  %v7817_v21 = vpop.f32.mrb[237].mxu0 }
 0x9ec   : > { %8046 = vst [vmem:[%s16799_s26 + $0xb0] sm:$0xff] %v7816_v43 }
 0x9ed   : > { %v7435_v1 = vpop.f32.mrb[238].mxu1  ;;  %v7820_v60 = vpop.f32.mrb[238].mxu0 }
 0x9ee   : > { %v7821_v20 = vadd.f32 %v7820_v60, %v7435_v1  ;;  %v7437_v51 = vpop.f32.mrb[239].mxu1  ;;  %v7822_v58 = vpop.f32.mrb[239].mxu0 }
 0x9f0   : > { %8047 = vst [vmem:[%s16799_s26 + $0xb8] sm:$0xff] %v7821_v20 }
 0x9f1   : > { %v7440_v29 = vpop.f32.mrb[240].mxu1  ;;  %v7825_v44 = vpop.f32.mrb[240].mxu0 }
 0x9f2   : > { %v7826_v23 = vadd.f32 %v7825_v44, %v7440_v29  ;;  %v7442_v31 = vpop.f32.mrb[241].mxu1  ;;  %v7827_v15 = vpop.f32.mrb[241].mxu0 }
 0x9f4   : > { %8048 = vst [vmem:[%s16799_s26 + $0xc0] sm:$0xff] %v7826_v23 }
 0x9f5   : > { %v7445_v17 = vpop.f32.mrb[242].mxu1  ;;  %v7830_v50 = vpop.f32.mrb[242].mxu0 }
 0x9f6   : > { %v7831_v42 = vadd.f32 %v7830_v50, %v7445_v17  ;;  %v7447_v30 = vpop.f32.mrb[243].mxu1  ;;  %v7832_v45 = vpop.f32.mrb[243].mxu0 }
 0x9f8   : > { %8049 = vst [vmem:[%s16799_s26 + $0xc8] sm:$0xff] %v7831_v42 }
 0x9f9   : > { %v7450_v36 = vpop.f32.mrb[244].mxu1  ;;  %v7835_v25 = vpop.f32.mrb[244].mxu0 }
 0x9fa   : > { %v7836_v3 = vadd.f32 %v7835_v25, %v7450_v36  ;;  %v7452_v57 = vpop.f32.mrb[245].mxu1  ;;  %v7837_v26 = vpop.f32.mrb[245].mxu0 }
 0x9fc   : > { %8050 = vst [vmem:[%s16799_s26 + $0xd0] sm:$0xff] %v7836_v3 }
 0x9fd   : > { %v7455_v18 = vpop.f32.mrb[246].mxu1  ;;  %v7840_v28 = vpop.f32.mrb[246].mxu0 }
 0x9fe   : > { %v7841_v10 = vadd.f32 %v7840_v28, %v7455_v18  ;;  %v7457_v54 = vpop.f32.mrb[247].mxu1  ;;  %v7842_v33 = vpop.f32.mrb[247].mxu0 }
 0xa00   : > { %8051 = vst [vmem:[%s16799_s26 + $0xd8] sm:$0xff] %v7841_v10 }
 0xa01   : > { %v7460_v8 = vpop.f32.mrb[248].mxu1  ;;  %v7845_v63 = vpop.f32.mrb[248].mxu0 }
 0xa02   : > { %v7846_v4 = vadd.f32 %v7845_v63, %v7460_v8  ;;  %v7462_v14 = vpop.f32.mrb[249].mxu1  ;;  %v7847_v55 = vpop.f32.mrb[249].mxu0 }
 0xa04   : > { %8052 = vst [vmem:[%s16799_s26 + $0xe0] sm:$0xff] %v7846_v4 }
 0xa05   : > { %v7465_v24 = vpop.f32.mrb[250].mxu1  ;;  %v7850_v41 = vpop.f32.mrb[250].mxu0 }
 0xa06   : > { %v7851_v48 = vadd.f32 %v7850_v41, %v7465_v24  ;;  %v7467_v40 = vpop.f32.mrb[251].mxu1  ;;  %v7852_v32 = vpop.f32.mrb[251].mxu0 }
 0xa08   : > { %8053 = vst [vmem:[%s16799_s26 + $0xe8] sm:$0xff] %v7851_v48 }
 0xa09   : > { %v7470_v35 = vpop.f32.mrb[252].mxu1  ;;  %v7855_v59 = vpop.f32.mrb[252].mxu0 }
 0xa0a   : > { %v7856_v19 = vadd.f32 %v7855_v59, %v7470_v35  ;;  %v7472_v34 = vpop.f32.mrb[253].mxu1  ;;  %v7857_v9 = vpop.f32.mrb[253].mxu0 }
 0xa0c   : > { %8054 = vst [vmem:[%s16799_s26 + $0xf0] sm:$0xff] %v7856_v19 }
 0xa0d   : > { %v7475_v53 = vpop.f32.mrb[254].mxu1  ;;  %v7860_v27 = vpop.f32.mrb[254].mxu0 }
 0xa0e   : > { %v7861_v47 = vadd.f32 %v7860_v27, %v7475_v53  ;;  %v7477_v6 = vpop.f32.mrb[255].mxu1  ;;  %v7862_v12 = vpop.f32.mrb[255].mxu0 }
 0xa10   : > { %8055 = vst [vmem:[%s16799_s26 + $0xf8] sm:$0xff] %v7861_v47 }
 0xa11   : > { %v7480_v62 = vpop.f32.mrb[0].mxu1  ;;  %v7865_v16 = vpop.f32.mrb[0].mxu0 }
 0xa12   : > { %v7866_v46 = vadd.f32 %v7865_v16, %v7480_v62  ;;  %v7482_v38 = vpop.f32.mrb[1].mxu1  ;;  %v7867_v52 = vpop.f32.mrb[1].mxu0 }
 0xa14   : > { %8056 = vst [vmem:[%s16799_s26 + $0x100] sm:$0xff] %v7866_v46 }
 0xa15   : > { %v7485_v61 = vpop.f32.mrb[2].mxu1  ;;  %v7870_v11 = vpop.f32.mrb[2].mxu0 }
 0xa16   : > { %v7871_v13 = vadd.f32 %v7870_v11, %v7485_v61  ;;  %v7487_v39 = vpop.f32.mrb[3].mxu1  ;;  %v7872_v37 = vpop.f32.mrb[3].mxu0 }
 0xa18   : > { %8057 = vst [vmem:[%s16799_s26 + $0x108] sm:$0xff] %v7871_v13 }
 0xa19   : > { %v7490_v7 = vpop.f32.mrb[4].mxu1  ;;  %v7875_v2 = vpop.f32.mrb[4].mxu0 }
 0xa1a   : > { %v7876_v56 = vadd.f32 %v7875_v2, %v7490_v7  ;;  %v7492_v22 = vpop.f32.mrb[5].mxu1  ;;  %v7877_v49 = vpop.f32.mrb[5].mxu0 }
 0xa1c   : > { %8058 = vst [vmem:[%s16799_s26 + $0x110] sm:$0xff] %v7876_v56 }
 0xa1d   : > { %v7495_v0 = vpop.f32.mrb[6].mxu1  ;;  %v7880_v43 = vpop.f32.mrb[6].mxu0 }
 0xa1e   : > { %v7881_v5 = vadd.f32 %v7880_v43, %v7495_v0  ;;  %v7497_v21 = vpop.f32.mrb[7].mxu1  ;;  %v7882_v1 = vpop.f32.mrb[7].mxu0 }
 0xa20   : > { %8059 = vst [vmem:[%s16799_s26 + $0x118] sm:$0xff] %v7881_v5 }
 0xa21   : > { %v7500_v60 = vpop.f32.mrb[8].mxu1  ;;  %v7885_v20 = vpop.f32.mrb[8].mxu0 }
 0xa22   : > { %v7886_v51 = vadd.f32 %v7885_v20, %v7500_v60  ;;  %v7502_v58 = vpop.f32.mrb[9].mxu1  ;;  %v7887_v29 = vpop.f32.mrb[9].mxu0 }
 0xa24   : > { %8060 = vst [vmem:[%s16799_s26 + $0x120] sm:$0xff] %v7886_v51 }
 0xa25   : > { %v7505_v44 = vpop.f32.mrb[10].mxu1  ;;  %v7890_v23 = vpop.f32.mrb[10].mxu0 }
 0xa26   : > { %v7891_v31 = vadd.f32 %v7890_v23, %v7505_v44  ;;  %v7507_v15 = vpop.f32.mrb[11].mxu1  ;;  %v7892_v17 = vpop.f32.mrb[11].mxu0 }
 0xa28   : > { %8061 = vst [vmem:[%s16799_s26 + $0x128] sm:$0xff] %v7891_v31 }
 0xa29   : > { %v7510_v50 = vpop.f32.mrb[12].mxu1  ;;  %v7895_v42 = vpop.f32.mrb[12].mxu0 }
 0xa2a   : > { %v7896_v30 = vadd.f32 %v7895_v42, %v7510_v50  ;;  %v7512_v45 = vpop.f32.mrb[13].mxu1  ;;  %v7897_v36 = vpop.f32.mrb[13].mxu0 }
 0xa2c   : > { %8062 = vst [vmem:[%s16799_s26 + $0x130] sm:$0xff] %v7896_v30 }
 0xa2d   : > { %v7515_v25 = vpop.f32.mrb[14].mxu1  ;;  %v7900_v3 = vpop.f32.mrb[14].mxu0 }
 0xa2e   : > { %v7901_v57 = vadd.f32 %v7900_v3, %v7515_v25  ;;  %v7517_v26 = vpop.f32.mrb[15].mxu1  ;;  %v7902_v18 = vpop.f32.mrb[15].mxu0 }
 0xa30   : > { %8063 = vst [vmem:[%s16799_s26 + $0x138] sm:$0xff] %v7901_v57 }
 0xa31   : > { %v7520_v28 = vpop.f32.mrb[16].mxu1  ;;  %v7905_v10 = vpop.f32.mrb[16].mxu0 }
 0xa32   : > { %v7906_v54 = vadd.f32 %v7905_v10, %v7520_v28  ;;  %v7522_v33 = vpop.f32.mrb[17].mxu1  ;;  %v7907_v8 = vpop.f32.mrb[17].mxu0 }
 0xa34   : > { %8064 = vst [vmem:[%s16799_s26 + $0x140] sm:$0xff] %v7906_v54 }
 0xa35   : > { %v7525_v63 = vpop.f32.mrb[18].mxu1  ;;  %v7910_v4 = vpop.f32.mrb[18].mxu0 }
 0xa36   : > { %v7911_v14 = vadd.f32 %v7910_v4, %v7525_v63  ;;  %v7527_v55 = vpop.f32.mrb[19].mxu1  ;;  %v7912_v24 = vpop.f32.mrb[19].mxu0 }
 0xa38   : > { %8065 = vst [vmem:[%s16799_s26 + $0x148] sm:$0xff] %v7911_v14 }
 0xa39   : > { %v7530_v41 = vpop.f32.mrb[20].mxu1  ;;  %v7915_v48 = vpop.f32.mrb[20].mxu0 }
 0xa3a   : > { %v7916_v40 = vadd.f32 %v7915_v48, %v7530_v41  ;;  %v7532_v32 = vpop.f32.mrb[21].mxu1  ;;  %v7917_v35 = vpop.f32.mrb[21].mxu0 }
 0xa3c   : > { %8066 = vst [vmem:[%s16799_s26 + $0x150] sm:$0xff] %v7916_v40 }
 0xa3d   : > { %v7535_v59 = vpop.f32.mrb[22].mxu1  ;;  %v7920_v19 = vpop.f32.mrb[22].mxu0 }
 0xa3e   : > { %v7921_v34 = vadd.f32 %v7920_v19, %v7535_v59  ;;  %v7537_v9 = vpop.f32.mrb[23].mxu1  ;;  %v7922_v53 = vpop.f32.mrb[23].mxu0 }
 0xa40   : > { %8067 = vst [vmem:[%s16799_s26 + $0x158] sm:$0xff] %v7921_v34 }
 0xa41   : > { %v7540_v27 = vpop.f32.mrb[24].mxu1  ;;  %v7925_v47 = vpop.f32.mrb[24].mxu0 }
 0xa42   : > { %v7926_v6 = vadd.f32 %v7925_v47, %v7540_v27  ;;  %v7542_v12 = vpop.f32.mrb[25].mxu1  ;;  %v7927_v62 = vpop.f32.mrb[25].mxu0 }
 0xa44   : > { %8068 = vst [vmem:[%s16799_s26 + $0x160] sm:$0xff] %v7926_v6 }
 0xa45   : > { %v7545_v16 = vpop.f32.mrb[26].mxu1  ;;  %v7930_v46 = vpop.f32.mrb[26].mxu0 }
 0xa46   : > { %v7931_v38 = vadd.f32 %v7930_v46, %v7545_v16  ;;  %v7547_v52 = vpop.f32.mrb[27].mxu1  ;;  %v7932_v61 = vpop.f32.mrb[27].mxu0 }
 0xa48   : > { %8069 = vst [vmem:[%s16799_s26 + $0x168] sm:$0xff] %v7931_v38 }
 0xa49   : > { %v7550_v11 = vpop.f32.mrb[28].mxu1  ;;  %v7935_v13 = vpop.f32.mrb[28].mxu0 }
 0xa4a   : > { %v7936_v39 = vadd.f32 %v7935_v13, %v7550_v11  ;;  %v7552_v37 = vpop.f32.mrb[29].mxu1  ;;  %v7937_v7 = vpop.f32.mrb[29].mxu0 }
 0xa4c   : > { %8070 = vst [vmem:[%s16799_s26 + $0x170] sm:$0xff] %v7936_v39 }
 0xa4d   : > { %v7555_v2 = vpop.f32.mrb[30].mxu1  ;;  %v7940_v56 = vpop.f32.mrb[30].mxu0 }
 0xa4e   : > { %v7941_v22 = vadd.f32 %v7940_v56, %v7555_v2  ;;  %v7557_v49 = vpop.f32.mrb[31].mxu1  ;;  %v7942_v0 = vpop.f32.mrb[31].mxu0 }
 0xa50   : > { %8071 = vst [vmem:[%s16799_s26 + $0x178] sm:$0xff] %v7941_v22 }
 0xa51   : > { %v7560_v43 = vpop.f32.mrb[32].mxu1  ;;  %v7945_v5 = vpop.f32.mrb[32].mxu0 }
 0xa52   : > { %v7946_v21 = vadd.f32 %v7945_v5, %v7560_v43  ;;  %v7562_v1 = vpop.f32.mrb[33].mxu1  ;;  %v7947_v60 = vpop.f32.mrb[33].mxu0 }
 0xa54   : > { %8072 = vst [vmem:[%s16799_s26 + $0x180] sm:$0xff] %v7946_v21 }
 0xa55   : > { %v7565_v20 = vpop.f32.mrb[34].mxu1  ;;  %v7950_v51 = vpop.f32.mrb[34].mxu0 }
 0xa56   : > { %v7951_v58 = vadd.f32 %v7950_v51, %v7565_v20  ;;  %v7567_v29 = vpop.f32.mrb[35].mxu1  ;;  %v7952_v44 = vpop.f32.mrb[35].mxu0 }
 0xa58   : > { %8073 = vst [vmem:[%s16799_s26 + $0x188] sm:$0xff] %v7951_v58 }
 0xa59   : > { %v7570_v23 = vpop.f32.mrb[36].mxu1  ;;  %v7955_v31 = vpop.f32.mrb[36].mxu0 }
 0xa5a   : > { %v7956_v15 = vadd.f32 %v7955_v31, %v7570_v23  ;;  %v7572_v17 = vpop.f32.mrb[37].mxu1  ;;  %v7957_v50 = vpop.f32.mrb[37].mxu0 }
 0xa5c   : > { %8074 = vst [vmem:[%s16799_s26 + $0x190] sm:$0xff] %v7956_v15 }
 0xa5d   : > { %v7575_v42 = vpop.f32.mrb[38].mxu1  ;;  %v7960_v30 = vpop.f32.mrb[38].mxu0 }
 0xa5e   : > { %v7961_v45 = vadd.f32 %v7960_v30, %v7575_v42  ;;  %v7577_v36 = vpop.f32.mrb[39].mxu1  ;;  %v7962_v25 = vpop.f32.mrb[39].mxu0 }
 0xa60   : > { %8075 = vst [vmem:[%s16799_s26 + $0x198] sm:$0xff] %v7961_v45 }
 0xa61   : > { %v7580_v3 = vpop.f32.mrb[40].mxu1  ;;  %v7965_v57 = vpop.f32.mrb[40].mxu0 }
 0xa62   : > { %v7966_v26 = vadd.f32 %v7965_v57, %v7580_v3  ;;  %v7582_v18 = vpop.f32.mrb[41].mxu1  ;;  %v7967_v28 = vpop.f32.mrb[41].mxu0 }
 0xa64   : > { %8076 = vst [vmem:[%s16799_s26 + $0x1a0] sm:$0xff] %v7966_v26 }
 0xa65   : > { %v7585_v10 = vpop.f32.mrb[42].mxu1  ;;  %v7970_v54 = vpop.f32.mrb[42].mxu0 }
 0xa66   : > { %v7971_v33 = vadd.f32 %v7970_v54, %v7585_v10  ;;  %v7587_v8 = vpop.f32.mrb[43].mxu1  ;;  %v7972_v63 = vpop.f32.mrb[43].mxu0 }
 0xa68   : > { %8077 = vst [vmem:[%s16799_s26 + $0x1a8] sm:$0xff] %v7971_v33 }
 0xa69   : > { %v7590_v4 = vpop.f32.mrb[44].mxu1  ;;  %v7975_v14 = vpop.f32.mrb[44].mxu0 }
 0xa6a   : > { %v7976_v55 = vadd.f32 %v7975_v14, %v7590_v4  ;;  %v7592_v24 = vpop.f32.mrb[45].mxu1  ;;  %v7977_v41 = vpop.f32.mrb[45].mxu0 }
 0xa6c   : > { %8078 = vst [vmem:[%s16799_s26 + $0x1b0] sm:$0xff] %v7976_v55 }
 0xa6d   : > { %v7595_v48 = vpop.f32.mrb[46].mxu1  ;;  %v7980_v40 = vpop.f32.mrb[46].mxu0 }
 0xa6e   : > { %v7981_v32 = vadd.f32 %v7980_v40, %v7595_v48  ;;  %v7597_v35 = vpop.f32.mrb[47].mxu1  ;;  %v7982_v59 = vpop.f32.mrb[47].mxu0 }
 0xa70   : > { %8079 = vst [vmem:[%s16799_s26 + $0x1b8] sm:$0xff] %v7981_v32 }
 0xa71   : > { %v7600_v19 = vpop.f32.mrb[48].mxu1  ;;  %v7985_v34 = vpop.f32.mrb[48].mxu0 }
 0xa72   : > { %v7986_v9 = vadd.f32 %v7985_v34, %v7600_v19  ;;  %v7602_v53 = vpop.f32.mrb[49].mxu1  ;;  %v7987_v27 = vpop.f32.mrb[49].mxu0 }
 0xa74   : > { %8080 = vst [vmem:[%s16799_s26 + $0x1c0] sm:$0xff] %v7986_v9 }
 0xa75   : > { %v7605_v47 = vpop.f32.mrb[50].mxu1  ;;  %v7990_v6 = vpop.f32.mrb[50].mxu0 }
 0xa76   : > { %v7991_v12 = vadd.f32 %v7990_v6, %v7605_v47  ;;  %v7607_v62 = vpop.f32.mrb[51].mxu1  ;;  %v7992_v16 = vpop.f32.mrb[51].mxu0 }
 0xa78   : > { %8081 = vst [vmem:[%s16799_s26 + $0x1c8] sm:$0xff] %v7991_v12 }
 0xa79   : > { %v7610_v46 = vpop.f32.mrb[52].mxu1  ;;  %v7995_v38 = vpop.f32.mrb[52].mxu0 }
 0xa7a   : > { %v7996_v52 = vadd.f32 %v7995_v38, %v7610_v46  ;;  %v7612_v61 = vpop.f32.mrb[53].mxu1  ;;  %v7997_v11 = vpop.f32.mrb[53].mxu0 }
 0xa7c   : > { %8082 = vst [vmem:[%s16799_s26 + $0x1d0] sm:$0xff] %v7996_v52 }
 0xa7d   : > { %v7615_v13 = vpop.f32.mrb[54].mxu1  ;;  %v8000_v39 = vpop.f32.mrb[54].mxu0 }
 0xa7e   : > { %v8001_v37 = vadd.f32 %v8000_v39, %v7615_v13  ;;  %v7617_v7 = vpop.f32.mrb[55].mxu1  ;;  %v8002_v2 = vpop.f32.mrb[55].mxu0 }
 0xa80   : > { %8083 = vst [vmem:[%s16799_s26 + $0x1d8] sm:$0xff] %v8001_v37 }
 0xa81   : > { %v7620_v56 = vpop.f32.mrb[56].mxu1  ;;  %v8005_v22 = vpop.f32.mrb[56].mxu0 }
 0xa82   : > { %v8006_v49 = vadd.f32 %v8005_v22, %v7620_v56  ;;  %v7622_v0 = vpop.f32.mrb[57].mxu1  ;;  %v8007_v43 = vpop.f32.mrb[57].mxu0 }
 0xa84   : > { %8084 = vst [vmem:[%s16799_s26 + $0x1e0] sm:$0xff] %v8006_v49 }
 0xa85   : > { %v7625_v5 = vpop.f32.mrb[58].mxu1  ;;  %v8010_v21 = vpop.f32.mrb[58].mxu0 }
 0xa86   : > { %v8011_v1 = vadd.f32 %v8010_v21, %v7625_v5  ;;  %v7627_v60 = vpop.f32.mrb[59].mxu1  ;;  %v8012_v20 = vpop.f32.mrb[59].mxu0 }
 0xa88   : > { %8085 = vst [vmem:[%s16799_s26 + $0x1e8] sm:$0xff] %v8011_v1 }
 0xa91   : > { %v8015_v51 = vpop.f32.mrb[60].mxu1 }
 0xa92   : > { %8086 = vst [vmem:[%s16799_s26 + $0x1f0] sm:$0xff] %v8015_v51  ;;  %v8017_v58 = vpop.f32.mrb[61].mxu1 }
 0xa95   : > { %v8020_v29 = vpop.f32.mrb[62].mxu1 }
 0xa96   : > { %8087 = vst [vmem:[%s16799_s26 + $0x1f8] sm:$0xff] %v8020_v29  ;;  %v8022_v44 = vpop.f32.mrb[63].mxu1 }
 0xa97   : > { %10044 = shalt.err (!%p10041_p9)
}
 0xa98   : > { %s10045_s16 = scalar_lea.hbm %s16914_s10, 8192  ;;  %s10049_s26 = scalar_lea.hbm %s16967_s5, 16384 }
 0xa99   : > { %p10046_p1 = scmp.ne.s32.totalorder %s16914_s10, %s10045_s16  ;;  %p10050_p11 = scmp.lt.u32.totalorder %s16914_s10, %s16967_s5 }
 0xa9a   : > { %p10051_p2 = scmp.lt.u32.totalorder %s10049_s26, %s10045_s16  ;;  %p10053_p6 = scmp.lt.u32.totalorder %s10045_s16, %s16914_s10 }
 0xa9b   : > { %p10047_p0 = pnand %p10046_p1, %p10246_p12 }
 0xa9c   : > { %p10052_p4 = por %p10051_p2, %p10050_p11 }
 0xa9d   : > { %p10048_p5 = pneg %p10047_p0 }
 0xa9e   : > { %p10054_p8 = por %p10053_p6, %p10052_p4 }
 0xaa0   : > { %p10055_p10 = pnand %p10054_p8, %p10048_p5 }
 0xaa2   : > { %10058 = shalt.err (!%p10055_p10)
}
 0xaa3   : > { %s10116_s29 = smov 128  }
 0xaa4   : > { %9079 = dma.vmem_to_hbm [thread:$0]  (%p10246_p12), %s16916_s19, 8192, %s16914_s10, %s8089_s7, %s10116_s29, %s10116_s29, %s10112_s30  }
 0xaa5 PF: > { %s8126_s27 = sand.u32 1, %s10089_s21   ;;  %p19109_p13 = scmp.ne.s32.totalorder %s17464_s28, 0 }
 0xaa6   : > { %p19110_p3 = scmp.ge.s32.totalorder %s10101_s24, 2  ;;  %s8127_s25 = scalar_lea.sflag [#allocation4], %s8126_s27 }
 0xaa8   : > { %p9090_p7 = pnand %p19110_p3, %p19109_p13 }
 0xaaa   : > { %10084 = dma.done.wait (!%p9090_p7), %s8127_s25, 8192  }
 0xaab   : > { %10086 = vsyncadd (!%p9090_p7), %s8127_s25, 4294959104  ;;  %p21_p9 = scmp.ge.s32.totalorder %s10208_s9, 4   ;;  %s19111_s21 = smov %s10093_s22 }
 0xaac   : > { %s19112_s22 = smov %s10097_s23  ;;  %s19113_s23 = smov %s10242_s13 }
 0xaad   : > { %s19114_s24 = smov %s10208_s9  ;;  %23 = sbr.rel (!%p21_p9) target bundleno = 6 (0x6), region = 101 }
 0xab4   :  { %8140 = vsyncpa [#allocation3], 1 }
 0xab5   :  { %8142 = vsyncpa [#allocation3 + $0x1], 1 }
 0xab6   :  { %8143 = vsyncpa [#allocation6], 1 }
 0xab7   :  { %8144 = vsyncpa [#allocation4], 1 }
 0xab8   :  { %8146 = vsyncpa [#allocation4 + $0x1], 1 }

</bundles_post_ra>
